<compile_context>
chip_gen: v5e
topology: v5e:2x2
jax: 0.10.0
libtpu: 0.0.40
codegen_flags: <defaults>
</compile_context>

<pallas_src>
import functools

import numpy as np
import jax
import jax.numpy as jnp
from jax.experimental import pallas as pl
from jax.experimental.pallas import tpu as pltpu

_EPS = 1e-5
_COMPILER_PARAMS = pltpu.CompilerParams(vmem_limit_bytes=32 * 1024 * 1024)


# ----------------------------- Pallas kernels -----------------------------

def _col_sum(y):
    """(M, N) -> (1, N) column sums via a ones-vector MXU matmul.

    Avoids relying on cross-sublane reductions inside Mosaic; cost is tiny
    (M <= 512, N <= 256 here).
    """
    ones = jnp.ones((1, y.shape[0]), jnp.float32)
    return jnp.dot(ones, y, preferred_element_type=jnp.float32)


def _gemm_fused_kernel(*refs, bn, act, add_res, inv_m):
    """out = [relu]( [BN]( x @ w + b ) [+ res] )  -- one MXU pass + fused epilogue.

    x:(M,K) bf16, w:(K,N) bf16, b/gamma/beta:(1,N) f32, res:(M,N) f32,
    out:(M,N) f32.  BN uses train-mode batch statistics over the M (= B*H*W)
    axis with biased variance, matching torch.nn.BatchNorm2d in .train().
    """
    it = iter(refs)
    x_ref, w_ref, b_ref = next(it), next(it), next(it)
    if bn:
        gamma_ref, beta_ref = next(it), next(it)
    if add_res:
        res_ref = next(it)
    o_ref = next(it)

    y = jnp.dot(x_ref[...], w_ref[...], preferred_element_type=jnp.float32)
    y = y + b_ref[...]
    if bn:
        mean = _col_sum(y) * inv_m
        yc = y - mean
        var = _col_sum(yc * yc) * inv_m
        y = yc * jax.lax.rsqrt(var + _EPS) * gamma_ref[...] + beta_ref[...]
    if add_res:
        y = y + res_ref[...]
    if act == "relu":
        y = jnp.maximum(y, 0.0)
    o_ref[...] = y.astype(o_ref.dtype)


def _bn_relu_add_kernel(x_ref, gamma_ref, beta_ref, res_ref, o_ref, *, inv_m):
    """out = relu(BN_train(x)) + res   (upsample-block tail fused with skip add)."""
    y = x_ref[...]
    mean = _col_sum(y) * inv_m
    yc = y - mean
    var = _col_sum(yc * yc) * inv_m
    y = yc * jax.lax.rsqrt(var + _EPS) * gamma_ref[...] + beta_ref[...]
    y = jnp.maximum(y, 0.0)
    o_ref[...] = (y + res_ref[...]).astype(o_ref.dtype)


# ----------------------------- kernel wrappers -----------------------------

def _fused_gemm(patches, p, *, bn, act, res=None):
    """Single grid-less pallas_call; whole operands live in VMEM (tiny problem).

    No K tiling, no M/N/K padding to 128, and bias/BN/ReLU/residual never
    round-trip HBM.
    """
    M, K = patches.shape
    N = p["w"].shape[1]
    args = [patches.astype(jnp.bfloat16), p["w"], p["b"]]
    if bn:
        args += [p["gamma"], p["beta"]]
    if res is not None:
        args += [res.reshape(M, N)]
    cost = pl.CostEstimate(
        flops=2 * M * K * N + (6 * M * N if bn else 0),
        transcendentals=N if bn else 0,
        bytes_accessed=2 * (M * K + K * N) + 4 * M * N * (2 if res is not None else 1),
    )
    return pl.pallas_call(
        functools.partial(_gemm_fused_kernel, bn=bn, act=act,
                          add_res=res is not None, inv_m=1.0 / M),
        out_shape=jax.ShapeDtypeStruct((M, N), jnp.float32),
        cost_estimate=cost,
        compiler_params=_COMPILER_PARAMS,
    )(*args)


def conv2d_fused(x, p, k, *, bn=True, act="relu", res=None):
    """stride-1 'same' conv + bias (+ train-mode BN) (+ residual) (+ ReLU), one
    Pallas call.  x: (B,H,W,Cin) NHWC; p['w'] pre-reshaped to (k*k*Cin, Cout)."""
    B, H, W, Cin = x.shape
    if k == 1:
        patches = x.reshape(B * H * W, Cin)
    else:
        pad = (k - 1) // 2
        xp = jnp.pad(x.astype(jnp.bfloat16),
                     ((0, 0), (pad, pad), (pad, pad), (0, 0)))
        patches = jnp.concatenate(
            [xp[:, di:di + H, dj:dj + W, :] for di in range(k) for dj in range(k)],
            axis=-1).reshape(B * H * W, k * k * Cin)
    y = _fused_gemm(patches, p, bn=bn, act=act, res=res)
    return y.reshape(B, H, W, p["w"].shape[1])


def maxpool2(x):
    # 2x2 / stride-2 max pool as a single fused XLA reshape+reduce; a Pallas
    # version would need four strided HBM copies just to feed the kernel.
    B, H, W, C = x.shape
    return jnp.max(x.reshape(B, H // 2, 2, W // 2, 2, C), axis=(2, 4))


def upsample_add(x, p, skip):
    """ConvTranspose2d(k=2,s=2) -> train-BN -> ReLU -> + skip, in two Pallas
    calls (GEMM, then fused BN/ReLU/add on the pixel-shuffled result)."""
    B, H, W, Cin = x.shape
    C = p["w"].shape[1] // 4
    y = _fused_gemm(x.reshape(B * H * W, Cin), p, bn=False, act="none")  # (M, 4C)
    y = y.reshape(B, H, W, 2, 2, C).transpose(0, 1, 3, 2, 4, 5)
    y = y.reshape(B, 2 * H, 2 * W, C)
    M2 = B * 2 * H * 2 * W
    out = pl.pallas_call(
        functools.partial(_bn_relu_add_kernel, inv_m=1.0 / M2),
        out_shape=jax.ShapeDtypeStruct((M2, C), jnp.float32),
        compiler_params=_COMPILER_PARAMS,
    )(y.reshape(M2, C), p["gamma"], p["beta"], skip.reshape(M2, C))
    return out.reshape(B, 2 * H, 2 * W, C)


# ----------------------------- V2V model -----------------------------

def res_block(x, p):
    # ReLU( BN2(conv2( ReLU(BN1(conv1(x))) )) + skip(x) ); the skip add and the
    # final ReLU are fused into conv2's GEMM epilogue.
    r = conv2d_fused(x, p["c1"], 3, bn=True, act="relu")
    s = conv2d_fused(x, p["cs"], 1, bn=True, act="none") if "cs" in p else x
    return conv2d_fused(r, p["c2"], 3, bn=True, act="relu", res=s)


def v2v_forward(x, P):
    # front layers
    x = conv2d_fused(x, P["front_b1"], 7)           # in_dim -> 16 (BN+ReLU)
    x = maxpool2(x)
    x = res_block(x, P["front_r1"])                 # 16 -> 32
    x = res_block(x, P["front_r2"])                 # 32 -> 32
    x = res_block(x, P["front_r3"])                 # 32 -> 32
    # encoder / decoder
    skip1 = res_block(x, P["skip_r1"])              # 32 -> 32
    x = maxpool2(x)
    x = res_block(x, P["enc_r1"])                   # 32 -> 64
    skip2 = res_block(x, P["skip_r2"])              # 64 -> 64
    x = maxpool2(x)
    x = res_block(x, P["enc_r2"])                   # 64 -> 128
    x = res_block(x, P["mid"])                      # 128 -> 128
    x = res_block(x, P["dec_r2"])                   # 128 -> 128
    x = upsample_add(x, P["up2"], skip2)            # 128 -> 64 (+skip2)
    x = res_block(x, P["dec_r1"])                   # 64 -> 64
    x = upsample_add(x, P["up1"], skip1)            # 64 -> 32 (+skip1)
    # back layers
    x = res_block(x, P["back_r1"])                  # 32 -> 32
    x = conv2d_fused(x, P["back_b1"], 1)            # 32 -> 32 (BN+ReLU)
    x = conv2d_fused(x, P["back_b2"], 1)            # 32 -> 32 (BN+ReLU)
    # output layer (1x1 conv, no BN/ReLU)
    x = conv2d_fused(x, P["out"], 1, bn=False, act="none")   # 32 -> feat2_dim
    return x


def feat2net_forward(feat_nchw, params):
    # Feat2Net.forward: total_loss is created but not returned; feat = self.net(feat).
    x = jnp.transpose(feat_nchw, (0, 2, 3, 1)).astype(jnp.float32)   # NCHW -> NHWC
    cin_pad = params["front_b1"]["w"].shape[0] // 49                 # static
    if cin_pad > x.shape[-1]:                                        # pad Cin to x8
        x = jnp.pad(x, ((0, 0), (0, 0), (0, 0), (0, cin_pad - x.shape[-1])))
    y = v2v_forward(x, params)
    return jnp.transpose(y, (0, 3, 1, 2))                            # NHWC -> NCHW


# ----------------------------- parameter init -----------------------------

def _bn_p(c):
    return {"gamma": jnp.ones((1, c), jnp.float32),
            "beta": jnp.zeros((1, c), jnp.float32)}


def conv_p(key, cin, cout, k, *, bn=True, cin_pad=None):
    """torch Conv2d init (uniform +-1/sqrt(fan_in)), pre-reshaped once to the
    (k*k*Cin, Cout) bf16 matmul layout (hoisted out of the forward pass)."""
    kw, kb = jax.random.split(key)
    bound = 1.0 / float(np.sqrt(cin * k * k))
    w = jax.random.uniform(kw, (cout, cin, k, k), jnp.float32, -bound, bound)
    b = jax.random.uniform(kb, (cout,), jnp.float32, -bound, bound)
    if cin_pad is not None and cin_pad > cin:
        w = jnp.pad(w, ((0, 0), (0, cin_pad - cin), (0, 0), (0, 0)))
        cin = cin_pad
    p = {"w": jnp.transpose(w, (2, 3, 1, 0)).reshape(k * k * cin, cout)
               .astype(jnp.bfloat16),
         "b": b.reshape(1, cout)}
    if bn:
        p.update(_bn_p(cout))
    return p


def res_p(key, cin, cout):
    k1, k2, k3 = jax.random.split(key, 3)
    p = {"c1": conv_p(k1, cin, cout, 3),
         "c2": conv_p(k2, cout, cout, 3)}
    if cin != cout:                      # 1x1 conv + BN skip when channels change
        p["cs"] = conv_p(k3, cin, cout, 1)
    return p


def deconv_p(key, cin, cout):
    kw, kb = jax.random.split(key)
    bound = 1.0 / float(np.sqrt(cin * 4))
    w = jax.random.uniform(kw, (cin, cout, 2, 2), jnp.float32, -bound, bound)
    b = jax.random.uniform(kb, (cout,), jnp.float32, -bound, bound)
    p = {"w": jnp.transpose(w, (0, 2, 3, 1)).reshape(cin, 4 * cout)
               .astype(jnp.bfloat16),
         "b": jnp.tile(b, 4).reshape(1, 4 * cout)}
    p.update(_bn_p(cout))
    return p


def init_feat2net_params(key, in_dim, feat2_dim):
    ks = jax.random.split(key, 17)
    cin_pad = -(-in_dim // 8) * 8        # front conv K aligned to a multiple of 8
    return {
        "front_b1": conv_p(ks[0], in_dim, 16, 7, cin_pad=cin_pad),
        "front_r1": res_p(ks[1], 16, 32),
        "front_r2": res_p(ks[2], 32, 32),
        "front_r3": res_p(ks[3], 32, 32),
        "skip_r1": res_p(ks[4], 32, 32),
        "enc_r1": res_p(ks[5], 32, 64),
        "skip_r2": res_p(ks[6], 64, 64),
        "enc_r2": res_p(ks[7], 64, 128),
        "mid": res_p(ks[8], 128, 128),
        "dec_r2": res_p(ks[9], 128, 128),
        "up2": deconv_p(ks[10], 128, 64),
        "dec_r1": res_p(ks[11], 64, 64),
        "up1": deconv_p(ks[12], 64, 32),
        "back_r1": res_p(ks[13], 32, 32),
        "back_b1": conv_p(ks[14], 32, 32, 1),
        "back_b2": conv_p(ks[15], 32, 32, 1),
        "out": conv_p(ks[16], 32, feat2_dim, 1, bn=False),
    }


# ----------------------------- main -----------------------------

if __name__ == "__main__":
    IN_DIM = 4         # Feat2Net(in_dim=4)
    FEAT2_DIM = 32     # hyp.feat2_dim
    B, H, W = 2, 16, 16

    key = jax.random.PRNGKey(0)
    kx, kp = jax.random.split(key)
    feat = jax.random.normal(kx, (B, IN_DIM, H, W), jnp.float32)   # NCHW, like PyTorch
    params = init_feat2net_params(kp, IN_DIM, FEAT2_DIM)

    fwd = jax.jit(feat2net_forward)
    out = jax.block_until_ready(fwd(feat, params))

    # V2V has one un-undone front pool -> output is half resolution.
    assert out.shape == (B, FEAT2_DIM, H // 2, W // 2), out.shape
    assert bool(jnp.all(jnp.isfinite(out)))
    print("KERNEL_OK")
</pallas_src>

<mosaic_0001>
module attributes {stable_mosaic.version = 11 : i64} {
  func.func @_gemm_fused_kernel(%arg0: memref<512x392xbf16, #tpu.memory_space<vmem>>, %arg1: memref<392x16xbf16, #tpu.memory_space<vmem>>, %arg2: memref<1x16xf32, #tpu.memory_space<vmem>>, %arg3: memref<1x16xf32, #tpu.memory_space<vmem>>, %arg4: memref<1x16xf32, #tpu.memory_space<vmem>>, %arg5: memref<512x16xf32, #tpu.memory_space<vmem>>) attributes {dimension_semantics = [], scalar_prefetch = 0 : i64, scratch_operands = 0 : i64, tpu.core_type = #tpu.core_type<tc>} {
    %c0 = arith.constant 0 : index
    %c0_0 = arith.constant 0 : index
    %0 = vector.load %arg0[%c0, %c0_0] : memref<512x392xbf16, #tpu.memory_space<vmem>>, vector<512x392xbf16>
    %c0_1 = arith.constant 0 : index
    %c0_2 = arith.constant 0 : index
    %1 = vector.load %arg1[%c0_1, %c0_2] : memref<392x16xbf16, #tpu.memory_space<vmem>>, vector<392x16xbf16>
    %cst = arith.constant dense<0.000000e+00> : vector<512x16xf32>
    %2 = tpu.matmul %0, %1, %cst {dimension_numbers = #tpu.dot_dimension_numbers<[1], [0], [0], [1], [0, 0, 1, 1], [], []>} : vector<512x392xbf16>, vector<392x16xbf16>, vector<512x16xf32> -> vector<512x16xf32>
    %c0_3 = arith.constant 0 : index
    %c0_4 = arith.constant 0 : index
    %3 = vector.load %arg2[%c0_3, %c0_4] : memref<1x16xf32, #tpu.memory_space<vmem>>, vector<1x16xf32>
    %4 = vector.broadcast %3 : vector<1x16xf32> to vector<512x16xf32>
    %5 = arith.addf %2, %4 : vector<512x16xf32>
    %cst_5 = arith.constant 1.000000e+00 : f32
    %6 = vector.broadcast %cst_5 : f32 to vector<1x512xf32>
    %cst_6 = arith.constant dense<0.000000e+00> : vector<1x16xf32>
    %7 = tpu.matmul %6, %5, %cst_6 {dimension_numbers = #tpu.dot_dimension_numbers<[1], [0], [0], [1], [0, 0, 1, 1], [], []>} : vector<1x512xf32>, vector<512x16xf32>, vector<1x16xf32> -> vector<1x16xf32>
    %cst_7 = arith.constant 0.001953125 : f32
    %8 = vector.broadcast %cst_7 : f32 to vector<1x16xf32>
    %9 = arith.mulf %7, %8 : vector<1x16xf32>
    %10 = vector.broadcast %9 : vector<1x16xf32> to vector<512x16xf32>
    %11 = arith.subf %5, %10 : vector<512x16xf32>
    %12 = arith.mulf %11, %11 : vector<512x16xf32>
    %cst_8 = arith.constant 1.000000e+00 : f32
    %13 = vector.broadcast %cst_8 : f32 to vector<1x512xf32>
    %cst_9 = arith.constant dense<0.000000e+00> : vector<1x16xf32>
    %14 = tpu.matmul %13, %12, %cst_9 {dimension_numbers = #tpu.dot_dimension_numbers<[1], [0], [0], [1], [0, 0, 1, 1], [], []>} : vector<1x512xf32>, vector<512x16xf32>, vector<1x16xf32> -> vector<1x16xf32>
    %cst_10 = arith.constant 0.001953125 : f32
    %15 = vector.broadcast %cst_10 : f32 to vector<1x16xf32>
    %16 = arith.mulf %14, %15 : vector<1x16xf32>
    %cst_11 = arith.constant 9.99999974E-6 : f32
    %17 = vector.broadcast %cst_11 : f32 to vector<1x16xf32>
    %18 = arith.addf %16, %17 : vector<1x16xf32>
    %19 = math.rsqrt %18 : vector<1x16xf32>
    %20 = vector.broadcast %19 : vector<1x16xf32> to vector<512x16xf32>
    %21 = arith.mulf %11, %20 : vector<512x16xf32>
    %c0_12 = arith.constant 0 : index
    %c0_13 = arith.constant 0 : index
    %22 = vector.load %arg3[%c0_12, %c0_13] : memref<1x16xf32, #tpu.memory_space<vmem>>, vector<1x16xf32>
    %23 = vector.broadcast %22 : vector<1x16xf32> to vector<512x16xf32>
    %24 = arith.mulf %21, %23 : vector<512x16xf32>
    %c0_14 = arith.constant 0 : index
    %c0_15 = arith.constant 0 : index
    %25 = vector.load %arg4[%c0_14, %c0_15] : memref<1x16xf32, #tpu.memory_space<vmem>>, vector<1x16xf32>
    %26 = vector.broadcast %25 : vector<1x16xf32> to vector<512x16xf32>
    %27 = arith.addf %24, %26 : vector<512x16xf32>
    %cst_16 = arith.constant 0.000000e+00 : f32
    %28 = vector.broadcast %cst_16 : f32 to vector<512x16xf32>
    %29 = arith.maximumf %27, %28 : vector<512x16xf32>
    %c0_17 = arith.constant 0 : index
    %c0_18 = arith.constant 0 : index
    %30 = vector.load %arg5[%c0_17, %c0_18] : memref<512x16xf32, #tpu.memory_space<vmem>>, vector<512x16xf32>
    tpu.vector_store %arg5[%c0_17, %c0_18], %29 {strides = array<i32>} : memref<512x16xf32, #tpu.memory_space<vmem>>, vector<512x16xf32>,
    return
  }
}

module attributes {stable_mosaic.version = 11 : i64} {
  func.func @_gemm_fused_kernel(%arg0: memref<128x144xbf16, #tpu.memory_space<vmem>>, %arg1: memref<144x32xbf16, #tpu.memory_space<vmem>>, %arg2: memref<1x32xf32, #tpu.memory_space<vmem>>, %arg3: memref<1x32xf32, #tpu.memory_space<vmem>>, %arg4: memref<1x32xf32, #tpu.memory_space<vmem>>, %arg5: memref<128x32xf32, #tpu.memory_space<vmem>>) attributes {dimension_semantics = [], scalar_prefetch = 0 : i64, scratch_operands = 0 : i64, tpu.core_type = #tpu.core_type<tc>} {
    %c0 = arith.constant 0 : index
    %c0_0 = arith.constant 0 : index
    %0 = vector.load %arg0[%c0, %c0_0] : memref<128x144xbf16, #tpu.memory_space<vmem>>, vector<128x144xbf16>
    %c0_1 = arith.constant 0 : index
    %c0_2 = arith.constant 0 : index
    %1 = vector.load %arg1[%c0_1, %c0_2] : memref<144x32xbf16, #tpu.memory_space<vmem>>, vector<144x32xbf16>
    %cst = arith.constant dense<0.000000e+00> : vector<128x32xf32>
    %2 = tpu.matmul %0, %1, %cst {dimension_numbers = #tpu.dot_dimension_numbers<[1], [0], [0], [1], [0, 0, 1, 1], [], []>} : vector<128x144xbf16>, vector<144x32xbf16>, vector<128x32xf32> -> vector<128x32xf32>
    %c0_3 = arith.constant 0 : index
    %c0_4 = arith.constant 0 : index
    %3 = vector.load %arg2[%c0_3, %c0_4] : memref<1x32xf32, #tpu.memory_space<vmem>>, vector<1x32xf32>
    %4 = vector.broadcast %3 : vector<1x32xf32> to vector<128x32xf32>
    %5 = arith.addf %2, %4 : vector<128x32xf32>
    %cst_5 = arith.constant 1.000000e+00 : f32
    %6 = vector.broadcast %cst_5 : f32 to vector<1x128xf32>
    %cst_6 = arith.constant dense<0.000000e+00> : vector<1x32xf32>
    %7 = tpu.matmul %6, %5, %cst_6 {dimension_numbers = #tpu.dot_dimension_numbers<[1], [0], [0], [1], [0, 0, 1, 1], [], []>} : vector<1x128xf32>, vector<128x32xf32>, vector<1x32xf32> -> vector<1x32xf32>
    %cst_7 = arith.constant 7.812500e-03 : f32
    %8 = vector.broadcast %cst_7 : f32 to vector<1x32xf32>
    %9 = arith.mulf %7, %8 : vector<1x32xf32>
    %10 = vector.broadcast %9 : vector<1x32xf32> to vector<128x32xf32>
    %11 = arith.subf %5, %10 : vector<128x32xf32>
    %12 = arith.mulf %11, %11 : vector<128x32xf32>
    %cst_8 = arith.constant 1.000000e+00 : f32
    %13 = vector.broadcast %cst_8 : f32 to vector<1x128xf32>
    %cst_9 = arith.constant dense<0.000000e+00> : vector<1x32xf32>
    %14 = tpu.matmul %13, %12, %cst_9 {dimension_numbers = #tpu.dot_dimension_numbers<[1], [0], [0], [1], [0, 0, 1, 1], [], []>} : vector<1x128xf32>, vector<128x32xf32>, vector<1x32xf32> -> vector<1x32xf32>
    %cst_10 = arith.constant 7.812500e-03 : f32
    %15 = vector.broadcast %cst_10 : f32 to vector<1x32xf32>
    %16 = arith.mulf %14, %15 : vector<1x32xf32>
    %cst_11 = arith.constant 9.99999974E-6 : f32
    %17 = vector.broadcast %cst_11 : f32 to vector<1x32xf32>
    %18 = arith.addf %16, %17 : vector<1x32xf32>
    %19 = math.rsqrt %18 : vector<1x32xf32>
    %20 = vector.broadcast %19 : vector<1x32xf32> to vector<128x32xf32>
    %21 = arith.mulf %11, %20 : vector<128x32xf32>
    %c0_12 = arith.constant 0 : index
    %c0_13 = arith.constant 0 : index
    %22 = vector.load %arg3[%c0_12, %c0_13] : memref<1x32xf32, #tpu.memory_space<vmem>>, vector<1x32xf32>
    %23 = vector.broadcast %22 : vector<1x32xf32> to vector<128x32xf32>
    %24 = arith.mulf %21, %23 : vector<128x32xf32>
    %c0_14 = arith.constant 0 : index
    %c0_15 = arith.constant 0 : index
    %25 = vector.load %arg4[%c0_14, %c0_15] : memref<1x32xf32, #tpu.memory_space<vmem>>, vector<1x32xf32>
    %26 = vector.broadcast %25 : vector<1x32xf32> to vector<128x32xf32>
    %27 = arith.addf %24, %26 : vector<128x32xf32>
    %cst_16 = arith.constant 0.000000e+00 : f32
    %28 = vector.broadcast %cst_16 : f32 to vector<128x32xf32>
    %29 = arith.maximumf %27, %28 : vector<128x32xf32>
    %c0_17 = arith.constant 0 : index
    %c0_18 = arith.constant 0 : index
    %30 = vector.load %arg5[%c0_17, %c0_18] : memref<128x32xf32, #tpu.memory_space<vmem>>, vector<128x32xf32>
    tpu.vector_store %arg5[%c0_17, %c0_18], %29 {strides = array<i32>} : memref<128x32xf32, #tpu.memory_space<vmem>>, vector<128x32xf32>,
    return
  }
}

module attributes {stable_mosaic.version = 11 : i64} {
  func.func @_gemm_fused_kernel(%arg0: memref<128x16xbf16, #tpu.memory_space<vmem>>, %arg1: memref<16x32xbf16, #tpu.memory_space<vmem>>, %arg2: memref<1x32xf32, #tpu.memory_space<vmem>>, %arg3: memref<1x32xf32, #tpu.memory_space<vmem>>, %arg4: memref<1x32xf32, #tpu.memory_space<vmem>>, %arg5: memref<128x32xf32, #tpu.memory_space<vmem>>) attributes {dimension_semantics = [], scalar_prefetch = 0 : i64, scratch_operands = 0 : i64, tpu.core_type = #tpu.core_type<tc>} {
    %c0 = arith.constant 0 : index
    %c0_0 = arith.constant 0 : index
    %0 = vector.load %arg0[%c0, %c0_0] : memref<128x16xbf16, #tpu.memory_space<vmem>>, vector<128x16xbf16>
    %c0_1 = arith.constant 0 : index
    %c0_2 = arith.constant 0 : index
    %1 = vector.load %arg1[%c0_1, %c0_2] : memref<16x32xbf16, #tpu.memory_space<vmem>>, vector<16x32xbf16>
    %cst = arith.constant dense<0.000000e+00> : vector<128x32xf32>
    %2 = tpu.matmul %0, %1, %cst {dimension_numbers = #tpu.dot_dimension_numbers<[1], [0], [0], [1], [0, 0, 1, 1], [], []>} : vector<128x16xbf16>, vector<16x32xbf16>, vector<128x32xf32> -> vector<128x32xf32>
    %c0_3 = arith.constant 0 : index
    %c0_4 = arith.constant 0 : index
    %3 = vector.load %arg2[%c0_3, %c0_4] : memref<1x32xf32, #tpu.memory_space<vmem>>, vector<1x32xf32>
    %4 = vector.broadcast %3 : vector<1x32xf32> to vector<128x32xf32>
    %5 = arith.addf %2, %4 : vector<128x32xf32>
    %cst_5 = arith.constant 1.000000e+00 : f32
    %6 = vector.broadcast %cst_5 : f32 to vector<1x128xf32>
    %cst_6 = arith.constant dense<0.000000e+00> : vector<1x32xf32>
    %7 = tpu.matmul %6, %5, %cst_6 {dimension_numbers = #tpu.dot_dimension_numbers<[1], [0], [0], [1], [0, 0, 1, 1], [], []>} : vector<1x128xf32>, vector<128x32xf32>, vector<1x32xf32> -> vector<1x32xf32>
    %cst_7 = arith.constant 7.812500e-03 : f32
    %8 = vector.broadcast %cst_7 : f32 to vector<1x32xf32>
    %9 = arith.mulf %7, %8 : vector<1x32xf32>
    %10 = vector.broadcast %9 : vector<1x32xf32> to vector<128x32xf32>
    %11 = arith.subf %5, %10 : vector<128x32xf32>
    %12 = arith.mulf %11, %11 : vector<128x32xf32>
    %cst_8 = arith.constant 1.000000e+00 : f32
    %13 = vector.broadcast %cst_8 : f32 to vector<1x128xf32>
    %cst_9 = arith.constant dense<0.000000e+00> : vector<1x32xf32>
    %14 = tpu.matmul %13, %12, %cst_9 {dimension_numbers = #tpu.dot_dimension_numbers<[1], [0], [0], [1], [0, 0, 1, 1], [], []>} : vector<1x128xf32>, vector<128x32xf32>, vector<1x32xf32> -> vector<1x32xf32>
    %cst_10 = arith.constant 7.812500e-03 : f32
    %15 = vector.broadcast %cst_10 : f32 to vector<1x32xf32>
    %16 = arith.mulf %14, %15 : vector<1x32xf32>
    %cst_11 = arith.constant 9.99999974E-6 : f32
    %17 = vector.broadcast %cst_11 : f32 to vector<1x32xf32>
    %18 = arith.addf %16, %17 : vector<1x32xf32>
    %19 = math.rsqrt %18 : vector<1x32xf32>
    %20 = vector.broadcast %19 : vector<1x32xf32> to vector<128x32xf32>
    %21 = arith.mulf %11, %20 : vector<128x32xf32>
    %c0_12 = arith.constant 0 : index
    %c0_13 = arith.constant 0 : index
    %22 = vector.load %arg3[%c0_12, %c0_13] : memref<1x32xf32, #tpu.memory_space<vmem>>, vector<1x32xf32>
    %23 = vector.broadcast %22 : vector<1x32xf32> to vector<128x32xf32>
    %24 = arith.mulf %21, %23 : vector<128x32xf32>
    %c0_14 = arith.constant 0 : index
    %c0_15 = arith.constant 0 : index
    %25 = vector.load %arg4[%c0_14, %c0_15] : memref<1x32xf32, #tpu.memory_space<vmem>>, vector<1x32xf32>
    %26 = vector.broadcast %25 : vector<1x32xf32> to vector<128x32xf32>
    %27 = arith.addf %24, %26 : vector<128x32xf32>
    %c0_16 = arith.constant 0 : index
    %c0_17 = arith.constant 0 : index
    %28 = vector.load %arg5[%c0_16, %c0_17] : memref<128x32xf32, #tpu.memory_space<vmem>>, vector<128x32xf32>
    tpu.vector_store %arg5[%c0_16, %c0_17], %27 {strides = array<i32>} : memref<128x32xf32, #tpu.memory_space<vmem>>, vector<128x32xf32>,
    return
  }
}

module attributes {stable_mosaic.version = 11 : i64} {
  func.func @_gemm_fused_kernel(%arg0: memref<128x288xbf16, #tpu.memory_space<vmem>>, %arg1: memref<288x32xbf16, #tpu.memory_space<vmem>>, %arg2: memref<1x32xf32, #tpu.memory_space<vmem>>, %arg3: memref<1x32xf32, #tpu.memory_space<vmem>>, %arg4: memref<1x32xf32, #tpu.memory_space<vmem>>, %arg5: memref<128x32xf32, #tpu.memory_space<vmem>>) attributes {dimension_semantics = [], scalar_prefetch = 0 : i64, scratch_operands = 0 : i64, tpu.core_type = #tpu.core_type<tc>} {
    %c0 = arith.constant 0 : index
    %c0_0 = arith.constant 0 : index
    %0 = vector.load %arg0[%c0, %c0_0] : memref<128x288xbf16, #tpu.memory_space<vmem>>, vector<128x288xbf16>
    %c0_1 = arith.constant 0 : index
    %c0_2 = arith.constant 0 : index
    %1 = vector.load %arg1[%c0_1, %c0_2] : memref<288x32xbf16, #tpu.memory_space<vmem>>, vector<288x32xbf16>
    %cst = arith.constant dense<0.000000e+00> : vector<128x32xf32>
    %2 = tpu.matmul %0, %1, %cst {dimension_numbers = #tpu.dot_dimension_numbers<[1], [0], [0], [1], [0, 0, 1, 1], [], []>} : vector<128x288xbf16>, vector<288x32xbf16>, vector<128x32xf32> -> vector<128x32xf32>
    %c0_3 = arith.constant 0 : index
    %c0_4 = arith.constant 0 : index
    %3 = vector.load %arg2[%c0_3, %c0_4] : memref<1x32xf32, #tpu.memory_space<vmem>>, vector<1x32xf32>
    %4 = vector.broadcast %3 : vector<1x32xf32> to vector<128x32xf32>
    %5 = arith.addf %2, %4 : vector<128x32xf32>
    %cst_5 = arith.constant 1.000000e+00 : f32
    %6 = vector.broadcast %cst_5 : f32 to vector<1x128xf32>
    %cst_6 = arith.constant dense<0.000000e+00> : vector<1x32xf32>
    %7 = tpu.matmul %6, %5, %cst_6 {dimension_numbers = #tpu.dot_dimension_numbers<[1], [0], [0], [1], [0, 0, 1, 1], [], []>} : vector<1x128xf32>, vector<128x32xf32>, vector<1x32xf32> -> vector<1x32xf32>
    %cst_7 = arith.constant 7.812500e-03 : f32
    %8 = vector.broadcast %cst_7 : f32 to vector<1x32xf32>
    %9 = arith.mulf %7, %8 : vector<1x32xf32>
    %10 = vector.broadcast %9 : vector<1x32xf32> to vector<128x32xf32>
    %11 = arith.subf %5, %10 : vector<128x32xf32>
    %12 = arith.mulf %11, %11 : vector<128x32xf32>
    %cst_8 = arith.constant 1.000000e+00 : f32
    %13 = vector.broadcast %cst_8 : f32 to vector<1x128xf32>
    %cst_9 = arith.constant dense<0.000000e+00> : vector<1x32xf32>
    %14 = tpu.matmul %13, %12, %cst_9 {dimension_numbers = #tpu.dot_dimension_numbers<[1], [0], [0], [1], [0, 0, 1, 1], [], []>} : vector<1x128xf32>, vector<128x32xf32>, vector<1x32xf32> -> vector<1x32xf32>
    %cst_10 = arith.constant 7.812500e-03 : f32
    %15 = vector.broadcast %cst_10 : f32 to vector<1x32xf32>
    %16 = arith.mulf %14, %15 : vector<1x32xf32>
    %cst_11 = arith.constant 9.99999974E-6 : f32
    %17 = vector.broadcast %cst_11 : f32 to vector<1x32xf32>
    %18 = arith.addf %16, %17 : vector<1x32xf32>
    %19 = math.rsqrt %18 : vector<1x32xf32>
    %20 = vector.broadcast %19 : vector<1x32xf32> to vector<128x32xf32>
    %21 = arith.mulf %11, %20 : vector<128x32xf32>
    %c0_12 = arith.constant 0 : index
    %c0_13 = arith.constant 0 : index
    %22 = vector.load %arg3[%c0_12, %c0_13] : memref<1x32xf32, #tpu.memory_space<vmem>>, vector<1x32xf32>
    %23 = vector.broadcast %22 : vector<1x32xf32> to vector<128x32xf32>
    %24 = arith.mulf %21, %23 : vector<128x32xf32>
    %c0_14 = arith.constant 0 : index
    %c0_15 = arith.constant 0 : index
    %25 = vector.load %arg4[%c0_14, %c0_15] : memref<1x32xf32, #tpu.memory_space<vmem>>, vector<1x32xf32>
    %26 = vector.broadcast %25 : vector<1x32xf32> to vector<128x32xf32>
    %27 = arith.addf %24, %26 : vector<128x32xf32>
    %cst_16 = arith.constant 0.000000e+00 : f32
    %28 = vector.broadcast %cst_16 : f32 to vector<128x32xf32>
    %29 = arith.maximumf %27, %28 : vector<128x32xf32>
    %c0_17 = arith.constant 0 : index
    %c0_18 = arith.constant 0 : index
    %30 = vector.load %arg5[%c0_17, %c0_18] : memref<128x32xf32, #tpu.memory_space<vmem>>, vector<128x32xf32>
    tpu.vector_store %arg5[%c0_17, %c0_18], %29 {strides = array<i32>} : memref<128x32xf32, #tpu.memory_space<vmem>>, vector<128x32xf32>,
    return
  }
}

module attributes {stable_mosaic.version = 11 : i64} {
  func.func @_gemm_fused_kernel(%arg0: memref<128x288xbf16, #tpu.memory_space<vmem>>, %arg1: memref<288x32xbf16, #tpu.memory_space<vmem>>, %arg2: memref<1x32xf32, #tpu.memory_space<vmem>>, %arg3: memref<1x32xf32, #tpu.memory_space<vmem>>, %arg4: memref<1x32xf32, #tpu.memory_space<vmem>>, %arg5: memref<128x32xf32, #tpu.memory_space<vmem>>, %arg6: memref<128x32xf32, #tpu.memory_space<vmem>>) attributes {dimension_semantics = [], scalar_prefetch = 0 : i64, scratch_operands = 0 : i64, tpu.core_type = #tpu.core_type<tc>} {
    %c0 = arith.constant 0 : index
    %c0_0 = arith.constant 0 : index
    %0 = vector.load %arg0[%c0, %c0_0] : memref<128x288xbf16, #tpu.memory_space<vmem>>, vector<128x288xbf16>
    %c0_1 = arith.constant 0 : index
    %c0_2 = arith.constant 0 : index
    %1 = vector.load %arg1[%c0_1, %c0_2] : memref<288x32xbf16, #tpu.memory_space<vmem>>, vector<288x32xbf16>
    %cst = arith.constant dense<0.000000e+00> : vector<128x32xf32>
    %2 = tpu.matmul %0, %1, %cst {dimension_numbers = #tpu.dot_dimension_numbers<[1], [0], [0], [1], [0, 0, 1, 1], [], []>} : vector<128x288xbf16>, vector<288x32xbf16>, vector<128x32xf32> -> vector<128x32xf32>
    %c0_3 = arith.constant 0 : index
    %c0_4 = arith.constant 0 : index
    %3 = vector.load %arg2[%c0_3, %c0_4] : memref<1x32xf32, #tpu.memory_space<vmem>>, vector<1x32xf32>
    %4 = vector.broadcast %3 : vector<1x32xf32> to vector<128x32xf32>
    %5 = arith.addf %2, %4 : vector<128x32xf32>
    %cst_5 = arith.constant 1.000000e+00 : f32
    %6 = vector.broadcast %cst_5 : f32 to vector<1x128xf32>
    %cst_6 = arith.constant dense<0.000000e+00> : vector<1x32xf32>
    %7 = tpu.matmul %6, %5, %cst_6 {dimension_numbers = #tpu.dot_dimension_numbers<[1], [0], [0], [1], [0, 0, 1, 1], [], []>} : vector<1x128xf32>, vector<128x32xf32>, vector<1x32xf32> -> vector<1x32xf32>
    %cst_7 = arith.constant 7.812500e-03 : f32
    %8 = vector.broadcast %cst_7 : f32 to vector<1x32xf32>
    %9 = arith.mulf %7, %8 : vector<1x32xf32>
    %10 = vector.broadcast %9 : vector<1x32xf32> to vector<128x32xf32>
    %11 = arith.subf %5, %10 : vector<128x32xf32>
    %12 = arith.mulf %11, %11 : vector<128x32xf32>
    %cst_8 = arith.constant 1.000000e+00 : f32
    %13 = vector.broadcast %cst_8 : f32 to vector<1x128xf32>
    %cst_9 = arith.constant dense<0.000000e+00> : vector<1x32xf32>
    %14 = tpu.matmul %13, %12, %cst_9 {dimension_numbers = #tpu.dot_dimension_numbers<[1], [0], [0], [1], [0, 0, 1, 1], [], []>} : vector<1x128xf32>, vector<128x32xf32>, vector<1x32xf32> -> vector<1x32xf32>
    %cst_10 = arith.constant 7.812500e-03 : f32
    %15 = vector.broadcast %cst_10 : f32 to vector<1x32xf32>
    %16 = arith.mulf %14, %15 : vector<1x32xf32>
    %cst_11 = arith.constant 9.99999974E-6 : f32
    %17 = vector.broadcast %cst_11 : f32 to vector<1x32xf32>
    %18 = arith.addf %16, %17 : vector<1x32xf32>
    %19 = math.rsqrt %18 : vector<1x32xf32>
    %20 = vector.broadcast %19 : vector<1x32xf32> to vector<128x32xf32>
    %21 = arith.mulf %11, %20 : vector<128x32xf32>
    %c0_12 = arith.constant 0 : index
    %c0_13 = arith.constant 0 : index
    %22 = vector.load %arg3[%c0_12, %c0_13] : memref<1x32xf32, #tpu.memory_space<vmem>>, vector<1x32xf32>
    %23 = vector.broadcast %22 : vector<1x32xf32> to vector<128x32xf32>
    %24 = arith.mulf %21, %23 : vector<128x32xf32>
    %c0_14 = arith.constant 0 : index
    %c0_15 = arith.constant 0 : index
    %25 = vector.load %arg4[%c0_14, %c0_15] : memref<1x32xf32, #tpu.memory_space<vmem>>, vector<1x32xf32>
    %26 = vector.broadcast %25 : vector<1x32xf32> to vector<128x32xf32>
    %27 = arith.addf %24, %26 : vector<128x32xf32>
    %c0_16 = arith.constant 0 : index
    %c0_17 = arith.constant 0 : index
    %28 = vector.load %arg5[%c0_16, %c0_17] : memref<128x32xf32, #tpu.memory_space<vmem>>, vector<128x32xf32>
    %29 = arith.addf %27, %28 : vector<128x32xf32>
    %cst_18 = arith.constant 0.000000e+00 : f32
    %30 = vector.broadcast %cst_18 : f32 to vector<128x32xf32>
    %31 = arith.maximumf %29, %30 : vector<128x32xf32>
    %c0_19 = arith.constant 0 : index
    %c0_20 = arith.constant 0 : index
    %32 = vector.load %arg6[%c0_19, %c0_20] : memref<128x32xf32, #tpu.memory_space<vmem>>, vector<128x32xf32>
    tpu.vector_store %arg6[%c0_19, %c0_20], %31 {strides = array<i32>} : memref<128x32xf32, #tpu.memory_space<vmem>>, vector<128x32xf32>,
    return
  }
}

module attributes {stable_mosaic.version = 11 : i64} {
  func.func @_gemm_fused_kernel(%arg0: memref<32x288xbf16, #tpu.memory_space<vmem>>, %arg1: memref<288x64xbf16, #tpu.memory_space<vmem>>, %arg2: memref<1x64xf32, #tpu.memory_space<vmem>>, %arg3: memref<1x64xf32, #tpu.memory_space<vmem>>, %arg4: memref<1x64xf32, #tpu.memory_space<vmem>>, %arg5: memref<32x64xf32, #tpu.memory_space<vmem>>) attributes {dimension_semantics = [], scalar_prefetch = 0 : i64, scratch_operands = 0 : i64, tpu.core_type = #tpu.core_type<tc>} {
    %c0 = arith.constant 0 : index
    %c0_0 = arith.constant 0 : index
    %0 = vector.load %arg0[%c0, %c0_0] : memref<32x288xbf16, #tpu.memory_space<vmem>>, vector<32x288xbf16>
    %c0_1 = arith.constant 0 : index
    %c0_2 = arith.constant 0 : index
    %1 = vector.load %arg1[%c0_1, %c0_2] : memref<288x64xbf16, #tpu.memory_space<vmem>>, vector<288x64xbf16>
    %cst = arith.constant dense<0.000000e+00> : vector<32x64xf32>
    %2 = tpu.matmul %0, %1, %cst {dimension_numbers = #tpu.dot_dimension_numbers<[1], [0], [0], [1], [0, 0, 1, 1], [], []>} : vector<32x288xbf16>, vector<288x64xbf16>, vector<32x64xf32> -> vector<32x64xf32>
    %c0_3 = arith.constant 0 : index
    %c0_4 = arith.constant 0 : index
    %3 = vector.load %arg2[%c0_3, %c0_4] : memref<1x64xf32, #tpu.memory_space<vmem>>, vector<1x64xf32>
    %4 = vector.broadcast %3 : vector<1x64xf32> to vector<32x64xf32>
    %5 = arith.addf %2, %4 : vector<32x64xf32>
    %cst_5 = arith.constant 1.000000e+00 : f32
    %6 = vector.broadcast %cst_5 : f32 to vector<1x32xf32>
    %cst_6 = arith.constant dense<0.000000e+00> : vector<1x64xf32>
    %7 = tpu.matmul %6, %5, %cst_6 {dimension_numbers = #tpu.dot_dimension_numbers<[1], [0], [0], [1], [0, 0, 1, 1], [], []>} : vector<1x32xf32>, vector<32x64xf32>, vector<1x64xf32> -> vector<1x64xf32>
    %cst_7 = arith.constant 3.125000e-02 : f32
    %8 = vector.broadcast %cst_7 : f32 to vector<1x64xf32>
    %9 = arith.mulf %7, %8 : vector<1x64xf32>
    %10 = vector.broadcast %9 : vector<1x64xf32> to vector<32x64xf32>
    %11 = arith.subf %5, %10 : vector<32x64xf32>
    %12 = arith.mulf %11, %11 : vector<32x64xf32>
    %cst_8 = arith.constant 1.000000e+00 : f32
    %13 = vector.broadcast %cst_8 : f32 to vector<1x32xf32>
    %cst_9 = arith.constant dense<0.000000e+00> : vector<1x64xf32>
    %14 = tpu.matmul %13, %12, %cst_9 {dimension_numbers = #tpu.dot_dimension_numbers<[1], [0], [0], [1], [0, 0, 1, 1], [], []>} : vector<1x32xf32>, vector<32x64xf32>, vector<1x64xf32> -> vector<1x64xf32>
    %cst_10 = arith.constant 3.125000e-02 : f32
    %15 = vector.broadcast %cst_10 : f32 to vector<1x64xf32>
    %16 = arith.mulf %14, %15 : vector<1x64xf32>
    %cst_11 = arith.constant 9.99999974E-6 : f32
    %17 = vector.broadcast %cst_11 : f32 to vector<1x64xf32>
    %18 = arith.addf %16, %17 : vector<1x64xf32>
    %19 = math.rsqrt %18 : vector<1x64xf32>
    %20 = vector.broadcast %19 : vector<1x64xf32> to vector<32x64xf32>
    %21 = arith.mulf %11, %20 : vector<32x64xf32>
    %c0_12 = arith.constant 0 : index
    %c0_13 = arith.constant 0 : index
    %22 = vector.load %arg3[%c0_12, %c0_13] : memref<1x64xf32, #tpu.memory_space<vmem>>, vector<1x64xf32>
    %23 = vector.broadcast %22 : vector<1x64xf32> to vector<32x64xf32>
    %24 = arith.mulf %21, %23 : vector<32x64xf32>
    %c0_14 = arith.constant 0 : index
    %c0_15 = arith.constant 0 : index
    %25 = vector.load %arg4[%c0_14, %c0_15] : memref<1x64xf32, #tpu.memory_space<vmem>>, vector<1x64xf32>
    %26 = vector.broadcast %25 : vector<1x64xf32> to vector<32x64xf32>
    %27 = arith.addf %24, %26 : vector<32x64xf32>
    %cst_16 = arith.constant 0.000000e+00 : f32
    %28 = vector.broadcast %cst_16 : f32 to vector<32x64xf32>
    %29 = arith.maximumf %27, %28 : vector<32x64xf32>
    %c0_17 = arith.constant 0 : index
    %c0_18 = arith.constant 0 : index
    %30 = vector.load %arg5[%c0_17, %c0_18] : memref<32x64xf32, #tpu.memory_space<vmem>>, vector<32x64xf32>
    tpu.vector_store %arg5[%c0_17, %c0_18], %29 {strides = array<i32>} : memref<32x64xf32, #tpu.memory_space<vmem>>, vector<32x64xf32>,
    return
  }
}

module attributes {stable_mosaic.version = 11 : i64} {
  func.func @_gemm_fused_kernel(%arg0: memref<32x32xbf16, #tpu.memory_space<vmem>>, %arg1: memref<32x64xbf16, #tpu.memory_space<vmem>>, %arg2: memref<1x64xf32, #tpu.memory_space<vmem>>, %arg3: memref<1x64xf32, #tpu.memory_space<vmem>>, %arg4: memref<1x64xf32, #tpu.memory_space<vmem>>, %arg5: memref<32x64xf32, #tpu.memory_space<vmem>>) attributes {dimension_semantics = [], scalar_prefetch = 0 : i64, scratch_operands = 0 : i64, tpu.core_type = #tpu.core_type<tc>} {
    %c0 = arith.constant 0 : index
    %c0_0 = arith.constant 0 : index
    %0 = vector.load %arg0[%c0, %c0_0] : memref<32x32xbf16, #tpu.memory_space<vmem>>, vector<32x32xbf16>
    %c0_1 = arith.constant 0 : index
    %c0_2 = arith.constant 0 : index
    %1 = vector.load %arg1[%c0_1, %c0_2] : memref<32x64xbf16, #tpu.memory_space<vmem>>, vector<32x64xbf16>
    %cst = arith.constant dense<0.000000e+00> : vector<32x64xf32>
    %2 = tpu.matmul %0, %1, %cst {dimension_numbers = #tpu.dot_dimension_numbers<[1], [0], [0], [1], [0, 0, 1, 1], [], []>} : vector<32x32xbf16>, vector<32x64xbf16>, vector<32x64xf32> -> vector<32x64xf32>
    %c0_3 = arith.constant 0 : index
    %c0_4 = arith.constant 0 : index
    %3 = vector.load %arg2[%c0_3, %c0_4] : memref<1x64xf32, #tpu.memory_space<vmem>>, vector<1x64xf32>
    %4 = vector.broadcast %3 : vector<1x64xf32> to vector<32x64xf32>
    %5 = arith.addf %2, %4 : vector<32x64xf32>
    %cst_5 = arith.constant 1.000000e+00 : f32
    %6 = vector.broadcast %cst_5 : f32 to vector<1x32xf32>
    %cst_6 = arith.constant dense<0.000000e+00> : vector<1x64xf32>
    %7 = tpu.matmul %6, %5, %cst_6 {dimension_numbers = #tpu.dot_dimension_numbers<[1], [0], [0], [1], [0, 0, 1, 1], [], []>} : vector<1x32xf32>, vector<32x64xf32>, vector<1x64xf32> -> vector<1x64xf32>
    %cst_7 = arith.constant 3.125000e-02 : f32
    %8 = vector.broadcast %cst_7 : f32 to vector<1x64xf32>
    %9 = arith.mulf %7, %8 : vector<1x64xf32>
    %10 = vector.broadcast %9 : vector<1x64xf32> to vector<32x64xf32>
    %11 = arith.subf %5, %10 : vector<32x64xf32>
    %12 = arith.mulf %11, %11 : vector<32x64xf32>
    %cst_8 = arith.constant 1.000000e+00 : f32
    %13 = vector.broadcast %cst_8 : f32 to vector<1x32xf32>
    %cst_9 = arith.constant dense<0.000000e+00> : vector<1x64xf32>
    %14 = tpu.matmul %13, %12, %cst_9 {dimension_numbers = #tpu.dot_dimension_numbers<[1], [0], [0], [1], [0, 0, 1, 1], [], []>} : vector<1x32xf32>, vector<32x64xf32>, vector<1x64xf32> -> vector<1x64xf32>
    %cst_10 = arith.constant 3.125000e-02 : f32
    %15 = vector.broadcast %cst_10 : f32 to vector<1x64xf32>
    %16 = arith.mulf %14, %15 : vector<1x64xf32>
    %cst_11 = arith.constant 9.99999974E-6 : f32
    %17 = vector.broadcast %cst_11 : f32 to vector<1x64xf32>
    %18 = arith.addf %16, %17 : vector<1x64xf32>
    %19 = math.rsqrt %18 : vector<1x64xf32>
    %20 = vector.broadcast %19 : vector<1x64xf32> to vector<32x64xf32>
    %21 = arith.mulf %11, %20 : vector<32x64xf32>
    %c0_12 = arith.constant 0 : index
    %c0_13 = arith.constant 0 : index
    %22 = vector.load %arg3[%c0_12, %c0_13] : memref<1x64xf32, #tpu.memory_space<vmem>>, vector<1x64xf32>
    %23 = vector.broadcast %22 : vector<1x64xf32> to vector<32x64xf32>
    %24 = arith.mulf %21, %23 : vector<32x64xf32>
    %c0_14 = arith.constant 0 : index
    %c0_15 = arith.constant 0 : index
    %25 = vector.load %arg4[%c0_14, %c0_15] : memref<1x64xf32, #tpu.memory_space<vmem>>, vector<1x64xf32>
    %26 = vector.broadcast %25 : vector<1x64xf32> to vector<32x64xf32>
    %27 = arith.addf %24, %26 : vector<32x64xf32>
    %c0_16 = arith.constant 0 : index
    %c0_17 = arith.constant 0 : index
    %28 = vector.load %arg5[%c0_16, %c0_17] : memref<32x64xf32, #tpu.memory_space<vmem>>, vector<32x64xf32>
    tpu.vector_store %arg5[%c0_16, %c0_17], %27 {strides = array<i32>} : memref<32x64xf32, #tpu.memory_space<vmem>>, vector<32x64xf32>,
    return
  }
}

module attributes {stable_mosaic.version = 11 : i64} {
  func.func @_gemm_fused_kernel(%arg0: memref<32x576xbf16, #tpu.memory_space<vmem>>, %arg1: memref<576x64xbf16, #tpu.memory_space<vmem>>, %arg2: memref<1x64xf32, #tpu.memory_space<vmem>>, %arg3: memref<1x64xf32, #tpu.memory_space<vmem>>, %arg4: memref<1x64xf32, #tpu.memory_space<vmem>>, %arg5: memref<32x64xf32, #tpu.memory_space<vmem>>, %arg6: memref<32x64xf32, #tpu.memory_space<vmem>>) attributes {dimension_semantics = [], scalar_prefetch = 0 : i64, scratch_operands = 0 : i64, tpu.core_type = #tpu.core_type<tc>} {
    %c0 = arith.constant 0 : index
    %c0_0 = arith.constant 0 : index
    %0 = vector.load %arg0[%c0, %c0_0] : memref<32x576xbf16, #tpu.memory_space<vmem>>, vector<32x576xbf16>
    %c0_1 = arith.constant 0 : index
    %c0_2 = arith.constant 0 : index
    %1 = vector.load %arg1[%c0_1, %c0_2] : memref<576x64xbf16, #tpu.memory_space<vmem>>, vector<576x64xbf16>
    %cst = arith.constant dense<0.000000e+00> : vector<32x64xf32>
    %2 = tpu.matmul %0, %1, %cst {dimension_numbers = #tpu.dot_dimension_numbers<[1], [0], [0], [1], [0, 0, 1, 1], [], []>} : vector<32x576xbf16>, vector<576x64xbf16>, vector<32x64xf32> -> vector<32x64xf32>
    %c0_3 = arith.constant 0 : index
    %c0_4 = arith.constant 0 : index
    %3 = vector.load %arg2[%c0_3, %c0_4] : memref<1x64xf32, #tpu.memory_space<vmem>>, vector<1x64xf32>
    %4 = vector.broadcast %3 : vector<1x64xf32> to vector<32x64xf32>
    %5 = arith.addf %2, %4 : vector<32x64xf32>
    %cst_5 = arith.constant 1.000000e+00 : f32
    %6 = vector.broadcast %cst_5 : f32 to vector<1x32xf32>
    %cst_6 = arith.constant dense<0.000000e+00> : vector<1x64xf32>
    %7 = tpu.matmul %6, %5, %cst_6 {dimension_numbers = #tpu.dot_dimension_numbers<[1], [0], [0], [1], [0, 0, 1, 1], [], []>} : vector<1x32xf32>, vector<32x64xf32>, vector<1x64xf32> -> vector<1x64xf32>
    %cst_7 = arith.constant 3.125000e-02 : f32
    %8 = vector.broadcast %cst_7 : f32 to vector<1x64xf32>
    %9 = arith.mulf %7, %8 : vector<1x64xf32>
    %10 = vector.broadcast %9 : vector<1x64xf32> to vector<32x64xf32>
    %11 = arith.subf %5, %10 : vector<32x64xf32>
    %12 = arith.mulf %11, %11 : vector<32x64xf32>
    %cst_8 = arith.constant 1.000000e+00 : f32
    %13 = vector.broadcast %cst_8 : f32 to vector<1x32xf32>
    %cst_9 = arith.constant dense<0.000000e+00> : vector<1x64xf32>
    %14 = tpu.matmul %13, %12, %cst_9 {dimension_numbers = #tpu.dot_dimension_numbers<[1], [0], [0], [1], [0, 0, 1, 1], [], []>} : vector<1x32xf32>, vector<32x64xf32>, vector<1x64xf32> -> vector<1x64xf32>
    %cst_10 = arith.constant 3.125000e-02 : f32
    %15 = vector.broadcast %cst_10 : f32 to vector<1x64xf32>
    %16 = arith.mulf %14, %15 : vector<1x64xf32>
    %cst_11 = arith.constant 9.99999974E-6 : f32
    %17 = vector.broadcast %cst_11 : f32 to vector<1x64xf32>
    %18 = arith.addf %16, %17 : vector<1x64xf32>
    %19 = math.rsqrt %18 : vector<1x64xf32>
    %20 = vector.broadcast %19 : vector<1x64xf32> to vector<32x64xf32>
    %21 = arith.mulf %11, %20 : vector<32x64xf32>
    %c0_12 = arith.constant 0 : index
    %c0_13 = arith.constant 0 : index
    %22 = vector.load %arg3[%c0_12, %c0_13] : memref<1x64xf32, #tpu.memory_space<vmem>>, vector<1x64xf32>
    %23 = vector.broadcast %22 : vector<1x64xf32> to vector<32x64xf32>
    %24 = arith.mulf %21, %23 : vector<32x64xf32>
    %c0_14 = arith.constant 0 : index
    %c0_15 = arith.constant 0 : index
    %25 = vector.load %arg4[%c0_14, %c0_15] : memref<1x64xf32, #tpu.memory_space<vmem>>, vector<1x64xf32>
    %26 = vector.broadcast %25 : vector<1x64xf32> to vector<32x64xf32>
    %27 = arith.addf %24, %26 : vector<32x64xf32>
    %c0_16 = arith.constant 0 : index
    %c0_17 = arith.constant 0 : index
    %28 = vector.load %arg5[%c0_16, %c0_17] : memref<32x64xf32, #tpu.memory_space<vmem>>, vector<32x64xf32>
    %29 = arith.addf %27, %28 : vector<32x64xf32>
    %cst_18 = arith.constant 0.000000e+00 : f32
    %30 = vector.broadcast %cst_18 : f32 to vector<32x64xf32>
    %31 = arith.maximumf %29, %30 : vector<32x64xf32>
    %c0_19 = arith.constant 0 : index
    %c0_20 = arith.constant 0 : index
    %32 = vector.load %arg6[%c0_19, %c0_20] : memref<32x64xf32, #tpu.memory_space<vmem>>, vector<32x64xf32>
    tpu.vector_store %arg6[%c0_19, %c0_20], %31 {strides = array<i32>} : memref<32x64xf32, #tpu.memory_space<vmem>>, vector<32x64xf32>,
    return
  }
}

module attributes {stable_mosaic.version = 11 : i64} {
  func.func @_gemm_fused_kernel(%arg0: memref<32x576xbf16, #tpu.memory_space<vmem>>, %arg1: memref<576x64xbf16, #tpu.memory_space<vmem>>, %arg2: memref<1x64xf32, #tpu.memory_space<vmem>>, %arg3: memref<1x64xf32, #tpu.memory_space<vmem>>, %arg4: memref<1x64xf32, #tpu.memory_space<vmem>>, %arg5: memref<32x64xf32, #tpu.memory_space<vmem>>) attributes {dimension_semantics = [], scalar_prefetch = 0 : i64, scratch_operands = 0 : i64, tpu.core_type = #tpu.core_type<tc>} {
    %c0 = arith.constant 0 : index
    %c0_0 = arith.constant 0 : index
    %0 = vector.load %arg0[%c0, %c0_0] : memref<32x576xbf16, #tpu.memory_space<vmem>>, vector<32x576xbf16>
    %c0_1 = arith.constant 0 : index
    %c0_2 = arith.constant 0 : index
    %1 = vector.load %arg1[%c0_1, %c0_2] : memref<576x64xbf16, #tpu.memory_space<vmem>>, vector<576x64xbf16>
    %cst = arith.constant dense<0.000000e+00> : vector<32x64xf32>
    %2 = tpu.matmul %0, %1, %cst {dimension_numbers = #tpu.dot_dimension_numbers<[1], [0], [0], [1], [0, 0, 1, 1], [], []>} : vector<32x576xbf16>, vector<576x64xbf16>, vector<32x64xf32> -> vector<32x64xf32>
    %c0_3 = arith.constant 0 : index
    %c0_4 = arith.constant 0 : index
    %3 = vector.load %arg2[%c0_3, %c0_4] : memref<1x64xf32, #tpu.memory_space<vmem>>, vector<1x64xf32>
    %4 = vector.broadcast %3 : vector<1x64xf32> to vector<32x64xf32>
    %5 = arith.addf %2, %4 : vector<32x64xf32>
    %cst_5 = arith.constant 1.000000e+00 : f32
    %6 = vector.broadcast %cst_5 : f32 to vector<1x32xf32>
    %cst_6 = arith.constant dense<0.000000e+00> : vector<1x64xf32>
    %7 = tpu.matmul %6, %5, %cst_6 {dimension_numbers = #tpu.dot_dimension_numbers<[1], [0], [0], [1], [0, 0, 1, 1], [], []>} : vector<1x32xf32>, vector<32x64xf32>, vector<1x64xf32> -> vector<1x64xf32>
    %cst_7 = arith.constant 3.125000e-02 : f32
    %8 = vector.broadcast %cst_7 : f32 to vector<1x64xf32>
    %9 = arith.mulf %7, %8 : vector<1x64xf32>
    %10 = vector.broadcast %9 : vector<1x64xf32> to vector<32x64xf32>
    %11 = arith.subf %5, %10 : vector<32x64xf32>
    %12 = arith.mulf %11, %11 : vector<32x64xf32>
    %cst_8 = arith.constant 1.000000e+00 : f32
    %13 = vector.broadcast %cst_8 : f32 to vector<1x32xf32>
    %cst_9 = arith.constant dense<0.000000e+00> : vector<1x64xf32>
    %14 = tpu.matmul %13, %12, %cst_9 {dimension_numbers = #tpu.dot_dimension_numbers<[1], [0], [0], [1], [0, 0, 1, 1], [], []>} : vector<1x32xf32>, vector<32x64xf32>, vector<1x64xf32> -> vector<1x64xf32>
    %cst_10 = arith.constant 3.125000e-02 : f32
    %15 = vector.broadcast %cst_10 : f32 to vector<1x64xf32>
    %16 = arith.mulf %14, %15 : vector<1x64xf32>
    %cst_11 = arith.constant 9.99999974E-6 : f32
    %17 = vector.broadcast %cst_11 : f32 to vector<1x64xf32>
    %18 = arith.addf %16, %17 : vector<1x64xf32>
    %19 = math.rsqrt %18 : vector<1x64xf32>
    %20 = vector.broadcast %19 : vector<1x64xf32> to vector<32x64xf32>
    %21 = arith.mulf %11, %20 : vector<32x64xf32>
    %c0_12 = arith.constant 0 : index
    %c0_13 = arith.constant 0 : index
    %22 = vector.load %arg3[%c0_12, %c0_13] : memref<1x64xf32, #tpu.memory_space<vmem>>, vector<1x64xf32>
    %23 = vector.broadcast %22 : vector<1x64xf32> to vector<32x64xf32>
    %24 = arith.mulf %21, %23 : vector<32x64xf32>
    %c0_14 = arith.constant 0 : index
    %c0_15 = arith.constant 0 : index
    %25 = vector.load %arg4[%c0_14, %c0_15] : memref<1x64xf32, #tpu.memory_space<vmem>>, vector<1x64xf32>
    %26 = vector.broadcast %25 : vector<1x64xf32> to vector<32x64xf32>
    %27 = arith.addf %24, %26 : vector<32x64xf32>
    %cst_16 = arith.constant 0.000000e+00 : f32
    %28 = vector.broadcast %cst_16 : f32 to vector<32x64xf32>
    %29 = arith.maximumf %27, %28 : vector<32x64xf32>
    %c0_17 = arith.constant 0 : index
    %c0_18 = arith.constant 0 : index
    %30 = vector.load %arg5[%c0_17, %c0_18] : memref<32x64xf32, #tpu.memory_space<vmem>>, vector<32x64xf32>
    tpu.vector_store %arg5[%c0_17, %c0_18], %29 {strides = array<i32>} : memref<32x64xf32, #tpu.memory_space<vmem>>, vector<32x64xf32>,
    return
  }
}

module attributes {stable_mosaic.version = 11 : i64} {
  func.func @_gemm_fused_kernel(%arg0: memref<8x576xbf16, #tpu.memory_space<vmem>>, %arg1: memref<576x128xbf16, #tpu.memory_space<vmem>>, %arg2: memref<1x128xf32, #tpu.memory_space<vmem>>, %arg3: memref<1x128xf32, #tpu.memory_space<vmem>>, %arg4: memref<1x128xf32, #tpu.memory_space<vmem>>, %arg5: memref<8x128xf32, #tpu.memory_space<vmem>>) attributes {dimension_semantics = [], scalar_prefetch = 0 : i64, scratch_operands = 0 : i64, tpu.core_type = #tpu.core_type<tc>} {
    %c0 = arith.constant 0 : index
    %c0_0 = arith.constant 0 : index
    %0 = vector.load %arg0[%c0, %c0_0] : memref<8x576xbf16, #tpu.memory_space<vmem>>, vector<8x576xbf16>
    %c0_1 = arith.constant 0 : index
    %c0_2 = arith.constant 0 : index
    %1 = vector.load %arg1[%c0_1, %c0_2] : memref<576x128xbf16, #tpu.memory_space<vmem>>, vector<576x128xbf16>
    %cst = arith.constant dense<0.000000e+00> : vector<8x128xf32>
    %2 = tpu.matmul %0, %1, %cst {dimension_numbers = #tpu.dot_dimension_numbers<[1], [0], [0], [1], [0, 0, 1, 1], [], []>} : vector<8x576xbf16>, vector<576x128xbf16>, vector<8x128xf32> -> vector<8x128xf32>
    %c0_3 = arith.constant 0 : index
    %c0_4 = arith.constant 0 : index
    %3 = vector.load %arg2[%c0_3, %c0_4] : memref<1x128xf32, #tpu.memory_space<vmem>>, vector<1x128xf32>
    %4 = vector.broadcast %3 : vector<1x128xf32> to vector<8x128xf32>
    %5 = arith.addf %2, %4 : vector<8x128xf32>
    %cst_5 = arith.constant 1.000000e+00 : f32
    %6 = vector.broadcast %cst_5 : f32 to vector<1x8xf32>
    %cst_6 = arith.constant dense<0.000000e+00> : vector<1x128xf32>
    %7 = tpu.matmul %6, %5, %cst_6 {dimension_numbers = #tpu.dot_dimension_numbers<[1], [0], [0], [1], [0, 0, 1, 1], [], []>} : vector<1x8xf32>, vector<8x128xf32>, vector<1x128xf32> -> vector<1x128xf32>
    %cst_7 = arith.constant 1.250000e-01 : f32
    %8 = vector.broadcast %cst_7 : f32 to vector<1x128xf32>
    %9 = arith.mulf %7, %8 : vector<1x128xf32>
    %10 = vector.broadcast %9 : vector<1x128xf32> to vector<8x128xf32>
    %11 = arith.subf %5, %10 : vector<8x128xf32>
    %12 = arith.mulf %11, %11 : vector<8x128xf32>
    %cst_8 = arith.constant 1.000000e+00 : f32
    %13 = vector.broadcast %cst_8 : f32 to vector<1x8xf32>
    %cst_9 = arith.constant dense<0.000000e+00> : vector<1x128xf32>
    %14 = tpu.matmul %13, %12, %cst_9 {dimension_numbers = #tpu.dot_dimension_numbers<[1], [0], [0], [1], [0, 0, 1, 1], [], []>} : vector<1x8xf32>, vector<8x128xf32>, vector<1x128xf32> -> vector<1x128xf32>
    %cst_10 = arith.constant 1.250000e-01 : f32
    %15 = vector.broadcast %cst_10 : f32 to vector<1x128xf32>
    %16 = arith.mulf %14, %15 : vector<1x128xf32>
    %cst_11 = arith.constant 9.99999974E-6 : f32
    %17 = vector.broadcast %cst_11 : f32 to vector<1x128xf32>
    %18 = arith.addf %16, %17 : vector<1x128xf32>
    %19 = math.rsqrt %18 : vector<1x128xf32>
    %20 = vector.broadcast %19 : vector<1x128xf32> to vector<8x128xf32>
    %21 = arith.mulf %11, %20 : vector<8x128xf32>
    %c0_12 = arith.constant 0 : index
    %c0_13 = arith.constant 0 : index
    %22 = vector.load %arg3[%c0_12, %c0_13] : memref<1x128xf32, #tpu.memory_space<vmem>>, vector<1x128xf32>
    %23 = vector.broadcast %22 : vector<1x128xf32> to vector<8x128xf32>
    %24 = arith.mulf %21, %23 : vector<8x128xf32>
    %c0_14 = arith.constant 0 : index
    %c0_15 = arith.constant 0 : index
    %25 = vector.load %arg4[%c0_14, %c0_15] : memref<1x128xf32, #tpu.memory_space<vmem>>, vector<1x128xf32>
    %26 = vector.broadcast %25 : vector<1x128xf32> to vector<8x128xf32>
    %27 = arith.addf %24, %26 : vector<8x128xf32>
    %cst_16 = arith.constant 0.000000e+00 : f32
    %28 = vector.broadcast %cst_16 : f32 to vector<8x128xf32>
    %29 = arith.maximumf %27, %28 : vector<8x128xf32>
    %c0_17 = arith.constant 0 : index
    %c0_18 = arith.constant 0 : index
    %30 = vector.load %arg5[%c0_17, %c0_18] : memref<8x128xf32, #tpu.memory_space<vmem>>, vector<8x128xf32>
    tpu.vector_store %arg5[%c0_17, %c0_18], %29 {strides = array<i32>} : memref<8x128xf32, #tpu.memory_space<vmem>>, vector<8x128xf32>,
    return
  }
}

module attributes {stable_mosaic.version = 11 : i64} {
  func.func @_gemm_fused_kernel(%arg0: memref<8x64xbf16, #tpu.memory_space<vmem>>, %arg1: memref<64x128xbf16, #tpu.memory_space<vmem>>, %arg2: memref<1x128xf32, #tpu.memory_space<vmem>>, %arg3: memref<1x128xf32, #tpu.memory_space<vmem>>, %arg4: memref<1x128xf32, #tpu.memory_space<vmem>>, %arg5: memref<8x128xf32, #tpu.memory_space<vmem>>) attributes {dimension_semantics = [], scalar_prefetch = 0 : i64, scratch_operands = 0 : i64, tpu.core_type = #tpu.core_type<tc>} {
    %c0 = arith.constant 0 : index
    %c0_0 = arith.constant 0 : index
    %0 = vector.load %arg0[%c0, %c0_0] : memref<8x64xbf16, #tpu.memory_space<vmem>>, vector<8x64xbf16>
    %c0_1 = arith.constant 0 : index
    %c0_2 = arith.constant 0 : index
    %1 = vector.load %arg1[%c0_1, %c0_2] : memref<64x128xbf16, #tpu.memory_space<vmem>>, vector<64x128xbf16>
    %cst = arith.constant dense<0.000000e+00> : vector<8x128xf32>
    %2 = tpu.matmul %0, %1, %cst {dimension_numbers = #tpu.dot_dimension_numbers<[1], [0], [0], [1], [0, 0, 1, 1], [], []>} : vector<8x64xbf16>, vector<64x128xbf16>, vector<8x128xf32> -> vector<8x128xf32>
    %c0_3 = arith.constant 0 : index
    %c0_4 = arith.constant 0 : index
    %3 = vector.load %arg2[%c0_3, %c0_4] : memref<1x128xf32, #tpu.memory_space<vmem>>, vector<1x128xf32>
    %4 = vector.broadcast %3 : vector<1x128xf32> to vector<8x128xf32>
    %5 = arith.addf %2, %4 : vector<8x128xf32>
    %cst_5 = arith.constant 1.000000e+00 : f32
    %6 = vector.broadcast %cst_5 : f32 to vector<1x8xf32>
    %cst_6 = arith.constant dense<0.000000e+00> : vector<1x128xf32>
    %7 = tpu.matmul %6, %5, %cst_6 {dimension_numbers = #tpu.dot_dimension_numbers<[1], [0], [0], [1], [0, 0, 1, 1], [], []>} : vector<1x8xf32>, vector<8x128xf32>, vector<1x128xf32> -> vector<1x128xf32>
    %cst_7 = arith.constant 1.250000e-01 : f32
    %8 = vector.broadcast %cst_7 : f32 to vector<1x128xf32>
    %9 = arith.mulf %7, %8 : vector<1x128xf32>
    %10 = vector.broadcast %9 : vector<1x128xf32> to vector<8x128xf32>
    %11 = arith.subf %5, %10 : vector<8x128xf32>
    %12 = arith.mulf %11, %11 : vector<8x128xf32>
    %cst_8 = arith.constant 1.000000e+00 : f32
    %13 = vector.broadcast %cst_8 : f32 to vector<1x8xf32>
    %cst_9 = arith.constant dense<0.000000e+00> : vector<1x128xf32>
    %14 = tpu.matmul %13, %12, %cst_9 {dimension_numbers = #tpu.dot_dimension_numbers<[1], [0], [0], [1], [0, 0, 1, 1], [], []>} : vector<1x8xf32>, vector<8x128xf32>, vector<1x128xf32> -> vector<1x128xf32>
    %cst_10 = arith.constant 1.250000e-01 : f32
    %15 = vector.broadcast %cst_10 : f32 to vector<1x128xf32>
    %16 = arith.mulf %14, %15 : vector<1x128xf32>
    %cst_11 = arith.constant 9.99999974E-6 : f32
    %17 = vector.broadcast %cst_11 : f32 to vector<1x128xf32>
    %18 = arith.addf %16, %17 : vector<1x128xf32>
    %19 = math.rsqrt %18 : vector<1x128xf32>
    %20 = vector.broadcast %19 : vector<1x128xf32> to vector<8x128xf32>
    %21 = arith.mulf %11, %20 : vector<8x128xf32>
    %c0_12 = arith.constant 0 : index
    %c0_13 = arith.constant 0 : index
    %22 = vector.load %arg3[%c0_12, %c0_13] : memref<1x128xf32, #tpu.memory_space<vmem>>, vector<1x128xf32>
    %23 = vector.broadcast %22 : vector<1x128xf32> to vector<8x128xf32>
    %24 = arith.mulf %21, %23 : vector<8x128xf32>
    %c0_14 = arith.constant 0 : index
    %c0_15 = arith.constant 0 : index
    %25 = vector.load %arg4[%c0_14, %c0_15] : memref<1x128xf32, #tpu.memory_space<vmem>>, vector<1x128xf32>
    %26 = vector.broadcast %25 : vector<1x128xf32> to vector<8x128xf32>
    %27 = arith.addf %24, %26 : vector<8x128xf32>
    %c0_16 = arith.constant 0 : index
    %c0_17 = arith.constant 0 : index
    %28 = vector.load %arg5[%c0_16, %c0_17] : memref<8x128xf32, #tpu.memory_space<vmem>>, vector<8x128xf32>
    tpu.vector_store %arg5[%c0_16, %c0_17], %27 {strides = array<i32>} : memref<8x128xf32, #tpu.memory_space<vmem>>, vector<8x128xf32>,
    return
  }
}

module attributes {stable_mosaic.version = 11 : i64} {
  func.func @_gemm_fused_kernel(%arg0: memref<8x1152xbf16, #tpu.memory_space<vmem>>, %arg1: memref<1152x128xbf16, #tpu.memory_space<vmem>>, %arg2: memref<1x128xf32, #tpu.memory_space<vmem>>, %arg3: memref<1x128xf32, #tpu.memory_space<vmem>>, %arg4: memref<1x128xf32, #tpu.memory_space<vmem>>, %arg5: memref<8x128xf32, #tpu.memory_space<vmem>>) attributes {dimension_semantics = [], scalar_prefetch = 0 : i64, scratch_operands = 0 : i64, tpu.core_type = #tpu.core_type<tc>} {
    %c0 = arith.constant 0 : index
    %c0_0 = arith.constant 0 : index
    %0 = vector.load %arg0[%c0, %c0_0] : memref<8x1152xbf16, #tpu.memory_space<vmem>>, vector<8x1152xbf16>
    %c0_1 = arith.constant 0 : index
    %c0_2 = arith.constant 0 : index
    %1 = vector.load %arg1[%c0_1, %c0_2] : memref<1152x128xbf16, #tpu.memory_space<vmem>>, vector<1152x128xbf16>
    %cst = arith.constant dense<0.000000e+00> : vector<8x128xf32>
    %2 = tpu.matmul %0, %1, %cst {dimension_numbers = #tpu.dot_dimension_numbers<[1], [0], [0], [1], [0, 0, 1, 1], [], []>} : vector<8x1152xbf16>, vector<1152x128xbf16>, vector<8x128xf32> -> vector<8x128xf32>
    %c0_3 = arith.constant 0 : index
    %c0_4 = arith.constant 0 : index
    %3 = vector.load %arg2[%c0_3, %c0_4] : memref<1x128xf32, #tpu.memory_space<vmem>>, vector<1x128xf32>
    %4 = vector.broadcast %3 : vector<1x128xf32> to vector<8x128xf32>
    %5 = arith.addf %2, %4 : vector<8x128xf32>
    %cst_5 = arith.constant 1.000000e+00 : f32
    %6 = vector.broadcast %cst_5 : f32 to vector<1x8xf32>
    %cst_6 = arith.constant dense<0.000000e+00> : vector<1x128xf32>
    %7 = tpu.matmul %6, %5, %cst_6 {dimension_numbers = #tpu.dot_dimension_numbers<[1], [0], [0], [1], [0, 0, 1, 1], [], []>} : vector<1x8xf32>, vector<8x128xf32>, vector<1x128xf32> -> vector<1x128xf32>
    %cst_7 = arith.constant 1.250000e-01 : f32
    %8 = vector.broadcast %cst_7 : f32 to vector<1x128xf32>
    %9 = arith.mulf %7, %8 : vector<1x128xf32>
    %10 = vector.broadcast %9 : vector<1x128xf32> to vector<8x128xf32>
    %11 = arith.subf %5, %10 : vector<8x128xf32>
    %12 = arith.mulf %11, %11 : vector<8x128xf32>
    %cst_8 = arith.constant 1.000000e+00 : f32
    %13 = vector.broadcast %cst_8 : f32 to vector<1x8xf32>
    %cst_9 = arith.constant dense<0.000000e+00> : vector<1x128xf32>
    %14 = tpu.matmul %13, %12, %cst_9 {dimension_numbers = #tpu.dot_dimension_numbers<[1], [0], [0], [1], [0, 0, 1, 1], [], []>} : vector<1x8xf32>, vector<8x128xf32>, vector<1x128xf32> -> vector<1x128xf32>
    %cst_10 = arith.constant 1.250000e-01 : f32
    %15 = vector.broadcast %cst_10 : f32 to vector<1x128xf32>
    %16 = arith.mulf %14, %15 : vector<1x128xf32>
    %cst_11 = arith.constant 9.99999974E-6 : f32
    %17 = vector.broadcast %cst_11 : f32 to vector<1x128xf32>
    %18 = arith.addf %16, %17 : vector<1x128xf32>
    %19 = math.rsqrt %18 : vector<1x128xf32>
    %20 = vector.broadcast %19 : vector<1x128xf32> to vector<8x128xf32>
    %21 = arith.mulf %11, %20 : vector<8x128xf32>
    %c0_12 = arith.constant 0 : index
    %c0_13 = arith.constant 0 : index
    %22 = vector.load %arg3[%c0_12, %c0_13] : memref<1x128xf32, #tpu.memory_space<vmem>>, vector<1x128xf32>
    %23 = vector.broadcast %22 : vector<1x128xf32> to vector<8x128xf32>
    %24 = arith.mulf %21, %23 : vector<8x128xf32>
    %c0_14 = arith.constant 0 : index
    %c0_15 = arith.constant 0 : index
    %25 = vector.load %arg4[%c0_14, %c0_15] : memref<1x128xf32, #tpu.memory_space<vmem>>, vector<1x128xf32>
    %26 = vector.broadcast %25 : vector<1x128xf32> to vector<8x128xf32>
    %27 = arith.addf %24, %26 : vector<8x128xf32>
    %cst_16 = arith.constant 0.000000e+00 : f32
    %28 = vector.broadcast %cst_16 : f32 to vector<8x128xf32>
    %29 = arith.maximumf %27, %28 : vector<8x128xf32>
    %c0_17 = arith.constant 0 : index
    %c0_18 = arith.constant 0 : index
    %30 = vector.load %arg5[%c0_17, %c0_18] : memref<8x128xf32, #tpu.memory_space<vmem>>, vector<8x128xf32>
    tpu.vector_store %arg5[%c0_17, %c0_18], %29 {strides = array<i32>} : memref<8x128xf32, #tpu.memory_space<vmem>>, vector<8x128xf32>,
    return
  }
}

module attributes {stable_mosaic.version = 11 : i64} {
  func.func @_gemm_fused_kernel(%arg0: memref<8x128xbf16, #tpu.memory_space<vmem>>, %arg1: memref<128x256xbf16, #tpu.memory_space<vmem>>, %arg2: memref<1x256xf32, #tpu.memory_space<vmem>>, %arg3: memref<8x256xf32, #tpu.memory_space<vmem>>) attributes {dimension_semantics = [], scalar_prefetch = 0 : i64, scratch_operands = 0 : i64, tpu.core_type = #tpu.core_type<tc>} {
    %c0 = arith.constant 0 : index
    %c0_0 = arith.constant 0 : index
    %0 = vector.load %arg0[%c0, %c0_0] : memref<8x128xbf16, #tpu.memory_space<vmem>>, vector<8x128xbf16>
    %c0_1 = arith.constant 0 : index
    %c0_2 = arith.constant 0 : index
    %1 = vector.load %arg1[%c0_1, %c0_2] : memref<128x256xbf16, #tpu.memory_space<vmem>>, vector<128x256xbf16>
    %cst = arith.constant dense<0.000000e+00> : vector<8x256xf32>
    %2 = tpu.matmul %0, %1, %cst {dimension_numbers = #tpu.dot_dimension_numbers<[1], [0], [0], [1], [0, 0, 1, 1], [], []>} : vector<8x128xbf16>, vector<128x256xbf16>, vector<8x256xf32> -> vector<8x256xf32>
    %c0_3 = arith.constant 0 : index
    %c0_4 = arith.constant 0 : index
    %3 = vector.load %arg2[%c0_3, %c0_4] : memref<1x256xf32, #tpu.memory_space<vmem>>, vector<1x256xf32>
    %4 = vector.broadcast %3 : vector<1x256xf32> to vector<8x256xf32>
    %5 = arith.addf %2, %4 : vector<8x256xf32>
    %c0_5 = arith.constant 0 : index
    %c0_6 = arith.constant 0 : index
    %6 = vector.load %arg3[%c0_5, %c0_6] : memref<8x256xf32, #tpu.memory_space<vmem>>, vector<8x256xf32>
    tpu.vector_store %arg3[%c0_5, %c0_6], %5 {strides = array<i32>} : memref<8x256xf32, #tpu.memory_space<vmem>>, vector<8x256xf32>,
    return
  }
}

module attributes {stable_mosaic.version = 11 : i64} {
  func.func @_gemm_fused_kernel(%arg0: memref<8x1152xbf16, #tpu.memory_space<vmem>>, %arg1: memref<1152x128xbf16, #tpu.memory_space<vmem>>, %arg2: memref<1x128xf32, #tpu.memory_space<vmem>>, %arg3: memref<1x128xf32, #tpu.memory_space<vmem>>, %arg4: memref<1x128xf32, #tpu.memory_space<vmem>>, %arg5: memref<8x128xf32, #tpu.memory_space<vmem>>, %arg6: memref<8x128xf32, #tpu.memory_space<vmem>>) attributes {dimension_semantics = [], scalar_prefetch = 0 : i64, scratch_operands = 0 : i64, tpu.core_type = #tpu.core_type<tc>} {
    %c0 = arith.constant 0 : index
    %c0_0 = arith.constant 0 : index
    %0 = vector.load %arg0[%c0, %c0_0] : memref<8x1152xbf16, #tpu.memory_space<vmem>>, vector<8x1152xbf16>
    %c0_1 = arith.constant 0 : index
    %c0_2 = arith.constant 0 : index
    %1 = vector.load %arg1[%c0_1, %c0_2] : memref<1152x128xbf16, #tpu.memory_space<vmem>>, vector<1152x128xbf16>
    %cst = arith.constant dense<0.000000e+00> : vector<8x128xf32>
    %2 = tpu.matmul %0, %1, %cst {dimension_numbers = #tpu.dot_dimension_numbers<[1], [0], [0], [1], [0, 0, 1, 1], [], []>} : vector<8x1152xbf16>, vector<1152x128xbf16>, vector<8x128xf32> -> vector<8x128xf32>
    %c0_3 = arith.constant 0 : index
    %c0_4 = arith.constant 0 : index
    %3 = vector.load %arg2[%c0_3, %c0_4] : memref<1x128xf32, #tpu.memory_space<vmem>>, vector<1x128xf32>
    %4 = vector.broadcast %3 : vector<1x128xf32> to vector<8x128xf32>
    %5 = arith.addf %2, %4 : vector<8x128xf32>
    %cst_5 = arith.constant 1.000000e+00 : f32
    %6 = vector.broadcast %cst_5 : f32 to vector<1x8xf32>
    %cst_6 = arith.constant dense<0.000000e+00> : vector<1x128xf32>
    %7 = tpu.matmul %6, %5, %cst_6 {dimension_numbers = #tpu.dot_dimension_numbers<[1], [0], [0], [1], [0, 0, 1, 1], [], []>} : vector<1x8xf32>, vector<8x128xf32>, vector<1x128xf32> -> vector<1x128xf32>
    %cst_7 = arith.constant 1.250000e-01 : f32
    %8 = vector.broadcast %cst_7 : f32 to vector<1x128xf32>
    %9 = arith.mulf %7, %8 : vector<1x128xf32>
    %10 = vector.broadcast %9 : vector<1x128xf32> to vector<8x128xf32>
    %11 = arith.subf %5, %10 : vector<8x128xf32>
    %12 = arith.mulf %11, %11 : vector<8x128xf32>
    %cst_8 = arith.constant 1.000000e+00 : f32
    %13 = vector.broadcast %cst_8 : f32 to vector<1x8xf32>
    %cst_9 = arith.constant dense<0.000000e+00> : vector<1x128xf32>
    %14 = tpu.matmul %13, %12, %cst_9 {dimension_numbers = #tpu.dot_dimension_numbers<[1], [0], [0], [1], [0, 0, 1, 1], [], []>} : vector<1x8xf32>, vector<8x128xf32>, vector<1x128xf32> -> vector<1x128xf32>
    %cst_10 = arith.constant 1.250000e-01 : f32
    %15 = vector.broadcast %cst_10 : f32 to vector<1x128xf32>
    %16 = arith.mulf %14, %15 : vector<1x128xf32>
    %cst_11 = arith.constant 9.99999974E-6 : f32
    %17 = vector.broadcast %cst_11 : f32 to vector<1x128xf32>
    %18 = arith.addf %16, %17 : vector<1x128xf32>
    %19 = math.rsqrt %18 : vector<1x128xf32>
    %20 = vector.broadcast %19 : vector<1x128xf32> to vector<8x128xf32>
    %21 = arith.mulf %11, %20 : vector<8x128xf32>
    %c0_12 = arith.constant 0 : index
    %c0_13 = arith.constant 0 : index
    %22 = vector.load %arg3[%c0_12, %c0_13] : memref<1x128xf32, #tpu.memory_space<vmem>>, vector<1x128xf32>
    %23 = vector.broadcast %22 : vector<1x128xf32> to vector<8x128xf32>
    %24 = arith.mulf %21, %23 : vector<8x128xf32>
    %c0_14 = arith.constant 0 : index
    %c0_15 = arith.constant 0 : index
    %25 = vector.load %arg4[%c0_14, %c0_15] : memref<1x128xf32, #tpu.memory_space<vmem>>, vector<1x128xf32>
    %26 = vector.broadcast %25 : vector<1x128xf32> to vector<8x128xf32>
    %27 = arith.addf %24, %26 : vector<8x128xf32>
    %c0_16 = arith.constant 0 : index
    %c0_17 = arith.constant 0 : index
    %28 = vector.load %arg5[%c0_16, %c0_17] : memref<8x128xf32, #tpu.memory_space<vmem>>, vector<8x128xf32>
    %29 = arith.addf %27, %28 : vector<8x128xf32>
    %cst_18 = arith.constant 0.000000e+00 : f32
    %30 = vector.broadcast %cst_18 : f32 to vector<8x128xf32>
    %31 = arith.maximumf %29, %30 : vector<8x128xf32>
    %c0_19 = arith.constant 0 : index
    %c0_20 = arith.constant 0 : index
    %32 = vector.load %arg6[%c0_19, %c0_20] : memref<8x128xf32, #tpu.memory_space<vmem>>, vector<8x128xf32>
    tpu.vector_store %arg6[%c0_19, %c0_20], %31 {strides = array<i32>} : memref<8x128xf32, #tpu.memory_space<vmem>>, vector<8x128xf32>,
    return
  }
}

module attributes {stable_mosaic.version = 11 : i64} {
  func.func @_bn_relu_add_kernel(%arg0: memref<32x64xf32, #tpu.memory_space<vmem>>, %arg1: memref<1x64xf32, #tpu.memory_space<vmem>>, %arg2: memref<1x64xf32, #tpu.memory_space<vmem>>, %arg3: memref<32x64xf32, #tpu.memory_space<vmem>>, %arg4: memref<32x64xf32, #tpu.memory_space<vmem>>) attributes {dimension_semantics = [], scalar_prefetch = 0 : i64, scratch_operands = 0 : i64, tpu.core_type = #tpu.core_type<tc>} {
    %c0 = arith.constant 0 : index
    %c0_0 = arith.constant 0 : index
    %0 = vector.load %arg0[%c0, %c0_0] : memref<32x64xf32, #tpu.memory_space<vmem>>, vector<32x64xf32>
    %cst = arith.constant 1.000000e+00 : f32
    %1 = vector.broadcast %cst : f32 to vector<1x32xf32>
    %cst_1 = arith.constant dense<0.000000e+00> : vector<1x64xf32>
    %2 = tpu.matmul %1, %0, %cst_1 {dimension_numbers = #tpu.dot_dimension_numbers<[1], [0], [0], [1], [0, 0, 1, 1], [], []>} : vector<1x32xf32>, vector<32x64xf32>, vector<1x64xf32> -> vector<1x64xf32>
    %cst_2 = arith.constant 3.125000e-02 : f32
    %3 = vector.broadcast %cst_2 : f32 to vector<1x64xf32>
    %4 = arith.mulf %2, %3 : vector<1x64xf32>
    %5 = vector.broadcast %4 : vector<1x64xf32> to vector<32x64xf32>
    %6 = arith.subf %0, %5 : vector<32x64xf32>
    %7 = arith.mulf %6, %6 : vector<32x64xf32>
    %cst_3 = arith.constant 1.000000e+00 : f32
    %8 = vector.broadcast %cst_3 : f32 to vector<1x32xf32>
    %cst_4 = arith.constant dense<0.000000e+00> : vector<1x64xf32>
    %9 = tpu.matmul %8, %7, %cst_4 {dimension_numbers = #tpu.dot_dimension_numbers<[1], [0], [0], [1], [0, 0, 1, 1], [], []>} : vector<1x32xf32>, vector<32x64xf32>, vector<1x64xf32> -> vector<1x64xf32>
    %cst_5 = arith.constant 3.125000e-02 : f32
    %10 = vector.broadcast %cst_5 : f32 to vector<1x64xf32>
    %11 = arith.mulf %9, %10 : vector<1x64xf32>
    %cst_6 = arith.constant 9.99999974E-6 : f32
    %12 = vector.broadcast %cst_6 : f32 to vector<1x64xf32>
    %13 = arith.addf %11, %12 : vector<1x64xf32>
    %14 = math.rsqrt %13 : vector<1x64xf32>
    %15 = vector.broadcast %14 : vector<1x64xf32> to vector<32x64xf32>
    %16 = arith.mulf %6, %15 : vector<32x64xf32>
    %c0_7 = arith.constant 0 : index
    %c0_8 = arith.constant 0 : index
    %17 = vector.load %arg1[%c0_7, %c0_8] : memref<1x64xf32, #tpu.memory_space<vmem>>, vector<1x64xf32>
    %18 = vector.broadcast %17 : vector<1x64xf32> to vector<32x64xf32>
    %19 = arith.mulf %16, %18 : vector<32x64xf32>
    %c0_9 = arith.constant 0 : index
    %c0_10 = arith.constant 0 : index
    %20 = vector.load %arg2[%c0_9, %c0_10] : memref<1x64xf32, #tpu.memory_space<vmem>>, vector<1x64xf32>
    %21 = vector.broadcast %20 : vector<1x64xf32> to vector<32x64xf32>
    %22 = arith.addf %19, %21 : vector<32x64xf32>
    %cst_11 = arith.constant 0.000000e+00 : f32
    %23 = vector.broadcast %cst_11 : f32 to vector<32x64xf32>
    %24 = arith.maximumf %22, %23 : vector<32x64xf32>
    %c0_12 = arith.constant 0 : index
    %c0_13 = arith.constant 0 : index
    %25 = vector.load %arg3[%c0_12, %c0_13] : memref<32x64xf32, #tpu.memory_space<vmem>>, vector<32x64xf32>
    %26 = arith.addf %24, %25 : vector<32x64xf32>
    %c0_14 = arith.constant 0 : index
    %c0_15 = arith.constant 0 : index
    %27 = vector.load %arg4[%c0_14, %c0_15] : memref<32x64xf32, #tpu.memory_space<vmem>>, vector<32x64xf32>
    tpu.vector_store %arg4[%c0_14, %c0_15], %26 {strides = array<i32>} : memref<32x64xf32, #tpu.memory_space<vmem>>, vector<32x64xf32>,
    return
  }
}

module attributes {stable_mosaic.version = 11 : i64} {
  func.func @_gemm_fused_kernel(%arg0: memref<32x64xbf16, #tpu.memory_space<vmem>>, %arg1: memref<64x128xbf16, #tpu.memory_space<vmem>>, %arg2: memref<1x128xf32, #tpu.memory_space<vmem>>, %arg3: memref<32x128xf32, #tpu.memory_space<vmem>>) attributes {dimension_semantics = [], scalar_prefetch = 0 : i64, scratch_operands = 0 : i64, tpu.core_type = #tpu.core_type<tc>} {
    %c0 = arith.constant 0 : index
    %c0_0 = arith.constant 0 : index
    %0 = vector.load %arg0[%c0, %c0_0] : memref<32x64xbf16, #tpu.memory_space<vmem>>, vector<32x64xbf16>
    %c0_1 = arith.constant 0 : index
    %c0_2 = arith.constant 0 : index
    %1 = vector.load %arg1[%c0_1, %c0_2] : memref<64x128xbf16, #tpu.memory_space<vmem>>, vector<64x128xbf16>
    %cst = arith.constant dense<0.000000e+00> : vector<32x128xf32>
    %2 = tpu.matmul %0, %1, %cst {dimension_numbers = #tpu.dot_dimension_numbers<[1], [0], [0], [1], [0, 0, 1, 1], [], []>} : vector<32x64xbf16>, vector<64x128xbf16>, vector<32x128xf32> -> vector<32x128xf32>
    %c0_3 = arith.constant 0 : index
    %c0_4 = arith.constant 0 : index
    %3 = vector.load %arg2[%c0_3, %c0_4] : memref<1x128xf32, #tpu.memory_space<vmem>>, vector<1x128xf32>
    %4 = vector.broadcast %3 : vector<1x128xf32> to vector<32x128xf32>
    %5 = arith.addf %2, %4 : vector<32x128xf32>
    %c0_5 = arith.constant 0 : index
    %c0_6 = arith.constant 0 : index
    %6 = vector.load %arg3[%c0_5, %c0_6] : memref<32x128xf32, #tpu.memory_space<vmem>>, vector<32x128xf32>
    tpu.vector_store %arg3[%c0_5, %c0_6], %5 {strides = array<i32>} : memref<32x128xf32, #tpu.memory_space<vmem>>, vector<32x128xf32>,
    return
  }
}

module attributes {stable_mosaic.version = 11 : i64} {
  func.func @_bn_relu_add_kernel(%arg0: memref<128x32xf32, #tpu.memory_space<vmem>>, %arg1: memref<1x32xf32, #tpu.memory_space<vmem>>, %arg2: memref<1x32xf32, #tpu.memory_space<vmem>>, %arg3: memref<128x32xf32, #tpu.memory_space<vmem>>, %arg4: memref<128x32xf32, #tpu.memory_space<vmem>>) attributes {dimension_semantics = [], scalar_prefetch = 0 : i64, scratch_operands = 0 : i64, tpu.core_type = #tpu.core_type<tc>} {
    %c0 = arith.constant 0 : index
    %c0_0 = arith.constant 0 : index
    %0 = vector.load %arg0[%c0, %c0_0] : memref<128x32xf32, #tpu.memory_space<vmem>>, vector<128x32xf32>
    %cst = arith.constant 1.000000e+00 : f32
    %1 = vector.broadcast %cst : f32 to vector<1x128xf32>
    %cst_1 = arith.constant dense<0.000000e+00> : vector<1x32xf32>
    %2 = tpu.matmul %1, %0, %cst_1 {dimension_numbers = #tpu.dot_dimension_numbers<[1], [0], [0], [1], [0, 0, 1, 1], [], []>} : vector<1x128xf32>, vector<128x32xf32>, vector<1x32xf32> -> vector<1x32xf32>
    %cst_2 = arith.constant 7.812500e-03 : f32
    %3 = vector.broadcast %cst_2 : f32 to vector<1x32xf32>
    %4 = arith.mulf %2, %3 : vector<1x32xf32>
    %5 = vector.broadcast %4 : vector<1x32xf32> to vector<128x32xf32>
    %6 = arith.subf %0, %5 : vector<128x32xf32>
    %7 = arith.mulf %6, %6 : vector<128x32xf32>
    %cst_3 = arith.constant 1.000000e+00 : f32
    %8 = vector.broadcast %cst_3 : f32 to vector<1x128xf32>
    %cst_4 = arith.constant dense<0.000000e+00> : vector<1x32xf32>
    %9 = tpu.matmul %8, %7, %cst_4 {dimension_numbers = #tpu.dot_dimension_numbers<[1], [0], [0], [1], [0, 0, 1, 1], [], []>} : vector<1x128xf32>, vector<128x32xf32>, vector<1x32xf32> -> vector<1x32xf32>
    %cst_5 = arith.constant 7.812500e-03 : f32
    %10 = vector.broadcast %cst_5 : f32 to vector<1x32xf32>
    %11 = arith.mulf %9, %10 : vector<1x32xf32>
    %cst_6 = arith.constant 9.99999974E-6 : f32
    %12 = vector.broadcast %cst_6 : f32 to vector<1x32xf32>
    %13 = arith.addf %11, %12 : vector<1x32xf32>
    %14 = math.rsqrt %13 : vector<1x32xf32>
    %15 = vector.broadcast %14 : vector<1x32xf32> to vector<128x32xf32>
    %16 = arith.mulf %6, %15 : vector<128x32xf32>
    %c0_7 = arith.constant 0 : index
    %c0_8 = arith.constant 0 : index
    %17 = vector.load %arg1[%c0_7, %c0_8] : memref<1x32xf32, #tpu.memory_space<vmem>>, vector<1x32xf32>
    %18 = vector.broadcast %17 : vector<1x32xf32> to vector<128x32xf32>
    %19 = arith.mulf %16, %18 : vector<128x32xf32>
    %c0_9 = arith.constant 0 : index
    %c0_10 = arith.constant 0 : index
    %20 = vector.load %arg2[%c0_9, %c0_10] : memref<1x32xf32, #tpu.memory_space<vmem>>, vector<1x32xf32>
    %21 = vector.broadcast %20 : vector<1x32xf32> to vector<128x32xf32>
    %22 = arith.addf %19, %21 : vector<128x32xf32>
    %cst_11 = arith.constant 0.000000e+00 : f32
    %23 = vector.broadcast %cst_11 : f32 to vector<128x32xf32>
    %24 = arith.maximumf %22, %23 : vector<128x32xf32>
    %c0_12 = arith.constant 0 : index
    %c0_13 = arith.constant 0 : index
    %25 = vector.load %arg3[%c0_12, %c0_13] : memref<128x32xf32, #tpu.memory_space<vmem>>, vector<128x32xf32>
    %26 = arith.addf %24, %25 : vector<128x32xf32>
    %c0_14 = arith.constant 0 : index
    %c0_15 = arith.constant 0 : index
    %27 = vector.load %arg4[%c0_14, %c0_15] : memref<128x32xf32, #tpu.memory_space<vmem>>, vector<128x32xf32>
    tpu.vector_store %arg4[%c0_14, %c0_15], %26 {strides = array<i32>} : memref<128x32xf32, #tpu.memory_space<vmem>>, vector<128x32xf32>,
    return
  }
}

module attributes {stable_mosaic.version = 11 : i64} {
  func.func @_gemm_fused_kernel(%arg0: memref<128x32xbf16, #tpu.memory_space<vmem>>, %arg1: memref<32x32xbf16, #tpu.memory_space<vmem>>, %arg2: memref<1x32xf32, #tpu.memory_space<vmem>>, %arg3: memref<128x32xf32, #tpu.memory_space<vmem>>) attributes {dimension_semantics = [], scalar_prefetch = 0 : i64, scratch_operands = 0 : i64, tpu.core_type = #tpu.core_type<tc>} {
    %c0 = arith.constant 0 : index
    %c0_0 = arith.constant 0 : index
    %0 = vector.load %arg0[%c0, %c0_0] : memref<128x32xbf16, #tpu.memory_space<vmem>>, vector<128x32xbf16>
    %c0_1 = arith.constant 0 : index
    %c0_2 = arith.constant 0 : index
    %1 = vector.load %arg1[%c0_1, %c0_2] : memref<32x32xbf16, #tpu.memory_space<vmem>>, vector<32x32xbf16>
    %cst = arith.constant dense<0.000000e+00> : vector<128x32xf32>
    %2 = tpu.matmul %0, %1, %cst {dimension_numbers = #tpu.dot_dimension_numbers<[1], [0], [0], [1], [0, 0, 1, 1], [], []>} : vector<128x32xbf16>, vector<32x32xbf16>, vector<128x32xf32> -> vector<128x32xf32>
    %c0_3 = arith.constant 0 : index
    %c0_4 = arith.constant 0 : index
    %3 = vector.load %arg2[%c0_3, %c0_4] : memref<1x32xf32, #tpu.memory_space<vmem>>, vector<1x32xf32>
    %4 = vector.broadcast %3 : vector<1x32xf32> to vector<128x32xf32>
    %5 = arith.addf %2, %4 : vector<128x32xf32>
    %c0_5 = arith.constant 0 : index
    %c0_6 = arith.constant 0 : index
    %6 = vector.load %arg3[%c0_5, %c0_6] : memref<128x32xf32, #tpu.memory_space<vmem>>, vector<128x32xf32>
    tpu.vector_store %arg3[%c0_5, %c0_6], %5 {strides = array<i32>} : memref<128x32xf32, #tpu.memory_space<vmem>>, vector<128x32xf32>,
    return
  }
}

module attributes {stable_mosaic.version = 11 : i64} {
  func.func @_gemm_fused_kernel(%arg0: memref<128x32xbf16, #tpu.memory_space<vmem>>, %arg1: memref<32x32xbf16, #tpu.memory_space<vmem>>, %arg2: memref<1x32xf32, #tpu.memory_space<vmem>>, %arg3: memref<1x32xf32, #tpu.memory_space<vmem>>, %arg4: memref<1x32xf32, #tpu.memory_space<vmem>>, %arg5: memref<128x32xf32, #tpu.memory_space<vmem>>) attributes {dimension_semantics = [], scalar_prefetch = 0 : i64, scratch_operands = 0 : i64, tpu.core_type = #tpu.core_type<tc>} {
    %c0 = arith.constant 0 : index
    %c0_0 = arith.constant 0 : index
    %0 = vector.load %arg0[%c0, %c0_0] : memref<128x32xbf16, #tpu.memory_space<vmem>>, vector<128x32xbf16>
    %c0_1 = arith.constant 0 : index
    %c0_2 = arith.constant 0 : index
    %1 = vector.load %arg1[%c0_1, %c0_2] : memref<32x32xbf16, #tpu.memory_space<vmem>>, vector<32x32xbf16>
    %cst = arith.constant dense<0.000000e+00> : vector<128x32xf32>
    %2 = tpu.matmul %0, %1, %cst {dimension_numbers = #tpu.dot_dimension_numbers<[1], [0], [0], [1], [0, 0, 1, 1], [], []>} : vector<128x32xbf16>, vector<32x32xbf16>, vector<128x32xf32> -> vector<128x32xf32>
    %c0_3 = arith.constant 0 : index
    %c0_4 = arith.constant 0 : index
    %3 = vector.load %arg2[%c0_3, %c0_4] : memref<1x32xf32, #tpu.memory_space<vmem>>, vector<1x32xf32>
    %4 = vector.broadcast %3 : vector<1x32xf32> to vector<128x32xf32>
    %5 = arith.addf %2, %4 : vector<128x32xf32>
    %cst_5 = arith.constant 1.000000e+00 : f32
    %6 = vector.broadcast %cst_5 : f32 to vector<1x128xf32>
    %cst_6 = arith.constant dense<0.000000e+00> : vector<1x32xf32>
    %7 = tpu.matmul %6, %5, %cst_6 {dimension_numbers = #tpu.dot_dimension_numbers<[1], [0], [0], [1], [0, 0, 1, 1], [], []>} : vector<1x128xf32>, vector<128x32xf32>, vector<1x32xf32> -> vector<1x32xf32>
    %cst_7 = arith.constant 7.812500e-03 : f32
    %8 = vector.broadcast %cst_7 : f32 to vector<1x32xf32>
    %9 = arith.mulf %7, %8 : vector<1x32xf32>
    %10 = vector.broadcast %9 : vector<1x32xf32> to vector<128x32xf32>
    %11 = arith.subf %5, %10 : vector<128x32xf32>
    %12 = arith.mulf %11, %11 : vector<128x32xf32>
    %cst_8 = arith.constant 1.000000e+00 : f32
    %13 = vector.broadcast %cst_8 : f32 to vector<1x128xf32>
    %cst_9 = arith.constant dense<0.000000e+00> : vector<1x32xf32>
    %14 = tpu.matmul %13, %12, %cst_9 {dimension_numbers = #tpu.dot_dimension_numbers<[1], [0], [0], [1], [0, 0, 1, 1], [], []>} : vector<1x128xf32>, vector<128x32xf32>, vector<1x32xf32> -> vector<1x32xf32>
    %cst_10 = arith.constant 7.812500e-03 : f32
    %15 = vector.broadcast %cst_10 : f32 to vector<1x32xf32>
    %16 = arith.mulf %14, %15 : vector<1x32xf32>
    %cst_11 = arith.constant 9.99999974E-6 : f32
    %17 = vector.broadcast %cst_11 : f32 to vector<1x32xf32>
    %18 = arith.addf %16, %17 : vector<1x32xf32>
    %19 = math.rsqrt %18 : vector<1x32xf32>
    %20 = vector.broadcast %19 : vector<1x32xf32> to vector<128x32xf32>
    %21 = arith.mulf %11, %20 : vector<128x32xf32>
    %c0_12 = arith.constant 0 : index
    %c0_13 = arith.constant 0 : index
    %22 = vector.load %arg3[%c0_12, %c0_13] : memref<1x32xf32, #tpu.memory_space<vmem>>, vector<1x32xf32>
    %23 = vector.broadcast %22 : vector<1x32xf32> to vector<128x32xf32>
    %24 = arith.mulf %21, %23 : vector<128x32xf32>
    %c0_14 = arith.constant 0 : index
    %c0_15 = arith.constant 0 : index
    %25 = vector.load %arg4[%c0_14, %c0_15] : memref<1x32xf32, #tpu.memory_space<vmem>>, vector<1x32xf32>
    %26 = vector.broadcast %25 : vector<1x32xf32> to vector<128x32xf32>
    %27 = arith.addf %24, %26 : vector<128x32xf32>
    %cst_16 = arith.constant 0.000000e+00 : f32
    %28 = vector.broadcast %cst_16 : f32 to vector<128x32xf32>
    %29 = arith.maximumf %27, %28 : vector<128x32xf32>
    %c0_17 = arith.constant 0 : index
    %c0_18 = arith.constant 0 : index
    %30 = vector.load %arg5[%c0_17, %c0_18] : memref<128x32xf32, #tpu.memory_space<vmem>>, vector<128x32xf32>
    tpu.vector_store %arg5[%c0_17, %c0_18], %29 {strides = array<i32>} : memref<128x32xf32, #tpu.memory_space<vmem>>, vector<128x32xf32>,
    return
  }
}

</mosaic_0001>

<bundles_post_ra>
// kernel: feat2net_forward.33
= control target key start
LH: loop header
LB: loop body
LE: loop exit
PB: predicated region body
PF: predicated region fallthrough
CT: control target
= control target key end

     0   :  { %vm1054_vm0 = vcmask 1043456   ;;  %vm957_vm1 = vcmask 64512   ;;  %vm2301_vm5 = vcmask 130048   ;;  %s5418_s1 = inlined_call_operand.vmem [shape: bf16[392,16], index: 1, kind: input, shape index: {}]   ;;  %s5419_s0 = inlined_call_operand.vmem [shape: bf16[512,392], index: 0, kind: input, shape index: {}]   ;;  %s5420_s2 = inlined_call_operand.vmem [shape: f32[1,16], index: 2, kind: input, shape index: {}]   ;;  %s5421_s3 = inlined_call_operand.vmem [shape: f32[1,16], index: 3, kind: input, shape index: {}]   ;;  %s5422_s4 = inlined_call_operand.vmem [shape: f32[1,16], index: 4, kind: input, shape index: {}]   ;;  %s5423_s5 = inlined_call_operand.vmem [shape: f32[512,16], index: 5, kind: output, shape index: {}]  }
   0x1   :  { %v3145_v0 = vld [vmem:[%s5418_s1 + $0x38] sm:$0xff]  ;;  %v3144_v3 = vld [vmem:[%s5418_s1 + $0x30] sm:$0xff]  ;;  %v3143_v6 = vld [vmem:[%s5418_s1 + $0x28] sm:$0xff] }
   0x2   :  { %v3153_v1 = vld [vmem:[%s5418_s1 + $0x78] sm:$0xff]  ;;  %1058 = vmatpush.bf16.msra.mxu0 %v3145_v0  ;;  %v3152_v4 = vld [vmem:[%s5418_s1 + $0x70] sm:$0xff]  ;;  %v3151_v7 = vld [vmem:[%s5418_s1 + $0x68] sm:$0xff] }
   0x3   :  { %v3161_v2 = vld [vmem:[%s5418_s1 + $0xb8] sm:$0xff]  ;;  %1227 = vmatpush.bf16.msra.mxu1 %v3153_v1  ;;  %v3160_v5 = vld [vmem:[%s5418_s1 + $0xb0] sm:$0xff]  ;;  %v197_v8 = vld [vmem:[%s5418_s1 + $0xc0] sm:$0xf] }
   0x4   :  { %1396 = vmatpush.bf16.msra.mxu2 %v3161_v2  ;;  %v3159_v9 = vld [vmem:[%s5418_s1 + $0xa8] sm:$0xff]  ;;  %v907_v10 = vunpack.c.l.b16 %v197_v8  ;;  %v2382_v12 = vld [vmem:[%s5419_s0 + $0x18] sm:$0xf0]  ;;  %v3142_v14 = vld [vmem:[%s5418_s1 + $0x20] sm:$0xff] }
   0x5   :  { %v3011_v11 = vld [vmem:[%s5419_s0 + $0xc] sm:$0xf]  ;;  %v3150_v15 = vld [vmem:[%s5418_s1 + $0x60] sm:$0xff]  ;;  %v3141_v19 = vld [vmem:[%s5418_s1 + $0x18] sm:$0xff] }
   0x6   :  { %1059 = vmatpush.bf16.msra.mxu0 %v3144_v3  ;;  %v932_v13 = vpack.c.b16 %v907_v10, %v907_v10  ;;  %v3158_v16 = vld [vmem:[%s5418_s1 + $0xa0] sm:$0xff]  ;;  %v2385_v18 = vor.u32 %v3011_v11, %v2382_v12  ;;  %v3149_v20 = vld [vmem:[%s5418_s1 + $0x58] sm:$0xff]  ;;  %v3140_v22 = vld [vmem:[%s5418_s1 + $0x10] sm:$0xff] }
   0x7   :  { %1228 = vmatpush.bf16.msra.mxu1 %v3152_v4  ;;  %v3157_v21 = vld [vmem:[%s5418_s1 + $0x98] sm:$0xff]  ;;  %v3148_v23 = vld [vmem:[%s5418_s1 + $0x50] sm:$0xff]  ;;  %v3139_v25 = vld [vmem:[%s5418_s1 + $0x8] sm:$0xff] }
   0x8   :  { %1397 = vmatpush.bf16.msra.mxu2 %v3160_v5  ;;  %v1056_v17 = vsel %vm1054_vm0, %v932_v13, 0  ;;  %v3156_v24 = vld [vmem:[%s5418_s1 + $0x90] sm:$0xff]  ;;  %v3147_v26 = vld [vmem:[%s5418_s1 + $0x48] sm:$0xff]  ;;  %v2398_v29 = vld [vmem:[%s5419_s0 + $0x38] sm:$0xf0] }
   0x9   :  { %1572 = vmatpush.bf16.msra.mxu3 %v1056_v17  ;;  %v3155_v27 = vld [vmem:[%s5418_s1 + $0x88] sm:$0xff]  ;;  %v3138_v30 = vld [vmem:[%s5418_s1] sm:$0xff]  ;;  %v3012_v33 = vld [vmem:[%s5419_s0 + $0xc] sm:$0xf0] }
   0xa   :  { %1060 = vmatpush.bf16.msra.mxu0 %v3143_v6  ;;  %v3015_v28 = vld [vmem:[%s5419_s0 + $0x2c] sm:$0xf]  ;;  %v3146_v31 = vld [vmem:[%s5418_s1 + $0x40] sm:$0xff]  ;;  %v2374_v35 = vld [vmem:[%s5419_s0 + $0x10] sm:$0xf0] }
   0xb   :  { %1229 = vmatpush.bf16.msra.mxu1 %v3151_v7  ;;  %v2372_v32 = vld [vmem:[%s5419_s0] sm:$0xf]  ;;  %v3010_v34 = vld [vmem:[%s5419_s0 + $0x4] sm:$0xf]  ;;  %v2380_v37 = vld [vmem:[%s5419_s0 + $0x8] sm:$0xf]  ;;  %v2401_v39 = vor.u32 %v3015_v28, %v2398_v29 }
   0xc   :  { %1398 = vmatpush.bf16.msra.mxu2 %v3159_v9  ;;  %2978 = vmatmul.msk.bf16.vlgmr.msra.gmra.mxu3 %vm957_vm1, %v2385_v18  ;;  %v3154_v36 = vld [vmem:[%s5418_s1 + $0x80] sm:$0xff]  ;;  %v3013_v38 = vld [vmem:[%s5419_s0 + $0x14] sm:$0xf0]  ;;  %v2373_v40 = vor.u32 %v3012_v33, %v2372_v32  ;;  %v2377_v41 = vor.u32 %v3010_v34, %v2374_v35  ;;  %v3019_v43 = vld [vmem:[%s5419_s0 + $0x4c] sm:$0xf] }
   0xd   :  { %v2381_v42 = vor.u32 %v3013_v38, %v2380_v37  ;;  %v2414_v44 = vld [vmem:[%s5419_s0 + $0x58] sm:$0xf0]  ;;  %v2388_v45 = vld [vmem:[%s5419_s0 + $0x20] sm:$0xf]  ;;  %v3016_v46 = vld [vmem:[%s5419_s0 + $0x2c] sm:$0xf0] }
   0xe   :  { %1061 = vmatpush.bf16.msra.mxu0 %v3142_v14  ;;  %v3014_v47 = vld [vmem:[%s5419_s0 + $0x24] sm:$0xf]  ;;  %v2390_v48 = vld [vmem:[%s5419_s0 + $0x30] sm:$0xf0]  ;;  %v2396_v49 = vld [vmem:[%s5419_s0 + $0x28] sm:$0xf]  ;;  %v2417_v51 = vor.u32 %v3019_v43, %v2414_v44  ;;  %v2389_v52 = vor.u32 %v3016_v46, %v2388_v45 }
   0xf   :  { %1230 = vmatpush.bf16.msra.mxu1 %v3150_v15  ;;  %v3017_v50 = vld [vmem:[%s5419_s0 + $0x34] sm:$0xf0]  ;;  %v2393_v53 = vor.u32 %v3014_v47, %v2390_v48  ;;  %v3023_v55 = vld [vmem:[%s5419_s0 + $0x6c] sm:$0xf]  ;;  %v2430_v56 = vld [vmem:[%s5419_s0 + $0x78] sm:$0xf0] }
  0x10   :  { %1399 = vmatpush.bf16.msra.mxu2 %v3158_v16  ;;  %v2397_v54 = vor.u32 %v3017_v50, %v2396_v49  ;;  %v2404_v57 = vld [vmem:[%s5419_s0 + $0x40] sm:$0xf]  ;;  %v3020_v58 = vld [vmem:[%s5419_s0 + $0x4c] sm:$0xf0]  ;;  %v3018_v59 = vld [vmem:[%s5419_s0 + $0x44] sm:$0xf]  ;;  %v2433_v63 = vor.u32 %v3023_v55, %v2430_v56 }
  0x11   :  { %v2406_v60 = vld [vmem:[%s5419_s0 + $0x50] sm:$0xf0]  ;;  %v2412_v61 = vld [vmem:[%s5419_s0 + $0x48] sm:$0xf]  ;;  %v3021_v62 = vld [vmem:[%s5419_s0 + $0x54] sm:$0xf0]  ;;  %v2405_v0 = vor.u32 %v3020_v58, %v2404_v57 }
  0x12   :  { %1062 = vmatpush.bf16.msra.mxu0 %v3141_v19  ;;  %v2409_v1 = vor.u32 %v3018_v59, %v2406_v60  ;;  %v2413_v2 = vor.u32 %v3021_v62, %v2412_v61  ;;  %v3027_v3 = vld [vmem:[%s5419_s0 + $0x8c] sm:$0xf]  ;;  %v2446_v4 = vld [vmem:[%s5419_s0 + $0x98] sm:$0xf0]  ;;  %v2420_v5 = vld [vmem:[%s5419_s0 + $0x60] sm:$0xf] }
  0x13   :  { %1231 = vmatpush.bf16.msra.mxu1 %v3149_v20  ;;  %v3024_v6 = vld [vmem:[%s5419_s0 + $0x6c] sm:$0xf0]  ;;  %v3022_v7 = vld [vmem:[%s5419_s0 + $0x64] sm:$0xf]  ;;  %v2422_v8 = vld [vmem:[%s5419_s0 + $0x70] sm:$0xf0]  ;;  %v2449_v11 = vor.u32 %v3027_v3, %v2446_v4 }
  0x14   :  { %1400 = vmatpush.bf16.msra.mxu2 %v3157_v21  ;;  %v2428_v9 = vld [vmem:[%s5419_s0 + $0x68] sm:$0xf]  ;;  %v3025_v10 = vld [vmem:[%s5419_s0 + $0x74] sm:$0xf0]  ;;  %v2421_v12 = vor.u32 %v3024_v6, %v2420_v5  ;;  %v2425_v13 = vor.u32 %v3022_v7, %v2422_v8  ;;  %v3031_v15 = vld [vmem:[%s5419_s0 + $0xac] sm:$0xf] }
  0x15   :  { %v2429_v14 = vor.u32 %v3025_v10, %v2428_v9  ;;  %v2462_v16 = vld [vmem:[%s5419_s0 + $0xb8] sm:$0xf0]  ;;  %v2436_v17 = vld [vmem:[%s5419_s0 + $0x80] sm:$0xf]  ;;  %v3028_v18 = vld [vmem:[%s5419_s0 + $0x8c] sm:$0xf0] }
  0x16   :  { %1063 = vmatpush.bf16.msra.mxu0 %v3140_v22  ;;  %v3026_v19 = vld [vmem:[%s5419_s0 + $0x84] sm:$0xf]  ;;  %v2438_v20 = vld [vmem:[%s5419_s0 + $0x90] sm:$0xf0]  ;;  %v2444_v21 = vld [vmem:[%s5419_s0 + $0x88] sm:$0xf] }
  0x17   :  { %1232 = vmatpush.bf16.msra.mxu1 %v3148_v23  ;;  %v3029_v22 = vld [vmem:[%s5419_s0 + $0x94] sm:$0xf0]  ;;  %v2465_v23 = vor.u32 %v3031_v15, %v2462_v16  ;;  %v2478_v28 = vld [vmem:[%s5419_s0 + $0xd8] sm:$0xf0]  ;;  %v2452_v29 = vld [vmem:[%s5419_s0 + $0xa0] sm:$0xf] }
  0x18   :  { %1401 = vmatpush.bf16.msra.mxu2 %v3156_v24  ;;  %v2437_v24 = vor.u32 %v3028_v18, %v2436_v17  ;;  %v2454_v32 = vld [vmem:[%s5419_s0 + $0xb0] sm:$0xf0]  ;;  %v2460_v33 = vld [vmem:[%s5419_s0 + $0xa8] sm:$0xf]  ;;  %v3033_v34 = vld [vmem:[%s5419_s0 + $0xb4] sm:$0xf0] }
  0x19   :  { %v2461_v38 = vor.u32 %v3033_v34, %v2460_v33  ;;  %v3034_v43 = vld [vmem:[%s5419_s0 + $0xc4] sm:$0xf]  ;;  %v2470_v44 = vld [vmem:[%s5419_s0 + $0xd0] sm:$0xf0]  ;;  %v2476_v45 = vld [vmem:[%s5419_s0 + $0xc8] sm:$0xf] }
  0x1a   :  { %1064 = vmatpush.bf16.msra.mxu0 %v3139_v25  ;;  %v2441_v25 = vor.u32 %v3026_v19, %v2438_v20  ;;  %v3037_v46 = vld [vmem:[%s5419_s0 + $0xd4] sm:$0xf0]  ;;  %v2473_v49 = vor.u32 %v3034_v43, %v2470_v44  ;;  %v3038_v55 = vld [vmem:[%s5419_s0 + $0xe4] sm:$0xf]  ;;  %v2486_v56 = vld [vmem:[%s5419_s0 + $0xf0] sm:$0xf0] }
  0x1b   :  { %1233 = vmatpush.bf16.msra.mxu1 %v3147_v26  ;;  %v2445_v26 = vor.u32 %v3029_v22, %v2444_v21  ;;  %v2477_v50 = vor.u32 %v3037_v46, %v2476_v45  ;;  %v2492_v57 = vld [vmem:[%s5419_s0 + $0xe8] sm:$0xf]  ;;  %v3041_v58 = vld [vmem:[%s5419_s0 + $0xf4] sm:$0xf0]  ;;  %v2489_v61 = vor.u32 %v3038_v55, %v2486_v56  ;;  %v3044_v3 = vld [vmem:[%s5419_s0 + $0x10c] sm:$0xf0] }
  0x1c   :  { %1402 = vmatpush.bf16.msra.mxu2 %v3155_v27  ;;  %2979 = vmatmul.msk.bf16.gmra.mxu3 %vm957_vm1, %v2401_v39  ;;  %v3035_v27 = vld [vmem:[%s5419_s0 + $0xcc] sm:$0xf]  ;;  %v2493_v62 = vor.u32 %v3041_v58, %v2492_v57  ;;  %v3042_v4 = vld [vmem:[%s5419_s0 + $0x104] sm:$0xf]  ;;  %v2502_v5 = vld [vmem:[%s5419_s0 + $0x110] sm:$0xf0] }
  0x1d   :  { %v2481_v35 = vor.u32 %v3035_v27, %v2478_v28  ;;  %v3039_v39 = vld [vmem:[%s5419_s0 + $0xec] sm:$0xf]  ;;  %v3503_v7 = vld [vmem:[%s5420_s2] ss:$0 sm:$0xff]  ;;  %v2508_v8 = vld [vmem:[%s5419_s0 + $0x108] sm:$0xf] }
  0x1e   :  { %1065 = vmatpush.bf16.msra.mxu0 %v3138_v30  ;;  %v3032_v30 = vld [vmem:[%s5419_s0 + $0xac] sm:$0xf0]  ;;  %v3045_v9 = vld [vmem:[%s5419_s0 + $0x114] sm:$0xf0]  ;;  %v2516_v28 = vld [vmem:[%s5419_s0 + $0x120] sm:$0xf] }
  0x1f   :  { %1234 = vmatpush.bf16.msra.mxu1 %v3146_v31  ;;  %v3030_v31 = vld [vmem:[%s5419_s0 + $0xa4] sm:$0xf]  ;;  %v2509_v15 = vor.u32 %v3045_v9, %v2508_v8  ;;  %v2524_v33 = vld [vmem:[%s5419_s0 + $0x128] sm:$0xf]  ;;  %v3049_v34 = vld [vmem:[%s5419_s0 + $0x134] sm:$0xf0] }
  0x20   :  { %1403 = vmatpush.bf16.msra.mxu2 %v3154_v36  ;;  %v2453_v36 = vor.u32 %v3032_v30, %v2452_v29  ;;  %v2457_v37 = vor.u32 %v3030_v31, %v2454_v32  ;;  %v3048_v29 = vld [vmem:[%s5419_s0 + $0x12c] sm:$0xf0]  ;;  %v3046_v30 = vld [vmem:[%s5419_s0 + $0x124] sm:$0xf]  ;;  %v2518_v31 = vld [vmem:[%s5419_s0 + $0x130] sm:$0xf0] }
  0x21   :  { %1066 = vmatmul.bf16.vlgmr.msra.gmra.mxu0 %v2373_v40  ;;  %v2494_v40 = vld [vmem:[%s5419_s0 + $0xf8] sm:$0xf0]  ;;  %v2532_v56 = vld [vmem:[%s5419_s0 + $0x140] sm:$0xf]  ;;  %v3052_v57 = vld [vmem:[%s5419_s0 + $0x14c] sm:$0xf0] }
  0x22   :  { %1235 = vmatmul.bf16.vlgmr.msra.gmra.mxu1 %v2377_v41  ;;  %v2468_v41 = vld [vmem:[%s5419_s0 + $0xc0] sm:$0xf]  ;;  %v2497_v47 = vor.u32 %v3039_v39, %v2494_v40  ;;  %v3050_v58 = vld [vmem:[%s5419_s0 + $0x144] sm:$0xf] }
  0x23   :  { %1404 = vmatmul.bf16.vlgmr.msra.gmra.mxu2 %v2381_v42  ;;  %v3036_v42 = vld [vmem:[%s5419_s0 + $0xcc] sm:$0xf0] }
  0x24   :  { %v2469_v48 = vor.u32 %v3036_v42, %v2468_v41  ;;  %v2525_v42 = vor.u32 %v3049_v34, %v2524_v33 }
  0x2c   :  { %2980 = vmatmul.msk.bf16.gmra.mxu3 %vm957_vm1, %v2417_v51  ;;  %v3043_v51 = vld [vmem:[%s5419_s0 + $0x10c] sm:$0xf] }
  0x31   :  { %1071 = vmatmul.bf16.gmra.mxu0 %v2389_v52  ;;  %v2510_v52 = vld [vmem:[%s5419_s0 + $0x118] sm:$0xf0] }
  0x32   :  { %1240 = vmatmul.bf16.gmra.mxu1 %v2393_v53  ;;  %v2484_v53 = vld [vmem:[%s5419_s0 + $0xe0] sm:$0xf]  ;;  %v2513_v59 = vor.u32 %v3043_v51, %v2510_v52  ;;  %v3055_v52 = vld [vmem:[%s5419_s0 + $0x16c] sm:$0xf] }
  0x33   :  { %1409 = vmatmul.bf16.gmra.mxu2 %v2397_v54  ;;  %v3040_v54 = vld [vmem:[%s5419_s0 + $0xec] sm:$0xf0] }
  0x34   :  { %v2485_v60 = vor.u32 %v3040_v54, %v2484_v53  ;;  %v2558_v53 = vld [vmem:[%s5419_s0 + $0x178] sm:$0xf0] }
  0x3c   :  { %2981 = vmatmul.msk.bf16.gmra.mxu3 %vm957_vm1, %v2433_v63 }
  0x41   :  { %1076 = vmatmul.bf16.gmra.mxu0 %v2405_v0  ;;  %v3047_v0 = vld [vmem:[%s5419_s0 + $0x12c] sm:$0xf] }
  0x42   :  { %1245 = vmatmul.bf16.gmra.mxu1 %v2409_v1  ;;  %v2526_v1 = vld [vmem:[%s5419_s0 + $0x138] sm:$0xf0] }
  0x43   :  { %1414 = vmatmul.bf16.gmra.mxu2 %v2413_v2  ;;  %v2500_v2 = vld [vmem:[%s5419_s0 + $0x100] sm:$0xf]  ;;  %v2529_v10 = vor.u32 %v3047_v0, %v2526_v1  ;;  %v2533_v1 = vor.u32 %v3052_v57, %v2532_v56  ;;  %v2572_v57 = vld [vmem:[%s5419_s0 + $0x188] sm:$0xf] }
  0x4c   :  { %2982 = vmatmul.msk.bf16.gmra.mxu3 %vm957_vm1, %v2449_v11  ;;  %v2501_v11 = vor.u32 %v3044_v3, %v2500_v2 }
  0x51   :  { %1081 = vmatmul.bf16.gmra.mxu0 %v2421_v12  ;;  %v2505_v12 = vor.u32 %v3042_v4, %v2502_v5 }
  0x52   :  { %1250 = vmatmul.bf16.gmra.mxu1 %v2425_v13 }
  0x53   :  { %1419 = vmatmul.bf16.gmra.mxu2 %v2429_v14 }
  0x5c   :  { %2983 = vmatmul.msk.bf16.gmra.mxu3 %vm957_vm1, %v2465_v23 }
  0x61   :  { %1086 = vmatmul.bf16.gmra.mxu0 %v2437_v24  ;;  %v3051_v24 = vld [vmem:[%s5419_s0 + $0x14c] sm:$0xf] }
  0x62   :  { %1255 = vmatmul.bf16.gmra.mxu1 %v2441_v25  ;;  %v2542_v25 = vld [vmem:[%s5419_s0 + $0x158] sm:$0xf0] }
  0x63   :  { %1424 = vmatmul.bf16.gmra.mxu2 %v2445_v26 }
  0x6c   :  { %2984 = vmatmul.msk.bf16.gmra.mxu3 %vm957_vm1, %v2481_v35  ;;  %v2545_v35 = vor.u32 %v3051_v24, %v2542_v25  ;;  %v2550_v24 = vld [vmem:[%s5419_s0 + $0x170] sm:$0xf0] }
  0x71   :  { %1091 = vmatmul.bf16.gmra.mxu0 %v2453_v36 }
  0x72   :  { %1260 = vmatmul.bf16.gmra.mxu1 %v2457_v37  ;;  %v2517_v37 = vor.u32 %v3048_v29, %v2516_v28  ;;  %v3057_v28 = vld [vmem:[%s5419_s0 + $0x174] sm:$0xf0] }
  0x73   :  { %1429 = vmatmul.bf16.gmra.mxu2 %v2461_v38  ;;  %v2521_v38 = vor.u32 %v3046_v30, %v2518_v31 }
  0x7c   :  { %2985 = vmatmul.msk.bf16.gmra.mxu3 %vm957_vm1, %v2497_v47 }
  0x81   :  { %1096 = vmatmul.bf16.gmra.mxu0 %v2469_v48 }
  0x82   :  { %1265 = vmatmul.bf16.gmra.mxu1 %v2473_v49 }
  0x83   :  { %1434 = vmatmul.bf16.gmra.mxu2 %v2477_v50 }
  0x8c   :  { %2986 = vmatmul.msk.bf16.gmra.mxu3 %vm957_vm1, %v2513_v59  ;;  %v2534_v59 = vld [vmem:[%s5419_s0 + $0x150] sm:$0xf0] }
  0x8d   :  { %v2537_v2 = vor.u32 %v3050_v58, %v2534_v59  ;;  %v3061_v58 = vld [vmem:[%s5419_s0 + $0x194] sm:$0xf0] }
  0x8f   :  { %v1574_v63 = vpop.f32.mrf.mxu3 }
  0x91   :  { %1101 = vmatmul.bf16.gmra.mxu0 %v2485_v60 }
  0x92   :  { %1270 = vmatmul.bf16.gmra.mxu1 %v2489_v61  ;;  %v2540_v61 = vld [vmem:[%s5419_s0 + $0x148] sm:$0xf] }
  0x93   :  { %1439 = vmatmul.bf16.gmra.mxu2 %v2493_v62  ;;  %v3053_v62 = vld [vmem:[%s5419_s0 + $0x154] sm:$0xf0] }
  0x97   :  { %v1576_v6 = vpop.f32.mrf.mxu3 }
  0x9c   :  { %2987 = vmatmul.msk.bf16.gmra.mxu3 %vm957_vm1, %v2529_v10 }
  0x9e   :  { %v1067_v13 = vpop.f32.mrf.mxu0 }
  0x9f   :  { %v1236_v14 = vpop.f32.mrf.mxu1  ;;  %v1068_v16 = vadd.f32 %v3503_v7, %v1067_v13  ;;  %v1579_v18 = vpop.f32.mrf.mxu3 }
  0xa1   :  { %v1237_v17 = vadd.f32 %v1236_v14, %v1068_v16  ;;  %1106 = vmatmul.bf16.gmra.mxu0 %v2501_v11 }
  0xa2   :  { %1275 = vmatmul.bf16.gmra.mxu1 %v2505_v12 }
  0xa3   :  { %1444 = vmatmul.bf16.gmra.mxu2 %v2509_v15 }
  0xa6   :  { %v1405_v19 = vpop.f32.mrf.mxu2  ;;  %v1069_v21 = vpop.f32.mrf.mxu0 }
  0xa7   :  { %v1406_v20 = vadd.f32 %v1405_v19, %v1237_v17  ;;  %v1238_v22 = vpop.f32.mrf.mxu1  ;;  %v1070_v23 = vadd.f32 %v3503_v7, %v1069_v21  ;;  %v1581_v32 = vpop.f32.mrf.mxu3  ;;  %v3059_v17 = vld [vmem:[%s5419_s0 + $0x18c] sm:$0xf]  ;;  %v2548_v21 = vld [vmem:[%s5419_s0 + $0x160] sm:$0xf] }
  0xa9   :  { %v3520_v26 = vadd.f32 %v1574_v63, %v1406_v20  ;;  %v1239_v27 = vadd.f32 %v1238_v22, %v1070_v23  ;;  %v2561_v63 = vor.u32 %v3055_v52, %v2558_v53  ;;  %v3056_v22 = vld [vmem:[%s5419_s0 + $0x16c] sm:$0xf0]  ;;  %v3054_v23 = vld [vmem:[%s5419_s0 + $0x164] sm:$0xf] }
  0xaa   :  { %v2549_v31 = vor.u32 %v3056_v22, %v2548_v21  ;;  %v3060_v52 = vld [vmem:[%s5419_s0 + $0x18c] sm:$0xf0]  ;;  %v3058_v53 = vld [vmem:[%s5419_s0 + $0x184] sm:$0xf]  ;;  %v2588_v22 = vld [vmem:[%s5419_s0 + $0x1a8] sm:$0xf] }
  0xac   :  { %2988 = vmatmul.msk.bf16.gmra.mxu3 %vm957_vm1, %v2545_v35 }
  0xae   :  { %v1407_v36 = vpop.f32.mrf.mxu2  ;;  %v1072_v40 = vpop.f32.mrf.mxu0 }
  0xaf   :  { %v1408_v39 = vadd.f32 %v1407_v36, %v1239_v27  ;;  %v1241_v41 = vpop.f32.mrf.mxu1  ;;  %v1073_v43 = vadd.f32 %v3503_v7, %v1072_v40  ;;  %v1584_v46 = vpop.f32.mrf.mxu3  ;;  %v2556_v27 = vld [vmem:[%s5419_s0 + $0x168] sm:$0xf] }
  0xb0   :  { %v2557_v36 = vor.u32 %v3057_v28, %v2556_v27 }
  0xb1   :  { %v3542_v44 = vadd.f32 %v1576_v6, %v1408_v39  ;;  %v1242_v45 = vadd.f32 %v1241_v41, %v1073_v43  ;;  %1111 = vmatmul.bf16.gmra.mxu0 %v2517_v37  ;;  %v2541_v6 = vor.u32 %v3053_v62, %v2540_v61 }
  0xb2   :  { %1280 = vmatmul.bf16.gmra.mxu1 %v2521_v38 }
  0xb3   :  { %1449 = vmatmul.bf16.gmra.mxu2 %v2525_v42 }
  0xb6   :  { %v1410_v47 = vpop.f32.mrf.mxu2  ;;  %v1074_v49 = vpop.f32.mrf.mxu0 }
  0xb7   :  { %v1411_v48 = vadd.f32 %v1410_v47, %v1242_v45  ;;  %v1243_v50 = vpop.f32.mrf.mxu1  ;;  %v1075_v51 = vadd.f32 %v3503_v7, %v1074_v49  ;;  %v1586_v60 = vpop.f32.mrf.mxu3  ;;  %v3063_v47 = vld [vmem:[%s5419_s0 + $0x1ac] sm:$0xf] }
  0xb9   :  { %v3551_v54 = vadd.f32 %v1579_v18, %v1411_v48  ;;  %v1244_v55 = vadd.f32 %v1243_v50, %v1075_v51  ;;  %v2574_v18 = vld [vmem:[%s5419_s0 + $0x198] sm:$0xf0]  ;;  %v2564_v51 = vld [vmem:[%s5419_s0 + $0x180] sm:$0xf] }
  0xba   :  { %v2577_v29 = vor.u32 %v3059_v17, %v2574_v18  ;;  %v2590_v48 = vld [vmem:[%s5419_s0 + $0x1b8] sm:$0xf0]  ;;  %v2565_v61 = vor.u32 %v3060_v52, %v2564_v51  ;;  %v3064_v17 = vld [vmem:[%s5419_s0 + $0x1ac] sm:$0xf0]  ;;  %v3062_v18 = vld [vmem:[%s5419_s0 + $0x1a4] sm:$0xf] }
  0xbb   :  { %v2593_v59 = vor.u32 %v3063_v47, %v2590_v48 }
  0xbc   :  { %2989 = vmatmul.msk.bf16.gmra.mxu3 %vm957_vm1, %v2561_v63 }
  0xbe   :  { %v1412_v0 = vpop.f32.mrf.mxu2  ;;  %v1077_v4 = vpop.f32.mrf.mxu0 }
  0xbf   :  { %v1413_v3 = vadd.f32 %v1412_v0, %v1244_v55  ;;  %v1246_v5 = vpop.f32.mrf.mxu1  ;;  %v1078_v8 = vadd.f32 %v3503_v7, %v1077_v4  ;;  %v1589_v11 = vpop.f32.mrf.mxu3  ;;  %v2566_v55 = vld [vmem:[%s5419_s0 + $0x190] sm:$0xf0] }
  0xc0   :  { %v2569_v62 = vor.u32 %v3058_v53, %v2566_v55 }
  0xc1   :  { %v3573_v9 = vadd.f32 %v1581_v32, %v1413_v3  ;;  %v1247_v10 = vadd.f32 %v1246_v5, %v1078_v8  ;;  %1116 = vmatmul.bf16.gmra.mxu0 %v2533_v1  ;;  %v2553_v32 = vor.u32 %v3054_v23, %v2550_v24  ;;  %v3065_v23 = vld [vmem:[%s5419_s0 + $0x1b4] sm:$0xf0] }
  0xc2   :  { %1285 = vmatmul.bf16.gmra.mxu1 %v2537_v2  ;;  %v2573_v2 = vor.u32 %v3061_v58, %v2572_v57 }
  0xc3   :  { %1454 = vmatmul.bf16.gmra.mxu2 %v2541_v6 }
  0xc6   :  { %v1415_v12 = vpop.f32.mrf.mxu2  ;;  %v1079_v14 = vpop.f32.mrf.mxu0 }
  0xc7   :  { %v1416_v13 = vadd.f32 %v1415_v12, %v1247_v10  ;;  %v1248_v15 = vpop.f32.mrf.mxu1  ;;  %v1080_v16 = vadd.f32 %v3503_v7, %v1079_v14  ;;  %v1591_v25 = vpop.f32.mrf.mxu3  ;;  %v2606_v14 = vld [vmem:[%s5419_s0 + $0x1d8] sm:$0xf0] }
  0xc9   :  { %v3582_v19 = vadd.f32 %v1584_v46, %v1416_v13  ;;  %v1249_v20 = vadd.f32 %v1248_v15, %v1080_v16  ;;  %v3067_v13 = vld [vmem:[%s5419_s0 + $0x1cc] sm:$0xf]  ;;  %v2580_v16 = vld [vmem:[%s5419_s0 + $0x1a0] sm:$0xf] }
  0xca   :  { %v2609_v24 = vor.u32 %v3067_v13, %v2606_v14  ;;  %v2581_v27 = vor.u32 %v3064_v17, %v2580_v16 }
  0xcb   :  { %5476 = vst [vmem:[#allocation2_spill] sm:$0xff] %v3582_v19 }
  0xcc   :  { %2990 = vmatmul.msk.bf16.gmra.mxu3 %vm957_vm1, %v2577_v29 }
  0xce   :  { %v1417_v30 = vpop.f32.mrf.mxu2  ;;  %v1082_v34 = vpop.f32.mrf.mxu0 }
  0xcf   :  { %v1418_v33 = vadd.f32 %v1417_v30, %v1249_v20  ;;  %v1251_v35 = vpop.f32.mrf.mxu1  ;;  %v1083_v37 = vadd.f32 %v3503_v7, %v1082_v34  ;;  %v1594_v40 = vpop.f32.mrf.mxu3  ;;  %v2582_v20 = vld [vmem:[%s5419_s0 + $0x1b0] sm:$0xf0] }
  0xd0   :  { %v2585_v28 = vor.u32 %v3062_v18, %v2582_v20 }
  0xd1   :  { %v3604_v38 = vadd.f32 %v1586_v60, %v1418_v33  ;;  %v1252_v39 = vadd.f32 %v1251_v35, %v1083_v37  ;;  %1121 = vmatmul.bf16.gmra.mxu0 %v2549_v31  ;;  %v2589_v31 = vor.u32 %v3065_v23, %v2588_v22  ;;  %v2622_v37 = vld [vmem:[%s5419_s0 + $0x1f8] sm:$0xf0] }
  0xd2   :  { %1290 = vmatmul.bf16.gmra.mxu1 %v2553_v32 }
  0xd3   :  { %5477 = vst [vmem:[#allocation3_spill] sm:$0xff] %v3604_v38  ;;  %1459 = vmatmul.bf16.gmra.mxu2 %v2557_v36  ;;  %v3071_v36 = vld [vmem:[%s5419_s0 + $0x1ec] sm:$0xf] }
  0xd4   :  { %v2625_v47 = vor.u32 %v3071_v36, %v2622_v37  ;;  %v3079_v36 = vld [vmem:[%s5419_s0 + $0x22c] sm:$0xf]  ;;  %v2654_v37 = vld [vmem:[%s5419_s0 + $0x238] sm:$0xf0] }
  0xd6   :  { %v1420_v41 = vpop.f32.mrf.mxu2  ;;  %v1084_v43 = vpop.f32.mrf.mxu0 }
  0xd7   :  { %v1421_v42 = vadd.f32 %v1420_v41, %v1252_v39  ;;  %v1253_v45 = vpop.f32.mrf.mxu1  ;;  %v1085_v46 = vadd.f32 %v3503_v7, %v1084_v43  ;;  %v3627_v56 = vpop.f32.mrf.mxu3  ;;  %v2596_v39 = vld [vmem:[%s5419_s0 + $0x1c0] sm:$0xf]  ;;  %v3066_v41 = vld [vmem:[%s5419_s0 + $0x1c4] sm:$0xf] }
  0xd9   :  { %v3613_v49 = vadd.f32 %v1589_v11, %v1421_v42  ;;  %v1254_v50 = vadd.f32 %v1253_v45, %v1085_v46  ;;  %v2598_v42 = vld [vmem:[%s5419_s0 + $0x1d0] sm:$0xf0]  ;;  %v2604_v45 = vld [vmem:[%s5419_s0 + $0x1c8] sm:$0xf]  ;;  %v3069_v46 = vld [vmem:[%s5419_s0 + $0x1d4] sm:$0xf0] }
  0xda   :  { %v2601_v51 = vor.u32 %v3066_v41, %v2598_v42  ;;  %v2605_v55 = vor.u32 %v3069_v46, %v2604_v45  ;;  %v3076_v45 = vld [vmem:[%s5419_s0 + $0x20c] sm:$0xf0]  ;;  %v3074_v46 = vld [vmem:[%s5419_s0 + $0x204] sm:$0xf] }
  0xdb   :  { %5478 = vst [vmem:[#allocation4_spill] sm:$0xff] %v3613_v49 }
  0xdc   :  { %2991 = vmatmul.msk.bf16.gmra.mxu3 %vm957_vm1, %v2593_v59 }
  0xde   :  { %v1422_v60 = vpop.f32.mrf.mxu2  ;;  %v1087_v0 = vpop.f32.mrf.mxu0 }
  0xdf   :  { %v1423_v63 = vadd.f32 %v1422_v60, %v1254_v50  ;;  %v1256_v1 = vpop.f32.mrf.mxu1  ;;  %v1088_v3 = vadd.f32 %v3503_v7, %v1087_v0  ;;  %v3639_v6 = vpop.f32.mrf.mxu3  ;;  %v3072_v0 = vld [vmem:[%s5419_s0 + $0x1ec] sm:$0xf0] }
  0xe1   :  { %v3637_v4 = vadd.f32 %v1591_v25, %v1423_v63  ;;  %v1257_v5 = vadd.f32 %v1256_v1, %v1088_v3  ;;  %1126 = vmatmul.bf16.gmra.mxu0 %v2565_v61  ;;  %v3075_v61 = vld [vmem:[%s5419_s0 + $0x20c] sm:$0xf]  ;;  %v2612_v63 = vld [vmem:[%s5419_s0 + $0x1e0] sm:$0xf]  ;;  %v3070_v1 = vld [vmem:[%s5419_s0 + $0x1e4] sm:$0xf] }
  0xe2   :  { %1295 = vmatmul.bf16.gmra.mxu1 %v2569_v62  ;;  %v2638_v62 = vld [vmem:[%s5419_s0 + $0x218] sm:$0xf0]  ;;  %v2613_v14 = vor.u32 %v3072_v0, %v2612_v63 }
  0xe3   :  { %5479 = vst [vmem:[#allocation5_spill] sm:$0xff] %v3637_v4  ;;  %1464 = vmatmul.bf16.gmra.mxu2 %v2573_v2  ;;  %v2614_v2 = vld [vmem:[%s5419_s0 + $0x1f0] sm:$0xf0] }
  0xe4   :  { %v2617_v16 = vor.u32 %v3070_v1, %v2614_v2 }
  0xe6   :  { %v1425_v8 = vpop.f32.mrf.mxu2  ;;  %v3641_v11 = vpop.f32.mrf.mxu0 }
  0xe7   :  { %v1426_v10 = vadd.f32 %v1425_v8, %v1257_v5  ;;  %v3643_v12 = vpop.f32.mrf.mxu1  ;;  %v3665_v21 = vpop.f32.mrf.mxu3  ;;  %v2620_v5 = vld [vmem:[%s5419_s0 + $0x1e8] sm:$0xf]  ;;  %v3073_v8 = vld [vmem:[%s5419_s0 + $0x1f4] sm:$0xf0] }
  0xe8   :  { %v2621_v20 = vor.u32 %v3073_v8, %v2620_v5 }
  0xe9   :  { %v3651_v15 = vadd.f32 %v1594_v40, %v1426_v10  ;;  %v3068_v40 = vld [vmem:[%s5419_s0 + $0x1cc] sm:$0xf0]  ;;  %v2641_v10 = vor.u32 %v3075_v61, %v2638_v62 }
  0xea   :  { %v2597_v50 = vor.u32 %v3068_v40, %v2596_v39  ;;  %v2628_v40 = vld [vmem:[%s5419_s0 + $0x200] sm:$0xf] }
  0xeb   :  { %5480 = vst [vmem:[#allocation6_spill] sm:$0xff] %v3651_v15  ;;  %v2629_v1 = vor.u32 %v3076_v45, %v2628_v40  ;;  %v3080_v40 = vld [vmem:[%s5419_s0 + $0x22c] sm:$0xf0]  ;;  %v2652_v45 = vld [vmem:[%s5419_s0 + $0x228] sm:$0xf] }
  0xec   :  { %2992 = vmatmul.msk.bf16.gmra.mxu3 %vm957_vm1, %v2609_v24 }
  0xee   :  { %v3673_v25 = vpop.f32.mrf.mxu2  ;;  %v3675_v29 = vpop.f32.mrf.mxu0 }
  0xef   :  { %v3677_v30 = vpop.f32.mrf.mxu1  ;;  %v3680_v32 = vpop.f32.mrf.mxu3 }
  0xf1   :  { %1131 = vmatmul.bf16.gmra.mxu0 %v2581_v27 }
  0xf2   :  { %1300 = vmatmul.bf16.gmra.mxu1 %v2585_v28 }
  0xf3   :  { %1469 = vmatmul.bf16.gmra.mxu2 %v2589_v31 }
  0xf6   :  { %v3682_v33 = vpop.f32.mrf.mxu2  ;;  %v3684_v34 = vpop.f32.mrf.mxu0 }
  0xf7   :  { %v3686_v35 = vpop.f32.mrf.mxu1  ;;  %v3706_v43 = vpop.f32.mrf.mxu3  ;;  %v1095_v62 = vadd.f32 %v3503_v7, %v3684_v34  ;;  %v1090_v34 = vadd.f32 %v3503_v7, %v3641_v11 }
  0xfc   :  { %2993 = vmatmul.msk.bf16.gmra.mxu3 %vm957_vm1, %v2625_v47  ;;  %v2630_v47 = vld [vmem:[%s5419_s0 + $0x210] sm:$0xf0] }
  0xfd   :  { %v2633_v2 = vor.u32 %v3074_v46, %v2630_v47 }
  0xfe   :  { %v3714_v48 = vpop.f32.mrf.mxu2  ;;  %v1097_v52 = vpop.f32.mrf.mxu0 }
  0xff   :  { %v1266_v53 = vpop.f32.mrf.mxu1  ;;  %v3717_v57 = vpop.f32.mrf.mxu3  ;;  %v1098_v39 = vadd.f32 %v3503_v7, %v1097_v52  ;;  %v3077_v52 = vld [vmem:[%s5419_s0 + $0x214] sm:$0xf0] }
 0x101   :  { %1136 = vmatmul.bf16.gmra.mxu0 %v2597_v50  ;;  %v1267_v63 = vadd.f32 %v1266_v53, %v1098_v39 }
 0x102   :  { %1305 = vmatmul.bf16.gmra.mxu1 %v2601_v51  ;;  %v2636_v51 = vld [vmem:[%s5419_s0 + $0x208] sm:$0xf] }
 0x103   :  { %1474 = vmatmul.bf16.gmra.mxu2 %v2605_v55  ;;  %v2657_v55 = vor.u32 %v3079_v36, %v2654_v37 }
 0x106   :  { %v3719_v58 = vpop.f32.mrf.mxu2  ;;  %v1099_v59 = vpop.f32.mrf.mxu0 }
 0x107   :  { %v1268_v60 = vpop.f32.mrf.mxu1  ;;  %v1611_v3 = vpop.f32.mrf.mxu3  ;;  %v1100_v41 = vadd.f32 %v3503_v7, %v1099_v59  ;;  %v1093_v59 = vadd.f32 %v3503_v7, %v3675_v29 }
 0x109   :  { %v1269_v5 = vadd.f32 %v1268_v60, %v1100_v41  ;;  %v1262_v53 = vadd.f32 %v3677_v30, %v1093_v59  ;;  %v1264_v60 = vadd.f32 %v3686_v35, %v1095_v62  ;;  %v3078_v41 = vld [vmem:[%s5419_s0 + $0x224] sm:$0xf] }
 0x10b   :  { %v1431_v35 = vadd.f32 %v3682_v33, %v1262_v53  ;;  %v2670_v33 = vld [vmem:[%s5419_s0 + $0x258] sm:$0xf0]  ;;  %v3084_v53 = vld [vmem:[%s5419_s0 + $0x24c] sm:$0xf0] }
 0x10c   :  { %2994 = vmatmul.msk.bf16.gmra.mxu3 %vm957_vm1, %v2641_v10 }
 0x10e   :  { %v1437_v13 = vpop.f32.mrf.mxu2  ;;  %v1102_v17 = vpop.f32.mrf.mxu0 }
 0x10f   :  { %v1271_v18 = vpop.f32.mrf.mxu1  ;;  %v3746_v22 = vpop.f32.mrf.mxu3  ;;  %v1103_v24 = vadd.f32 %v3503_v7, %v1102_v17  ;;  %v2637_v17 = vor.u32 %v3077_v52, %v2636_v51 }
 0x111   :  { %1141 = vmatmul.bf16.gmra.mxu0 %v2613_v14  ;;  %v1272_v42 = vadd.f32 %v1271_v18, %v1103_v24 }
 0x112   :  { %1310 = vmatmul.bf16.gmra.mxu1 %v2617_v16 }
 0x113   :  { %1479 = vmatmul.bf16.gmra.mxu2 %v2621_v20  ;;  %v1438_v20 = vadd.f32 %v1437_v13, %v1269_v5  ;;  %v1433_v13 = vadd.f32 %v3714_v48, %v1264_v60  ;;  %v2662_v60 = vld [vmem:[%s5419_s0 + $0x250] sm:$0xf0] }
 0x115   :  { %v3798_v11 = vadd.f32 %v3706_v43, %v1438_v20  ;;  %v3810_v43 = vadd.f32 %v3665_v21, %v1433_v13  ;;  %v3826_v21 = vadd.f32 %v3639_v6, %v1431_v35  ;;  %v3081_v6 = vld [vmem:[%s5419_s0 + $0x234] sm:$0xf0] }
 0x116   :  { %v1440_v23 = vpop.f32.mrf.mxu2  ;;  %v1104_v27 = vpop.f32.mrf.mxu0  ;;  %v3085_v13 = vld [vmem:[%s5419_s0 + $0x254] sm:$0xf0] }
 0x117   :  { %v1273_v28 = vpop.f32.mrf.mxu1  ;;  %v1105_v31 = vadd.f32 %v3503_v7, %v1104_v27  ;;  %v3770_v50 = vpop.f32.mrf.mxu3  ;;  %v1441_v8 = vadd.f32 %v1440_v23, %v1272_v42  ;;  %v1436_v23 = vadd.f32 %v3719_v58, %v1267_v63  ;;  %5483 = vst [vmem:[#allocation9_spill] sm:$0xff] %v3798_v11  ;;  %v2653_v63 = vor.u32 %v3081_v6, %v2652_v45 }
 0x118   :  { %5485 = vst [vmem:[#allocation11_spill] sm:$0xff] %v3810_v43 }
 0x119   :  { %v1274_v61 = vadd.f32 %v1273_v28, %v1105_v31  ;;  %v3793_v27 = vadd.f32 %v3717_v57, %v1441_v8  ;;  %v1259_v28 = vadd.f32 %v3643_v12, %v1090_v34  ;;  %v3804_v57 = vadd.f32 %v3680_v32, %v1436_v23  ;;  %v3083_v12 = vld [vmem:[%s5419_s0 + $0x24c] sm:$0xf]  ;;  %5486 = vst [vmem:[#allocation12_spill] sm:$0xff] %v3826_v21  ;;  %v2660_v34 = vld [vmem:[%s5419_s0 + $0x240] sm:$0xf] }
 0x11a   :  { %v2673_v46 = vor.u32 %v3083_v12, %v2670_v33  ;;  %v2661_v35 = vor.u32 %v3084_v53, %v2660_v34 }
 0x11b   :  { %5482 = vst [vmem:[#allocation8_spill] sm:$0xff] %v3793_v27  ;;  %v1428_v37 = vadd.f32 %v3673_v25, %v1259_v28  ;;  %v2644_v25 = vld [vmem:[%s5419_s0 + $0x220] sm:$0xf] }
 0x11c   :  { %2995 = vmatmul.msk.bf16.gmra.mxu3 %vm957_vm1, %v2657_v55  ;;  %5484 = vst [vmem:[#allocation10_spill] sm:$0xff] %v3804_v57  ;;  %v2645_v52 = vor.u32 %v3080_v40, %v2644_v25 }
 0x11d   :  { %v3845_v47 = vadd.f32 %v3627_v56, %v1428_v37 }
 0x11e   :  { %v1442_v0 = vpop.f32.mrf.mxu2  ;;  %v1107_v14 = vpop.f32.mrf.mxu0 }
 0x11f   :  { %v1443_v10 = vadd.f32 %v1442_v0, %v1274_v61  ;;  %v1276_v16 = vpop.f32.mrf.mxu1  ;;  %v1108_v18 = vadd.f32 %v3503_v7, %v1107_v14  ;;  %5487 = vst [vmem:[#allocation13_spill] sm:$0xff] %v3845_v47 }
 0x121   :  { %v3784_v29 = vadd.f32 %v1611_v3, %v1443_v10  ;;  %v1277_v24 = vadd.f32 %v1276_v16, %v1108_v18  ;;  %1146 = vmatmul.bf16.gmra.mxu0 %v2629_v1  ;;  %v1619_v3 = vpop.f32.mrf.mxu3 }
 0x122   :  { %1315 = vmatmul.bf16.gmra.mxu1 %v2633_v2 }
 0x123   :  { %5481 = vst [vmem:[#allocation7_spill] sm:$0xff] %v3784_v29  ;;  %1484 = vmatmul.bf16.gmra.mxu2 %v2637_v17  ;;  %1734 = vmatpush.msrb.mxu3 %v3784_v29  ;;  %v2686_v17 = vld [vmem:[%s5419_s0 + $0x278] sm:$0xf0] }
 0x125   :  { %1735 = vmatpush.msrb.mxu3 %v3793_v27 }
 0x126   :  { %v1445_v30 = vpop.f32.mrf.mxu2  ;;  %v1109_v31 = vpop.f32.mrf.mxu0 }
 0x127   :  { %v1446_v58 = vadd.f32 %v1445_v30, %v1277_v24  ;;  %1736 = vmatpush.msrb.mxu3 %v3798_v11  ;;  %v1278_v36 = vpop.f32.mrf.mxu1  ;;  %v1110_v48 = vadd.f32 %v3503_v7, %v1109_v31  ;;  %v3082_v24 = vld [vmem:[%s5419_s0 + $0x244] sm:$0xf] }
 0x129   :  { %1737 = vmatpush.msrb.mxu3 %v3804_v57  ;;  %v3819_v32 = vadd.f32 %v3746_v22, %v1446_v58  ;;  %v1279_v39 = vadd.f32 %v1278_v36, %v1110_v48  ;;  %v2646_v22 = vld [vmem:[%s5419_s0 + $0x230] sm:$0xf0]  ;;  %v1621_v42 = vpop.f32.mrf.mxu3  ;;  %v2665_v58 = vor.u32 %v3082_v24, %v2662_v60 }
 0x12a   :  { %v2649_v55 = vor.u32 %v3078_v41, %v2646_v22 }
 0x12b   :  { %1738 = vmatpush.msrb.mxu3 %v3810_v43 }
 0x12c   :  { %2996 = vmatmul.msk.bf16.gmra.mxu3 %vm957_vm1, %v2673_v46  ;;  %v3091_v46 = vld [vmem:[%s5419_s0 + $0x28c] sm:$0xf] }
 0x12d   :  { %1739 = vmatpush.msrb.mxu3 %v3826_v21 }
 0x12e   :  { %v1447_v51 = vpop.f32.mrf.mxu2  ;;  %v1112_v61 = vpop.f32.mrf.mxu0 }
 0x12f   :  { %v1448_v59 = vadd.f32 %v1447_v51, %v1279_v39  ;;  %1740 = vmatpush.msrb.mxu3 %v3845_v47  ;;  %v1281_v62 = vpop.f32.mrf.mxu1  ;;  %v1113_v0 = vadd.f32 %v3503_v7, %v1112_v61  ;;  %v3086_v61 = vld [vmem:[%s5419_s0 + $0x264] sm:$0xf] }
 0x131   :  { %1741 = vmatpush.msrb.mxu3 %v3651_v15  ;;  %v3852_v1 = vadd.f32 %v3770_v50, %v1448_v59  ;;  %v1282_v56 = vadd.f32 %v1281_v62, %v1113_v0  ;;  %1151 = vmatmul.bf16.gmra.mxu0 %v2645_v52  ;;  %v1624_v2 = vpop.f32.mrf.mxu3  ;;  %v3087_v50 = vld [vmem:[%s5419_s0 + $0x26c] sm:$0xf]  ;;  %v3088_v59 = vld [vmem:[%s5419_s0 + $0x26c] sm:$0xf0]  ;;  %v2678_v62 = vld [vmem:[%s5419_s0 + $0x270] sm:$0xf0] }
 0x132   :  { %1320 = vmatmul.bf16.gmra.mxu1 %v2649_v55  ;;  %v2689_v30 = vor.u32 %v3087_v50, %v2686_v17  ;;  %v2676_v55 = vld [vmem:[%s5419_s0 + $0x260] sm:$0xf]  ;;  %v2684_v0 = vld [vmem:[%s5419_s0 + $0x268] sm:$0xf] }
 0x133   :  { %1489 = vmatmul.bf16.gmra.mxu2 %v2653_v63  ;;  %1742 = vmatpush.msrb.mxu3 %v3637_v4 }
 0x135   :  { %1743 = vmatpush.msrb.mxu3 %v3613_v49 }
 0x136   :  { %v1450_v5 = vpop.f32.mrf.mxu2  ;;  %v1114_v10 = vpop.f32.mrf.mxu0 }
 0x137   :  { %v1451_v8 = vadd.f32 %v1450_v5, %v1282_v56  ;;  %1744 = vmatpush.msrb.mxu3 %v3604_v38  ;;  %v1283_v14 = vpop.f32.mrf.mxu1  ;;  %v1115_v16 = vadd.f32 %v3503_v7, %v1114_v10  ;;  %v3089_v56 = vld [vmem:[%s5419_s0 + $0x274] sm:$0xf0]  ;;  %v2681_v10 = vor.u32 %v3086_v61, %v2678_v62 }
 0x138   :  { %v2685_v17 = vor.u32 %v3089_v56, %v2684_v0 }
 0x139   :  { %1745 = vmatpush.msrb.mxu3 %v3582_v19  ;;  %v3865_v18 = vadd.f32 %v1619_v3, %v1451_v8  ;;  %v1284_v20 = vadd.f32 %v1283_v14, %v1115_v16  ;;  %v1626_v23 = vpop.f32.mrf.mxu3  ;;  %v2668_v3 = vld [vmem:[%s5419_s0 + $0x248] sm:$0xf]  ;;  %v2677_v8 = vor.u32 %v3088_v59, %v2676_v55 }
 0x13a   :  { %v2669_v37 = vor.u32 %v3085_v13, %v2668_v3 }
 0x13b   :  { %1746 = vmatpush.msrb.mxu3 %v3573_v9 }
 0x13c   :  { %2997 = vmatmul.msk.bf16.gmra.mxu3 %vm957_vm1, %v2689_v30 }
 0x13d   :  { %1747 = vmatpush.msrb.mxu3 %v3551_v54 }
 0x13e   :  { %v1452_v28 = vpop.f32.mrf.mxu2  ;;  %v1117_v36 = vpop.f32.mrf.mxu0 }
 0x13f   :  { %v1453_v31 = vadd.f32 %v1452_v28, %v1284_v20  ;;  %1748 = vmatpush.msrb.mxu3 %v3542_v44  ;;  %v1286_v48 = vpop.f32.mrf.mxu1  ;;  %v1118_v12 = vadd.f32 %v3503_v7, %v1117_v36  ;;  %v2692_v36 = vld [vmem:[%s5419_s0 + $0x280] sm:$0xf] }
 0x141   :  { %1749 = vmatpush.msrb.mxu3 %v3520_v26  ;;  %v3891_v33 = vadd.f32 %v1621_v42, %v1453_v31  ;;  %v1287_v39 = vadd.f32 %v1286_v48, %v1118_v12  ;;  %1156 = vmatmul.bf16.gmra.mxu0 %v2661_v35  ;;  %v1629_v25 = vpop.f32.mrf.mxu3  ;;  %v2702_v42 = vld [vmem:[%s5419_s0 + $0x298] sm:$0xf0]  ;;  %v3095_v35 = vld [vmem:[%s5419_s0 + $0x2ac] sm:$0xf]  ;;  %v3092_v48 = vld [vmem:[%s5419_s0 + $0x28c] sm:$0xf0] }
 0x142   :  { %1325 = vmatmul.bf16.gmra.mxu1 %v2665_v58  ;;  %v2694_v12 = vld [vmem:[%s5419_s0 + $0x290] sm:$0xf0] }
 0x143   :  { %5488 = vst [vmem:[#allocation14_spill] sm:$0xff] %v3891_v33  ;;  %1494 = vmatmul.bf16.gmra.mxu2 %v2669_v37  ;;  %v3090_v37 = vld [vmem:[%s5419_s0 + $0x284] sm:$0xf] }
 0x146   :  { %v1455_v40 = vpop.f32.mrf.mxu2  ;;  %v1119_v22 = vpop.f32.mrf.mxu0 }
 0x147   :  { %v1456_v41 = vadd.f32 %v1455_v40, %v1287_v39  ;;  %v1288_v45 = vpop.f32.mrf.mxu1  ;;  %v1120_v6 = vadd.f32 %v3503_v7, %v1119_v22  ;;  %v3093_v40 = vld [vmem:[%s5419_s0 + $0x294] sm:$0xf0] }
 0x149   :  { %v3900_v51 = vadd.f32 %v1624_v2, %v1456_v41  ;;  %v1289_v52 = vadd.f32 %v1288_v45, %v1120_v6  ;;  %v1631_v63 = vpop.f32.mrf.mxu3  ;;  %v2705_v2 = vor.u32 %v3091_v46, %v2702_v42  ;;  %v2693_v45 = vor.u32 %v3092_v48, %v2692_v36 }
 0x14a   :  { %v2697_v6 = vor.u32 %v3090_v37, %v2694_v12 }
 0x14b   :  { %5489 = vst [vmem:[#allocation15_spill] sm:$0xff] %v3900_v51 }
 0x14c   :  { %2998 = vmatmul.msk.bf16.gmra.mxu3 %vm957_vm1, %v2705_v2 }
 0x14e   :  { %v1457_v5 = vpop.f32.mrf.mxu2  ;;  %v1122_v16 = vpop.f32.mrf.mxu0 }
 0x14f   :  { %v1458_v14 = vadd.f32 %v1457_v5, %v1289_v52  ;;  %v1291_v50 = vpop.f32.mrf.mxu1  ;;  %v1123_v20 = vadd.f32 %v3503_v7, %v1122_v16  ;;  %v2708_v16 = vld [vmem:[%s5419_s0 + $0x2a0] sm:$0xf] }
 0x151   :  { %v3922_v34 = vadd.f32 %v1626_v23, %v1458_v14  ;;  %v1292_v53 = vadd.f32 %v1291_v50, %v1123_v20  ;;  %1161 = vmatmul.bf16.gmra.mxu0 %v2677_v8  ;;  %v1634_v24 = vpop.f32.mrf.mxu3  ;;  %v2718_v23 = vld [vmem:[%s5419_s0 + $0x2b8] sm:$0xf0]  ;;  %v3096_v50 = vld [vmem:[%s5419_s0 + $0x2ac] sm:$0xf0]  ;;  %v2710_v20 = vld [vmem:[%s5419_s0 + $0x2b0] sm:$0xf0] }
 0x152   :  { %1330 = vmatmul.bf16.gmra.mxu1 %v2681_v10  ;;  %v2721_v41 = vor.u32 %v3095_v35, %v2718_v23  ;;  %v3099_v10 = vld [vmem:[%s5419_s0 + $0x2cc] sm:$0xf] }
 0x153   :  { %5490 = vst [vmem:[#allocation16_spill] sm:$0xff] %v3922_v34  ;;  %1499 = vmatmul.bf16.gmra.mxu2 %v2685_v17  ;;  %v3094_v17 = vld [vmem:[%s5419_s0 + $0x2a4] sm:$0xf] }
 0x156   :  { %v1460_v60 = vpop.f32.mrf.mxu2  ;;  %v1124_v13 = vpop.f32.mrf.mxu0 }
 0x157   :  { %v1461_v3 = vadd.f32 %v1460_v60, %v1292_v53  ;;  %v1293_v30 = vpop.f32.mrf.mxu1  ;;  %v1125_v28 = vadd.f32 %v3503_v7, %v1124_v13  ;;  %v3097_v60 = vld [vmem:[%s5419_s0 + $0x2b4] sm:$0xf0] }
 0x159   :  { %v3931_v58 = vadd.f32 %v1629_v25, %v1461_v3  ;;  %v1294_v31 = vadd.f32 %v1293_v30, %v1125_v28  ;;  %v3945_v39 = vpop.f32.mrf.mxu3  ;;  %v2700_v25 = vld [vmem:[%s5419_s0 + $0x288] sm:$0xf]  ;;  %v2709_v30 = vor.u32 %v3096_v50, %v2708_v16  ;;  %v2713_v28 = vor.u32 %v3094_v17, %v2710_v20 }
 0x15a   :  { %v2701_v55 = vor.u32 %v3093_v40, %v2700_v25  ;;  %v3103_v25 = vld [vmem:[%s5419_s0 + $0x2ec] sm:$0xf]  ;;  %v2750_v40 = vld [vmem:[%s5419_s0 + $0x2f8] sm:$0xf0] }
 0x15b   :  { %5491 = vst [vmem:[#allocation17_spill] sm:$0xff] %v3931_v58 }
 0x15c   :  { %2999 = vmatmul.msk.bf16.gmra.mxu3 %vm957_vm1, %v2721_v41  ;;  %v2724_v41 = vld [vmem:[%s5419_s0 + $0x2c0] sm:$0xf] }
 0x15e   :  { %v1462_v22 = vpop.f32.mrf.mxu2  ;;  %v1127_v42 = vpop.f32.mrf.mxu0 }
 0x15f   :  { %v1463_v46 = vadd.f32 %v1462_v22, %v1294_v31  ;;  %v1296_v52 = vpop.f32.mrf.mxu1  ;;  %v1128_v59 = vadd.f32 %v3503_v7, %v1127_v42  ;;  %v3100_v22 = vld [vmem:[%s5419_s0 + $0x2cc] sm:$0xf0]  ;;  %v2732_v42 = vld [vmem:[%s5419_s0 + $0x2c8] sm:$0xf] }
 0x161   :  { %v3955_v61 = vadd.f32 %v1631_v63, %v1463_v46  ;;  %v1297_v62 = vadd.f32 %v1296_v52, %v1128_v59  ;;  %1166 = vmatmul.bf16.gmra.mxu0 %v2693_v45  ;;  %v3957_v0 = vpop.f32.mrf.mxu3  ;;  %v2734_v63 = vld [vmem:[%s5419_s0 + $0x2d8] sm:$0xf0]  ;;  %v3098_v45 = vld [vmem:[%s5419_s0 + $0x2c4] sm:$0xf]  ;;  %v3101_v52 = vld [vmem:[%s5419_s0 + $0x2d4] sm:$0xf0] }
 0x162   :  { %1335 = vmatmul.bf16.gmra.mxu1 %v2697_v6  ;;  %v2737_v3 = vor.u32 %v3099_v10, %v2734_v63  ;;  %v2726_v6 = vld [vmem:[%s5419_s0 + $0x2d0] sm:$0xf0]  ;;  %v2733_v63 = vor.u32 %v3101_v52, %v2732_v42 }
 0x163   :  { %5492 = vst [vmem:[#allocation18_spill] sm:$0xff] %v3955_v61  ;;  %1504 = vmatmul.bf16.gmra.mxu2 %v2701_v55  ;;  %v2753_v55 = vor.u32 %v3103_v25, %v2750_v40  ;;  %v2748_v40 = vld [vmem:[%s5419_s0 + $0x2e8] sm:$0xf] }
 0x166   :  { %v1465_v56 = vpop.f32.mrf.mxu2  ;;  %v3959_v5 = vpop.f32.mrf.mxu0 }
 0x167   :  { %v1466_v2 = vadd.f32 %v1465_v56, %v1297_v62  ;;  %v3961_v8 = vpop.f32.mrf.mxu1  ;;  %v2725_v62 = vor.u32 %v3100_v22, %v2724_v41  ;;  %v2729_v56 = vor.u32 %v3098_v45, %v2726_v6  ;;  %v3105_v41 = vld [vmem:[%s5419_s0 + $0x2f4] sm:$0xf0] }
 0x169   :  { %v3969_v14 = vadd.f32 %v1634_v24, %v1466_v2  ;;  %v3983_v53 = vpop.f32.mrf.mxu3  ;;  %v2716_v24 = vld [vmem:[%s5419_s0 + $0x2a8] sm:$0xf] }
 0x16a   :  { %v2717_v31 = vor.u32 %v3097_v60, %v2716_v24  ;;  %v3107_v24 = vld [vmem:[%s5419_s0 + $0x30c] sm:$0xf]  ;;  %v2766_v60 = vld [vmem:[%s5419_s0 + $0x318] sm:$0xf0] }
 0x16b   :  { %5493 = vst [vmem:[#allocation19_spill] sm:$0xff] %v3969_v14  ;;  %v2769_v22 = vor.u32 %v3107_v24, %v2766_v60  ;;  %v3111_v60 = vld [vmem:[%s5419_s0 + $0x32c] sm:$0xf] }
 0x16c   :  { %3000 = vmatmul.msk.bf16.gmra.mxu3 %vm957_vm1, %v2737_v3  ;;  %v2740_v3 = vld [vmem:[%s5419_s0 + $0x2e0] sm:$0xf] }
 0x16e   :  { %v3991_v13 = vpop.f32.mrf.mxu2  ;;  %v3993_v35 = vpop.f32.mrf.mxu0 }
 0x16f   :  { %v3995_v23 = vpop.f32.mrf.mxu1 }
 0x171   :  { %1171 = vmatmul.bf16.gmra.mxu0 %v2709_v30  ;;  %v3998_v36 = vpop.f32.mrf.mxu3  ;;  %v3104_v30 = vld [vmem:[%s5419_s0 + $0x2ec] sm:$0xf0] }
 0x172   :  { %1340 = vmatmul.bf16.gmra.mxu1 %v2713_v28  ;;  %v3102_v28 = vld [vmem:[%s5419_s0 + $0x2e4] sm:$0xf]  ;;  %v2741_v6 = vor.u32 %v3104_v30, %v2740_v3  ;;  %v2782_v3 = vld [vmem:[%s5419_s0 + $0x338] sm:$0xf0] }
 0x173   :  { %1509 = vmatmul.bf16.gmra.mxu2 %v2717_v31  ;;  %v2742_v31 = vld [vmem:[%s5419_s0 + $0x2f0] sm:$0xf0] }
 0x174   :  { %v2745_v42 = vor.u32 %v3102_v28, %v2742_v31  ;;  %v2756_v28 = vld [vmem:[%s5419_s0 + $0x300] sm:$0xf] }
 0x176   :  { %v4000_v48 = vpop.f32.mrf.mxu2  ;;  %v4002_v37 = vpop.f32.mrf.mxu0 }
 0x177   :  { %v4004_v12 = vpop.f32.mrf.mxu1 }
 0x179   :  { %v4024_v46 = vpop.f32.mrf.mxu3 }
 0x17c   :  { %3001 = vmatmul.msk.bf16.gmra.mxu3 %vm957_vm1, %v2753_v55 }
 0x17e   :  { %v4032_v59 = vpop.f32.mrf.mxu2  ;;  %v1137_v2 = vpop.f32.mrf.mxu0 }
 0x17f   :  { %v1306_v10 = vpop.f32.mrf.mxu1  ;;  %v1138_v30 = vadd.f32 %v3503_v7, %v1137_v2 }
 0x181   :  { %1176 = vmatmul.bf16.gmra.mxu0 %v2725_v62  ;;  %v4035_v16 = vpop.f32.mrf.mxu3  ;;  %v2749_v62 = vor.u32 %v3105_v41, %v2748_v40  ;;  %v3106_v41 = vld [vmem:[%s5419_s0 + $0x304] sm:$0xf] }
 0x182   :  { %1345 = vmatmul.bf16.gmra.mxu1 %v2729_v56 }
 0x183   :  { %1514 = vmatmul.bf16.gmra.mxu2 %v2733_v63 }
 0x186   :  { %v4037_v50 = vpop.f32.mrf.mxu2  ;;  %v1139_v17 = vpop.f32.mrf.mxu0 }
 0x187   :  { %v1308_v20 = vpop.f32.mrf.mxu1  ;;  %v1140_v31 = vadd.f32 %v3503_v7, %v1139_v17  ;;  %v2785_v17 = vor.u32 %v3111_v60, %v2782_v3  ;;  %v4103_v60 = vld [vmem:[%s5420_s2] ss:$0 sm:$0xff]  ;;  %v2780_v3 = vld [vmem:[%s5419_s0 + $0x328] sm:$0xf] }
 0x189   :  { %v1651_v25 = vpop.f32.mrf.mxu3  ;;  %v1309_v47 = vadd.f32 %v1308_v20, %v1140_v31 }
 0x18c   :  { %3002 = vmatmul.msk.bf16.gmra.mxu3 %vm957_vm1, %v2769_v22  ;;  %v2758_v22 = vld [vmem:[%s5419_s0 + $0x310] sm:$0xf0] }
 0x18d   :  { %v2761_v21 = vor.u32 %v3106_v41, %v2758_v22 }
 0x18e   :  { %v1477_v45 = vpop.f32.mrf.mxu2  ;;  %v1142_v52 = vpop.f32.mrf.mxu0 }
 0x18f   :  { %v1311_v55 = vpop.f32.mrf.mxu1  ;;  %v1143_v29 = vadd.f32 %v3503_v7, %v1142_v52 }
 0x191   :  { %1181 = vmatmul.bf16.gmra.mxu0 %v2741_v6  ;;  %v4064_v56 = vpop.f32.mrf.mxu3  ;;  %v1312_v40 = vadd.f32 %v1311_v55, %v1143_v29  ;;  %v2764_v6 = vld [vmem:[%s5419_s0 + $0x308] sm:$0xf]  ;;  %v3109_v29 = vld [vmem:[%s5419_s0 + $0x314] sm:$0xf0]  ;;  %v1135_v55 = vadd.f32 %v3503_v7, %v4002_v37  ;;  %v1130_v37 = vadd.f32 %v4103_v60, %v3959_v5 }
 0x192   :  { %1350 = vmatmul.bf16.gmra.mxu1 %v2745_v42  ;;  %v1133_v42 = vadd.f32 %v3503_v7, %v3993_v35  ;;  %v2765_v19 = vor.u32 %v3109_v29, %v2764_v6 }
 0x193   :  { %1519 = vmatmul.bf16.gmra.mxu2 %v2749_v62  ;;  %v1307_v62 = vadd.f32 %v1306_v10, %v1138_v30  ;;  %v1304_v20 = vadd.f32 %v4004_v12, %v1135_v55 }
 0x196   :  { %v1480_v63 = vpop.f32.mrf.mxu2  ;;  %v1144_v27 = vpop.f32.mrf.mxu0 }
 0x197   :  { %v1313_v11 = vpop.f32.mrf.mxu1  ;;  %v1145_v24 = vadd.f32 %v3503_v7, %v1144_v27  ;;  %v3108_v27 = vld [vmem:[%s5419_s0 + $0x30c] sm:$0xf0]  ;;  %v1481_v15 = vadd.f32 %v1480_v63, %v1312_v40  ;;  %v1478_v7 = vadd.f32 %v1477_v45, %v1309_v47  ;;  %v1476_v63 = vadd.f32 %v4037_v50, %v1307_v62  ;;  %v3110_v45 = vld [vmem:[%s5419_s0 + $0x324] sm:$0xf] }
 0x198   :  { %v2757_v43 = vor.u32 %v3108_v27, %v2756_v28  ;;  %v1473_v47 = vadd.f32 %v4032_v59, %v1304_v20 }
 0x199   :  { %v4088_v2 = vpop.f32.mrf.mxu3  ;;  %v1314_v52 = vadd.f32 %v1313_v11, %v1145_v24  ;;  %v4121_v5 = vadd.f32 %v4024_v46, %v1478_v7 }
 0x19a   :  { %v4133_v46 = vadd.f32 %v3983_v53, %v1473_v47  ;;  %v3116_v47 = vld [vmem:[%s5419_s0 + $0x34c] sm:$0xf0] }
 0x19b   :  { %5496 = vst [vmem:[#allocation22_spill] sm:$0xff] %v4121_v5 }
 0x19c   :  { %3003 = vmatmul.msk.bf16.gmra.mxu3 %vm957_vm1, %v2785_v17  ;;  %5498 = vst [vmem:[#allocation24_spill] sm:$0xff] %v4133_v46 }
 0x19e   :  { %v1482_v57 = vpop.f32.mrf.mxu2  ;;  %v1147_v49 = vpop.f32.mrf.mxu0 }
 0x19f   :  { %v1483_v4 = vadd.f32 %v1482_v57, %v1314_v52  ;;  %v1316_v38 = vpop.f32.mrf.mxu1  ;;  %v1148_v11 = vadd.f32 %v4103_v60, %v1147_v49  ;;  %v1302_v57 = vadd.f32 %v3995_v23, %v1133_v42  ;;  %v4116_v49 = vadd.f32 %v4035_v16, %v1481_v15 }
 0x1a0   :  { %v4127_v15 = vadd.f32 %v3998_v36, %v1476_v63  ;;  %v2788_v63 = vld [vmem:[%s5419_s0 + $0x340] sm:$0xf] }
 0x1a1   :  { %v4107_v35 = vadd.f32 %v1651_v25, %v1483_v4  ;;  %v1317_v10 = vadd.f32 %v1316_v38, %v1148_v11  ;;  %1186 = vmatmul.bf16.gmra.mxu0 %v2757_v43  ;;  %5495 = vst [vmem:[#allocation21_spill] sm:$0xff] %v4116_v49  ;;  %v1659_v4 = vpop.f32.mrf.mxu3  ;;  %v1299_v43 = vadd.f32 %v3961_v8, %v1130_v37  ;;  %v3115_v8 = vld [vmem:[%s5419_s0 + $0x34c] sm:$0xf]  ;;  %v3112_v25 = vld [vmem:[%s5419_s0 + $0x32c] sm:$0xf0] }
 0x1a2   :  { %1355 = vmatmul.bf16.gmra.mxu1 %v2761_v21  ;;  %v1471_v21 = vadd.f32 %v4000_v48, %v1302_v57  ;;  %5497 = vst [vmem:[#allocation23_spill] sm:$0xff] %v4127_v15  ;;  %v2798_v48 = vld [vmem:[%s5419_s0 + $0x358] sm:$0xf0] }
 0x1a3   :  { %5494 = vst [vmem:[#allocation20_spill] sm:$0xff] %v4107_v35  ;;  %1524 = vmatmul.bf16.gmra.mxu2 %v2765_v19  ;;  %1754 = vmatpush.msrb.mxu0 %v4107_v35  ;;  %v1468_v16 = vadd.f32 %v3991_v13, %v1299_v43  ;;  %v2772_v13 = vld [vmem:[%s5419_s0 + $0x320] sm:$0xf]  ;;  %v2801_v30 = vor.u32 %v3115_v8, %v2798_v48  ;;  %v2814_v57 = vld [vmem:[%s5419_s0 + $0x378] sm:$0xf0] }
 0x1a4   :  { %v4149_v53 = vadd.f32 %v3957_v0, %v1471_v21  ;;  %v3113_v0 = vld [vmem:[%s5419_s0 + $0x334] sm:$0xf0]  ;;  %v2773_v40 = vor.u32 %v3112_v25, %v2772_v13  ;;  %v2796_v21 = vld [vmem:[%s5419_s0 + $0x348] sm:$0xf] }
 0x1a5   :  { %1755 = vmatpush.msrb.mxu0 %v4116_v49  ;;  %v4168_v28 = vadd.f32 %v3945_v39, %v1468_v16  ;;  %v2781_v29 = vor.u32 %v3113_v0, %v2780_v3 }
 0x1a6   :  { %v1485_v38 = vpop.f32.mrf.mxu2  ;;  %v1149_v19 = vpop.f32.mrf.mxu0  ;;  %5500 = vst [vmem:[#allocation26_spill] sm:$0xff] %v4149_v53 }
 0x1a7   :  { %v1486_v23 = vadd.f32 %v1485_v38, %v1317_v10  ;;  %1756 = vmatpush.msrb.mxu0 %v4121_v5  ;;  %v1318_v12 = vpop.f32.mrf.mxu1  ;;  %v1150_v59 = vadd.f32 %v4103_v60, %v1149_v19  ;;  %5501 = vst [vmem:[#allocation27_spill] sm:$0xff] %v4168_v28  ;;  %v3114_v38 = vld [vmem:[%s5419_s0 + $0x344] sm:$0xf]  ;;  %v2868_v5 = vld [vmem:[%s5419_s0 + $0x3e0] sm:$0xf] }
 0x1a9   :  { %1757 = vmatpush.msrb.mxu0 %v4127_v15  ;;  %v4142_v36 = vadd.f32 %v4064_v56, %v1486_v23  ;;  %v1319_v50 = vadd.f32 %v1318_v12, %v1150_v59  ;;  %v2774_v56 = vld [vmem:[%s5419_s0 + $0x330] sm:$0xf0]  ;;  %v1661_v24 = vpop.f32.mrf.mxu3  ;;  %v3117_v23 = vld [vmem:[%s5419_s0 + $0x354] sm:$0xf0]  ;;  %v2789_v59 = vor.u32 %v3116_v47, %v2788_v63 }
 0x1aa   :  { %v2777_v27 = vor.u32 %v3110_v45, %v2774_v56  ;;  %v2797_v13 = vor.u32 %v3117_v23, %v2796_v21 }
 0x1ab   :  { %5499 = vst [vmem:[#allocation25_spill] sm:$0xff] %v4142_v36  ;;  %1758 = vmatpush.msrb.mxu0 %v4133_v46 }
 0x1ac   :  { %3004 = vmatmul.msk.bf16.gmra.mxu3 %vm957_vm1, %v2801_v30 }
 0x1ad   :  { %1759 = vmatpush.msrb.mxu0 %v4149_v53 }
 0x1ae   :  { %v1487_v31 = vpop.f32.mrf.mxu2  ;;  %v1152_v22 = vpop.f32.mrf.mxu0 }
 0x1af   :  { %v1488_v41 = vadd.f32 %v1487_v31, %v1319_v50  ;;  %1760 = vmatpush.msrb.mxu0 %v4168_v28  ;;  %v1321_v6 = vpop.f32.mrf.mxu1  ;;  %v1153_v17 = vadd.f32 %v4103_v60, %v1152_v22 }
 0x1b1   :  { %1761 = vmatpush.msrb.mxu0 %v3969_v14  ;;  %v4175_v42 = vadd.f32 %v4088_v2, %v1488_v41  ;;  %v1322_v39 = vadd.f32 %v1321_v6, %v1153_v17  ;;  %v1664_v52 = vpop.f32.mrf.mxu3  ;;  %v3119_v2 = vld [vmem:[%s5419_s0 + $0x36c] sm:$0xf]  ;;  %v3120_v17 = vld [vmem:[%s5419_s0 + $0x36c] sm:$0xf0] }
 0x1b2   :  { %1191 = vmatmul.bf16.gmra.mxu0 %v2773_v40  ;;  %1360 = vmatmul.bf16.gmra.mxu1 %v2777_v27  ;;  %v2817_v19 = vor.u32 %v3119_v2, %v2814_v57  ;;  %v3123_v41 = vld [vmem:[%s5419_s0 + $0x38c] sm:$0xf] }
 0x1b3   :  { %5502 = vst [vmem:[#allocation28_spill] sm:$0xff] %v4175_v42  ;;  %1529 = vmatmul.bf16.gmra.mxu2 %v2781_v29  ;;  %1762 = vmatpush.msrb.mxu0 %v3955_v61  ;;  %v2804_v29 = vld [vmem:[%s5419_s0 + $0x360] sm:$0xf] }
 0x1b4   :  { %v2805_v2 = vor.u32 %v3120_v17, %v2804_v29 }
 0x1b5   :  { %1763 = vmatpush.msrb.mxu0 %v3931_v58 }
 0x1b6   :  { %v1490_v55 = vpop.f32.mrf.mxu2  ;;  %v1154_v11 = vpop.f32.mrf.mxu0 }
 0x1b7   :  { %v1491_v62 = vadd.f32 %v1490_v55, %v1322_v39  ;;  %1764 = vmatpush.msrb.mxu0 %v3922_v34  ;;  %v1323_v7 = vpop.f32.mrf.mxu1  ;;  %v1155_v37 = vadd.f32 %v4103_v60, %v1154_v11  ;;  %v3118_v39 = vld [vmem:[%s5419_s0 + $0x364] sm:$0xf]  ;;  %v2806_v55 = vld [vmem:[%s5419_s0 + $0x370] sm:$0xf0]  ;;  %v3121_v11 = vld [vmem:[%s5419_s0 + $0x374] sm:$0xf0] }
 0x1b8   :  { %v2809_v57 = vor.u32 %v3118_v39, %v2806_v55 }
 0x1b9   :  { %1765 = vmatpush.msrb.mxu0 %v3900_v51  ;;  %v4188_v10 = vadd.f32 %v1659_v4, %v1491_v62  ;;  %v1324_v20 = vadd.f32 %v1323_v7, %v1155_v37  ;;  %v2790_v4 = vld [vmem:[%s5419_s0 + $0x350] sm:$0xf0]  ;;  %v1666_v43 = vpop.f32.mrf.mxu3 }
 0x1ba   :  { %v2793_v16 = vor.u32 %v3114_v38, %v2790_v4 }
 0x1bb   :  { %5503 = vst [vmem:[#allocation29_spill] sm:$0xff] %v4188_v10  ;;  %1766 = vmatpush.msrb.mxu0 %v3891_v33 }
 0x1bc   :  { %3005 = vmatmul.msk.bf16.gmra.mxu3 %vm957_vm1, %v2817_v19 }
 0x1bd   :  { %1767 = vmatpush.msrb.mxu0 %v3865_v18 }
 0x1be   :  { %v1492_v12 = vpop.f32.mrf.mxu2  ;;  %v1157_v48 = vpop.f32.mrf.mxu0 }
 0x1bf   :  { %v1493_v8 = vadd.f32 %v1492_v12, %v1324_v20  ;;  %1768 = vmatpush.msrb.mxu0 %v3852_v1  ;;  %v1326_v50 = vpop.f32.mrf.mxu1  ;;  %v1158_v25 = vadd.f32 %v4103_v60, %v1157_v48 }
 0x1c1   :  { %1769 = vmatpush.msrb.mxu0 %v3819_v32  ;;  %v4214_v45 = vadd.f32 %v1661_v24, %v1493_v8  ;;  %v1327_v56 = vadd.f32 %v1326_v50, %v1158_v25  ;;  %v1669_v3 = vpop.f32.mrf.mxu3  ;;  %v2830_v24 = vld [vmem:[%s5419_s0 + $0x398] sm:$0xf0]  ;;  %v3127_v50 = vld [vmem:[%s5419_s0 + $0x3ac] sm:$0xf] }
 0x1c2   :  { %1196 = vmatmul.bf16.gmra.mxu0 %v2789_v59  ;;  %1365 = vmatmul.bf16.gmra.mxu1 %v2793_v16  ;;  %v2833_v7 = vor.u32 %v3123_v41, %v2830_v24 }
 0x1c3   :  { %5504 = vst [vmem:[#allocation30_spill] sm:$0xff] %v4214_v45  ;;  %1534 = vmatmul.bf16.gmra.mxu2 %v2797_v13 }
 0x1c6   :  { %v1495_v0 = vpop.f32.mrf.mxu2  ;;  %v1159_v31 = vpop.f32.mrf.mxu0 }
 0x1c7   :  { %v1496_v30 = vadd.f32 %v1495_v0, %v1327_v56  ;;  %v1328_v40 = vpop.f32.mrf.mxu1  ;;  %v1160_v27 = vadd.f32 %v4103_v60, %v1159_v31  ;;  %v2820_v56 = vld [vmem:[%s5419_s0 + $0x380] sm:$0xf]  ;;  %v3124_v0 = vld [vmem:[%s5419_s0 + $0x38c] sm:$0xf0]  ;;  %v2822_v31 = vld [vmem:[%s5419_s0 + $0x390] sm:$0xf0] }
 0x1c9   :  { %v4223_v22 = vadd.f32 %v1664_v52, %v1496_v30  ;;  %v1329_v6 = vadd.f32 %v1328_v40, %v1160_v27  ;;  %v1671_v62 = vpop.f32.mrf.mxu3  ;;  %v2812_v52 = vld [vmem:[%s5419_s0 + $0x368] sm:$0xf]  ;;  %v3122_v30 = vld [vmem:[%s5419_s0 + $0x384] sm:$0xf]  ;;  %v3125_v27 = vld [vmem:[%s5419_s0 + $0x394] sm:$0xf0] }
 0x1ca   :  { %v2813_v38 = vor.u32 %v3121_v11, %v2812_v52  ;;  %v2825_v29 = vor.u32 %v3122_v30, %v2822_v31 }
 0x1cb   :  { %5505 = vst [vmem:[#allocation31_spill] sm:$0xff] %v4223_v22 }
 0x1cc   :  { %3006 = vmatmul.msk.bf16.gmra.mxu3 %vm957_vm1, %v2833_v7 }
 0x1ce   :  { %v1497_v37 = vpop.f32.mrf.mxu2  ;;  %v1162_v63 = vpop.f32.mrf.mxu0 }
 0x1cf   :  { %v1498_v20 = vadd.f32 %v1497_v37, %v1329_v6  ;;  %v1331_v47 = vpop.f32.mrf.mxu1  ;;  %v1163_v4 = vadd.f32 %v4103_v60, %v1162_v63  ;;  %v2821_v6 = vor.u32 %v3124_v0, %v2820_v56  ;;  %v2836_v63 = vld [vmem:[%s5419_s0 + $0x3a0] sm:$0xf] }
 0x1d1   :  { %v4245_v21 = vadd.f32 %v1666_v43, %v1498_v20  ;;  %v1332_v23 = vadd.f32 %v1331_v47, %v1163_v4  ;;  %v4247_v19 = vpop.f32.mrf.mxu3  ;;  %v2846_v43 = vld [vmem:[%s5419_s0 + $0x3b8] sm:$0xf0]  ;;  %v3131_v20 = vld [vmem:[%s5419_s0 + $0x3cc] sm:$0xf]  ;;  %v3128_v47 = vld [vmem:[%s5419_s0 + $0x3ac] sm:$0xf0] }
 0x1d2   :  { %1201 = vmatmul.bf16.gmra.mxu0 %v2805_v2  ;;  %1370 = vmatmul.bf16.gmra.mxu1 %v2809_v57  ;;  %v2849_v41 = vor.u32 %v3127_v50, %v2846_v43  ;;  %v2838_v4 = vld [vmem:[%s5419_s0 + $0x3b0] sm:$0xf0] }
 0x1d3   :  { %5506 = vst [vmem:[#allocation32_spill] sm:$0xff] %v4245_v21  ;;  %1539 = vmatmul.bf16.gmra.mxu2 %v2813_v38  ;;  %v3126_v38 = vld [vmem:[%s5419_s0 + $0x3a4] sm:$0xf] }
 0x1d4   :  { %v2841_v50 = vor.u32 %v3126_v38, %v2838_v4 }
 0x1d6   :  { %v1500_v12 = vpop.f32.mrf.mxu2  ;;  %v1164_v16 = vpop.f32.mrf.mxu0 }
 0x1d7   :  { %v1501_v59 = vadd.f32 %v1500_v12, %v1332_v23  ;;  %v1333_v8 = vpop.f32.mrf.mxu1  ;;  %v1165_v48 = vadd.f32 %v4103_v60, %v1164_v16  ;;  %v2844_v12 = vld [vmem:[%s5419_s0 + $0x3a8] sm:$0xf] }
 0x1d9   :  { %v4256_v13 = vadd.f32 %v1669_v3, %v1501_v59  ;;  %v1334_v25 = vadd.f32 %v1333_v8, %v1165_v48  ;;  %v4270_v40 = vpop.f32.mrf.mxu3  ;;  %v2828_v3 = vld [vmem:[%s5419_s0 + $0x388] sm:$0xf]  ;;  %v3129_v59 = vld [vmem:[%s5419_s0 + $0x3b4] sm:$0xf0]  ;;  %v2837_v48 = vor.u32 %v3128_v47, %v2836_v63 }
 0x1da   :  { %v2829_v52 = vor.u32 %v3125_v27, %v2828_v3  ;;  %v2845_v56 = vor.u32 %v3129_v59, %v2844_v12  ;;  %v3135_v27 = vld [vmem:[%s5419_s0 + $0x3ec] sm:$0xf] }
 0x1db   :  { %5507 = vst [vmem:[#allocation33_spill] sm:$0xff] %v4256_v13 }
 0x1dc   :  { %3007 = vmatmul.msk.bf16.gmra.mxu3 %vm957_vm1, %v2849_v41  ;;  %v2878_v41 = vld [vmem:[%s5419_s0 + $0x3f8] sm:$0xf0] }
 0x1dd   :  { %v2881_v63 = vor.u32 %v3135_v27, %v2878_v41  ;;  %v3136_v27 = vld [vmem:[%s5419_s0 + $0x3ec] sm:$0xf0]  ;;  %v3134_v41 = vld [vmem:[%s5419_s0 + $0x3e4] sm:$0xf] }
 0x1de   :  { %v1502_v24 = vpop.f32.mrf.mxu2  ;;  %v4278_v39 = vpop.f32.mrf.mxu0 }
 0x1df   :  { %v1503_v17 = vadd.f32 %v1502_v24, %v1334_v25  ;;  %v4280_v55 = vpop.f32.mrf.mxu1  ;;  %v2852_v24 = vld [vmem:[%s5419_s0 + $0x3c0] sm:$0xf] }
 0x1e1   :  { %v4283_v11 = vadd.f32 %v1671_v62, %v1503_v17  ;;  %v4285_v7 = vpop.f32.mrf.mxu3  ;;  %v2862_v62 = vld [vmem:[%s5419_s0 + $0x3d8] sm:$0xf0]  ;;  %v2854_v17 = vld [vmem:[%s5419_s0 + $0x3d0] sm:$0xf0] }
 0x1e2   :  { %1206 = vmatmul.bf16.gmra.mxu0 %v2821_v6  ;;  %1375 = vmatmul.bf16.gmra.mxu1 %v2825_v29  ;;  %v2865_v16 = vor.u32 %v3131_v20, %v2862_v62  ;;  %v3132_v6 = vld [vmem:[%s5419_s0 + $0x3cc] sm:$0xf0]  ;;  %v3130_v29 = vld [vmem:[%s5419_s0 + $0x3c4] sm:$0xf]  ;;  %v2860_v20 = vld [vmem:[%s5419_s0 + $0x3c8] sm:$0xf] }
 0x1e3   :  { %5508 = vst [vmem:[#allocation34_spill] sm:$0xff] %v4283_v11  ;;  %1544 = vmatmul.bf16.gmra.mxu2 %v2829_v52  ;;  %v3133_v62 = vld [vmem:[%s5419_s0 + $0x3d4] sm:$0xf0]  ;;  %v2853_v38 = vor.u32 %v3132_v6, %v2852_v24  ;;  %v2857_v4 = vor.u32 %v3130_v29, %v2854_v17  ;;  %v2870_v24 = vld [vmem:[%s5419_s0 + $0x3f0] sm:$0xf0] }
 0x1e4   :  { %v2876_v29 = vld [vmem:[%s5419_s0 + $0x3e8] sm:$0xf]  ;;  %v3137_v17 = vld [vmem:[%s5419_s0 + $0x3f4] sm:$0xf0] }
 0x1e6   :  { %v4287_v37 = vpop.f32.mrf.mxu2  ;;  %v4289_v2 = vpop.f32.mrf.mxu0 }
 0x1e7   :  { %v4291_v57 = vpop.f32.mrf.mxu1 }
 0x1e9   :  { %v4311_v23 = vpop.f32.mrf.mxu3 }
 0x1ec   :  { %3008 = vmatmul.msk.bf16.gmra.mxu3 %vm957_vm1, %v2865_v16  ;;  %v2861_v16 = vor.u32 %v3133_v62, %v2860_v20  ;;  %v2869_v62 = vor.u32 %v3136_v27, %v2868_v5 }
 0x1ee   :  { %v4319_v8 = vpop.f32.mrf.mxu2  ;;  %v1172_v43 = vpop.f32.mrf.mxu0 }
 0x1ef   :  { %v4321_v25 = vpop.f32.mrf.mxu1 }
 0x1f1   :  { %v4324_v0 = vpop.f32.mrf.mxu3 }
 0x1f2   :  { %1211 = vmatmul.bf16.gmra.mxu0 %v2837_v48  ;;  %1380 = vmatmul.bf16.gmra.mxu1 %v2841_v50 }
 0x1f3   :  { %1549 = vmatmul.bf16.gmra.mxu2 %v2845_v56 }
 0x1f6   :  { %v4326_v30 = vpop.f32.mrf.mxu2  ;;  %v1174_v31 = vpop.f32.mrf.mxu0 }
 0x1f7   :  { %v4328_v3 = vpop.f32.mrf.mxu1 }
 0x1f9   :  { %v4348_v52 = vpop.f32.mrf.mxu3 }
 0x1fc   :  { %3009 = vmatmul.msk.bf16.gmra.mxu3 %vm957_vm1, %v2881_v63  ;;  %v2873_v63 = vor.u32 %v3134_v41, %v2870_v24  ;;  %v1173_v24 = vadd.f32 %v4103_v60, %v1172_v43 }
 0x1fe   :  { %v1512_v47 = vpop.f32.mrf.mxu2  ;;  %v1177_v12 = vpop.f32.mrf.mxu0  ;;  %v1342_v43 = vadd.f32 %v4321_v25, %v1173_v24 }
 0x1ff   :  { %v1346_v59 = vpop.f32.mrf.mxu1  ;;  %v1178_v58 = vadd.f32 %v4103_v60, %v1177_v12 }
 0x200   :  { %v1511_v25 = vadd.f32 %v4326_v30, %v1342_v43 }
 0x201   :  { %v1689_v48 = vpop.f32.mrf.mxu3 }
 0x202   :  { %1216 = vmatmul.bf16.gmra.mxu0 %v2853_v38  ;;  %1385 = vmatmul.bf16.gmra.mxu1 %v2857_v4 }
 0x203   :  { %1554 = vmatmul.bf16.gmra.mxu2 %v2861_v16  ;;  %v2877_v16 = vor.u32 %v3137_v17, %v2876_v29  ;;  %v1175_v29 = vadd.f32 %v4103_v60, %v1174_v31 }
 0x206   :  { %v1515_v50 = vpop.f32.mrf.mxu2  ;;  %v1179_v56 = vpop.f32.mrf.mxu0 }
 0x207   :  { %v1348_v15 = vpop.f32.mrf.mxu1  ;;  %v1180_v34 = vadd.f32 %v4103_v60, %v1179_v56  ;;  %v4415_v56 = vadd.f32 %v4285_v7, %v1511_v25 }
 0x209   :  { %v1691_v6 = vpop.f32.mrf.mxu3 }
 0x20e   :  { %v1517_v20 = vpop.f32.mrf.mxu2  ;;  %v1182_v38 = vpop.f32.mrf.mxu0 }
 0x20f   :  { %v1351_v4 = vpop.f32.mrf.mxu1  ;;  %v1183_v53 = vadd.f32 %v4103_v60, %v1182_v38 }
 0x211   :  { %v1694_v46 = vpop.f32.mrf.mxu3  ;;  %v1352_v5 = vadd.f32 %v1351_v4, %v1183_v53  ;;  %v1168_v53 = vadd.f32 %v4103_v60, %v4278_v39 }
 0x212   :  { %1221 = vmatmul.bf16.gmra.mxu0 %v2869_v62  ;;  %1390 = vmatmul.bf16.gmra.mxu1 %v2873_v63  ;;  %v1347_v62 = vadd.f32 %v1346_v59, %v1178_v58  ;;  %v1349_v63 = vadd.f32 %v1348_v15, %v1180_v34  ;;  %v1344_v34 = vadd.f32 %v4328_v3, %v1175_v29 }
 0x213   :  { %1559 = vmatmul.bf16.gmra.mxu2 %v2877_v16  ;;  %v1337_v39 = vadd.f32 %v4280_v55, %v1168_v53 }
 0x214   :  { %v1518_v33 = vadd.f32 %v1517_v20, %v1349_v63  ;;  %v1516_v58 = vadd.f32 %v1515_v50, %v1347_v62  ;;  %v1513_v15 = vadd.f32 %v1512_v47, %v1344_v34 }
 0x216   :  { %v1520_v49 = vpop.f32.mrf.mxu2  ;;  %v1184_v28 = vpop.f32.mrf.mxu0  ;;  %v4395_v31 = vadd.f32 %v4348_v52, %v1518_v33  ;;  %v4402_v50 = vadd.f32 %v4324_v0, %v1516_v58  ;;  %v4408_v55 = vadd.f32 %v4311_v23, %v1513_v15  ;;  %v1506_v52 = vadd.f32 %v4287_v37, %v1337_v39 }
 0x217   :  { %v1353_v14 = vpop.f32.mrf.mxu1  ;;  %v1185_v61 = vadd.f32 %v4103_v60, %v1184_v28  ;;  %v1521_v16 = vadd.f32 %v1520_v49, %v1352_v5 }
 0x218   :  { %v4423_v4 = vadd.f32 %v4247_v19, %v1506_v52 }
 0x219   :  { %v1696_v27 = vpop.f32.mrf.mxu3  ;;  %v1354_v41 = vadd.f32 %v1353_v14, %v1185_v61  ;;  %v1170_v61 = vadd.f32 %v4103_v60, %v4289_v2  ;;  %v4391_v49 = vadd.f32 %v1689_v48, %v1521_v16 }
 0x21e   :  { %v1522_v17 = vpop.f32.mrf.mxu2  ;;  %v1187_v51 = vpop.f32.mrf.mxu0 }
 0x21f   :  { %v1523_v38 = vadd.f32 %v1522_v17, %v1354_v41  ;;  %v1356_v35 = vpop.f32.mrf.mxu1  ;;  %v1188_v28 = vadd.f32 %v4103_v60, %v1187_v51 }
 0x221   :  { %v4382_v12 = vadd.f32 %v1691_v6, %v1523_v38  ;;  %v1357_v14 = vadd.f32 %v1356_v35, %v1188_v28  ;;  %v1699_v51 = vpop.f32.mrf.mxu3  ;;  %v1339_v35 = vadd.f32 %v4291_v57, %v1170_v61 }
 0x223   :  { %1774 = vmatpush.msrb.mxu1 %v4382_v12  ;;  %v1508_v33 = vadd.f32 %v4319_v8, %v1339_v35 }
 0x225   :  { %1775 = vmatpush.msrb.mxu1 %v4391_v49  ;;  %v4419_v8 = vadd.f32 %v4270_v40, %v1508_v33 }
 0x226   :  { %v1525_v2 = vpop.f32.mrf.mxu2  ;;  %v1189_v59 = vpop.f32.mrf.mxu0 }
 0x227   :  { %v1526_v3 = vadd.f32 %v1525_v2, %v1357_v14  ;;  %1776 = vmatpush.msrb.mxu1 %v4395_v31  ;;  %v1358_v48 = vpop.f32.mrf.mxu1  ;;  %v1190_v47 = vadd.f32 %v4103_v60, %v1189_v59 }
 0x229   :  { %1777 = vmatpush.msrb.mxu1 %v4402_v50  ;;  %v4410_v57 = vadd.f32 %v1694_v46, %v1526_v3  ;;  %v1359_v30 = vadd.f32 %v1358_v48, %v1190_v47  ;;  %v1701_v0 = vpop.f32.mrf.mxu3 }
 0x22b   :  { %1778 = vmatpush.msrb.mxu1 %v4408_v55 }
 0x22d   :  { %1779 = vmatpush.msrb.mxu1 %v4415_v56 }
 0x22e   :  { %v1527_v6 = vpop.f32.mrf.mxu2 }
 0x22f   :  { %v1528_v20 = vadd.f32 %v1527_v6, %v1359_v30  ;;  %1780 = vmatpush.msrb.mxu1 %v4419_v8  ;;  %v1192_v46 = vpop.f32.mrf.mxu0  ;;  %v1361_v23 = vpop.f32.mrf.mxu1 }
 0x230   :  { %v1193_v37 = vadd.f32 %v4103_v60, %v1192_v46 }
 0x231   :  { %1781 = vmatpush.msrb.mxu1 %v4423_v4  ;;  %v4427_v7 = vadd.f32 %v1696_v27, %v1528_v20  ;;  %v1704_v40 = vpop.f32.mrf.mxu3 }
 0x232   :  { %v1362_v5 = vadd.f32 %v1361_v23, %v1193_v37 }
 0x233   :  { %1782 = vmatpush.msrb.mxu1 %v4283_v11 }
 0x235   :  { %1783 = vmatpush.msrb.mxu1 %v4256_v13 }
 0x236   :  { %v1530_v41 = vpop.f32.mrf.mxu2 }
 0x237   :  { %v1531_v24 = vadd.f32 %v1530_v41, %v1362_v5  ;;  %1784 = vmatpush.msrb.mxu1 %v4245_v21  ;;  %v1194_v29 = vpop.f32.mrf.mxu0  ;;  %v1363_v17 = vpop.f32.mrf.mxu1 }
 0x238   :  { %v1195_v19 = vadd.f32 %v4103_v60, %v1194_v29 }
 0x239   :  { %1785 = vmatpush.msrb.mxu1 %v4223_v22  ;;  %v4434_v62 = vadd.f32 %v1699_v51, %v1531_v24  ;;  %v1706_v63 = vpop.f32.mrf.mxu3  ;;  %v5457_v22 = vmov 1.0  }
 0x23a   :  { %v1364_v27 = vadd.f32 %v1363_v17, %v1195_v19  ;;  %1750 = vmatmul.f32.vlgmr.msrb.gmra.mxu3 %v5457_v22  ;;  %1770 = vmatmul.f32.vlgmr.msrb.gmra.mxu0 %v5457_v22 }
 0x23b   :  { %1786 = vmatpush.msrb.mxu1 %v4214_v45 }
 0x23d   :  { %1787 = vmatpush.msrb.mxu1 %v4188_v10 }
 0x23e   :  { %v1532_v16 = vpop.f32.mrf.mxu2 }
 0x23f   :  { %v1533_v38 = vadd.f32 %v1532_v16, %v1364_v27  ;;  %1788 = vmatpush.msrb.mxu1 %v4175_v42  ;;  %v1197_v28 = vpop.f32.mrf.mxu0  ;;  %v1366_v53 = vpop.f32.mrf.mxu1 }
 0x240   :  { %v1198_v61 = vadd.f32 %v4103_v60, %v1197_v28 }
 0x241   :  { %1789 = vmatpush.msrb.mxu1 %v4142_v36  ;;  %v4441_v14 = vadd.f32 %v1701_v0, %v1533_v38  ;;  %v1709_v58 = vpop.f32.mrf.mxu3 }
 0x242   :  { %v1367_v43 = vadd.f32 %v1366_v53, %v1198_v61  ;;  %1790 = vmatmul.f32.vlgmr.msrb.gmra.mxu1 %v5457_v22 }
 0x246   :  { %v1535_v34 = vpop.f32.mrf.mxu2 }
 0x247   :  { %v1536_v51 = vadd.f32 %v1535_v34, %v1367_v43  ;;  %v1199_v15 = vpop.f32.mrf.mxu0  ;;  %v1368_v39 = vpop.f32.mrf.mxu1 }
 0x248   :  { %v1200_v2 = vadd.f32 %v4103_v60, %v1199_v15 }
 0x249   :  { %v4444_v35 = vadd.f32 %v1704_v40, %v1536_v51  ;;  %v1711_v30 = vpop.f32.mrf.mxu3 }
 0x24a   :  { %v1369_v25 = vadd.f32 %v1368_v39, %v1200_v2 }
 0x24e   :  { %v1537_v3 = vpop.f32.mrf.mxu2 }
 0x24f   :  { %v1538_v59 = vadd.f32 %v1537_v3, %v1369_v25  ;;  %v1202_v48 = vpop.f32.mrf.mxu0  ;;  %v1371_v47 = vpop.f32.mrf.mxu1 }
 0x250   :  { %v1203_v33 = vadd.f32 %v4103_v60, %v1202_v48 }
 0x251   :  { %v4447_v52 = vadd.f32 %v1706_v63, %v1538_v59  ;;  %v1714_v41 = vpop.f32.mrf.mxu3 }
 0x252   :  { %v1372_v0 = vadd.f32 %v1371_v47, %v1203_v33 }
 0x256   :  { %v1540_v6 = vpop.f32.mrf.mxu2 }
 0x257   :  { %v1541_v20 = vadd.f32 %v1540_v6, %v1372_v0  ;;  %v1204_v46 = vpop.f32.mrf.mxu0  ;;  %v1373_v23 = vpop.f32.mrf.mxu1 }
 0x258   :  { %v1205_v37 = vadd.f32 %v4103_v60, %v1204_v46 }
 0x259   :  { %v4450_v5 = vadd.f32 %v1709_v58, %v1541_v20  ;;  %v4455_v38 = vpop.f32.mrf.mxu3 }
 0x25a   :  { %v1374_v40 = vadd.f32 %v1373_v23, %v1205_v37 }
 0x25e   :  { %v1542_v24 = vpop.f32.mrf.mxu2 }
 0x25f   :  { %v1543_v29 = vadd.f32 %v1542_v24, %v1374_v40  ;;  %v1207_v17 = vpop.f32.mrf.mxu0  ;;  %v1376_v19 = vpop.f32.mrf.mxu1 }
 0x260   :  { %v1208_v27 = vadd.f32 %v4103_v60, %v1207_v17 }
 0x261   :  { %v4453_v16 = vadd.f32 %v1711_v30, %v1543_v29  ;;  %v1719_v51 = vpop.f32.mrf.mxu3 }
 0x262   :  { %v1377_v63 = vadd.f32 %v1376_v19, %v1208_v27 }
 0x266   :  { %v1545_v28 = vpop.f32.mrf.mxu2 }
 0x267   :  { %v1546_v53 = vadd.f32 %v1545_v28, %v1377_v63  ;;  %v1209_v61 = vpop.f32.mrf.mxu0  ;;  %v1378_v43 = vpop.f32.mrf.mxu1 }
 0x269   :  { %v4457_v34 = vadd.f32 %v1714_v41, %v1546_v53  ;;  %v1721_v59 = vpop.f32.mrf.mxu3 }
 0x26e   :  { %v1547_v58 = vpop.f32.mrf.mxu2 }
 0x26f   :  { %v1212_v15 = vpop.f32.mrf.mxu0  ;;  %v1381_v39 = vpop.f32.mrf.mxu1 }
 0x270   :  { %v1213_v42 = vadd.f32 %v4103_v60, %v1212_v15  ;;  %v1210_v15 = vadd.f32 %v4103_v60, %v1209_v61 }
 0x271   :  { %v1724_v30 = vpop.f32.mrf.mxu3 }
 0x276   :  { %v1550_v2 = vpop.f32.mrf.mxu2 }
 0x277   :  { %v1214_v25 = vpop.f32.mrf.mxu0  ;;  %v1383_v3 = vpop.f32.mrf.mxu1 }
 0x278   :  { %v1215_v10 = vadd.f32 %v4103_v60, %v1214_v25 }
 0x279   :  { %v1726_v46 = vpop.f32.mrf.mxu3 }
 0x27a   :  { %v1384_v25 = vadd.f32 %v1383_v3, %v1215_v10 }
 0x27e   :  { %v1552_v48 = vpop.f32.mrf.mxu2 }
 0x27f   :  { %v1217_v47 = vpop.f32.mrf.mxu0  ;;  %v1386_v33 = vpop.f32.mrf.mxu1  ;;  %v1553_v11 = vadd.f32 %v1552_v48, %v1384_v25  ;;  %v5518_v25 = vld [vmem:[#allocation9_spill] sm:$0xff] }
 0x280   :  { %v1218_v27 = vadd.f32 %v4103_v60, %v1217_v47 }
 0x281   :  { %v1729_v41 = vpop.f32.mrf.mxu3 }
 0x286   :  { %v1555_v0 = vpop.f32.mrf.mxu2 }
 0x287   :  { %v1219_v6 = vpop.f32.mrf.mxu0  ;;  %v1388_v20 = vpop.f32.mrf.mxu1 }
 0x288   :  { %v1220_v63 = vadd.f32 %v4103_v60, %v1219_v6 }
 0x289   :  { %v1731_v47 = vpop.f32.mrf.mxu3 }
 0x28a   :  { %v1389_v21 = vadd.f32 %v1388_v20, %v1220_v63  ;;  %v5509_v20 = vld [vmem:[#allocation2_spill] sm:$0xff]  ;;  %v5514_v63 = vld [vmem:[#allocation13_spill] sm:$0xff] }
 0x28e   :  { %v1557_v23 = vpop.f32.mrf.mxu2 }
 0x28f   :  { %v1222_v37 = vpop.f32.mrf.mxu0  ;;  %v1391_v40 = vpop.f32.mrf.mxu1  ;;  %v1558_v6 = vadd.f32 %v1557_v23, %v1389_v21  ;;  %v5510_v23 = vld [vmem:[#allocation3_spill] sm:$0xff] }
 0x290   :  { %v1223_v29 = vadd.f32 %v4103_v60, %v1222_v37  ;;  %v1387_v37 = vadd.f32 %v1386_v33, %v1218_v27  ;;  %v5513_v27 = vld [vmem:[#allocation6_spill] sm:$0xff] }
 0x291   :  { %v4475_v33 = vadd.f32 %v1726_v46, %v1558_v6 }
 0x292   :  { %v1392_v28 = vadd.f32 %v1391_v40, %v1223_v29  ;;  %v1382_v29 = vadd.f32 %v1381_v39, %v1213_v42 }
 0x296   :  { %v1560_v24 = vpop.f32.mrf.mxu2 }
 0x297   :  { %v1224_v17 = vpop.f32.mrf.mxu0  ;;  %v1393_v53 = vpop.f32.mrf.mxu1 }
 0x298   :  { %v1225_v19 = vadd.f32 %v4103_v60, %v1224_v17  ;;  %v1561_v17 = vadd.f32 %v1560_v24, %v1392_v28  ;;  %v4481_v60 = vadd.f32 %v1721_v59, %v1553_v11  ;;  %v5512_v24 = vld [vmem:[#allocation5_spill] sm:$0xff] }
 0x29a   :  { %v1394_v36 = vadd.f32 %v1393_v53, %v1225_v19  ;;  %v1556_v19 = vadd.f32 %v1555_v0, %v1387_v37  ;;  %v4472_v53 = vadd.f32 %v1729_v41, %v1561_v17  ;;  %v5511_v41 = vld [vmem:[#allocation4_spill] sm:$0xff] }
 0x29b   :  { %v5515_v37 = vld [vmem:[#allocation12_spill] sm:$0xff] }
 0x29c   :  { %v4478_v21 = vadd.f32 %v1724_v30, %v1556_v19 }
 0x29e   :  { %v1562_v45 = vpop.f32.mrf.mxu2 }
 0x29f   :  { %v1563_v13 = vadd.f32 %v1562_v45, %v1394_v36  ;;  %v1379_v36 = vadd.f32 %v1378_v43, %v1210_v15  ;;  %v1551_v45 = vadd.f32 %v1550_v2, %v1382_v29  ;;  %v5517_v15 = vld [vmem:[#allocation10_spill] sm:$0xff] }
 0x2a1   :  { %v4468_v40 = vadd.f32 %v1731_v47, %v1563_v13  ;;  %v1548_v13 = vadd.f32 %v1547_v58, %v1379_v36  ;;  %v4484_v42 = vadd.f32 %v1719_v51, %v1551_v45  ;;  %v5516_v47 = vld [vmem:[#allocation11_spill] sm:$0xff]  ;;  %v5519_v36 = vld [vmem:[#allocation8_spill] sm:$0xff] }
 0x2a3   :  { %1794 = vmatpush.msrb.mxu2 %v4468_v40  ;;  %v4488_v10 = vadd.f32 %v4455_v38, %v1548_v13  ;;  %v5520_v13 = vld [vmem:[#allocation7_spill] sm:$0xff] }
 0x2a5   :  { %1795 = vmatpush.msrb.mxu2 %v4472_v53 }
 0x2a7   :  { %1796 = vmatpush.msrb.mxu2 %v4475_v33 }
 0x2a9   :  { %1797 = vmatpush.msrb.mxu2 %v4478_v21 }
 0x2ab   :  { %1798 = vmatpush.msrb.mxu2 %v4481_v60 }
 0x2ad   :  { %1799 = vmatpush.msrb.mxu2 %v4484_v42 }
 0x2af   :  { %1800 = vmatpush.msrb.mxu2 %v4488_v10 }
 0x2b1   :  { %1801 = vmatpush.msrb.mxu2 %v4457_v34 }
 0x2b3   :  { %1802 = vmatpush.msrb.mxu2 %v4453_v16 }
 0x2b5   :  { %1803 = vmatpush.msrb.mxu2 %v4450_v5 }
 0x2b7   :  { %1804 = vmatpush.msrb.mxu2 %v4447_v52  ;;  %v1771_v38 = vpop.f32.mrf.mxu0 }
 0x2b9   :  { %1805 = vmatpush.msrb.mxu2 %v4444_v35 }
 0x2bb   :  { %1806 = vmatpush.msrb.mxu2 %v4441_v14 }
 0x2bd   :  { %1807 = vmatpush.msrb.mxu2 %v4434_v62  ;;  %v1751_v11 = vpop.f32.mrf.mxu3 }
 0x2be   :  { %v1772_v61 = vadd.f32 %v1771_v38, %v1751_v11 }
 0x2bf   :  { %1808 = vmatpush.msrb.mxu2 %v4427_v7  ;;  %v1791_v43 = vpop.f32.mrf.mxu1 }
 0x2c0   :  { %v1792_v58 = vadd.f32 %v1791_v43, %v1772_v61 }
 0x2c1   :  { %1809 = vmatpush.msrb.mxu2 %v4410_v57 }
 0x2c2   :  { %1810 = vmatmul.f32.vlgmr.msrb.gmra.mxu2 %v5457_v22 }
 0x345   :  { %v1811_v51 = vpop.f32.mrf.mxu2 }
 0x346   :  { %v1812_v39 = vadd.f32 %v1811_v51, %v1792_v58  ;;  %v5521_v58 = vld [vmem:[#allocation14_spill] sm:$0xff] }
 0x348   :  { %v1814_v2 = vmul.f32 0.001953125, %v1812_v39  ;;  %v5522_v39 = vld [vmem:[#allocation20_spill] sm:$0xff] }
 0x34a   :  { %v4501_v3 = vperm.slane %v1814_v2, 0 }
 0x34c   :  { %v4505_v59 = vsub.f32 %v3520_v26, %v4501_v3  ;;  %v4509_v48 = vsub.f32 %v3542_v44, %v4501_v3  ;;  %v4513_v30 = vsub.f32 %v3551_v54, %v4501_v3  ;;  %v4517_v0 = vsub.f32 %v3573_v9, %v4501_v3 }
 0x34d   :  { %v4521_v46 = vsub.f32 %v5509_v20, %v4501_v3  ;;  %v4525_v26 = vsub.f32 %v5510_v23, %v4501_v3  ;;  %v4529_v44 = vsub.f32 %v5511_v41, %v4501_v3  ;;  %v4533_v54 = vsub.f32 %v5512_v24, %v4501_v3  ;;  %v5525_v20 = vld [vmem:[#allocation15_spill] sm:$0xff]  ;;  %v5526_v23 = vld [vmem:[#allocation16_spill] sm:$0xff]  ;;  %v5527_v41 = vld [vmem:[#allocation17_spill] sm:$0xff] }
 0x34e   :  { %v4537_v9 = vsub.f32 %v5513_v27, %v4501_v3  ;;  %v4541_v28 = vsub.f32 %v5514_v63, %v4501_v3  ;;  %v4545_v17 = vsub.f32 %v5515_v37, %v4501_v3  ;;  %v4549_v6 = vsub.f32 %v5516_v47, %v4501_v3  ;;  %v5528_v27 = vld [vmem:[#allocation18_spill] sm:$0xff]  ;;  %v5529_v37 = vld [vmem:[#allocation19_spill] sm:$0xff] }
 0x34f   :  { %v4553_v29 = vsub.f32 %v5517_v15, %v4501_v3  ;;  %v4557_v19 = vsub.f32 %v5518_v25, %v4501_v3  ;;  %v4561_v45 = vsub.f32 %v5519_v36, %v4501_v3  ;;  %v4565_v11 = vsub.f32 %v5520_v13, %v4501_v3  ;;  %v5530_v47 = vld [vmem:[#allocation27_spill] sm:$0xff]  ;;  %v5531_v25 = vld [vmem:[#allocation26_spill] sm:$0xff]  ;;  %v5532_v13 = vld [vmem:[#allocation21_spill] sm:$0xff] }
 0x350   :  { %v4569_v38 = vsub.f32 %v3819_v32, %v4501_v3  ;;  %v4573_v61 = vsub.f32 %v3852_v1, %v4501_v3  ;;  %v4577_v43 = vsub.f32 %v3865_v18, %v4501_v3  ;;  %v4581_v51 = vsub.f32 %v5521_v58, %v4501_v3 }
 0x351   :  { %v4585_v2 = vsub.f32 %v5522_v39, %v4501_v3  ;;  %v4589_v32 = vsub.f32 %v4382_v12, %v4501_v3  ;;  %v4593_v1 = vsub.f32 %v5525_v20, %v4501_v3  ;;  %v4597_v18 = vsub.f32 %v5526_v23, %v4501_v3  ;;  %v5533_v39 = vld [vmem:[#allocation24_spill] sm:$0xff] }
 0x352   :  { %v4601_v24 = vsub.f32 %v5527_v41, %v4501_v3  ;;  %v4605_v63 = vsub.f32 %v5528_v27, %v4501_v3  ;;  %v4609_v12 = vsub.f32 %v5529_v37, %v4501_v3  ;;  %v4613_v15 = vsub.f32 %v5530_v47, %v4501_v3  ;;  %v5535_v37 = vld [vmem:[#allocation22_spill] sm:$0xff] }
 0x353   :  { %5523 = vst [vmem:[#allocation2_spill] sm:$0xff] %v4585_v2  ;;  %v4617_v36 = vsub.f32 %v5531_v25, %v4501_v3  ;;  %v4621_v58 = vsub.f32 %v5532_v13, %v4501_v3  ;;  %v4625_v20 = vsub.f32 %v5533_v39, %v4501_v3  ;;  %v4629_v23 = vsub.f32 %v4391_v49, %v4501_v3 }
 0x354   :  { %5524 = vst [vmem:[#allocation3_spill] sm:$0xff] %v4589_v32  ;;  %v4633_v41 = vsub.f32 %v4472_v53, %v4501_v3  ;;  %v4637_v27 = vsub.f32 %v4468_v40, %v4501_v3  ;;  %v4641_v47 = vsub.f32 %v5535_v37, %v4501_v3  ;;  %v1895_v25 = vmul.f32 %v4565_v11, %v4565_v11  ;;  %v5536_v53 = vld [vmem:[#allocation23_spill] sm:$0xff] }
 0x355   :  { %v1911_v13 = vmul.f32 %v4585_v2, %v4585_v2  ;;  %v1927_v49 = vmul.f32 %v4589_v32, %v4589_v32  ;;  %v4651_v39 = vsub.f32 %v5536_v53, %v4501_v3  ;;  %v4655_v40 = vsub.f32 %v4395_v31, %v4501_v3 }
 0x356   :  { %5534 = vst [vmem:[#allocation4_spill] sm:$0xff] %v4633_v41  ;;  %v4659_v37 = vsub.f32 %v4475_v33, %v4501_v3  ;;  %v1943_v22 = vmul.f32 %v4637_v27, %v4637_v27  ;;  %v4665_v2 = vsub.f32 %v4402_v50, %v4501_v3  ;;  %1944 = vmatpush.msra.mxu3 %v1895_v25 }
 0x357   :  { %1964 = vmatpush.msra.mxu0 %v1911_v13  ;;  %v1894_v53 = vmul.f32 %v4561_v45, %v4561_v45  ;;  %v1910_v31 = vmul.f32 %v4621_v58, %v4621_v58  ;;  %v4673_v32 = vsub.f32 %v4478_v21, %v4501_v3  ;;  %1984 = vmatpush.msra.mxu1 %v1927_v49 }
 0x358   :  { %5537 = vst [vmem:[#allocation5_spill] sm:$0xff] %v4659_v37  ;;  %2004 = vmatpush.msra.mxu2 %v1943_v22  ;;  %v1926_v33 = vmul.f32 %v4629_v23, %v4629_v23  ;;  %v1942_v50 = vmul.f32 %v4633_v41, %v4633_v41  ;;  %v4681_v25 = vsub.f32 %v4408_v55, %v4501_v3 }
 0x359   :  { %5538 = vst [vmem:[#allocation6_spill] sm:$0xff] %v4673_v32  ;;  %1945 = vmatpush.msra.mxu3 %v1894_v53  ;;  %1965 = vmatpush.msra.mxu0 %v1910_v31  ;;  %v1893_v13 = vmul.f32 %v4557_v19, %v4557_v19  ;;  %v1909_v21 = vmul.f32 %v4641_v47, %v4641_v47 }
 0x35a   :  { %v4689_v22 = vsub.f32 %v4481_v60, %v4501_v3  ;;  %1985 = vmatpush.msra.mxu1 %v1926_v33  ;;  %2005 = vmatpush.msra.mxu2 %v1942_v50  ;;  %v1925_v49 = vmul.f32 %v4655_v40, %v4655_v40  ;;  %v1941_v55 = vmul.f32 %v4659_v37, %v4659_v37 }
 0x35b   :  { %v4697_v53 = vsub.f32 %v4415_v56, %v4501_v3  ;;  %1946 = vmatpush.msra.mxu3 %v1893_v13  ;;  %1966 = vmatpush.msra.mxu0 %v1909_v21  ;;  %v1892_v31 = vmul.f32 %v4553_v29, %v4553_v29  ;;  %v1908_v60 = vmul.f32 %v4651_v39, %v4651_v39 }
 0x35c   :  { %5539 = vst [vmem:[#allocation13_spill] sm:$0xff] %v4689_v22  ;;  %v4705_v33 = vsub.f32 %v4484_v42, %v4501_v3  ;;  %1986 = vmatpush.msra.mxu1 %v1925_v49  ;;  %2006 = vmatpush.msra.mxu2 %v1941_v55  ;;  %v1924_v50 = vmul.f32 %v4665_v2, %v4665_v2 }
 0x35d   :  { %v1940_v56 = vmul.f32 %v4673_v32, %v4673_v32  ;;  %v4713_v13 = vsub.f32 %v4419_v8, %v4501_v3  ;;  %1947 = vmatpush.msra.mxu3 %v1892_v31  ;;  %1967 = vmatpush.msra.mxu0 %v1908_v60  ;;  %v1891_v21 = vmul.f32 %v4549_v6, %v4549_v6 }
 0x35e   :  { %5540 = vst [vmem:[#allocation12_spill] sm:$0xff] %v4705_v33  ;;  %v1907_v42 = vmul.f32 %v4625_v20, %v4625_v20  ;;  %v4721_v49 = vsub.f32 %v4488_v10, %v4501_v3  ;;  %1987 = vmatpush.msra.mxu1 %v1924_v50  ;;  %v1923_v55 = vmul.f32 %v4681_v25, %v4681_v25 }
 0x35f   :  { %2007 = vmatpush.msra.mxu2 %v1940_v56  ;;  %v1939_v8 = vmul.f32 %v4689_v22, %v4689_v22  ;;  %v4729_v31 = vsub.f32 %v4423_v4, %v4501_v3  ;;  %1948 = vmatpush.msra.mxu3 %v1891_v21  ;;  %v1890_v60 = vmul.f32 %v4545_v17, %v4545_v17  ;;  %v5543_v21 = vld [vmem:[#allocation34_spill] sm:$0xff] }
 0x360   :  { %5541 = vst [vmem:[#allocation11_spill] sm:$0xff] %v4721_v49  ;;  %1968 = vmatpush.msra.mxu0 %v1907_v42  ;;  %v1906_v10 = vmul.f32 %v4617_v36, %v4617_v36  ;;  %v4737_v50 = vsub.f32 %v4457_v34, %v4501_v3  ;;  %1988 = vmatpush.msra.mxu1 %v1923_v55 }
 0x361   :  { %2008 = vmatpush.msra.mxu2 %v1939_v8  ;;  %v1922_v56 = vmul.f32 %v4697_v53, %v4697_v53  ;;  %v1938_v4 = vmul.f32 %v4705_v33, %v4705_v33  ;;  %v4745_v42 = vsub.f32 %v5543_v21, %v4501_v3  ;;  %1949 = vmatpush.msra.mxu3 %v1890_v60  ;;  %v5545_v60 = vld [vmem:[#allocation33_spill] sm:$0xff] }
 0x362   :  { %5542 = vst [vmem:[#allocation10_spill] sm:$0xff] %v4737_v50  ;;  %1969 = vmatpush.msra.mxu0 %v1906_v10  ;;  %v1889_v41 = vmul.f32 %v4541_v28, %v4541_v28  ;;  %v1905_v34 = vmul.f32 %v4613_v15, %v4613_v15  ;;  %v4753_v55 = vsub.f32 %v4453_v16, %v4501_v3 }
 0x363   :  { %1989 = vmatpush.msra.mxu1 %v1922_v56  ;;  %2009 = vmatpush.msra.mxu2 %v1938_v4  ;;  %v1921_v8 = vmul.f32 %v4713_v13, %v4713_v13  ;;  %v1937_v21 = vmul.f32 %v4721_v49, %v4721_v49  ;;  %v4761_v10 = vsub.f32 %v5545_v60, %v4501_v3 }
 0x364   :  { %5544 = vst [vmem:[#allocation9_spill] sm:$0xff] %v4753_v55  ;;  %1950 = vmatpush.msra.mxu3 %v1889_v41  ;;  %1970 = vmatpush.msra.mxu0 %v1905_v34  ;;  %v1888_v37 = vmul.f32 %v4537_v9, %v4537_v9  ;;  %v1904_v16 = vmul.f32 %v4609_v12, %v4609_v12  ;;  %v5547_v41 = vld [vmem:[#allocation32_spill] sm:$0xff] }
 0x365   :  { %v4769_v56 = vsub.f32 %v4450_v5, %v4501_v3  ;;  %1990 = vmatpush.msra.mxu1 %v1921_v8  ;;  %2010 = vmatpush.msra.mxu2 %v1937_v21  ;;  %v1920_v4 = vmul.f32 %v4729_v31, %v4729_v31  ;;  %v1936_v60 = vmul.f32 %v4737_v50, %v4737_v50 }
 0x366   :  { %v4777_v34 = vsub.f32 %v5547_v41, %v4501_v3  ;;  %1951 = vmatpush.msra.mxu3 %v1888_v37  ;;  %1971 = vmatpush.msra.mxu0 %v1904_v16  ;;  %v1887_v32 = vmul.f32 %v4533_v54, %v4533_v54  ;;  %v1903_v5 = vmul.f32 %v4605_v63, %v4605_v63  ;;  %v5549_v37 = vld [vmem:[#allocation31_spill] sm:$0xff] }
 0x367   :  { %5546 = vst [vmem:[#allocation8_spill] sm:$0xff] %v4769_v56  ;;  %v4785_v8 = vsub.f32 %v4447_v52, %v4501_v3  ;;  %1991 = vmatpush.msra.mxu1 %v1920_v4  ;;  %2011 = vmatpush.msra.mxu2 %v1936_v60  ;;  %v1919_v21 = vmul.f32 %v4745_v42, %v4745_v42 }
 0x368   :  { %v1935_v41 = vmul.f32 %v4753_v55, %v4753_v55  ;;  %v4793_v16 = vsub.f32 %v5549_v37, %v4501_v3  ;;  %1952 = vmatpush.msra.mxu3 %v1887_v32  ;;  %1972 = vmatpush.msra.mxu0 %v1903_v5  ;;  %v1886_v22 = vmul.f32 %v4529_v44, %v4529_v44  ;;  %v5551_v32 = vld [vmem:[#allocation30_spill] sm:$0xff] }
 0x369   :  { %5548 = vst [vmem:[#allocation7_spill] sm:$0xff] %v4785_v8  ;;  %v1902_v52 = vmul.f32 %v4601_v24, %v4601_v24  ;;  %v4801_v4 = vsub.f32 %v4444_v35, %v4501_v3  ;;  %1992 = vmatpush.msra.mxu1 %v1919_v21  ;;  %v1918_v60 = vmul.f32 %v4761_v10, %v4761_v10 }
 0x36a   :  { %2012 = vmatpush.msra.mxu2 %v1935_v41  ;;  %v1934_v37 = vmul.f32 %v4769_v56, %v4769_v56  ;;  %v4809_v5 = vsub.f32 %v5551_v32, %v4501_v3  ;;  %1953 = vmatpush.msra.mxu3 %v1886_v22  ;;  %v1885_v33 = vmul.f32 %v4525_v26, %v4525_v26  ;;  %v5553_v22 = vld [vmem:[#allocation29_spill] sm:$0xff] }
 0x36b   :  { %5550 = vst [vmem:[#allocation14_spill] sm:$0xff] %v4801_v4  ;;  %1973 = vmatpush.msra.mxu0 %v1902_v52  ;;  %v1901_v35 = vmul.f32 %v4597_v18, %v4597_v18  ;;  %v4817_v21 = vsub.f32 %v4441_v14, %v4501_v3  ;;  %1993 = vmatpush.msra.mxu1 %v1918_v60 }
 0x36c   :  { %2013 = vmatpush.msra.mxu2 %v1934_v37  ;;  %v1917_v41 = vmul.f32 %v4777_v34, %v4777_v34  ;;  %v1933_v32 = vmul.f32 %v4785_v8, %v4785_v8  ;;  %v4825_v52 = vsub.f32 %v5553_v22, %v4501_v3  ;;  %1954 = vmatpush.msra.mxu3 %v1885_v33  ;;  %v5555_v33 = vld [vmem:[#allocation28_spill] sm:$0xff] }
 0x36d   :  { %5552 = vst [vmem:[#allocation20_spill] sm:$0xff] %v4817_v21  ;;  %1974 = vmatpush.msra.mxu0 %v1901_v35  ;;  %v1884_v49 = vmul.f32 %v4521_v46, %v4521_v46  ;;  %v1900_v14 = vmul.f32 %v4593_v1, %v4593_v1  ;;  %v4833_v60 = vsub.f32 %v4434_v62, %v4501_v3 }
 0x36e   :  { %1994 = vmatpush.msra.mxu1 %v1917_v41  ;;  %2014 = vmatpush.msra.mxu2 %v1933_v32  ;;  %v1916_v37 = vmul.f32 %v4793_v16, %v4793_v16  ;;  %v1932_v22 = vmul.f32 %v4801_v4, %v4801_v4  ;;  %v4841_v35 = vsub.f32 %v5555_v33, %v4501_v3 }
 0x36f   :  { %5554 = vst [vmem:[#allocation15_spill] sm:$0xff] %v4833_v60  ;;  %1955 = vmatpush.msra.mxu3 %v1884_v49  ;;  %1975 = vmatpush.msra.mxu0 %v1900_v14  ;;  %v1883_v50 = vmul.f32 %v4517_v0, %v4517_v0  ;;  %v1899_v62 = vmul.f32 %v4581_v51, %v4581_v51  ;;  %v5557_v49 = vld [vmem:[#allocation25_spill] sm:$0xff] }
 0x370   :  { %v4849_v41 = vsub.f32 %v4427_v7, %v4501_v3  ;;  %1995 = vmatpush.msra.mxu1 %v1916_v37  ;;  %2015 = vmatpush.msra.mxu2 %v1932_v22  ;;  %v1915_v32 = vmul.f32 %v4809_v5, %v4809_v5  ;;  %v1931_v33 = vmul.f32 %v4817_v21, %v4817_v21 }
 0x371   :  { %v4857_v14 = vsub.f32 %v5557_v49, %v4501_v3  ;;  %1956 = vmatpush.msra.mxu3 %v1883_v50  ;;  %1976 = vmatpush.msra.mxu0 %v1899_v62  ;;  %v1882_v55 = vmul.f32 %v4513_v30, %v4513_v30  ;;  %v1898_v7 = vmul.f32 %v4577_v43, %v4577_v43 }
 0x372   :  { %5556 = vst [vmem:[#allocation16_spill] sm:$0xff] %v4849_v41  ;;  %v4865_v37 = vsub.f32 %v4410_v57, %v4501_v3  ;;  %1996 = vmatpush.msra.mxu1 %v1915_v32  ;;  %2016 = vmatpush.msra.mxu2 %v1931_v33  ;;  %v1914_v22 = vmul.f32 %v4825_v52, %v4825_v52 }
 0x373   :  { %v1930_v49 = vmul.f32 %v4833_v60, %v4833_v60  ;;  %1957 = vmatpush.msra.mxu3 %v1882_v55  ;;  %1977 = vmatpush.msra.mxu0 %v1898_v7  ;;  %v1881_v50 = vmul.f32 %v4509_v48, %v4509_v48  ;;  %v1897_v62 = vmul.f32 %v4573_v61, %v4573_v61 }
 0x374   :  { %5558 = vst [vmem:[#allocation17_spill] sm:$0xff] %v4865_v37  ;;  %1997 = vmatpush.msra.mxu1 %v1914_v22  ;;  %v1913_v57 = vmul.f32 %v4841_v35, %v4841_v35  ;;  %v1929_v3 = vmul.f32 %v4849_v41, %v4849_v41  ;;  %v1880_v55 = vmul.f32 %v4505_v59, %v4505_v59  ;;  %v5559_v22 = vmov 1.0  }
 0x375   :  { %2017 = vmatpush.msra.mxu2 %v1930_v49  ;;  %1958 = vmatpush.msra.mxu3 %v1881_v50  ;;  %v1896_v32 = vmul.f32 %v4569_v38, %v4569_v38  ;;  %v1912_v33 = vmul.f32 %v4857_v14, %v4857_v14  ;;  %v1928_v7 = vmul.f32 %v4865_v37, %v4865_v37 }
 0x376   :  { %1978 = vmatpush.msra.mxu0 %v1897_v62  ;;  %1998 = vmatpush.msra.mxu1 %v1913_v57 }
 0x377   :  { %2018 = vmatpush.msra.mxu2 %v1929_v3  ;;  %1959 = vmatpush.msra.mxu3 %v1880_v55 }
 0x378   :  { %1979 = vmatpush.msra.mxu0 %v1896_v32  ;;  %1999 = vmatpush.msra.mxu1 %v1912_v33 }
 0x379   :  { %2019 = vmatpush.msra.mxu2 %v1928_v7  ;;  %1960 = vmatmul.f32.vlgmr.msra.gmra.mxu3 %v5559_v22 }
 0x37a   :  { %2020 = vmatmul.f32.vlgmr.msra.gmra.mxu2 %v5559_v22  ;;  %1980 = vmatmul.f32.vlgmr.msra.gmra.mxu0 %v5559_v22 }
 0x37b   :  { %2000 = vmatmul.f32.vlgmr.msra.gmra.mxu1 %v5559_v22 }
 0x3f7   :  { %v1981_v49 = vpop.f32.mrf.mxu0 }
 0x3f8   :  { %v2001_v57 = vpop.f32.mrf.mxu1 }
 0x3fc   :  { %v1961_v50 = vpop.f32.mrf.mxu3 }
 0x3fd   :  { %v1982_v62 = vadd.f32 %v1981_v49, %v1961_v50  ;;  %v2021_v56 = vpop.f32.mrf.mxu2 }
 0x3ff   :  { %v2002_v3 = vadd.f32 %v2001_v57, %v1982_v62 }
 0x401   :  { %v2022_v8 = vadd.f32 %v2021_v56, %v2002_v3  ;;  %v4898_v56 = vld [vmem:[%s5421_s3] ss:$0 sm:$0xff] }
 0x403   :  { %v2024_v4 = vmul.f32 0.001953125, %v2022_v8 }
 0x405   :  { %v2025_v55 = vadd.f32 1e-05, %v2024_v4  ;;  %v4904_v4 = vld [vmem:[%s5422_s4] ss:$0 sm:$0xff] }
 0x407   :  { %3166 = vrsqrt.f32 %v2025_v55  ;;  %vm2032_vm3 = vweird.f32 %v2025_v55 }
 0x40d   :  { %v3167_v32 = vpop.eup %3166 }
 0x40e   :  { %v2027_v33 = vmul.f32 %v3167_v32, %v2025_v55  ;;  %vm2033_vm2 = vweird.f32 %v3167_v32 }
 0x40f   :  { %vm2034_vm4 = vmor %vm2032_vm3, %vm2033_vm2 }
 0x410   :  { %v2028_v7 = vmul.f32 %v3167_v32, %v2027_v33 }
 0x412   :  { %v2029_v21 = vmul.f32 0.5, %v2028_v7 }
 0x414   :  { %v2030_v60 = vsub.f32 1.5, %v2029_v21 }
 0x416   :  { %v2031_v41 = vmul.f32 %v3167_v32, %v2030_v60 }
 0x418   :  { %v2035_v22 = vsel %vm2034_vm4, %v3167_v32, %v2031_v41 }
 0x419   :  { %v4891_v37 = vperm.slane %v2035_v22, 0 }
 0x41b   :  { %v2100_v49 = vmul.f32 %v4891_v37, %v4637_v27  ;;  %v2037_v60 = vmul.f32 %v4891_v37, %v4505_v59  ;;  %v2038_v27 = vmul.f32 %v4891_v37, %v4509_v48  ;;  %v2039_v41 = vmul.f32 %v4891_v37, %v4513_v30 }
 0x41c   :  { %v2040_v50 = vmul.f32 %v4891_v37, %v4517_v0  ;;  %v2041_v62 = vmul.f32 %v4891_v37, %v4521_v46  ;;  %v2042_v3 = vmul.f32 %v4891_v37, %v4525_v26  ;;  %v2043_v59 = vmul.f32 %v4891_v37, %v4529_v44 }
 0x41d   :  { %v2168_v8 = vmul.f32 %v4898_v56, %v2100_v49  ;;  %v2105_v57 = vmul.f32 %v4898_v56, %v2037_v60  ;;  %v2106_v55 = vmul.f32 %v4898_v56, %v2038_v27  ;;  %v2107_v48 = vmul.f32 %v4898_v56, %v2039_v41 }
 0x41e   :  { %v2044_v30 = vmul.f32 %v4891_v37, %v4533_v54  ;;  %v2108_v0 = vmul.f32 %v4898_v56, %v2040_v50  ;;  %v2045_v46 = vmul.f32 %v4891_v37, %v4537_v9  ;;  %v2109_v32 = vmul.f32 %v4898_v56, %v2041_v62 }
 0x41f   :  { %v4907_v21 = vadd.f32 %v4904_v4, %v2168_v8  ;;  %v2173_v33 = vadd.f32 %v4904_v4, %v2105_v57  ;;  %v2046_v26 = vmul.f32 %v4891_v37, %v4541_v28  ;;  %v2110_v7 = vmul.f32 %v4898_v56, %v2042_v3 }
 0x420   :  { %v2174_v44 = vadd.f32 %v4904_v4, %v2106_v55  ;;  %v2047_v22 = vmul.f32 %v4891_v37, %v4545_v17  ;;  %v2111_v54 = vmul.f32 %v4898_v56, %v2043_v59  ;;  %v2175_v49 = vadd.f32 %v4904_v4, %v2107_v48 }
 0x421   :  { %v2048_v9 = vmul.f32 %v4891_v37, %v4549_v6  ;;  %v2049_v8 = vmul.f32 %v4891_v37, %v4553_v29  ;;  %v2112_v60 = vmul.f32 %v4898_v56, %v2044_v30  ;;  %v2176_v28 = vadd.f32 %v4904_v4, %v2108_v0 }
 0x422   :  { %v2050_v27 = vmul.f32 %v4891_v37, %v4557_v19  ;;  %v2113_v41 = vmul.f32 %v4898_v56, %v2045_v46  ;;  %v2177_v17 = vadd.f32 %v4904_v4, %v2109_v32  ;;  %v2237_v50 = vmax.f32 %v2173_v33, 0.0 }
 0x423   :  { %v2051_v62 = vmul.f32 %v4891_v37, %v4561_v45  ;;  %v2114_v6 = vmul.f32 %v4898_v56, %v2046_v26  ;;  %v2178_v57 = vadd.f32 %v4904_v4, %v2110_v7  ;;  %v2238_v29 = vmax.f32 %v2174_v44, 0.0 }
 0x424   :  { %v2052_v3 = vmul.f32 %v4891_v37, %v4565_v11  ;;  %v2115_v55 = vmul.f32 %v4898_v56, %v2047_v22  ;;  %v2179_v19 = vadd.f32 %v4904_v4, %v2111_v54  ;;  %v2239_v59 = vmax.f32 %v2175_v49, 0.0  ;;  %2302 = vst.msk [vmem:[%s5423_s5] sm:$0xff] %vm2301_vm5, %v2237_v50 }
 0x425   :  { %v2116_v48 = vmul.f32 %v4898_v56, %v2048_v9  ;;  %v2180_v30 = vadd.f32 %v4904_v4, %v2112_v60  ;;  %v2240_v0 = vmax.f32 %v2176_v28, 0.0  ;;  %v2053_v45 = vmul.f32 %v4891_v37, %v4569_v38  ;;  %2303 = vst.msk [vmem:[%s5423_s5 + $0x8] sm:$0xff] %vm2301_vm5, %v2238_v29 }
 0x426   :  { %v2117_v46 = vmul.f32 %v4898_v56, %v2049_v8  ;;  %v2181_v32 = vadd.f32 %v4904_v4, %v2113_v41  ;;  %v2241_v33 = vmax.f32 %v2177_v17, 0.0  ;;  %v2054_v11 = vmul.f32 %v4891_v37, %v4573_v61  ;;  %2304 = vst.msk [vmem:[%s5423_s5 + $0x10] sm:$0xff] %vm2301_vm5, %v2239_v59 }
 0x427   :  { %v2118_v26 = vmul.f32 %v4898_v56, %v2050_v27  ;;  %v2182_v7 = vadd.f32 %v4904_v4, %v2114_v6  ;;  %v2242_v44 = vmax.f32 %v2178_v57, 0.0  ;;  %v2055_v38 = vmul.f32 %v4891_v37, %v4577_v43  ;;  %2305 = vst.msk [vmem:[%s5423_s5 + $0x18] sm:$0xff] %vm2301_vm5, %v2240_v0 }
 0x428   :  { %v2119_v22 = vmul.f32 %v4898_v56, %v2051_v62  ;;  %v2183_v54 = vadd.f32 %v4904_v4, %v2115_v55  ;;  %v2243_v49 = vmax.f32 %v2179_v19, 0.0  ;;  %v2056_v61 = vmul.f32 %v4891_v37, %v4581_v51  ;;  %2306 = vst.msk [vmem:[%s5423_s5 + $0x20] sm:$0xff] %vm2301_vm5, %v2241_v33 }
 0x429   :  { %v2120_v9 = vmul.f32 %v4898_v56, %v2052_v3  ;;  %v2184_v8 = vadd.f32 %v4904_v4, %v2116_v48  ;;  %v2244_v60 = vmax.f32 %v2180_v30, 0.0  ;;  %v2057_v43 = vmul.f32 %v4891_v37, %v4593_v1  ;;  %2307 = vst.msk [vmem:[%s5423_s5 + $0x28] sm:$0xff] %vm2301_vm5, %v2242_v44 }
 0x42a   :  { %v2121_v28 = vmul.f32 %v4898_v56, %v2053_v45  ;;  %v2185_v27 = vadd.f32 %v4904_v4, %v2117_v46  ;;  %v2245_v41 = vmax.f32 %v2181_v32, 0.0  ;;  %v2058_v51 = vmul.f32 %v4891_v37, %v4597_v18  ;;  %2308 = vst.msk [vmem:[%s5423_s5 + $0x30] sm:$0xff] %vm2301_vm5, %v2243_v49 }
 0x42b   :  { %v2122_v17 = vmul.f32 %v4898_v56, %v2054_v11  ;;  %v2186_v50 = vadd.f32 %v4904_v4, %v2118_v26  ;;  %v2246_v62 = vmax.f32 %v2182_v7, 0.0  ;;  %v2059_v1 = vmul.f32 %v4891_v37, %v4601_v24  ;;  %2309 = vst.msk [vmem:[%s5423_s5 + $0x38] sm:$0xff] %vm2301_vm5, %v2244_v60 }
 0x42c   :  { %v2123_v6 = vmul.f32 %v4898_v56, %v2055_v38  ;;  %v2187_v57 = vadd.f32 %v4904_v4, %v2119_v22  ;;  %v2247_v29 = vmax.f32 %v2183_v54, 0.0  ;;  %v2060_v18 = vmul.f32 %v4891_v37, %v4605_v63  ;;  %2310 = vst.msk [vmem:[%s5423_s5 + $0x40] sm:$0xff] %vm2301_vm5, %v2245_v41 }
 0x42d   :  { %v2124_v3 = vmul.f32 %v4898_v56, %v2056_v61  ;;  %v2188_v55 = vadd.f32 %v4904_v4, %v2120_v9  ;;  %v2248_v19 = vmax.f32 %v2184_v8, 0.0  ;;  %v2061_v24 = vmul.f32 %v4891_v37, %v4609_v12  ;;  %2311 = vst.msk [vmem:[%s5423_s5 + $0x48] sm:$0xff] %vm2301_vm5, %v2246_v62 }
 0x42e   :  { %v2125_v59 = vmul.f32 %v4898_v56, %v2057_v43  ;;  %v2189_v48 = vadd.f32 %v4904_v4, %v2121_v28  ;;  %v2249_v30 = vmax.f32 %v2185_v27, 0.0  ;;  %v2062_v63 = vmul.f32 %v4891_v37, %v4613_v15  ;;  %2312 = vst.msk [vmem:[%s5423_s5 + $0x50] sm:$0xff] %vm2301_vm5, %v2247_v29 }
 0x42f   :  { %v2126_v0 = vmul.f32 %v4898_v56, %v2058_v51  ;;  %v2190_v45 = vadd.f32 %v4904_v4, %v2122_v17  ;;  %v2250_v46 = vmax.f32 %v2186_v50, 0.0  ;;  %v2063_v12 = vmul.f32 %v4891_v37, %v4617_v36  ;;  %2313 = vst.msk [vmem:[%s5423_s5 + $0x58] sm:$0xff] %vm2301_vm5, %v2248_v19 }
 0x430   :  { %v2127_v32 = vmul.f32 %v4898_v56, %v2059_v1  ;;  %v2191_v33 = vadd.f32 %v4904_v4, %v2123_v6  ;;  %v2251_v11 = vmax.f32 %v2187_v57, 0.0  ;;  %v2064_v15 = vmul.f32 %v4891_v37, %v4625_v20  ;;  %2314 = vst.msk [vmem:[%s5423_s5 + $0x60] sm:$0xff] %vm2301_vm5, %v2249_v30 }
 0x431   :  { %v2128_v26 = vmul.f32 %v4898_v56, %v2060_v18  ;;  %v2192_v7 = vadd.f32 %v4904_v4, %v2124_v3  ;;  %v2252_v44 = vmax.f32 %v2188_v55, 0.0  ;;  %v2065_v36 = vmul.f32 %v4891_v37, %v4651_v39  ;;  %2315 = vst.msk [vmem:[%s5423_s5 + $0x68] sm:$0xff] %vm2301_vm5, %v2250_v46 }
 0x432   :  { %v2129_v38 = vmul.f32 %v4898_v56, %v2061_v24  ;;  %v2193_v22 = vadd.f32 %v4904_v4, %v2125_v59  ;;  %v2253_v54 = vmax.f32 %v2189_v48, 0.0  ;;  %v2066_v20 = vmul.f32 %v4891_v37, %v4641_v47  ;;  %2316 = vst.msk [vmem:[%s5423_s5 + $0x70] sm:$0xff] %vm2301_vm5, %v2251_v11  ;;  %v5560_v47 = vld [vmem:[#allocation2_spill] sm:$0xff] }
 0x433   :  { %v2130_v49 = vmul.f32 %v4898_v56, %v2062_v63  ;;  %v2194_v61 = vadd.f32 %v4904_v4, %v2126_v0  ;;  %v2254_v9 = vmax.f32 %v2190_v45, 0.0  ;;  %v2067_v39 = vmul.f32 %v4891_v37, %v4621_v58  ;;  %2317 = vst.msk [vmem:[%s5423_s5 + $0x78] sm:$0xff] %vm2301_vm5, %v2252_v44 }
 0x434   :  { %v2131_v8 = vmul.f32 %v4898_v56, %v2063_v12  ;;  %v2195_v60 = vadd.f32 %v4904_v4, %v2127_v32  ;;  %v2255_v43 = vmax.f32 %v2191_v33, 0.0  ;;  %v2068_v28 = vmul.f32 %v4891_v37, %v5560_v47  ;;  %2318 = vst.msk [vmem:[%s5423_s5 + $0x80] sm:$0xff] %vm2301_vm5, %v2253_v54 }
 0x435   :  { %v2132_v27 = vmul.f32 %v4898_v56, %v2064_v15  ;;  %v2196_v41 = vadd.f32 %v4904_v4, %v2128_v26  ;;  %v2256_v51 = vmax.f32 %v2192_v7, 0.0  ;;  %v2069_v58 = vmul.f32 %v4891_v37, %v4857_v14  ;;  %2319 = vst.msk [vmem:[%s5423_s5 + $0x88] sm:$0xff] %vm2301_vm5, %v2254_v9 }
 0x436   :  { %v2133_v17 = vmul.f32 %v4898_v56, %v2065_v36  ;;  %v2197_v50 = vadd.f32 %v4904_v4, %v2129_v38  ;;  %v2257_v62 = vmax.f32 %v2193_v22, 0.0  ;;  %v2070_v1 = vmul.f32 %v4891_v37, %v4841_v35  ;;  %2320 = vst.msk [vmem:[%s5423_s5 + $0x90] sm:$0xff] %vm2301_vm5, %v2255_v43 }
 0x437   :  { %v2134_v6 = vmul.f32 %v4898_v56, %v2066_v20  ;;  %v2198_v57 = vadd.f32 %v4904_v4, %v2130_v49  ;;  %v2258_v29 = vmax.f32 %v2194_v61, 0.0  ;;  %v2071_v14 = vmul.f32 %v4891_v37, %v4825_v52  ;;  %2321 = vst.msk [vmem:[%s5423_s5 + $0x98] sm:$0xff] %vm2301_vm5, %v2256_v51 }
 0x438   :  { %v2135_v18 = vmul.f32 %v4898_v56, %v2067_v39  ;;  %v2199_v3 = vadd.f32 %v4904_v4, %v2131_v8  ;;  %v2259_v55 = vmax.f32 %v2195_v60, 0.0  ;;  %v2072_v35 = vmul.f32 %v4891_v37, %v4809_v5  ;;  %2322 = vst.msk [vmem:[%s5423_s5 + $0xa0] sm:$0xff] %vm2301_vm5, %v2257_v62 }
 0x439   :  { %v2136_v19 = vmul.f32 %v4898_v56, %v2068_v28  ;;  %v2200_v24 = vadd.f32 %v4904_v4, %v2132_v27  ;;  %v2260_v59 = vmax.f32 %v2196_v41, 0.0  ;;  %v2073_v52 = vmul.f32 %v4891_v37, %v4793_v16  ;;  %2323 = vst.msk [vmem:[%s5423_s5 + $0xa8] sm:$0xff] %vm2301_vm5, %v2258_v29 }
 0x43a   :  { %v2137_v48 = vmul.f32 %v4898_v56, %v2069_v58  ;;  %v2201_v30 = vadd.f32 %v4904_v4, %v2133_v17  ;;  %v2261_v63 = vmax.f32 %v2197_v50, 0.0  ;;  %v2074_v5 = vmul.f32 %v4891_v37, %v4777_v34  ;;  %2324 = vst.msk [vmem:[%s5423_s5 + $0xb0] sm:$0xff] %vm2301_vm5, %v2259_v55 }
 0x43b   :  { %v2138_v0 = vmul.f32 %v4898_v56, %v2070_v1  ;;  %v2202_v45 = vadd.f32 %v4904_v4, %v2134_v6  ;;  %v2262_v46 = vmax.f32 %v2198_v57, 0.0  ;;  %v2075_v16 = vmul.f32 %v4891_v37, %v4761_v10  ;;  %2325 = vst.msk [vmem:[%s5423_s5 + $0xb8] sm:$0xff] %vm2301_vm5, %v2260_v59  ;;  %v5564_v59 = vld [vmem:[#allocation15_spill] sm:$0xff] }
 0x43c   :  { %v2139_v12 = vmul.f32 %v4898_v56, %v2071_v14  ;;  %v2203_v32 = vadd.f32 %v4904_v4, %v2135_v18  ;;  %v2263_v33 = vmax.f32 %v2199_v3, 0.0  ;;  %v2076_v34 = vmul.f32 %v4891_v37, %v4745_v42  ;;  %2326 = vst.msk [vmem:[%s5423_s5 + $0xc0] sm:$0xff] %vm2301_vm5, %v2261_v63  ;;  %v5563_v3 = vld [vmem:[#allocation16_spill] sm:$0xff] }
 0x43d   :  { %v2140_v11 = vmul.f32 %v4898_v56, %v2072_v35  ;;  %v2204_v15 = vadd.f32 %v4904_v4, %v2136_v19  ;;  %v2264_v26 = vmax.f32 %v2200_v24, 0.0  ;;  %v2077_v10 = vmul.f32 %v4891_v37, %v4729_v31  ;;  %2327 = vst.msk [vmem:[%s5423_s5 + $0xc8] sm:$0xff] %vm2301_vm5, %v2262_v46 }
 0x43e   :  { %v2141_v7 = vmul.f32 %v4898_v56, %v2073_v52  ;;  %v2205_v44 = vadd.f32 %v4904_v4, %v2137_v48  ;;  %v2265_v36 = vmax.f32 %v2201_v30, 0.0  ;;  %v2078_v42 = vmul.f32 %v4891_v37, %v4713_v13  ;;  %2328 = vst.msk [vmem:[%s5423_s5 + $0xd0] sm:$0xff] %vm2301_vm5, %v2263_v33 }
 0x43f   :  { %v2142_v38 = vmul.f32 %v4898_v56, %v2074_v5  ;;  %v2206_v22 = vadd.f32 %v4904_v4, %v2138_v0  ;;  %v2266_v54 = vmax.f32 %v2202_v45, 0.0  ;;  %v2079_v31 = vmul.f32 %v4891_v37, %v4697_v53  ;;  %2329 = vst.msk [vmem:[%s5423_s5 + $0xd8] sm:$0xff] %vm2301_vm5, %v2264_v26  ;;  %v5565_v5 = vld [vmem:[#allocation20_spill] sm:$0xff] }
 0x440   :  { %v2143_v20 = vmul.f32 %v4898_v56, %v2075_v16  ;;  %v2207_v49 = vadd.f32 %v4904_v4, %v2139_v12  ;;  %v2267_v61 = vmax.f32 %v2203_v32, 0.0  ;;  %v2080_v13 = vmul.f32 %v4891_v37, %v4681_v25  ;;  %2330 = vst.msk [vmem:[%s5423_s5 + $0xe0] sm:$0xff] %vm2301_vm5, %v2265_v36  ;;  %v5566_v12 = vld [vmem:[#allocation14_spill] sm:$0xff]  ;;  %v5568_v36 = vld [vmem:[#allocation8_spill] sm:$0xff] }
 0x441   :  { %v2144_v9 = vmul.f32 %v4898_v56, %v2076_v34  ;;  %v2208_v39 = vadd.f32 %v4904_v4, %v2140_v11  ;;  %v2268_v8 = vmax.f32 %v2204_v15, 0.0  ;;  %v2081_v53 = vmul.f32 %v4891_v37, %v4665_v2  ;;  %2331 = vst.msk [vmem:[%s5423_s5 + $0xe8] sm:$0xff] %vm2301_vm5, %v2266_v54  ;;  %v5567_v15 = vld [vmem:[#allocation7_spill] sm:$0xff] }
 0x442   :  { %v2145_v60 = vmul.f32 %v4898_v56, %v2077_v10  ;;  %v2209_v43 = vadd.f32 %v4904_v4, %v2141_v7  ;;  %v2269_v47 = vmax.f32 %v2205_v44, 0.0  ;;  %v2082_v25 = vmul.f32 %v4891_v37, %v4655_v40  ;;  %2332 = vst.msk [vmem:[%s5423_s5 + $0xf0] sm:$0xff] %vm2301_vm5, %v2267_v61  ;;  %v5561_v40 = vld [vmem:[#allocation3_spill] sm:$0xff] }
 0x443   :  { %v2146_v28 = vmul.f32 %v4898_v56, %v2078_v42  ;;  %v2210_v27 = vadd.f32 %v4904_v4, %v2142_v38  ;;  %v2270_v41 = vmax.f32 %v2206_v22, 0.0  ;;  %v2083_v2 = vmul.f32 %v4891_v37, %v4629_v23  ;;  %2333 = vst.msk [vmem:[%s5423_s5 + $0xf8] sm:$0xff] %vm2301_vm5, %v2268_v8  ;;  %v5562_v23 = vld [vmem:[#allocation17_spill] sm:$0xff] }
 0x444   :  { %v2147_v51 = vmul.f32 %v4898_v56, %v2079_v31  ;;  %v2211_v58 = vadd.f32 %v4904_v4, %v2143_v20  ;;  %v2271_v17 = vmax.f32 %v2207_v49, 0.0  ;;  %v2084_v50 = vmul.f32 %v4891_v37, %v5561_v40  ;;  %2334 = vst.msk [vmem:[%s5423_s5 + $0x100] sm:$0xff] %vm2301_vm5, %v2269_v47  ;;  %v5569_v31 = vld [vmem:[#allocation9_spill] sm:$0xff] }
 0x445   :  { %v2148_v62 = vmul.f32 %v4898_v56, %v2080_v13  ;;  %v2212_v1 = vadd.f32 %v4904_v4, %v2144_v9  ;;  %v2272_v6 = vmax.f32 %v2208_v39, 0.0  ;;  %v2085_v57 = vmul.f32 %v4891_v37, %v5562_v23  ;;  %2335 = vst.msk [vmem:[%s5423_s5 + $0x108] sm:$0xff] %vm2301_vm5, %v2270_v41  ;;  %v5570_v9 = vld [vmem:[#allocation10_spill] sm:$0xff]  ;;  %v5572_v41 = vld [vmem:[#allocation12_spill] sm:$0xff]  ;;  %v5573_v40 = vld [vmem:[#allocation13_spill] sm:$0xff] }
 0x446   :  { %v2149_v29 = vmul.f32 %v4898_v56, %v2081_v53  ;;  %v2213_v14 = vadd.f32 %v4904_v4, %v2145_v60  ;;  %v2273_v18 = vmax.f32 %v2209_v43, 0.0  ;;  %v2086_v55 = vmul.f32 %v4891_v37, %v5563_v3  ;;  %2336 = vst.msk [vmem:[%s5423_s5 + $0x110] sm:$0xff] %vm2301_vm5, %v2271_v17  ;;  %v5571_v43 = vld [vmem:[#allocation11_spill] sm:$0xff]  ;;  %v5574_v23 = vld [vmem:[#allocation6_spill] sm:$0xff]  ;;  %v5575_v3 = vld [vmem:[#allocation5_spill] sm:$0xff] }
 0x447   :  { %v2150_v35 = vmul.f32 %v4898_v56, %v2082_v25  ;;  %v2214_v19 = vadd.f32 %v4904_v4, %v2146_v28  ;;  %v2274_v24 = vmax.f32 %v2210_v27, 0.0  ;;  %v2087_v52 = vmul.f32 %v4891_v37, %v5564_v59  ;;  %2337 = vst.msk [vmem:[%s5423_s5 + $0x118] sm:$0xff] %vm2301_vm5, %v2272_v6  ;;  %v5576_v59 = vld [vmem:[#allocation4_spill] sm:$0xff] }
 0x448   :  { %v2151_v48 = vmul.f32 %v4898_v56, %v2083_v2  ;;  %v2215_v30 = vadd.f32 %v4904_v4, %v2147_v51  ;;  %v2275_v63 = vmax.f32 %v2211_v58, 0.0  ;;  %v2088_v0 = vmul.f32 %v4891_v37, %v5565_v5  ;;  %2338 = vst.msk [vmem:[%s5423_s5 + $0x120] sm:$0xff] %vm2301_vm5, %v2273_v18 }
 0x449   :  { %v2152_v45 = vmul.f32 %v4898_v56, %v2084_v50  ;;  %v2216_v46 = vadd.f32 %v4904_v4, %v2148_v62  ;;  %v2276_v16 = vmax.f32 %v2212_v1, 0.0  ;;  %v2089_v32 = vmul.f32 %v4891_v37, %v5566_v12  ;;  %2339 = vst.msk [vmem:[%s5423_s5 + $0x128] sm:$0xff] %vm2301_vm5, %v2274_v24 }
 0x44a   :  { %v2153_v33 = vmul.f32 %v4898_v56, %v2085_v57  ;;  %v2217_v34 = vadd.f32 %v4904_v4, %v2149_v29  ;;  %v2277_v11 = vmax.f32 %v2213_v14, 0.0  ;;  %v2090_v26 = vmul.f32 %v4891_v37, %v5567_v15  ;;  %2340 = vst.msk [vmem:[%s5423_s5 + $0x130] sm:$0xff] %vm2301_vm5, %v2275_v63 }
 0x44b   :  { %v2154_v10 = vmul.f32 %v4898_v56, %v2086_v55  ;;  %v2218_v7 = vadd.f32 %v4904_v4, %v2150_v35  ;;  %v2278_v44 = vmax.f32 %v2214_v19, 0.0  ;;  %v2091_v42 = vmul.f32 %v4891_v37, %v5568_v36  ;;  %2341 = vst.msk [vmem:[%s5423_s5 + $0x138] sm:$0xff] %vm2301_vm5, %v2276_v16 }
 0x44c   :  { %v2155_v38 = vmul.f32 %v4898_v56, %v2087_v52  ;;  %v2219_v22 = vadd.f32 %v4904_v4, %v2151_v48  ;;  %v2279_v54 = vmax.f32 %v2215_v30, 0.0  ;;  %v2092_v20 = vmul.f32 %v4891_v37, %v5569_v31  ;;  %2342 = vst.msk [vmem:[%s5423_s5 + $0x140] sm:$0xff] %vm2301_vm5, %v2277_v11 }
 0x44d   :  { %v2156_v49 = vmul.f32 %v4898_v56, %v2088_v0  ;;  %v2220_v61 = vadd.f32 %v4904_v4, %v2152_v45  ;;  %v2280_v13 = vmax.f32 %v2216_v46, 0.0  ;;  %v2093_v39 = vmul.f32 %v4891_v37, %v5570_v9  ;;  %2343 = vst.msk [vmem:[%s5423_s5 + $0x148] sm:$0xff] %vm2301_vm5, %v2278_v44 }
 0x44e   :  { %v2157_v8 = vmul.f32 %v4898_v56, %v2089_v32  ;;  %v2221_v53 = vadd.f32 %v4904_v4, %v2153_v33  ;;  %v2281_v60 = vmax.f32 %v2217_v34, 0.0  ;;  %v2094_v47 = vmul.f32 %v4891_v37, %v5571_v43  ;;  %2344 = vst.msk [vmem:[%s5423_s5 + $0x150] sm:$0xff] %vm2301_vm5, %v2279_v54 }
 0x44f   :  { %v2158_v25 = vmul.f32 %v4898_v56, %v2090_v26  ;;  %v2222_v28 = vadd.f32 %v4904_v4, %v2154_v10  ;;  %v2282_v27 = vmax.f32 %v2218_v7, 0.0  ;;  %v2095_v2 = vmul.f32 %v4891_v37, %v5572_v41  ;;  %2345 = vst.msk [vmem:[%s5423_s5 + $0x158] sm:$0xff] %vm2301_vm5, %v2280_v13 }
 0x450   :  { %v2159_v51 = vmul.f32 %v4898_v56, %v2091_v42  ;;  %v2223_v58 = vadd.f32 %v4904_v4, %v2155_v38  ;;  %v2283_v17 = vmax.f32 %v2219_v22, 0.0  ;;  %v2096_v50 = vmul.f32 %v4891_v37, %v5573_v40  ;;  %2346 = vst.msk [vmem:[%s5423_s5 + $0x160] sm:$0xff] %vm2301_vm5, %v2281_v60 }
 0x451   :  { %v2160_v62 = vmul.f32 %v4898_v56, %v2092_v20  ;;  %v2224_v1 = vadd.f32 %v4904_v4, %v2156_v49  ;;  %v2284_v6 = vmax.f32 %v2220_v61, 0.0  ;;  %v2097_v57 = vmul.f32 %v4891_v37, %v5574_v23  ;;  %2347 = vst.msk [vmem:[%s5423_s5 + $0x168] sm:$0xff] %vm2301_vm5, %v2282_v27 }
 0x452   :  { %v2161_v29 = vmul.f32 %v4898_v56, %v2093_v39  ;;  %v2225_v14 = vadd.f32 %v4904_v4, %v2157_v8  ;;  %v2285_v18 = vmax.f32 %v2221_v53, 0.0  ;;  %v2098_v55 = vmul.f32 %v4891_v37, %v5575_v3  ;;  %2348 = vst.msk [vmem:[%s5423_s5 + $0x170] sm:$0xff] %vm2301_vm5, %v2283_v17 }
 0x453   :  { %v2162_v35 = vmul.f32 %v4898_v56, %v2094_v47  ;;  %v2226_v19 = vadd.f32 %v4904_v4, %v2158_v25  ;;  %v2286_v24 = vmax.f32 %v2222_v28, 0.0  ;;  %v2099_v52 = vmul.f32 %v4891_v37, %v5576_v59  ;;  %2349 = vst.msk [vmem:[%s5423_s5 + $0x178] sm:$0xff] %vm2301_vm5, %v2284_v6 }
 0x454   :  { %v2163_v48 = vmul.f32 %v4898_v56, %v2095_v2  ;;  %v2227_v30 = vadd.f32 %v4904_v4, %v2159_v51  ;;  %v2287_v63 = vmax.f32 %v2223_v58, 0.0  ;;  %v2164_v5 = vmul.f32 %v4898_v56, %v2096_v50  ;;  %2350 = vst.msk [vmem:[%s5423_s5 + $0x180] sm:$0xff] %vm2301_vm5, %v2285_v18 }
 0x455   :  { %v2228_v0 = vadd.f32 %v4904_v4, %v2160_v62  ;;  %v2288_v45 = vmax.f32 %v2224_v1, 0.0  ;;  %v2165_v37 = vmul.f32 %v4898_v56, %v2097_v57  ;;  %v2229_v46 = vadd.f32 %v4904_v4, %v2161_v29  ;;  %2351 = vst.msk [vmem:[%s5423_s5 + $0x188] sm:$0xff] %vm2301_vm5, %v2286_v24 }
 0x456   :  { %v2289_v16 = vmax.f32 %v2225_v14, 0.0  ;;  %v2166_v12 = vmul.f32 %v4898_v56, %v2098_v55  ;;  %v2230_v32 = vadd.f32 %v4904_v4, %v2162_v35  ;;  %v2290_v33 = vmax.f32 %v2226_v19, 0.0  ;;  %2352 = vst.msk [vmem:[%s5423_s5 + $0x190] sm:$0xff] %vm2301_vm5, %v2287_v63 }
 0x457   :  { %v2167_v34 = vmul.f32 %v4898_v56, %v2099_v52  ;;  %v2231_v11 = vadd.f32 %v4904_v4, %v2163_v48  ;;  %v2291_v15 = vmax.f32 %v2227_v30, 0.0  ;;  %v2232_v26 = vadd.f32 %v4904_v4, %v2164_v5  ;;  %2353 = vst.msk [vmem:[%s5423_s5 + $0x198] sm:$0xff] %vm2301_vm5, %v2288_v45 }
 0x458   :  { %v2292_v10 = vmax.f32 %v2228_v0, 0.0  ;;  %v2233_v7 = vadd.f32 %v4904_v4, %v2165_v37  ;;  %v2293_v44 = vmax.f32 %v2229_v46, 0.0  ;;  %2354 = vst.msk [vmem:[%s5423_s5 + $0x1a0] sm:$0xff] %vm2301_vm5, %v2289_v16  ;;  %v2234_v56 = vadd.f32 %v4904_v4, %v2166_v12 }
 0x459   :  { %v2294_v36 = vmax.f32 %v2230_v32, 0.0  ;;  %2355 = vst.msk [vmem:[%s5423_s5 + $0x1a8] sm:$0xff] %vm2301_vm5, %v2290_v33  ;;  %v2235_v42 = vadd.f32 %v4904_v4, %v2167_v34  ;;  %v2295_v38 = vmax.f32 %v2231_v11, 0.0  ;;  %v2296_v22 = vmax.f32 %v2232_v26, 0.0 }
 0x45a   :  { %2356 = vst.msk [vmem:[%s5423_s5 + $0x1b0] sm:$0xff] %vm2301_vm5, %v2291_v15  ;;  %v2297_v54 = vmax.f32 %v2233_v7, 0.0  ;;  %v2298_v31 = vmax.f32 %v2234_v56, 0.0  ;;  %v2300_v20 = vmax.f32 %v4907_v21, 0.0 }
 0x45b   :  { %2357 = vst.msk [vmem:[%s5423_s5 + $0x1b8] sm:$0xff] %vm2301_vm5, %v2292_v10  ;;  %v2299_v4 = vmax.f32 %v2235_v42, 0.0 }
 0x45c   :  { %2358 = vst.msk [vmem:[%s5423_s5 + $0x1c0] sm:$0xff] %vm2301_vm5, %v2293_v44 }
 0x45d   :  { %2359 = vst.msk [vmem:[%s5423_s5 + $0x1c8] sm:$0xff] %vm2301_vm5, %v2294_v36 }
 0x45e   :  { %2360 = vst.msk [vmem:[%s5423_s5 + $0x1d0] sm:$0xff] %vm2301_vm5, %v2295_v38 }
 0x45f   :  { %2361 = vst.msk [vmem:[%s5423_s5 + $0x1d8] sm:$0xff] %vm2301_vm5, %v2296_v22 }
 0x460   :  { %2362 = vst.msk [vmem:[%s5423_s5 + $0x1e0] sm:$0xff] %vm2301_vm5, %v2297_v54 }
 0x461   :  { %2363 = vst.msk [vmem:[%s5423_s5 + $0x1e8] sm:$0xff] %vm2301_vm5, %v2298_v31 }
 0x462   :  { %2364 = vst.msk [vmem:[%s5423_s5 + $0x1f0] sm:$0xff] %vm2301_vm5, %v2299_v4 }
 0x463   :  { %2365 = vst.msk [vmem:[%s5423_s5 + $0x1f8] sm:$0xff] %vm2301_vm5, %v2300_v20 }

// kernel: feat2net_forward.34
= control target key start
LH: loop header
LB: loop body
LE: loop exit
PB: predicated region body
PF: predicated region fallthrough
CT: control target
= control target key end

     0   :  { %vm185_vm0 = vcmask 130048   ;;  %vm467_vm4 = vcmask 261120   ;;  %s940_s1 = inlined_call_operand.vmem [shape: bf16[144,32], index: 1, kind: input, shape index: {}]   ;;  %s941_s0 = inlined_call_operand.vmem [shape: bf16[128,144], index: 0, kind: input, shape index: {}]   ;;  %s942_s2 = inlined_call_operand.vmem [shape: f32[1,32], index: 2, kind: input, shape index: {}]   ;;  %s943_s3 = inlined_call_operand.vmem [shape: f32[1,32], index: 3, kind: input, shape index: {}]   ;;  %s944_s4 = inlined_call_operand.vmem [shape: f32[1,32], index: 4, kind: input, shape index: {}]   ;;  %s945_s5 = inlined_call_operand.vmem [shape: f32[128,32], index: 5, kind: output, shape index: {}]  }
   0x1   :  { %v619_v0 = vld [vmem:[%s940_s1 + $0x38] sm:$0xff]  ;;  %v620_v1 = vld [vmem:[%s940_s1 + $0x40] sm:$0xff]  ;;  %v492_v3 = vld [vmem:[%s941_s0 + $0x8] sm:$0xf0] }
   0x2   :  { %v596_v2 = vld [vmem:[%s941_s0 + $0x4] sm:$0xf]  ;;  %210 = vmatpush.bf16.msra.mxu0 %v619_v0  ;;  %621 = vmatpush.bf16.msra.mxu2 %v619_v0  ;;  %v618_v5 = vld [vmem:[%s940_s1 + $0x30] sm:$0xff]  ;;  %v617_v6 = vld [vmem:[%s940_s1 + $0x28] sm:$0xff] }
   0x3   :  { %v495_v4 = vor.u32 %v596_v2, %v492_v3  ;;  %266 = vmatpush.bf16.msra.mxu1 %v620_v1  ;;  %629 = vmatpush.bf16.msra.mxu3 %v620_v1  ;;  %v616_v7 = vld [vmem:[%s940_s1 + $0x20] sm:$0xff]  ;;  %v615_v8 = vld [vmem:[%s940_s1 + $0x18] sm:$0xff]  ;;  %v598_v9 = vld [vmem:[%s941_s0 + $0x14] sm:$0xf] }
   0x4   :  { %v500_v10 = vld [vmem:[%s941_s0 + $0x18] sm:$0xf0]  ;;  %v614_v12 = vld [vmem:[%s940_s1 + $0x10] sm:$0xff]  ;;  %v613_v13 = vld [vmem:[%s940_s1 + $0x8] sm:$0xff] }
   0x5   :  { %v503_v11 = vor.u32 %v598_v9, %v500_v10  ;;  %v608_v14 = vld [vmem:[%s941_s0 + $0x64] sm:$0xf]  ;;  %v540_v15 = vld [vmem:[%s941_s0 + $0x68] sm:$0xf0]  ;;  %v490_v18 = vld [vmem:[%s941_s0] sm:$0xf] }
   0x6   :  { %588 = vmatmul.msk.bf16.vlgmr.msra.gmra.mxu1 %vm185_vm0, %v495_v4  ;;  %211 = vmatpush.bf16.msra.mxu0 %v618_v5  ;;  %v543_v16 = vor.u32 %v608_v14, %v540_v15  ;;  %v612_v17 = vld [vmem:[%s940_s1] sm:$0xff]  ;;  %v597_v19 = vld [vmem:[%s941_s0 + $0x4] sm:$0xf0]  ;;  %v508_v25 = vld [vmem:[%s941_s0 + $0x28] sm:$0xf0] }
   0x7   :  { %622 = vmatpush.bf16.msra.mxu2 %v618_v5  ;;  %v522_v20 = vld [vmem:[%s941_s0 + $0x40] sm:$0xf]  ;;  %v605_v21 = vld [vmem:[%s941_s0 + $0x44] sm:$0xf0]  ;;  %v491_v22 = vor.u32 %v597_v19, %v490_v18  ;;  %v600_v24 = vld [vmem:[%s941_s0 + $0x24] sm:$0xf] }
   0x8   :  { %594 = vmatmul.msk.bf16.vlgmr.msra.gmra.mxu3 %vm185_vm0, %v543_v16  ;;  %v523_v23 = vor.u32 %v605_v21, %v522_v20  ;;  %v511_v26 = vor.u32 %v600_v24, %v508_v25  ;;  %v610_v27 = vld [vmem:[%s941_s0 + $0x74] sm:$0xf]  ;;  %v548_v28 = vld [vmem:[%s941_s0 + $0x78] sm:$0xf0]  ;;  %v498_v30 = vld [vmem:[%s941_s0 + $0x10] sm:$0xf] }
   0x9   :  { %v551_v29 = vor.u32 %v610_v27, %v548_v28  ;;  %v599_v31 = vld [vmem:[%s941_s0 + $0x14] sm:$0xf0]  ;;  %v530_v32 = vld [vmem:[%s941_s0 + $0x50] sm:$0xf]  ;;  %v602_v36 = vld [vmem:[%s941_s0 + $0x34] sm:$0xf] }
   0xa   :  { %212 = vmatpush.bf16.msra.mxu0 %v617_v6  ;;  %v607_v33 = vld [vmem:[%s941_s0 + $0x54] sm:$0xf0]  ;;  %v499_v34 = vor.u32 %v599_v31, %v498_v30  ;;  %v516_v37 = vld [vmem:[%s941_s0 + $0x38] sm:$0xf0]  ;;  %v506_v39 = vld [vmem:[%s941_s0 + $0x20] sm:$0xf] }
   0xb   :  { %623 = vmatpush.bf16.msra.mxu2 %v617_v6  ;;  %v531_v35 = vor.u32 %v607_v33, %v530_v32  ;;  %v519_v38 = vor.u32 %v602_v36, %v516_v37  ;;  %v601_v40 = vld [vmem:[%s941_s0 + $0x24] sm:$0xf0]  ;;  %v538_v41 = vld [vmem:[%s941_s0 + $0x60] sm:$0xf]  ;;  %v604_v45 = vld [vmem:[%s941_s0 + $0x44] sm:$0xf] }
   0xc   :  { %v609_v42 = vld [vmem:[%s941_s0 + $0x64] sm:$0xf0]  ;;  %v507_v43 = vor.u32 %v601_v40, %v506_v39  ;;  %v524_v46 = vld [vmem:[%s941_s0 + $0x48] sm:$0xf0]  ;;  %v514_v48 = vld [vmem:[%s941_s0 + $0x30] sm:$0xf] }
   0xd   :  { %v539_v44 = vor.u32 %v609_v42, %v538_v41  ;;  %v527_v47 = vor.u32 %v604_v45, %v524_v46  ;;  %v603_v49 = vld [vmem:[%s941_s0 + $0x34] sm:$0xf0]  ;;  %v546_v50 = vld [vmem:[%s941_s0 + $0x70] sm:$0xf]  ;;  %v606_v54 = vld [vmem:[%s941_s0 + $0x54] sm:$0xf] }
   0xe   :  { %213 = vmatpush.bf16.msra.mxu0 %v616_v7  ;;  %v611_v51 = vld [vmem:[%s941_s0 + $0x74] sm:$0xf0]  ;;  %v515_v52 = vor.u32 %v603_v49, %v514_v48  ;;  %v532_v55 = vld [vmem:[%s941_s0 + $0x58] sm:$0xf0]  ;;  %v807_v61 = vld [vmem:[%s942_s2] ss:$0 sm:$0xff] }
   0xf   :  { %624 = vmatpush.bf16.msra.mxu2 %v616_v7  ;;  %v547_v53 = vor.u32 %v611_v51, %v546_v50  ;;  %v535_v56 = vor.u32 %v606_v54, %v532_v55 }
  0x12   :  { %214 = vmatpush.bf16.msra.mxu0 %v615_v8 }
  0x13   :  { %625 = vmatpush.bf16.msra.mxu2 %v615_v8 }
  0x16   :  { %589 = vmatmul.msk.bf16.gmra.mxu1 %vm185_vm0, %v503_v11  ;;  %215 = vmatpush.bf16.msra.mxu0 %v614_v12 }
  0x17   :  { %626 = vmatpush.bf16.msra.mxu2 %v614_v12 }
  0x18   :  { %595 = vmatmul.msk.bf16.gmra.mxu3 %vm185_vm0, %v551_v29 }
  0x1a   :  { %216 = vmatpush.bf16.msra.mxu0 %v613_v13 }
  0x1b   :  { %627 = vmatpush.bf16.msra.mxu2 %v613_v13 }
  0x1e   :  { %217 = vmatpush.bf16.msra.mxu0 %v612_v17 }
  0x1f   :  { %628 = vmatpush.bf16.msra.mxu2 %v612_v17 }
  0x21   :  { %218 = vmatmul.bf16.vlgmr.msra.gmra.mxu0 %v491_v22 }
  0x22   :  { %238 = vmatmul.bf16.vlgmr.msra.gmra.mxu2 %v523_v23 }
  0x26   :  { %590 = vmatmul.msk.bf16.gmra.mxu1 %vm185_vm0, %v511_v26 }
  0x31   :  { %223 = vmatmul.bf16.gmra.mxu0 %v499_v34 }
  0x32   :  { %243 = vmatmul.bf16.gmra.mxu2 %v531_v35 }
  0x36   :  { %591 = vmatmul.msk.bf16.gmra.mxu1 %vm185_vm0, %v519_v38 }
  0x41   :  { %228 = vmatmul.bf16.gmra.mxu0 %v507_v43 }
  0x42   :  { %248 = vmatmul.bf16.gmra.mxu2 %v539_v44 }
  0x46   :  { %592 = vmatmul.msk.bf16.gmra.mxu1 %vm185_vm0, %v527_v47 }
  0x51   :  { %233 = vmatmul.bf16.gmra.mxu0 %v515_v52 }
  0x52   :  { %253 = vmatmul.bf16.gmra.mxu2 %v547_v53 }
  0x56   :  { %593 = vmatmul.msk.bf16.gmra.mxu1 %vm185_vm0, %v535_v56 }
  0x83   :  { %v268_v57 = vpop.f32.mrf.mxu1 }
  0x8b   :  { %v798_v58 = vpop.f32.mrf.mxu1  ;;  %v298_v11 = vpop.f32.mrf.mxu3 }
  0x93   :  { %v800_v59 = vpop.f32.mrf.mxu1  ;;  %v300_v15 = vpop.f32.mrf.mxu3 }
  0x9b   :  { %v802_v60 = vpop.f32.mrf.mxu1  ;;  %v303_v19 = vpop.f32.mrf.mxu3 }
  0x9e   :  { %v219_v62 = vpop.f32.mrf.mxu0 }
  0x9f   :  { %v220_v63 = vadd.f32 %v807_v61, %v219_v62  ;;  %v636_v62 = vmov 1.0  }
  0xa1   :  { %v810_v0 = vadd.f32 %v268_v57, %v220_v63 }
  0xa3   :  { %v812_v1 = vpop.f32.mrf.mxu1  ;;  %v305_v27 = vpop.f32.mrf.mxu3 }
  0xa5   :  { %v239_v2 = vpop.f32.mrf.mxu2 }
  0xa6   :  { %v221_v4 = vpop.f32.mrf.mxu0  ;;  %v240_v41 = vadd.f32 %v807_v61, %v239_v2 }
  0xa7   :  { %v222_v54 = vadd.f32 %v807_v61, %v221_v4 }
  0xa9   :  { %v271_v57 = vadd.f32 %v798_v58, %v222_v54 }
  0xab   :  { %v280_v3 = vpop.f32.mrf.mxu1 }
  0xad   :  { %v241_v5 = vpop.f32.mrf.mxu2 }
  0xae   :  { %v224_v8 = vpop.f32.mrf.mxu0  ;;  %v242_v39 = vadd.f32 %v807_v61, %v241_v5 }
  0xaf   :  { %v225_v52 = vadd.f32 %v807_v61, %v224_v8 }
  0xb1   :  { %v274_v56 = vadd.f32 %v800_v59, %v225_v52  ;;  %v633_v52 = vld [vmem:[%s944_s4] ss:$0 sm:$0xff] }
  0xb3   :  { %v283_v6 = vpop.f32.mrf.mxu1 }
  0xb5   :  { %v244_v7 = vpop.f32.mrf.mxu2 }
  0xb6   :  { %v226_v12 = vpop.f32.mrf.mxu0  ;;  %v245_v36 = vadd.f32 %v807_v61, %v244_v7 }
  0xb7   :  { %v227_v50 = vadd.f32 %v807_v61, %v226_v12 }
  0xb9   :  { %v276_v55 = vadd.f32 %v802_v60, %v227_v50 }
  0xbb   :  { %v285_v9 = vpop.f32.mrf.mxu1 }
  0xbd   :  { %v246_v10 = vpop.f32.mrf.mxu2 }
  0xbe   :  { %v229_v16 = vpop.f32.mrf.mxu0  ;;  %v247_v34 = vadd.f32 %v807_v61, %v246_v10 }
  0xbf   :  { %v230_v48 = vadd.f32 %v807_v61, %v229_v16 }
  0xc1   :  { %v279_v53 = vadd.f32 %v812_v1, %v230_v48 }
  0xc3   :  { %v288_v14 = vpop.f32.mrf.mxu1 }
  0xc4   :  { %v289_v44 = vadd.f32 %v288_v14, %v240_v41 }
  0xc5   :  { %v249_v13 = vpop.f32.mrf.mxu2 }
  0xc6   :  { %v231_v20 = vpop.f32.mrf.mxu0  ;;  %v250_v30 = vadd.f32 %v807_v61, %v249_v13 }
  0xc7   :  { %v232_v46 = vadd.f32 %v807_v61, %v231_v20 }
  0xc8   :  { %v299_v35 = vadd.f32 %v298_v11, %v250_v30 }
  0xc9   :  { %v281_v51 = vadd.f32 %v280_v3, %v232_v46 }
  0xcb   :  { %v290_v18 = vpop.f32.mrf.mxu1 }
  0xcc   :  { %v291_v42 = vadd.f32 %v290_v18, %v242_v39 }
  0xcd   :  { %v251_v17 = vpop.f32.mrf.mxu2 }
  0xce   :  { %v234_v26 = vpop.f32.mrf.mxu0  ;;  %v252_v28 = vadd.f32 %v807_v61, %v251_v17 }
  0xcf   :  { %v235_v45 = vadd.f32 %v807_v61, %v234_v26 }
  0xd0   :  { %v301_v32 = vadd.f32 %v300_v15, %v252_v28 }
  0xd1   :  { %v284_v49 = vadd.f32 %v283_v6, %v235_v45 }
  0xd3   :  { %v293_v22 = vpop.f32.mrf.mxu1 }
  0xd4   :  { %v294_v40 = vadd.f32 %v293_v22, %v245_v36 }
  0xd5   :  { %v254_v21 = vpop.f32.mrf.mxu2 }
  0xd6   :  { %v255_v24 = vadd.f32 %v807_v61, %v254_v21  ;;  %v236_v38 = vpop.f32.mrf.mxu0 }
  0xd7   :  { %v237_v43 = vadd.f32 %v807_v61, %v236_v38 }
  0xd8   :  { %v304_v31 = vadd.f32 %v303_v19, %v255_v24 }
  0xd9   :  { %v286_v47 = vadd.f32 %v285_v9, %v237_v43 }
  0xdb   :  { %v295_v33 = vpop.f32.mrf.mxu1 }
  0xdc   :  { %v296_v37 = vadd.f32 %v295_v33, %v247_v34 }
  0xdd   :  { %v256_v23 = vpop.f32.mrf.mxu2 }
  0xde   :  { %v257_v25 = vadd.f32 %v807_v61, %v256_v23 }
  0xe0   :  { %v306_v29 = vadd.f32 %v305_v27, %v257_v25 }
  0xe2   :  { %308 = vmatpush.msrb.mxu3 %v306_v29 }
  0xe4   :  { %309 = vmatpush.msrb.mxu3 %v304_v31 }
  0xe6   :  { %310 = vmatpush.msrb.mxu3 %v301_v32 }
  0xe8   :  { %311 = vmatpush.msrb.mxu3 %v299_v35 }
  0xea   :  { %312 = vmatpush.msrb.mxu3 %v296_v37 }
  0xec   :  { %313 = vmatpush.msrb.mxu3 %v294_v40 }
  0xee   :  { %314 = vmatpush.msrb.mxu3 %v291_v42 }
  0xf0   :  { %315 = vmatpush.msrb.mxu3 %v289_v44 }
  0xf2   :  { %316 = vmatpush.msrb.mxu3 %v286_v47 }
  0xf4   :  { %317 = vmatpush.msrb.mxu3 %v284_v49 }
  0xf6   :  { %318 = vmatpush.msrb.mxu3 %v281_v51 }
  0xf8   :  { %319 = vmatpush.msrb.mxu3 %v279_v53 }
  0xfa   :  { %320 = vmatpush.msrb.mxu3 %v276_v55 }
  0xfc   :  { %321 = vmatpush.msrb.mxu3 %v274_v56 }
  0xfe   :  { %322 = vmatpush.msrb.mxu3 %v271_v57 }
 0x100   :  { %323 = vmatpush.msrb.mxu3 %v810_v0 }
 0x101   :  { %324 = vmatmul.f32.vlgmr.msrb.gmra.mxu3 %v636_v62 }
 0x184   :  { %v325_v63 = vpop.f32.mrf.mxu3 }
 0x185   :  { %v328_v2 = vmul.f32 0.0078125, %v325_v63 }
 0x187   :  { %v329_v3 = vperm.slane %v328_v2, 0 }
 0x189   :  { %v834_v1 = vsub.f32 %v306_v29, %v329_v3  ;;  %v836_v61 = vsub.f32 %v304_v31, %v329_v3  ;;  %v840_v4 = vsub.f32 %v301_v32, %v329_v3  ;;  %v844_v59 = vsub.f32 %v299_v35, %v329_v3 }
 0x18a   :  { %v848_v6 = vsub.f32 %v296_v37, %v329_v3  ;;  %v852_v8 = vsub.f32 %v294_v40, %v329_v3  ;;  %v856_v10 = vsub.f32 %v291_v42, %v329_v3  ;;  %v338_v12 = vsub.f32 %v289_v44, %v329_v3  ;;  %v632_v44 = vld [vmem:[%s943_s3] ss:$0 sm:$0xff] }
 0x18b   :  { %v361_v60 = vmul.f32 %v834_v1, %v834_v1  ;;  %v360_v58 = vmul.f32 %v836_v61, %v836_v61  ;;  %v359_v5 = vmul.f32 %v840_v4, %v840_v4  ;;  %v358_v7 = vmul.f32 %v844_v59, %v844_v59 }
 0x18c   :  { %v357_v9 = vmul.f32 %v848_v6, %v848_v6  ;;  %v356_v11 = vmul.f32 %v852_v8, %v852_v8  ;;  %v355_v13 = vmul.f32 %v856_v10, %v856_v10  ;;  %v337_v14 = vsub.f32 %v286_v47, %v329_v3 }
 0x18d   :  { %362 = vmatpush.msra.mxu3 %v361_v60  ;;  %v354_v15 = vmul.f32 %v338_v12, %v338_v12  ;;  %v336_v16 = vsub.f32 %v284_v49, %v329_v3  ;;  %v335_v18 = vsub.f32 %v281_v51, %v329_v3  ;;  %v334_v20 = vsub.f32 %v279_v53, %v329_v3 }
 0x18e   :  { %v353_v17 = vmul.f32 %v337_v14, %v337_v14  ;;  %v333_v22 = vsub.f32 %v276_v55, %v329_v3  ;;  %v332_v24 = vsub.f32 %v274_v56, %v329_v3  ;;  %v331_v26 = vsub.f32 %v271_v57, %v329_v3 }
 0x18f   :  { %363 = vmatpush.msra.mxu3 %v360_v58  ;;  %v352_v19 = vmul.f32 %v336_v16, %v336_v16  ;;  %v351_v21 = vmul.f32 %v335_v18, %v335_v18  ;;  %v350_v23 = vmul.f32 %v334_v20, %v334_v20  ;;  %v330_v28 = vsub.f32 %v810_v0, %v329_v3 }
 0x190   :  { %v349_v25 = vmul.f32 %v333_v22, %v333_v22  ;;  %v348_v27 = vmul.f32 %v332_v24, %v332_v24  ;;  %v347_v29 = vmul.f32 %v331_v26, %v331_v26 }
 0x191   :  { %364 = vmatpush.msra.mxu3 %v359_v5  ;;  %v346_v30 = vmul.f32 %v330_v28, %v330_v28 }
 0x193   :  { %365 = vmatpush.msra.mxu3 %v358_v7 }
 0x195   :  { %366 = vmatpush.msra.mxu3 %v357_v9 }
 0x197   :  { %367 = vmatpush.msra.mxu3 %v356_v11 }
 0x199   :  { %368 = vmatpush.msra.mxu3 %v355_v13 }
 0x19b   :  { %369 = vmatpush.msra.mxu3 %v354_v15 }
 0x19d   :  { %370 = vmatpush.msra.mxu3 %v353_v17 }
 0x19f   :  { %371 = vmatpush.msra.mxu3 %v352_v19 }
 0x1a1   :  { %372 = vmatpush.msra.mxu3 %v351_v21 }
 0x1a3   :  { %373 = vmatpush.msra.mxu3 %v350_v23 }
 0x1a5   :  { %374 = vmatpush.msra.mxu3 %v349_v25 }
 0x1a7   :  { %375 = vmatpush.msra.mxu3 %v348_v27 }
 0x1a9   :  { %376 = vmatpush.msra.mxu3 %v347_v29 }
 0x1ab   :  { %377 = vmatpush.msra.mxu3 %v346_v30 }
 0x1ac   :  { %378 = vmatmul.f32.vlgmr.msra.gmra.mxu3 %v636_v62 }
 0x22f   :  { %v379_v31 = vpop.f32.mrf.mxu3 }
 0x230   :  { %v382_v32 = vmul.f32 0.0078125, %v379_v31 }
 0x232   :  { %v383_v33 = vadd.f32 1e-05, %v382_v32 }
 0x234   :  { %634 = vrsqrt.f32 %v383_v33  ;;  %vm390_vm2 = vweird.f32 %v383_v33 }
 0x23a   :  { %v635_v34 = vpop.eup %634 }
 0x23b   :  { %v385_v35 = vmul.f32 %v635_v34, %v383_v33  ;;  %vm391_vm1 = vweird.f32 %v635_v34 }
 0x23c   :  { %vm392_vm3 = vmor %vm390_vm2, %vm391_vm1 }
 0x23d   :  { %v386_v36 = vmul.f32 %v635_v34, %v385_v35 }
 0x23f   :  { %v387_v37 = vmul.f32 0.5, %v386_v36 }
 0x241   :  { %v388_v38 = vsub.f32 1.5, %v387_v37 }
 0x243   :  { %v389_v39 = vmul.f32 %v635_v34, %v388_v38 }
 0x245   :  { %v393_v0 = vsel %vm392_vm3, %v635_v34, %v389_v39 }
 0x246   :  { %v394_v40 = vperm.slane %v393_v0, 0 }
 0x248   :  { %v395_v41 = vmul.f32 %v394_v40, %v330_v28  ;;  %v396_v42 = vmul.f32 %v394_v40, %v331_v26  ;;  %v397_v43 = vmul.f32 %v394_v40, %v332_v24  ;;  %v398_v45 = vmul.f32 %v394_v40, %v333_v22 }
 0x249   :  { %v399_v46 = vmul.f32 %v394_v40, %v334_v20  ;;  %v400_v47 = vmul.f32 %v394_v40, %v335_v18  ;;  %v401_v48 = vmul.f32 %v394_v40, %v336_v16  ;;  %v402_v53 = vmul.f32 %v394_v40, %v337_v14 }
 0x24a   :  { %v415_v49 = vmul.f32 %v632_v44, %v395_v41  ;;  %v416_v50 = vmul.f32 %v632_v44, %v396_v42  ;;  %v417_v51 = vmul.f32 %v632_v44, %v397_v43  ;;  %v418_v54 = vmul.f32 %v632_v44, %v398_v45 }
 0x24b   :  { %v403_v55 = vmul.f32 %v394_v40, %v338_v12  ;;  %v419_v56 = vmul.f32 %v632_v44, %v399_v46  ;;  %v404_v57 = vmul.f32 %v394_v40, %v856_v10  ;;  %v405_v62 = vmul.f32 %v394_v40, %v852_v8 }
 0x24c   :  { %v420_v63 = vmul.f32 %v632_v44, %v400_v47  ;;  %v421_v2 = vmul.f32 %v632_v44, %v401_v48  ;;  %v435_v3 = vadd.f32 %v633_v52, %v415_v49  ;;  %v436_v60 = vadd.f32 %v633_v52, %v416_v50 }
 0x24d   :  { %v437_v58 = vadd.f32 %v633_v52, %v417_v51  ;;  %v406_v5 = vmul.f32 %v394_v40, %v848_v6  ;;  %v422_v7 = vmul.f32 %v632_v44, %v402_v53  ;;  %v438_v9 = vadd.f32 %v633_v52, %v418_v54 }
 0x24e   :  { %v407_v11 = vmul.f32 %v394_v40, %v844_v59  ;;  %v408_v13 = vmul.f32 %v394_v40, %v840_v4  ;;  %v423_v12 = vmul.f32 %v632_v44, %v403_v55  ;;  %v439_v14 = vadd.f32 %v633_v52, %v419_v56 }
 0x24f   :  { %v409_v10 = vmul.f32 %v394_v40, %v836_v61  ;;  %v424_v15 = vmul.f32 %v632_v44, %v404_v57  ;;  %v425_v8 = vmul.f32 %v632_v44, %v405_v62  ;;  %v440_v16 = vadd.f32 %v633_v52, %v420_v63 }
 0x250   :  { %v441_v17 = vadd.f32 %v633_v52, %v421_v2  ;;  %v451_v18 = vmax.f32 %v435_v3, 0.0  ;;  %v452_v19 = vmax.f32 %v436_v60, 0.0  ;;  %v453_v20 = vmax.f32 %v437_v58, 0.0 }
 0x251   :  { %v410_v6 = vmul.f32 %v394_v40, %v834_v1  ;;  %v426_v21 = vmul.f32 %v632_v44, %v406_v5  ;;  %v442_v22 = vadd.f32 %v633_v52, %v422_v7  ;;  %v454_v23 = vmax.f32 %v438_v9, 0.0 }
 0x252   :  { %v427_v24 = vmul.f32 %v632_v44, %v407_v11  ;;  %v443_v59 = vadd.f32 %v633_v52, %v423_v12  ;;  %v455_v25 = vmax.f32 %v439_v14, 0.0  ;;  %468 = vst.msk [vmem:[%s945_s5] sm:$0xff] %vm467_vm4, %v451_v18  ;;  %v428_v61 = vmul.f32 %v632_v44, %v408_v13 }
 0x253   :  { %v444_v4 = vadd.f32 %v633_v52, %v424_v15  ;;  %v456_v26 = vmax.f32 %v440_v16, 0.0  ;;  %469 = vst.msk [vmem:[%s945_s5 + $0x8] sm:$0xff] %vm467_vm4, %v452_v19  ;;  %v429_v1 = vmul.f32 %v632_v44, %v409_v10  ;;  %v445_v27 = vadd.f32 %v633_v52, %v425_v8 }
 0x254   :  { %v457_v28 = vmax.f32 %v441_v17, 0.0  ;;  %470 = vst.msk [vmem:[%s945_s5 + $0x10] sm:$0xff] %vm467_vm4, %v453_v20  ;;  %v430_v29 = vmul.f32 %v632_v44, %v410_v6  ;;  %v446_v30 = vadd.f32 %v633_v52, %v426_v21  ;;  %v458_v31 = vmax.f32 %v442_v22, 0.0 }
 0x255   :  { %471 = vst.msk [vmem:[%s945_s5 + $0x18] sm:$0xff] %vm467_vm4, %v454_v23  ;;  %v447_v32 = vadd.f32 %v633_v52, %v427_v24  ;;  %v459_v33 = vmax.f32 %v443_v59, 0.0  ;;  %v448_v34 = vadd.f32 %v633_v52, %v428_v61  ;;  %v460_v35 = vmax.f32 %v444_v4, 0.0 }
 0x256   :  { %472 = vst.msk [vmem:[%s945_s5 + $0x20] sm:$0xff] %vm467_vm4, %v455_v25  ;;  %v449_v36 = vadd.f32 %v633_v52, %v429_v1  ;;  %v461_v37 = vmax.f32 %v445_v27, 0.0  ;;  %v450_v38 = vadd.f32 %v633_v52, %v430_v29  ;;  %v462_v39 = vmax.f32 %v446_v30, 0.0 }
 0x257   :  { %473 = vst.msk [vmem:[%s945_s5 + $0x28] sm:$0xff] %vm467_vm4, %v456_v26  ;;  %v463_v0 = vmax.f32 %v447_v32, 0.0  ;;  %v464_v40 = vmax.f32 %v448_v34, 0.0 }
 0x258   :  { %474 = vst.msk [vmem:[%s945_s5 + $0x30] sm:$0xff] %vm467_vm4, %v457_v28  ;;  %v465_v41 = vmax.f32 %v449_v36, 0.0  ;;  %v466_v42 = vmax.f32 %v450_v38, 0.0 }
 0x259   :  { %475 = vst.msk [vmem:[%s945_s5 + $0x38] sm:$0xff] %vm467_vm4, %v458_v31 }
 0x25a   :  { %476 = vst.msk [vmem:[%s945_s5 + $0x40] sm:$0xff] %vm467_vm4, %v459_v33 }
 0x25b   :  { %477 = vst.msk [vmem:[%s945_s5 + $0x48] sm:$0xff] %vm467_vm4, %v460_v35 }
 0x25c   :  { %478 = vst.msk [vmem:[%s945_s5 + $0x50] sm:$0xff] %vm467_vm4, %v461_v37 }
 0x25d   :  { %479 = vst.msk [vmem:[%s945_s5 + $0x58] sm:$0xff] %vm467_vm4, %v462_v39 }
 0x25e   :  { %480 = vst.msk [vmem:[%s945_s5 + $0x60] sm:$0xff] %vm467_vm4, %v463_v0 }
 0x25f   :  { %481 = vst.msk [vmem:[%s945_s5 + $0x68] sm:$0xff] %vm467_vm4, %v464_v40 }
 0x260   :  { %482 = vst.msk [vmem:[%s945_s5 + $0x70] sm:$0xff] %vm467_vm4, %v465_v41 }
 0x261   :  { %483 = vst.msk [vmem:[%s945_s5 + $0x78] sm:$0xff] %vm467_vm4, %v466_v42 }

// kernel: feat2net_forward.35
= control target key start
LH: loop header
LB: loop body
LE: loop exit
PB: predicated region body
PF: predicated region fallthrough
CT: control target
= control target key end

     0   :  { %vm89_vm0 = vcmask 130048   ;;  %v389_v42 = vmov 1.0   ;;  %vm306_vm4 = vcmask 261120   ;;  %s563_s1 = inlined_call_operand.vmem [shape: bf16[16,32], index: 1, kind: input, shape index: {}]   ;;  %s564_s0 = inlined_call_operand.vmem [shape: bf16[128,16], index: 0, kind: input, shape index: {}]   ;;  %s565_s2 = inlined_call_operand.vmem [shape: f32[1,32], index: 2, kind: input, shape index: {}]   ;;  %s566_s3 = inlined_call_operand.vmem [shape: f32[1,32], index: 3, kind: input, shape index: {}]   ;;  %s567_s4 = inlined_call_operand.vmem [shape: f32[1,32], index: 4, kind: input, shape index: {}]   ;;  %s568_s5 = inlined_call_operand.vmem [shape: f32[128,32], index: 5, kind: output, shape index: {}]  }
   0x1   :  { %v379_v0 = vld [vmem:[%s563_s1] sm:$0xff]  ;;  %v376_v1 = vld [vmem:[%s564_s0 + $0x28] sm:$0xff]  ;;  %v374_v2 = vld [vmem:[%s564_s0 + $0x18] sm:$0xff] }
   0x2   :  { %382 = vmatpush.bf16.msra.mxu3 %v379_v0  ;;  %381 = vmatpush.bf16.msra.mxu2 %v379_v0  ;;  %v372_v3 = vld [vmem:[%s564_s0 + $0x8] sm:$0xff]  ;;  %v371_v4 = vld [vmem:[%s564_s0] sm:$0xff]  ;;  %v377_v5 = vld [vmem:[%s564_s0 + $0x30] sm:$0xff] }
   0x3   :  { %380 = vmatpush.bf16.msra.mxu1 %v379_v0  ;;  %121 = vmatpush.bf16.msra.mxu0 %v379_v0  ;;  %v375_v6 = vld [vmem:[%s564_s0 + $0x20] sm:$0xff]  ;;  %v373_v7 = vld [vmem:[%s564_s0 + $0x10] sm:$0xff]  ;;  %v378_v8 = vld [vmem:[%s564_s0 + $0x38] sm:$0xff] }
   0x4   :  { %v384_v18 = vld [vmem:[%s565_s2] ss:$0 sm:$0xff] }
   0x5   :  { %368 = vmatmul.msk.bf16.vlgmr.msra.gmra.mxu3 %vm89_vm0, %v376_v1  ;;  %366 = vmatmul.msk.bf16.vlgmr.msra.gmra.mxu2 %vm89_vm0, %v374_v2 }
   0x6   :  { %364 = vmatmul.msk.bf16.vlgmr.msra.gmra.mxu1 %vm89_vm0, %v372_v3  ;;  %363 = vmatmul.msk.bf16.vlgmr.msra.gmra.mxu0 %vm89_vm0, %v371_v4 }
  0x15   :  { %369 = vmatmul.msk.bf16.gmra.mxu3 %vm89_vm0, %v377_v5  ;;  %367 = vmatmul.msk.bf16.gmra.mxu2 %vm89_vm0, %v375_v6 }
  0x16   :  { %365 = vmatmul.msk.bf16.gmra.mxu1 %vm89_vm0, %v373_v7 }
  0x25   :  { %370 = vmatmul.msk.bf16.gmra.mxu3 %vm89_vm0, %v378_v8 }
  0x83   :  { %v128_v14 = vpop.f32.mrf.mxu1  ;;  %v123_v31 = vpop.f32.mrf.mxu0 }
  0x84   :  { %v129_v39 = vadd.f32 %v384_v18, %v128_v14  ;;  %v124_v41 = vadd.f32 %v384_v18, %v123_v31 }
  0x88   :  { %v148_v9 = vpop.f32.mrf.mxu3  ;;  %v138_v12 = vpop.f32.mrf.mxu2 }
  0x89   :  { %v149_v28 = vadd.f32 %v384_v18, %v148_v9  ;;  %v139_v34 = vadd.f32 %v384_v18, %v138_v12 }
  0x8b   :  { %v130_v17 = vpop.f32.mrf.mxu1  ;;  %v125_v38 = vpop.f32.mrf.mxu0 }
  0x8c   :  { %v131_v37 = vadd.f32 %v384_v18, %v130_v17  ;;  %v126_v40 = vadd.f32 %v384_v18, %v125_v38 }
  0x90   :  { %v150_v10 = vpop.f32.mrf.mxu3  ;;  %v140_v15 = vpop.f32.mrf.mxu2 }
  0x91   :  { %v151_v26 = vadd.f32 %v384_v18, %v150_v10  ;;  %v141_v32 = vadd.f32 %v384_v18, %v140_v15 }
  0x93   :  { %v133_v25 = vpop.f32.mrf.mxu1 }
  0x94   :  { %v134_v36 = vadd.f32 %v384_v18, %v133_v25 }
  0x98   :  { %v153_v11 = vpop.f32.mrf.mxu3  ;;  %v143_v19 = vpop.f32.mrf.mxu2 }
  0x99   :  { %v154_v24 = vadd.f32 %v384_v18, %v153_v11  ;;  %v144_v30 = vadd.f32 %v384_v18, %v143_v19 }
  0x9b   :  { %v135_v33 = vpop.f32.mrf.mxu1 }
  0x9c   :  { %v136_v35 = vadd.f32 %v384_v18, %v135_v33 }
  0xa0   :  { %v155_v13 = vpop.f32.mrf.mxu3  ;;  %v145_v27 = vpop.f32.mrf.mxu2 }
  0xa1   :  { %v156_v23 = vadd.f32 %v384_v18, %v155_v13  ;;  %v146_v29 = vadd.f32 %v384_v18, %v145_v27 }
  0xa8   :  { %v158_v16 = vpop.f32.mrf.mxu3 }
  0xa9   :  { %v159_v22 = vadd.f32 %v384_v18, %v158_v16 }
  0xb0   :  { %v160_v20 = vpop.f32.mrf.mxu3 }
  0xb1   :  { %v161_v21 = vadd.f32 %v384_v18, %v160_v20 }
  0xb3   :  { %163 = vmatpush.msrb.mxu1 %v161_v21 }
  0xb5   :  { %164 = vmatpush.msrb.mxu1 %v159_v22 }
  0xb7   :  { %165 = vmatpush.msrb.mxu1 %v156_v23 }
  0xb9   :  { %166 = vmatpush.msrb.mxu1 %v154_v24 }
  0xbb   :  { %167 = vmatpush.msrb.mxu1 %v151_v26 }
  0xbd   :  { %168 = vmatpush.msrb.mxu1 %v149_v28 }
  0xbf   :  { %169 = vmatpush.msrb.mxu1 %v146_v29 }
  0xc1   :  { %170 = vmatpush.msrb.mxu1 %v144_v30 }
  0xc3   :  { %171 = vmatpush.msrb.mxu1 %v141_v32 }
  0xc5   :  { %172 = vmatpush.msrb.mxu1 %v139_v34 }
  0xc7   :  { %173 = vmatpush.msrb.mxu1 %v136_v35 }
  0xc9   :  { %174 = vmatpush.msrb.mxu1 %v134_v36 }
  0xcb   :  { %175 = vmatpush.msrb.mxu1 %v131_v37 }
  0xcd   :  { %176 = vmatpush.msrb.mxu1 %v129_v39 }
  0xcf   :  { %177 = vmatpush.msrb.mxu1 %v126_v40 }
  0xd1   :  { %178 = vmatpush.msrb.mxu1 %v124_v41 }
  0xd2   :  { %179 = vmatmul.f32.vlgmr.msrb.gmra.mxu1 %v389_v42 }
 0x14f   :  { %v180_v43 = vpop.f32.mrf.mxu1 }
 0x150   :  { %v183_v44 = vmul.f32 0.0078125, %v180_v43 }
 0x152   :  { %v184_v45 = vperm.slane %v183_v44, 0 }
 0x154   :  { %v458_v46 = vsub.f32 %v161_v21, %v184_v45  ;;  %v460_v47 = vsub.f32 %v159_v22, %v184_v45  ;;  %v464_v49 = vsub.f32 %v156_v23, %v184_v45  ;;  %v468_v51 = vsub.f32 %v154_v24, %v184_v45 }
 0x155   :  { %v472_v53 = vsub.f32 %v151_v26, %v184_v45  ;;  %v476_v55 = vsub.f32 %v149_v28, %v184_v45  ;;  %v480_v57 = vsub.f32 %v146_v29, %v184_v45  ;;  %v193_v59 = vsub.f32 %v144_v30, %v184_v45  ;;  %v385_v28 = vld [vmem:[%s566_s3] ss:$0 sm:$0xff] }
 0x156   :  { %v216_v48 = vmul.f32 %v458_v46, %v458_v46  ;;  %v215_v50 = vmul.f32 %v460_v47, %v460_v47  ;;  %v214_v52 = vmul.f32 %v464_v49, %v464_v49  ;;  %v213_v54 = vmul.f32 %v468_v51, %v468_v51 }
 0x157   :  { %v212_v56 = vmul.f32 %v472_v53, %v472_v53  ;;  %v211_v58 = vmul.f32 %v476_v55, %v476_v55  ;;  %v210_v60 = vmul.f32 %v480_v57, %v480_v57  ;;  %v192_v61 = vsub.f32 %v141_v32, %v184_v45 }
 0x158   :  { %217 = vmatpush.msrb.mxu2 %v216_v48  ;;  %v209_v62 = vmul.f32 %v193_v59, %v193_v59  ;;  %v191_v63 = vsub.f32 %v139_v34, %v184_v45  ;;  %v190_v1 = vsub.f32 %v136_v35, %v184_v45  ;;  %v189_v3 = vsub.f32 %v134_v36, %v184_v45  ;;  %v386_v36 = vld [vmem:[%s567_s4] ss:$0 sm:$0xff] }
 0x159   :  { %v208_v0 = vmul.f32 %v192_v61, %v192_v61  ;;  %v188_v5 = vsub.f32 %v131_v37, %v184_v45  ;;  %v187_v7 = vsub.f32 %v129_v39, %v184_v45  ;;  %v186_v9 = vsub.f32 %v126_v40, %v184_v45 }
 0x15a   :  { %218 = vmatpush.msrb.mxu2 %v215_v50  ;;  %v207_v2 = vmul.f32 %v191_v63, %v191_v63  ;;  %v206_v4 = vmul.f32 %v190_v1, %v190_v1  ;;  %v205_v6 = vmul.f32 %v189_v3, %v189_v3  ;;  %v185_v11 = vsub.f32 %v124_v41, %v184_v45 }
 0x15b   :  { %v204_v8 = vmul.f32 %v188_v5, %v188_v5  ;;  %v203_v10 = vmul.f32 %v187_v7, %v187_v7  ;;  %v202_v12 = vmul.f32 %v186_v9, %v186_v9 }
 0x15c   :  { %219 = vmatpush.msrb.mxu2 %v214_v52  ;;  %v201_v13 = vmul.f32 %v185_v11, %v185_v11 }
 0x15e   :  { %220 = vmatpush.msrb.mxu2 %v213_v54 }
 0x160   :  { %221 = vmatpush.msrb.mxu2 %v212_v56 }
 0x162   :  { %222 = vmatpush.msrb.mxu2 %v211_v58 }
 0x164   :  { %223 = vmatpush.msrb.mxu2 %v210_v60 }
 0x166   :  { %224 = vmatpush.msrb.mxu2 %v209_v62 }
 0x168   :  { %225 = vmatpush.msrb.mxu2 %v208_v0 }
 0x16a   :  { %226 = vmatpush.msrb.mxu2 %v207_v2 }
 0x16c   :  { %227 = vmatpush.msrb.mxu2 %v206_v4 }
 0x16e   :  { %228 = vmatpush.msrb.mxu2 %v205_v6 }
 0x170   :  { %229 = vmatpush.msrb.mxu2 %v204_v8 }
 0x172   :  { %230 = vmatpush.msrb.mxu2 %v203_v10 }
 0x174   :  { %231 = vmatpush.msrb.mxu2 %v202_v12 }
 0x176   :  { %232 = vmatpush.msrb.mxu2 %v201_v13 }
 0x177   :  { %233 = vmatmul.f32.vlgmr.msrb.gmra.mxu2 %v389_v42 }
 0x1fa   :  { %v234_v14 = vpop.f32.mrf.mxu2 }
 0x1fb   :  { %v237_v15 = vmul.f32 0.0078125, %v234_v14 }
 0x1fd   :  { %v238_v16 = vadd.f32 1e-05, %v237_v15 }
 0x1ff   :  { %387 = vrsqrt.f32 %v238_v16  ;;  %vm245_vm2 = vweird.f32 %v238_v16 }
 0x205   :  { %v388_v17 = vpop.eup %387 }
 0x206   :  { %v240_v18 = vmul.f32 %v388_v17, %v238_v16  ;;  %vm246_vm1 = vweird.f32 %v388_v17 }
 0x207   :  { %vm247_vm3 = vmor %vm245_vm2, %vm246_vm1 }
 0x208   :  { %v241_v19 = vmul.f32 %v388_v17, %v240_v18 }
 0x20a   :  { %v242_v20 = vmul.f32 0.5, %v241_v19 }
 0x20c   :  { %v243_v21 = vsub.f32 1.5, %v242_v20 }
 0x20e   :  { %v244_v22 = vmul.f32 %v388_v17, %v243_v21 }
 0x210   :  { %v248_v23 = vsel %vm247_vm3, %v388_v17, %v244_v22 }
 0x211   :  { %v249_v24 = vperm.slane %v248_v23, 0 }
 0x213   :  { %v250_v25 = vmul.f32 %v249_v24, %v185_v11  ;;  %v251_v26 = vmul.f32 %v249_v24, %v186_v9  ;;  %v252_v27 = vmul.f32 %v249_v24, %v187_v7  ;;  %v253_v29 = vmul.f32 %v249_v24, %v188_v5 }
 0x214   :  { %v254_v30 = vmul.f32 %v249_v24, %v189_v3  ;;  %v255_v31 = vmul.f32 %v249_v24, %v190_v1  ;;  %v256_v32 = vmul.f32 %v249_v24, %v191_v63  ;;  %v257_v37 = vmul.f32 %v249_v24, %v192_v61 }
 0x215   :  { %v270_v33 = vmul.f32 %v385_v28, %v250_v25  ;;  %v271_v34 = vmul.f32 %v385_v28, %v251_v26  ;;  %v272_v35 = vmul.f32 %v385_v28, %v252_v27  ;;  %v273_v38 = vmul.f32 %v385_v28, %v253_v29 }
 0x216   :  { %v258_v39 = vmul.f32 %v249_v24, %v193_v59  ;;  %v274_v40 = vmul.f32 %v385_v28, %v254_v30  ;;  %v259_v41 = vmul.f32 %v249_v24, %v480_v57  ;;  %v260_v42 = vmul.f32 %v249_v24, %v476_v55 }
 0x217   :  { %v275_v43 = vmul.f32 %v385_v28, %v255_v31  ;;  %v276_v44 = vmul.f32 %v385_v28, %v256_v32  ;;  %v290_v45 = vadd.f32 %v386_v36, %v270_v33  ;;  %v291_v48 = vadd.f32 %v386_v36, %v271_v34 }
 0x218   :  { %v292_v50 = vadd.f32 %v386_v36, %v272_v35  ;;  %v261_v52 = vmul.f32 %v249_v24, %v472_v53  ;;  %v277_v54 = vmul.f32 %v385_v28, %v257_v37  ;;  %v293_v56 = vadd.f32 %v386_v36, %v273_v38 }
 0x219   :  { %v262_v58 = vmul.f32 %v249_v24, %v468_v51  ;;  %v278_v60 = vmul.f32 %v385_v28, %v258_v39  ;;  %v294_v61 = vadd.f32 %v386_v36, %v274_v40  ;;  %307 = vst.msk [vmem:[%s568_s5] sm:$0xff] %vm306_vm4, %v290_v45  ;;  %v263_v55 = vmul.f32 %v249_v24, %v464_v49 }
 0x21a   :  { %v279_v57 = vmul.f32 %v385_v28, %v259_v41  ;;  %v295_v59 = vadd.f32 %v386_v36, %v275_v43  ;;  %308 = vst.msk [vmem:[%s568_s5 + $0x8] sm:$0xff] %vm306_vm4, %v291_v48  ;;  %v264_v53 = vmul.f32 %v249_v24, %v460_v47  ;;  %v280_v62 = vmul.f32 %v385_v28, %v260_v42 }
 0x21b   :  { %v296_v51 = vadd.f32 %v386_v36, %v276_v44  ;;  %309 = vst.msk [vmem:[%s568_s5 + $0x10] sm:$0xff] %vm306_vm4, %v292_v50  ;;  %v265_v63 = vmul.f32 %v249_v24, %v458_v46  ;;  %v281_v0 = vmul.f32 %v385_v28, %v261_v52  ;;  %v297_v49 = vadd.f32 %v386_v36, %v277_v54 }
 0x21c   :  { %310 = vst.msk [vmem:[%s568_s5 + $0x18] sm:$0xff] %vm306_vm4, %v293_v56  ;;  %v282_v1 = vmul.f32 %v385_v28, %v262_v58  ;;  %v298_v2 = vadd.f32 %v386_v36, %v278_v60  ;;  %v283_v47 = vmul.f32 %v385_v28, %v263_v55  ;;  %v299_v3 = vadd.f32 %v386_v36, %v279_v57 }
 0x21d   :  { %311 = vst.msk [vmem:[%s568_s5 + $0x20] sm:$0xff] %vm306_vm4, %v294_v61  ;;  %v284_v46 = vmul.f32 %v385_v28, %v264_v53  ;;  %v300_v4 = vadd.f32 %v386_v36, %v280_v62  ;;  %v285_v5 = vmul.f32 %v385_v28, %v265_v63  ;;  %v301_v6 = vadd.f32 %v386_v36, %v281_v0 }
 0x21e   :  { %312 = vst.msk [vmem:[%s568_s5 + $0x28] sm:$0xff] %vm306_vm4, %v295_v59  ;;  %v302_v7 = vadd.f32 %v386_v36, %v282_v1  ;;  %v303_v8 = vadd.f32 %v386_v36, %v283_v47 }
 0x21f   :  { %313 = vst.msk [vmem:[%s568_s5 + $0x30] sm:$0xff] %vm306_vm4, %v296_v51  ;;  %v304_v9 = vadd.f32 %v386_v36, %v284_v46  ;;  %v305_v10 = vadd.f32 %v386_v36, %v285_v5 }
 0x220   :  { %314 = vst.msk [vmem:[%s568_s5 + $0x38] sm:$0xff] %vm306_vm4, %v297_v49 }
 0x221   :  { %315 = vst.msk [vmem:[%s568_s5 + $0x40] sm:$0xff] %vm306_vm4, %v298_v2 }
 0x222   :  { %316 = vst.msk [vmem:[%s568_s5 + $0x48] sm:$0xff] %vm306_vm4, %v299_v3 }
 0x223   :  { %317 = vst.msk [vmem:[%s568_s5 + $0x50] sm:$0xff] %vm306_vm4, %v300_v4 }
 0x224   :  { %318 = vst.msk [vmem:[%s568_s5 + $0x58] sm:$0xff] %vm306_vm4, %v301_v6 }
 0x225   :  { %319 = vst.msk [vmem:[%s568_s5 + $0x60] sm:$0xff] %vm306_vm4, %v302_v7 }
 0x226   :  { %320 = vst.msk [vmem:[%s568_s5 + $0x68] sm:$0xff] %vm306_vm4, %v303_v8 }
 0x227   :  { %321 = vst.msk [vmem:[%s568_s5 + $0x70] sm:$0xff] %vm306_vm4, %v304_v9 }
 0x228   :  { %322 = vst.msk [vmem:[%s568_s5 + $0x78] sm:$0xff] %vm306_vm4, %v305_v10 }

// kernel: feat2net_forward.37
= control target key start
LH: loop header
LB: loop body
LE: loop exit
PB: predicated region body
PF: predicated region fallthrough
CT: control target
= control target key end

     0   :  { %vm321_vm0 = vcmask 261120   ;;  %s1295_s1 = inlined_call_operand.vmem [shape: bf16[288,32], index: 1, kind: input, shape index: {}]   ;;  %s1296_s0 = inlined_call_operand.vmem [shape: bf16[128,288], index: 0, kind: input, shape index: {}]   ;;  %s1297_s2 = inlined_call_operand.vmem [shape: f32[1,32], index: 2, kind: input, shape index: {}]   ;;  %s1298_s3 = inlined_call_operand.vmem [shape: f32[1,32], index: 3, kind: input, shape index: {}]   ;;  %s1299_s4 = inlined_call_operand.vmem [shape: f32[1,32], index: 4, kind: input, shape index: {}]   ;;  %s1300_s5 = inlined_call_operand.vmem [shape: f32[128,32], index: 5, kind: output, shape index: {}]  }
   0x1   :  { %v879_v0 = vld [vmem:[%s1295_s1 + $0x38] sm:$0xff]  ;;  %v878_v2 = vld [vmem:[%s1295_s1 + $0x30] sm:$0xff]  ;;  %v889_v4 = vld [vmem:[%s1295_s1 + $0x88] sm:$0xff] }
   0x2   :  { %v887_v1 = vld [vmem:[%s1295_s1 + $0x78] sm:$0xff]  ;;  %346 = vmatpush.bf16.msra.mxu0 %v879_v0  ;;  %v886_v3 = vld [vmem:[%s1295_s1 + $0x70] sm:$0xff]  ;;  %450 = vmatpush.bf16.msra.mxu2 %v889_v4  ;;  %v888_v5 = vld [vmem:[%s1295_s1 + $0x80] sm:$0xff] }
   0x3   :  { %395 = vmatpush.bf16.msra.mxu1 %v887_v1  ;;  %v682_v6 = vld [vmem:[%s1296_s0 + $0x8] sm:$0xf]  ;;  %v850_v7 = vld [vmem:[%s1296_s0 + $0x10] sm:$0xf0]  ;;  %v876_v11 = vld [vmem:[%s1295_s1 + $0x20] sm:$0xff] }
   0x4   :  { %v877_v8 = vld [vmem:[%s1295_s1 + $0x28] sm:$0xff]  ;;  %v683_v10 = vor.u32 %v850_v7, %v682_v6  ;;  %v884_v12 = vld [vmem:[%s1295_s1 + $0x60] sm:$0xff]  ;;  %v875_v13 = vld [vmem:[%s1295_s1 + $0x18] sm:$0xff] }
   0x5   :  { %v885_v9 = vld [vmem:[%s1295_s1 + $0x68] sm:$0xff]  ;;  %v883_v14 = vld [vmem:[%s1295_s1 + $0x58] sm:$0xff]  ;;  %v874_v15 = vld [vmem:[%s1295_s1 + $0x10] sm:$0xff] }
   0x6   :  { %347 = vmatpush.bf16.msra.mxu0 %v878_v2  ;;  %451 = vmatpush.bf16.msra.mxu2 %v888_v5  ;;  %v882_v16 = vld [vmem:[%s1295_s1 + $0x50] sm:$0xff]  ;;  %v694_v17 = vld [vmem:[%s1296_s0 + $0x20] sm:$0xf]  ;;  %v853_v18 = vld [vmem:[%s1296_s0 + $0x28] sm:$0xf0] }
   0x7   :  { %396 = vmatpush.bf16.msra.mxu1 %v886_v3  ;;  %v873_v19 = vld [vmem:[%s1295_s1 + $0x8] sm:$0xff]  ;;  %v695_v21 = vor.u32 %v853_v18, %v694_v17  ;;  %v872_v22 = vld [vmem:[%s1295_s1] sm:$0xff]  ;;  %v676_v27 = vld [vmem:[%s1296_s0 + $0xc] sm:$0xf0] }
   0x8   :  { %v881_v20 = vld [vmem:[%s1295_s1 + $0x48] sm:$0xff]  ;;  %v880_v23 = vld [vmem:[%s1295_s1 + $0x40] sm:$0xff]  ;;  %v706_v30 = vld [vmem:[%s1296_s0 + $0x38] sm:$0xf] }
   0x9   :  { %840 = vmatmul.msk.bf16.vlgmr.msra.gmra.mxu2 %vm321_vm0, %v683_v10  ;;  %v674_v24 = vld [vmem:[%s1296_s0] sm:$0xf]  ;;  %v849_v25 = vld [vmem:[%s1296_s0 + $0x8] sm:$0xf0]  ;;  %v848_v26 = vld [vmem:[%s1296_s0 + $0x4] sm:$0xf] }
   0xa   :  { %348 = vmatpush.bf16.msra.mxu0 %v877_v8  ;;  %v675_v28 = vor.u32 %v849_v25, %v674_v24  ;;  %v679_v29 = vor.u32 %v848_v26, %v676_v27  ;;  %v856_v31 = vld [vmem:[%s1296_s0 + $0x40] sm:$0xf0]  ;;  %v686_v33 = vld [vmem:[%s1296_s0 + $0x18] sm:$0xf]  ;;  %v851_v35 = vld [vmem:[%s1296_s0 + $0x1c] sm:$0xf] }
   0xb   :  { %397 = vmatpush.bf16.msra.mxu1 %v885_v9  ;;  %v707_v32 = vor.u32 %v856_v31, %v706_v30  ;;  %v852_v34 = vld [vmem:[%s1296_s0 + $0x20] sm:$0xf0]  ;;  %v688_v36 = vld [vmem:[%s1296_s0 + $0x24] sm:$0xf0]  ;;  %v718_v39 = vld [vmem:[%s1296_s0 + $0x50] sm:$0xf] }
   0xc   :  { %v687_v37 = vor.u32 %v852_v34, %v686_v33  ;;  %v691_v38 = vor.u32 %v851_v35, %v688_v36  ;;  %v859_v40 = vld [vmem:[%s1296_s0 + $0x58] sm:$0xf0]  ;;  %v698_v42 = vld [vmem:[%s1296_s0 + $0x30] sm:$0xf]  ;;  %v854_v44 = vld [vmem:[%s1296_s0 + $0x34] sm:$0xf] }
   0xd   :  { %v719_v41 = vor.u32 %v859_v40, %v718_v39  ;;  %v855_v43 = vld [vmem:[%s1296_s0 + $0x38] sm:$0xf0]  ;;  %v700_v45 = vld [vmem:[%s1296_s0 + $0x3c] sm:$0xf0]  ;;  %v730_v48 = vld [vmem:[%s1296_s0 + $0x68] sm:$0xf] }
   0xe   :  { %349 = vmatpush.bf16.msra.mxu0 %v876_v11  ;;  %v699_v46 = vor.u32 %v855_v43, %v698_v42  ;;  %v703_v47 = vor.u32 %v854_v44, %v700_v45  ;;  %v862_v49 = vld [vmem:[%s1296_s0 + $0x70] sm:$0xf0]  ;;  %v710_v51 = vld [vmem:[%s1296_s0 + $0x48] sm:$0xf]  ;;  %v857_v53 = vld [vmem:[%s1296_s0 + $0x4c] sm:$0xf] }
   0xf   :  { %398 = vmatpush.bf16.msra.mxu1 %v884_v12  ;;  %v731_v50 = vor.u32 %v862_v49, %v730_v48  ;;  %v858_v52 = vld [vmem:[%s1296_s0 + $0x50] sm:$0xf0]  ;;  %v712_v54 = vld [vmem:[%s1296_s0 + $0x54] sm:$0xf0]  ;;  %v742_v57 = vld [vmem:[%s1296_s0 + $0x80] sm:$0xf] }
  0x10   :  { %v711_v55 = vor.u32 %v858_v52, %v710_v51  ;;  %v715_v56 = vor.u32 %v857_v53, %v712_v54  ;;  %v865_v58 = vld [vmem:[%s1296_s0 + $0x88] sm:$0xf0]  ;;  %v722_v60 = vld [vmem:[%s1296_s0 + $0x60] sm:$0xf]  ;;  %v860_v62 = vld [vmem:[%s1296_s0 + $0x64] sm:$0xf] }
  0x11   :  { %v743_v59 = vor.u32 %v865_v58, %v742_v57  ;;  %v861_v61 = vld [vmem:[%s1296_s0 + $0x68] sm:$0xf0]  ;;  %v724_v63 = vld [vmem:[%s1296_s0 + $0x6c] sm:$0xf0]  ;;  %v754_v2 = vld [vmem:[%s1296_s0 + $0x98] sm:$0xf] }
  0x12   :  { %350 = vmatpush.bf16.msra.mxu0 %v875_v13  ;;  %v723_v0 = vor.u32 %v861_v61, %v722_v60  ;;  %v727_v1 = vor.u32 %v860_v62, %v724_v63  ;;  %v868_v3 = vld [vmem:[%s1296_s0 + $0xa0] sm:$0xf0]  ;;  %v734_v5 = vld [vmem:[%s1296_s0 + $0x78] sm:$0xf]  ;;  %v863_v7 = vld [vmem:[%s1296_s0 + $0x7c] sm:$0xf] }
  0x13   :  { %399 = vmatpush.bf16.msra.mxu1 %v883_v14  ;;  %v755_v4 = vor.u32 %v868_v3, %v754_v2  ;;  %v864_v6 = vld [vmem:[%s1296_s0 + $0x80] sm:$0xf0]  ;;  %v736_v8 = vld [vmem:[%s1296_s0 + $0x84] sm:$0xf0]  ;;  %v766_v11 = vld [vmem:[%s1296_s0 + $0xb0] sm:$0xf] }
  0x14   :  { %v735_v9 = vor.u32 %v864_v6, %v734_v5  ;;  %v739_v10 = vor.u32 %v863_v7, %v736_v8  ;;  %v871_v12 = vld [vmem:[%s1296_s0 + $0xb8] sm:$0xf0]  ;;  %v746_v14 = vld [vmem:[%s1296_s0 + $0x90] sm:$0xf]  ;;  %v748_v17 = vld [vmem:[%s1296_s0 + $0x9c] sm:$0xf0] }
  0x15   :  { %v767_v13 = vor.u32 %v871_v12, %v766_v11 }
  0x16   :  { %351 = vmatpush.bf16.msra.mxu0 %v874_v15  ;;  %v867_v15 = vld [vmem:[%s1296_s0 + $0x98] sm:$0xf0] }
  0x17   :  { %400 = vmatpush.bf16.msra.mxu1 %v882_v16  ;;  %v866_v16 = vld [vmem:[%s1296_s0 + $0x94] sm:$0xf]  ;;  %v747_v18 = vor.u32 %v867_v15, %v746_v14 }
  0x19   :  { %841 = vmatmul.msk.bf16.gmra.mxu2 %vm321_vm0, %v695_v21  ;;  %v870_v21 = vld [vmem:[%s1296_s0 + $0xb0] sm:$0xf0] }
  0x1a   :  { %352 = vmatpush.bf16.msra.mxu0 %v873_v19  ;;  %v751_v19 = vor.u32 %v866_v16, %v748_v17 }
  0x1b   :  { %401 = vmatpush.bf16.msra.mxu1 %v881_v20  ;;  %v758_v20 = vld [vmem:[%s1296_s0 + $0xa8] sm:$0xf] }
  0x1c   :  { %v759_v24 = vor.u32 %v870_v21, %v758_v20 }
  0x1e   :  { %353 = vmatpush.bf16.msra.mxu0 %v872_v22  ;;  %v869_v22 = vld [vmem:[%s1296_s0 + $0xac] sm:$0xf] }
  0x1f   :  { %402 = vmatpush.bf16.msra.mxu1 %v880_v23  ;;  %v760_v23 = vld [vmem:[%s1296_s0 + $0xb4] sm:$0xf0] }
  0x20   :  { %v763_v25 = vor.u32 %v869_v22, %v760_v23 }
  0x21   :  { %354 = vmatmul.bf16.vlgmr.msra.gmra.mxu0 %v675_v28  ;;  %v1136_v28 = vld [vmem:[%s1297_s2] ss:$0 sm:$0xff] }
  0x22   :  { %403 = vmatmul.bf16.vlgmr.msra.gmra.mxu1 %v679_v29 }
  0x29   :  { %842 = vmatmul.msk.bf16.gmra.mxu2 %vm321_vm0, %v707_v32 }
  0x31   :  { %359 = vmatmul.bf16.gmra.mxu0 %v687_v37 }
  0x32   :  { %408 = vmatmul.bf16.gmra.mxu1 %v691_v38 }
  0x39   :  { %843 = vmatmul.msk.bf16.gmra.mxu2 %vm321_vm0, %v719_v41 }
  0x41   :  { %364 = vmatmul.bf16.gmra.mxu0 %v699_v46 }
  0x42   :  { %413 = vmatmul.bf16.gmra.mxu1 %v703_v47 }
  0x49   :  { %844 = vmatmul.msk.bf16.gmra.mxu2 %vm321_vm0, %v731_v50 }
  0x51   :  { %369 = vmatmul.bf16.gmra.mxu0 %v711_v55 }
  0x52   :  { %418 = vmatmul.bf16.gmra.mxu1 %v715_v56 }
  0x59   :  { %845 = vmatmul.msk.bf16.gmra.mxu2 %vm321_vm0, %v743_v59 }
  0x61   :  { %374 = vmatmul.bf16.gmra.mxu0 %v723_v0 }
  0x62   :  { %423 = vmatmul.bf16.gmra.mxu1 %v727_v1 }
  0x69   :  { %846 = vmatmul.msk.bf16.gmra.mxu2 %vm321_vm0, %v755_v4 }
  0x71   :  { %379 = vmatmul.bf16.gmra.mxu0 %v735_v9 }
  0x72   :  { %428 = vmatmul.bf16.gmra.mxu1 %v739_v10 }
  0x79   :  { %847 = vmatmul.msk.bf16.gmra.mxu2 %vm321_vm0, %v767_v13 }
  0x81   :  { %384 = vmatmul.bf16.gmra.mxu0 %v747_v18 }
  0x82   :  { %433 = vmatmul.bf16.gmra.mxu1 %v751_v19 }
  0x8c   :  { %v453_v26 = vpop.f32.mrf.mxu2 }
  0x91   :  { %389 = vmatmul.bf16.gmra.mxu0 %v759_v24 }
  0x92   :  { %438 = vmatmul.bf16.gmra.mxu1 %v763_v25 }
  0x94   :  { %v455_v27 = vpop.f32.mrf.mxu2 }
  0x9c   :  { %v458_v32 = vpop.f32.mrf.mxu2 }
  0x9e   :  { %v355_v29 = vpop.f32.mrf.mxu0 }
  0x9f   :  { %v404_v30 = vpop.f32.mrf.mxu1  ;;  %v356_v31 = vadd.f32 %v1136_v28, %v355_v29 }
  0xa1   :  { %v405_v33 = vadd.f32 %v404_v30, %v356_v31 }
  0xa3   :  { %v1139_v34 = vadd.f32 %v453_v26, %v405_v33 }
  0xa4   :  { %v460_v38 = vpop.f32.mrf.mxu2 }
  0xa6   :  { %v357_v35 = vpop.f32.mrf.mxu0 }
  0xa7   :  { %v406_v36 = vpop.f32.mrf.mxu1  ;;  %v358_v37 = vadd.f32 %v1136_v28, %v357_v35 }
  0xa9   :  { %v407_v39 = vadd.f32 %v406_v36, %v358_v37 }
  0xab   :  { %v1142_v40 = vadd.f32 %v455_v27, %v407_v39 }
  0xac   :  { %v463_v44 = vpop.f32.mrf.mxu2 }
  0xae   :  { %v360_v41 = vpop.f32.mrf.mxu0 }
  0xaf   :  { %v409_v42 = vpop.f32.mrf.mxu1  ;;  %v361_v43 = vadd.f32 %v1136_v28, %v360_v41 }
  0xb1   :  { %v410_v45 = vadd.f32 %v409_v42, %v361_v43 }
  0xb3   :  { %v1145_v46 = vadd.f32 %v458_v32, %v410_v45 }
  0xb4   :  { %v465_v50 = vpop.f32.mrf.mxu2 }
  0xb6   :  { %v362_v47 = vpop.f32.mrf.mxu0 }
  0xb7   :  { %v411_v48 = vpop.f32.mrf.mxu1  ;;  %v363_v49 = vadd.f32 %v1136_v28, %v362_v47 }
  0xb9   :  { %v412_v51 = vadd.f32 %v411_v48, %v363_v49 }
  0xbb   :  { %v1148_v52 = vadd.f32 %v460_v38, %v412_v51 }
  0xbc   :  { %v468_v56 = vpop.f32.mrf.mxu2 }
  0xbe   :  { %v365_v53 = vpop.f32.mrf.mxu0 }
  0xbf   :  { %v414_v54 = vpop.f32.mrf.mxu1  ;;  %v366_v55 = vadd.f32 %v1136_v28, %v365_v53 }
  0xc1   :  { %v415_v57 = vadd.f32 %v414_v54, %v366_v55 }
  0xc3   :  { %v1151_v58 = vadd.f32 %v463_v44, %v415_v57 }
  0xc4   :  { %v470_v63 = vpop.f32.mrf.mxu2 }
  0xc6   :  { %v367_v59 = vpop.f32.mrf.mxu0 }
  0xc7   :  { %v416_v60 = vpop.f32.mrf.mxu1  ;;  %v368_v61 = vadd.f32 %v1136_v28, %v367_v59 }
  0xc9   :  { %v417_v62 = vadd.f32 %v416_v60, %v368_v61 }
  0xcb   :  { %v1154_v0 = vadd.f32 %v465_v50, %v417_v62 }
  0xcc   :  { %v473_v5 = vpop.f32.mrf.mxu2 }
  0xce   :  { %v370_v1 = vpop.f32.mrf.mxu0 }
  0xcf   :  { %v419_v2 = vpop.f32.mrf.mxu1  ;;  %v371_v3 = vadd.f32 %v1136_v28, %v370_v1 }
  0xd1   :  { %v420_v4 = vadd.f32 %v419_v2, %v371_v3 }
  0xd3   :  { %v1157_v6 = vadd.f32 %v468_v56, %v420_v4 }
  0xd4   :  { %v475_v12 = vpop.f32.mrf.mxu2 }
  0xd6   :  { %v372_v7 = vpop.f32.mrf.mxu0 }
  0xd7   :  { %v421_v8 = vpop.f32.mrf.mxu1  ;;  %v373_v9 = vadd.f32 %v1136_v28, %v372_v7 }
  0xd9   :  { %v422_v10 = vadd.f32 %v421_v8, %v373_v9 }
  0xdb   :  { %v1160_v11 = vadd.f32 %v470_v63, %v422_v10 }
  0xdc   :  { %v478_v20 = vpop.f32.mrf.mxu2 }
  0xde   :  { %v375_v13 = vpop.f32.mrf.mxu0 }
  0xdf   :  { %v424_v14 = vpop.f32.mrf.mxu1  ;;  %v376_v15 = vadd.f32 %v1136_v28, %v375_v13 }
  0xe1   :  { %v425_v16 = vadd.f32 %v424_v14, %v376_v15 }
  0xe3   :  { %v1163_v17 = vadd.f32 %v473_v5, %v425_v16 }
  0xe4   :  { %v480_v23 = vpop.f32.mrf.mxu2 }
  0xe6   :  { %v377_v18 = vpop.f32.mrf.mxu0 }
  0xe7   :  { %v426_v19 = vpop.f32.mrf.mxu1  ;;  %v378_v55 = vadd.f32 %v1136_v28, %v377_v18 }
  0xe9   :  { %v427_v61 = vadd.f32 %v426_v19, %v378_v55 }
  0xeb   :  { %v476_v1 = vadd.f32 %v475_v12, %v427_v61 }
  0xec   :  { %v483_v26 = vpop.f32.mrf.mxu2 }
  0xee   :  { %v380_v21 = vpop.f32.mrf.mxu0 }
  0xef   :  { %v429_v22 = vpop.f32.mrf.mxu1  ;;  %v381_v51 = vadd.f32 %v1136_v28, %v380_v21 }
  0xf1   :  { %v430_v59 = vadd.f32 %v429_v22, %v381_v51 }
  0xf3   :  { %v479_v63 = vadd.f32 %v478_v20, %v430_v59  ;;  %v893_v59 = vld [vmem:[%s1299_s4] ss:$0 sm:$0xff] }
  0xf4   :  { %v485_v30 = vpop.f32.mrf.mxu2 }
  0xf6   :  { %v382_v24 = vpop.f32.mrf.mxu0 }
  0xf7   :  { %v431_v25 = vpop.f32.mrf.mxu1  ;;  %v383_v48 = vadd.f32 %v1136_v28, %v382_v24 }
  0xf9   :  { %v432_v56 = vadd.f32 %v431_v25, %v383_v48 }
  0xfb   :  { %v481_v62 = vadd.f32 %v480_v23, %v432_v56 }
  0xfc   :  { %v488_v36 = vpop.f32.mrf.mxu2 }
  0xfe   :  { %v385_v27 = vpop.f32.mrf.mxu0 }
  0xff   :  { %v434_v29 = vpop.f32.mrf.mxu1  ;;  %v386_v43 = vadd.f32 %v1136_v28, %v385_v27 }
 0x101   :  { %v435_v53 = vadd.f32 %v434_v29, %v386_v43 }
 0x103   :  { %v484_v60 = vadd.f32 %v483_v26, %v435_v53 }
 0x104   :  { %v490_v47 = vpop.f32.mrf.mxu2 }
 0x106   :  { %v387_v31 = vpop.f32.mrf.mxu0 }
 0x107   :  { %v436_v32 = vpop.f32.mrf.mxu1  ;;  %v388_v39 = vadd.f32 %v1136_v28, %v387_v31 }
 0x109   :  { %v437_v49 = vadd.f32 %v436_v32, %v388_v39 }
 0x10b   :  { %v486_v57 = vadd.f32 %v485_v30, %v437_v49  ;;  %v892_v49 = vld [vmem:[%s1298_s3] ss:$0 sm:$0xff] }
 0x10e   :  { %v390_v33 = vpop.f32.mrf.mxu0 }
 0x10f   :  { %v439_v35 = vpop.f32.mrf.mxu1  ;;  %v391_v37 = vadd.f32 %v1136_v28, %v390_v33 }
 0x111   :  { %v440_v44 = vadd.f32 %v439_v35, %v391_v37 }
 0x113   :  { %v489_v54 = vadd.f32 %v488_v36, %v440_v44 }
 0x116   :  { %v392_v38 = vpop.f32.mrf.mxu0 }
 0x117   :  { %v393_v41 = vadd.f32 %v1136_v28, %v392_v38  ;;  %v441_v42 = vpop.f32.mrf.mxu1  ;;  %v896_v28 = vmov 1.0  }
 0x119   :  { %v442_v45 = vadd.f32 %v441_v42, %v393_v41 }
 0x11b   :  { %v491_v50 = vadd.f32 %v490_v47, %v442_v45 }
 0x11d   :  { %493 = vmatpush.msra.mxu3 %v491_v50 }
 0x11f   :  { %494 = vmatpush.msra.mxu3 %v489_v54 }
 0x121   :  { %495 = vmatpush.msra.mxu3 %v486_v57 }
 0x123   :  { %496 = vmatpush.msra.mxu3 %v484_v60 }
 0x125   :  { %497 = vmatpush.msra.mxu3 %v481_v62 }
 0x127   :  { %498 = vmatpush.msra.mxu3 %v479_v63 }
 0x129   :  { %499 = vmatpush.msra.mxu3 %v476_v1 }
 0x12b   :  { %500 = vmatpush.msra.mxu3 %v1163_v17 }
 0x12d   :  { %501 = vmatpush.msra.mxu3 %v1160_v11 }
 0x12f   :  { %502 = vmatpush.msra.mxu3 %v1157_v6 }
 0x131   :  { %503 = vmatpush.msra.mxu3 %v1154_v0 }
 0x133   :  { %504 = vmatpush.msra.mxu3 %v1151_v58 }
 0x135   :  { %505 = vmatpush.msra.mxu3 %v1148_v52 }
 0x137   :  { %506 = vmatpush.msra.mxu3 %v1145_v46 }
 0x139   :  { %507 = vmatpush.msra.mxu3 %v1142_v40 }
 0x13b   :  { %508 = vmatpush.msra.mxu3 %v1139_v34 }
 0x13c   :  { %509 = vmatmul.f32.vlgmr.msra.gmra.mxu3 %v896_v28 }
 0x1bf   :  { %v510_v2 = vpop.f32.mrf.mxu3 }
 0x1c0   :  { %v513_v3 = vmul.f32 0.0078125, %v510_v2 }
 0x1c2   :  { %v514_v4 = vperm.slane %v513_v3, 0 }
 0x1c4   :  { %v1181_v5 = vsub.f32 %v491_v50, %v514_v4  ;;  %v1183_v7 = vsub.f32 %v489_v54, %v514_v4  ;;  %v1187_v9 = vsub.f32 %v486_v57, %v514_v4  ;;  %v1191_v12 = vsub.f32 %v484_v60, %v514_v4 }
 0x1c5   :  { %v1195_v14 = vsub.f32 %v481_v62, %v514_v4  ;;  %v1199_v16 = vsub.f32 %v479_v63, %v514_v4  ;;  %v1203_v19 = vsub.f32 %v476_v1, %v514_v4  ;;  %v523_v21 = vsub.f32 %v1163_v17, %v514_v4 }
 0x1c6   :  { %v546_v8 = vmul.f32 %v1181_v5, %v1181_v5  ;;  %v545_v10 = vmul.f32 %v1183_v7, %v1183_v7  ;;  %v544_v13 = vmul.f32 %v1187_v9, %v1187_v9  ;;  %v543_v15 = vmul.f32 %v1191_v12, %v1191_v12 }
 0x1c7   :  { %v542_v18 = vmul.f32 %v1195_v14, %v1195_v14  ;;  %v541_v20 = vmul.f32 %v1199_v16, %v1199_v16  ;;  %v540_v22 = vmul.f32 %v1203_v19, %v1203_v19  ;;  %v522_v23 = vsub.f32 %v1160_v11, %v514_v4 }
 0x1c8   :  { %547 = vmatpush.msrb.mxu3 %v546_v8  ;;  %v539_v24 = vmul.f32 %v523_v21, %v523_v21  ;;  %v521_v25 = vsub.f32 %v1157_v6, %v514_v4  ;;  %v520_v27 = vsub.f32 %v1154_v0, %v514_v4  ;;  %v519_v30 = vsub.f32 %v1151_v58, %v514_v4 }
 0x1c9   :  { %v538_v26 = vmul.f32 %v522_v23, %v522_v23  ;;  %v518_v31 = vsub.f32 %v1148_v52, %v514_v4  ;;  %v517_v11 = vsub.f32 %v1145_v46, %v514_v4  ;;  %v516_v6 = vsub.f32 %v1142_v40, %v514_v4 }
 0x1ca   :  { %548 = vmatpush.msrb.mxu3 %v545_v10  ;;  %v537_v29 = vmul.f32 %v521_v25, %v521_v25  ;;  %v536_v17 = vmul.f32 %v520_v27, %v520_v27  ;;  %v535_v32 = vmul.f32 %v519_v30, %v519_v30  ;;  %v515_v0 = vsub.f32 %v1139_v34, %v514_v4 }
 0x1cb   :  { %v534_v33 = vmul.f32 %v518_v31, %v518_v31  ;;  %v533_v35 = vmul.f32 %v517_v11, %v517_v11  ;;  %v532_v36 = vmul.f32 %v516_v6, %v516_v6 }
 0x1cc   :  { %549 = vmatpush.msrb.mxu3 %v544_v13  ;;  %v531_v58 = vmul.f32 %v515_v0, %v515_v0 }
 0x1ce   :  { %550 = vmatpush.msrb.mxu3 %v543_v15 }
 0x1d0   :  { %551 = vmatpush.msrb.mxu3 %v542_v18 }
 0x1d2   :  { %552 = vmatpush.msrb.mxu3 %v541_v20 }
 0x1d4   :  { %553 = vmatpush.msrb.mxu3 %v540_v22 }
 0x1d6   :  { %554 = vmatpush.msrb.mxu3 %v539_v24 }
 0x1d8   :  { %555 = vmatpush.msrb.mxu3 %v538_v26 }
 0x1da   :  { %556 = vmatpush.msrb.mxu3 %v537_v29 }
 0x1dc   :  { %557 = vmatpush.msrb.mxu3 %v536_v17 }
 0x1de   :  { %558 = vmatpush.msrb.mxu3 %v535_v32 }
 0x1e0   :  { %559 = vmatpush.msrb.mxu3 %v534_v33 }
 0x1e2   :  { %560 = vmatpush.msrb.mxu3 %v533_v35 }
 0x1e4   :  { %561 = vmatpush.msrb.mxu3 %v532_v36 }
 0x1e6   :  { %562 = vmatpush.msrb.mxu3 %v531_v58 }
 0x1e7   :  { %563 = vmatmul.f32.vlgmr.msrb.gmra.mxu3 %v896_v28 }
 0x26a   :  { %v564_v37 = vpop.f32.mrf.mxu3 }
 0x26b   :  { %v567_v52 = vmul.f32 0.0078125, %v564_v37 }
 0x26d   :  { %v568_v38 = vadd.f32 1e-05, %v567_v52 }
 0x26f   :  { %894 = vrsqrt.f32 %v568_v38  ;;  %vm575_vm2 = vweird.f32 %v568_v38 }
 0x275   :  { %v895_v39 = vpop.eup %894 }
 0x276   :  { %v570_v46 = vmul.f32 %v895_v39, %v568_v38  ;;  %vm576_vm1 = vweird.f32 %v895_v39 }
 0x277   :  { %vm577_vm3 = vmor %vm575_vm2, %vm576_vm1 }
 0x278   :  { %v571_v41 = vmul.f32 %v895_v39, %v570_v46 }
 0x27a   :  { %v572_v42 = vmul.f32 0.5, %v571_v41 }
 0x27c   :  { %v573_v43 = vsub.f32 1.5, %v572_v42 }
 0x27e   :  { %v574_v40 = vmul.f32 %v895_v39, %v573_v43 }
 0x280   :  { %v578_v34 = vsel %vm577_vm3, %v895_v39, %v574_v40 }
 0x281   :  { %v579_v44 = vperm.slane %v578_v34, 0 }
 0x283   :  { %v580_v45 = vmul.f32 %v579_v44, %v515_v0  ;;  %v581_v47 = vmul.f32 %v579_v44, %v516_v6  ;;  %v582_v48 = vmul.f32 %v579_v44, %v517_v11  ;;  %v583_v50 = vmul.f32 %v579_v44, %v518_v31 }
 0x284   :  { %v584_v51 = vmul.f32 %v579_v44, %v519_v30  ;;  %v585_v53 = vmul.f32 %v579_v44, %v520_v27  ;;  %v586_v54 = vmul.f32 %v579_v44, %v521_v25  ;;  %v587_v60 = vmul.f32 %v579_v44, %v522_v23 }
 0x285   :  { %v600_v55 = vmul.f32 %v892_v49, %v580_v45  ;;  %v601_v56 = vmul.f32 %v892_v49, %v581_v47  ;;  %v602_v57 = vmul.f32 %v892_v49, %v582_v48  ;;  %v603_v61 = vmul.f32 %v892_v49, %v583_v50 }
 0x286   :  { %v588_v62 = vmul.f32 %v579_v44, %v523_v21  ;;  %v604_v63 = vmul.f32 %v892_v49, %v584_v51  ;;  %v589_v1 = vmul.f32 %v579_v44, %v1203_v19  ;;  %v590_v28 = vmul.f32 %v579_v44, %v1199_v16 }
 0x287   :  { %v605_v2 = vmul.f32 %v892_v49, %v585_v53  ;;  %v606_v3 = vmul.f32 %v892_v49, %v586_v54  ;;  %v620_v4 = vadd.f32 %v893_v59, %v600_v55  ;;  %v621_v8 = vadd.f32 %v893_v59, %v601_v56 }
 0x288   :  { %v622_v10 = vadd.f32 %v893_v59, %v602_v57  ;;  %v591_v13 = vmul.f32 %v579_v44, %v1195_v14  ;;  %v607_v15 = vmul.f32 %v892_v49, %v587_v60  ;;  %v623_v18 = vadd.f32 %v893_v59, %v603_v61 }
 0x289   :  { %v592_v20 = vmul.f32 %v579_v44, %v1191_v12  ;;  %v593_v22 = vmul.f32 %v579_v44, %v1187_v9  ;;  %v608_v23 = vmul.f32 %v892_v49, %v588_v62  ;;  %v624_v21 = vadd.f32 %v893_v59, %v604_v63 }
 0x28a   :  { %v594_v24 = vmul.f32 %v579_v44, %v1183_v7  ;;  %v609_v19 = vmul.f32 %v892_v49, %v589_v1  ;;  %v610_v25 = vmul.f32 %v892_v49, %v590_v28  ;;  %v625_v16 = vadd.f32 %v893_v59, %v605_v2 }
 0x28b   :  { %v626_v26 = vadd.f32 %v893_v59, %v606_v3  ;;  %v636_v27 = vmax.f32 %v620_v4, 0.0  ;;  %v637_v29 = vmax.f32 %v621_v8, 0.0  ;;  %v638_v30 = vmax.f32 %v622_v10, 0.0 }
 0x28c   :  { %v595_v17 = vmul.f32 %v579_v44, %v1181_v5  ;;  %v611_v14 = vmul.f32 %v892_v49, %v591_v13  ;;  %v627_v31 = vadd.f32 %v893_v59, %v607_v15  ;;  %v639_v32 = vmax.f32 %v623_v18, 0.0 }
 0x28d   :  { %v612_v11 = vmul.f32 %v892_v49, %v592_v20  ;;  %v628_v12 = vadd.f32 %v893_v59, %v608_v23  ;;  %v640_v33 = vmax.f32 %v624_v21, 0.0  ;;  %652 = vst.msk [vmem:[%s1300_s5] sm:$0xff] %vm321_vm0, %v636_v27  ;;  %v613_v7 = vmul.f32 %v892_v49, %v593_v22 }
 0x28e   :  { %v629_v9 = vadd.f32 %v893_v59, %v609_v19  ;;  %v641_v6 = vmax.f32 %v625_v16, 0.0  ;;  %653 = vst.msk [vmem:[%s1300_s5 + $0x8] sm:$0xff] %vm321_vm0, %v637_v29  ;;  %v614_v5 = vmul.f32 %v892_v49, %v594_v24  ;;  %v630_v35 = vadd.f32 %v893_v59, %v610_v25 }
 0x28f   :  { %v642_v0 = vmax.f32 %v626_v26, 0.0  ;;  %654 = vst.msk [vmem:[%s1300_s5 + $0x10] sm:$0xff] %vm321_vm0, %v638_v30  ;;  %v615_v36 = vmul.f32 %v892_v49, %v595_v17  ;;  %v631_v58 = vadd.f32 %v893_v59, %v611_v14  ;;  %v643_v37 = vmax.f32 %v627_v31, 0.0 }
 0x290   :  { %655 = vst.msk [vmem:[%s1300_s5 + $0x18] sm:$0xff] %vm321_vm0, %v639_v32  ;;  %v632_v52 = vadd.f32 %v893_v59, %v612_v11  ;;  %v644_v38 = vmax.f32 %v628_v12, 0.0  ;;  %v633_v39 = vadd.f32 %v893_v59, %v613_v7  ;;  %v645_v46 = vmax.f32 %v629_v9, 0.0 }
 0x291   :  { %656 = vst.msk [vmem:[%s1300_s5 + $0x20] sm:$0xff] %vm321_vm0, %v640_v33  ;;  %v634_v41 = vadd.f32 %v893_v59, %v614_v5  ;;  %v646_v42 = vmax.f32 %v630_v35, 0.0  ;;  %v635_v43 = vadd.f32 %v893_v59, %v615_v36  ;;  %v647_v40 = vmax.f32 %v631_v58, 0.0 }
 0x292   :  { %657 = vst.msk [vmem:[%s1300_s5 + $0x28] sm:$0xff] %vm321_vm0, %v641_v6  ;;  %v648_v34 = vmax.f32 %v632_v52, 0.0  ;;  %v649_v44 = vmax.f32 %v633_v39, 0.0 }
 0x293   :  { %658 = vst.msk [vmem:[%s1300_s5 + $0x30] sm:$0xff] %vm321_vm0, %v642_v0  ;;  %v650_v45 = vmax.f32 %v634_v41, 0.0  ;;  %v651_v47 = vmax.f32 %v635_v43, 0.0 }
 0x294   :  { %659 = vst.msk [vmem:[%s1300_s5 + $0x38] sm:$0xff] %vm321_vm0, %v643_v37 }
 0x295   :  { %660 = vst.msk [vmem:[%s1300_s5 + $0x40] sm:$0xff] %vm321_vm0, %v644_v38 }
 0x296   :  { %661 = vst.msk [vmem:[%s1300_s5 + $0x48] sm:$0xff] %vm321_vm0, %v645_v46 }
 0x297   :  { %662 = vst.msk [vmem:[%s1300_s5 + $0x50] sm:$0xff] %vm321_vm0, %v646_v42 }
 0x298   :  { %663 = vst.msk [vmem:[%s1300_s5 + $0x58] sm:$0xff] %vm321_vm0, %v647_v40 }
 0x299   :  { %664 = vst.msk [vmem:[%s1300_s5 + $0x60] sm:$0xff] %vm321_vm0, %v648_v34 }
 0x29a   :  { %665 = vst.msk [vmem:[%s1300_s5 + $0x68] sm:$0xff] %vm321_vm0, %v649_v44 }
 0x29b   :  { %666 = vst.msk [vmem:[%s1300_s5 + $0x70] sm:$0xff] %vm321_vm0, %v650_v45 }
 0x29c   :  { %667 = vst.msk [vmem:[%s1300_s5 + $0x78] sm:$0xff] %vm321_vm0, %v651_v47 }

// kernel: feat2net_forward.36
= control target key start
LH: loop header
LB: loop body
LE: loop exit
PB: predicated region body
PF: predicated region fallthrough
CT: control target
= control target key end

     0   :  { %vm324_vm0 = vcmask 261120   ;;  %s1419_s1 = inlined_call_operand.vmem [shape: bf16[288,32], index: 1, kind: input, shape index: {}]   ;;  %s1420_s0 = inlined_call_operand.vmem [shape: bf16[128,288], index: 0, kind: input, shape index: {}]   ;;  %s1421_s2 = inlined_call_operand.vmem [shape: f32[1,32], index: 2, kind: input, shape index: {}]   ;;  %s1422_s3 = inlined_call_operand.vmem [shape: f32[1,32], index: 3, kind: input, shape index: {}]   ;;  %s1423_s4 = inlined_call_operand.vmem [shape: f32[1,32], index: 4, kind: input, shape index: {}]   ;;  %s1424_s5 = inlined_call_operand.vmem [shape: f32[128,32], index: 5, kind: input, shape index: {}]   ;;  %s1425_s6 = inlined_call_operand.vmem [shape: f32[128,32], index: 6, kind: output, shape index: {}]  }
   0x1   :  { %v914_v0 = vld [vmem:[%s1419_s1 + $0x38] sm:$0xff]  ;;  %v913_v2 = vld [vmem:[%s1419_s1 + $0x30] sm:$0xff]  ;;  %v924_v4 = vld [vmem:[%s1419_s1 + $0x88] sm:$0xff] }
   0x2   :  { %v922_v1 = vld [vmem:[%s1419_s1 + $0x78] sm:$0xff]  ;;  %349 = vmatpush.bf16.msra.mxu0 %v914_v0  ;;  %v921_v3 = vld [vmem:[%s1419_s1 + $0x70] sm:$0xff]  ;;  %453 = vmatpush.bf16.msra.mxu2 %v924_v4  ;;  %v923_v5 = vld [vmem:[%s1419_s1 + $0x80] sm:$0xff] }
   0x3   :  { %398 = vmatpush.bf16.msra.mxu1 %v922_v1  ;;  %v717_v6 = vld [vmem:[%s1420_s0 + $0x8] sm:$0xf]  ;;  %v885_v7 = vld [vmem:[%s1420_s0 + $0x10] sm:$0xf0]  ;;  %v911_v11 = vld [vmem:[%s1419_s1 + $0x20] sm:$0xff] }
   0x4   :  { %v912_v8 = vld [vmem:[%s1419_s1 + $0x28] sm:$0xff]  ;;  %v718_v10 = vor.u32 %v885_v7, %v717_v6  ;;  %v919_v12 = vld [vmem:[%s1419_s1 + $0x60] sm:$0xff]  ;;  %v910_v13 = vld [vmem:[%s1419_s1 + $0x18] sm:$0xff] }
   0x5   :  { %v920_v9 = vld [vmem:[%s1419_s1 + $0x68] sm:$0xff]  ;;  %v918_v14 = vld [vmem:[%s1419_s1 + $0x58] sm:$0xff]  ;;  %v909_v15 = vld [vmem:[%s1419_s1 + $0x10] sm:$0xff] }
   0x6   :  { %350 = vmatpush.bf16.msra.mxu0 %v913_v2  ;;  %454 = vmatpush.bf16.msra.mxu2 %v923_v5  ;;  %v917_v16 = vld [vmem:[%s1419_s1 + $0x50] sm:$0xff]  ;;  %v729_v17 = vld [vmem:[%s1420_s0 + $0x20] sm:$0xf]  ;;  %v888_v18 = vld [vmem:[%s1420_s0 + $0x28] sm:$0xf0] }
   0x7   :  { %399 = vmatpush.bf16.msra.mxu1 %v921_v3  ;;  %v908_v19 = vld [vmem:[%s1419_s1 + $0x8] sm:$0xff]  ;;  %v730_v21 = vor.u32 %v888_v18, %v729_v17  ;;  %v907_v22 = vld [vmem:[%s1419_s1] sm:$0xff]  ;;  %v711_v27 = vld [vmem:[%s1420_s0 + $0xc] sm:$0xf0] }
   0x8   :  { %v916_v20 = vld [vmem:[%s1419_s1 + $0x48] sm:$0xff]  ;;  %v915_v23 = vld [vmem:[%s1419_s1 + $0x40] sm:$0xff]  ;;  %v741_v30 = vld [vmem:[%s1420_s0 + $0x38] sm:$0xf] }
   0x9   :  { %875 = vmatmul.msk.bf16.vlgmr.msra.gmra.mxu2 %vm324_vm0, %v718_v10  ;;  %v709_v24 = vld [vmem:[%s1420_s0] sm:$0xf]  ;;  %v884_v25 = vld [vmem:[%s1420_s0 + $0x8] sm:$0xf0]  ;;  %v883_v26 = vld [vmem:[%s1420_s0 + $0x4] sm:$0xf] }
   0xa   :  { %351 = vmatpush.bf16.msra.mxu0 %v912_v8  ;;  %v710_v28 = vor.u32 %v884_v25, %v709_v24  ;;  %v714_v29 = vor.u32 %v883_v26, %v711_v27  ;;  %v891_v31 = vld [vmem:[%s1420_s0 + $0x40] sm:$0xf0]  ;;  %v721_v33 = vld [vmem:[%s1420_s0 + $0x18] sm:$0xf]  ;;  %v886_v35 = vld [vmem:[%s1420_s0 + $0x1c] sm:$0xf] }
   0xb   :  { %400 = vmatpush.bf16.msra.mxu1 %v920_v9  ;;  %v742_v32 = vor.u32 %v891_v31, %v741_v30  ;;  %v887_v34 = vld [vmem:[%s1420_s0 + $0x20] sm:$0xf0]  ;;  %v723_v36 = vld [vmem:[%s1420_s0 + $0x24] sm:$0xf0]  ;;  %v753_v39 = vld [vmem:[%s1420_s0 + $0x50] sm:$0xf] }
   0xc   :  { %v722_v37 = vor.u32 %v887_v34, %v721_v33  ;;  %v726_v38 = vor.u32 %v886_v35, %v723_v36  ;;  %v894_v40 = vld [vmem:[%s1420_s0 + $0x58] sm:$0xf0]  ;;  %v733_v42 = vld [vmem:[%s1420_s0 + $0x30] sm:$0xf]  ;;  %v889_v44 = vld [vmem:[%s1420_s0 + $0x34] sm:$0xf] }
   0xd   :  { %v754_v41 = vor.u32 %v894_v40, %v753_v39  ;;  %v890_v43 = vld [vmem:[%s1420_s0 + $0x38] sm:$0xf0]  ;;  %v735_v45 = vld [vmem:[%s1420_s0 + $0x3c] sm:$0xf0]  ;;  %v765_v48 = vld [vmem:[%s1420_s0 + $0x68] sm:$0xf] }
   0xe   :  { %352 = vmatpush.bf16.msra.mxu0 %v911_v11  ;;  %v734_v46 = vor.u32 %v890_v43, %v733_v42  ;;  %v738_v47 = vor.u32 %v889_v44, %v735_v45  ;;  %v897_v49 = vld [vmem:[%s1420_s0 + $0x70] sm:$0xf0]  ;;  %v745_v51 = vld [vmem:[%s1420_s0 + $0x48] sm:$0xf]  ;;  %v892_v53 = vld [vmem:[%s1420_s0 + $0x4c] sm:$0xf] }
   0xf   :  { %401 = vmatpush.bf16.msra.mxu1 %v919_v12  ;;  %v766_v50 = vor.u32 %v897_v49, %v765_v48  ;;  %v893_v52 = vld [vmem:[%s1420_s0 + $0x50] sm:$0xf0]  ;;  %v747_v54 = vld [vmem:[%s1420_s0 + $0x54] sm:$0xf0]  ;;  %v777_v57 = vld [vmem:[%s1420_s0 + $0x80] sm:$0xf] }
  0x10   :  { %v746_v55 = vor.u32 %v893_v52, %v745_v51  ;;  %v750_v56 = vor.u32 %v892_v53, %v747_v54  ;;  %v900_v58 = vld [vmem:[%s1420_s0 + $0x88] sm:$0xf0]  ;;  %v757_v60 = vld [vmem:[%s1420_s0 + $0x60] sm:$0xf]  ;;  %v895_v62 = vld [vmem:[%s1420_s0 + $0x64] sm:$0xf] }
  0x11   :  { %v778_v59 = vor.u32 %v900_v58, %v777_v57  ;;  %v896_v61 = vld [vmem:[%s1420_s0 + $0x68] sm:$0xf0]  ;;  %v759_v63 = vld [vmem:[%s1420_s0 + $0x6c] sm:$0xf0]  ;;  %v789_v2 = vld [vmem:[%s1420_s0 + $0x98] sm:$0xf] }
  0x12   :  { %353 = vmatpush.bf16.msra.mxu0 %v910_v13  ;;  %v758_v0 = vor.u32 %v896_v61, %v757_v60  ;;  %v762_v1 = vor.u32 %v895_v62, %v759_v63  ;;  %v903_v3 = vld [vmem:[%s1420_s0 + $0xa0] sm:$0xf0]  ;;  %v769_v5 = vld [vmem:[%s1420_s0 + $0x78] sm:$0xf]  ;;  %v898_v7 = vld [vmem:[%s1420_s0 + $0x7c] sm:$0xf] }
  0x13   :  { %402 = vmatpush.bf16.msra.mxu1 %v918_v14  ;;  %v790_v4 = vor.u32 %v903_v3, %v789_v2  ;;  %v899_v6 = vld [vmem:[%s1420_s0 + $0x80] sm:$0xf0]  ;;  %v771_v8 = vld [vmem:[%s1420_s0 + $0x84] sm:$0xf0]  ;;  %v801_v11 = vld [vmem:[%s1420_s0 + $0xb0] sm:$0xf] }
  0x14   :  { %v770_v9 = vor.u32 %v899_v6, %v769_v5  ;;  %v774_v10 = vor.u32 %v898_v7, %v771_v8  ;;  %v906_v12 = vld [vmem:[%s1420_s0 + $0xb8] sm:$0xf0]  ;;  %v781_v14 = vld [vmem:[%s1420_s0 + $0x90] sm:$0xf]  ;;  %v783_v17 = vld [vmem:[%s1420_s0 + $0x9c] sm:$0xf0] }
  0x15   :  { %v802_v13 = vor.u32 %v906_v12, %v801_v11 }
  0x16   :  { %354 = vmatpush.bf16.msra.mxu0 %v909_v15  ;;  %v902_v15 = vld [vmem:[%s1420_s0 + $0x98] sm:$0xf0] }
  0x17   :  { %403 = vmatpush.bf16.msra.mxu1 %v917_v16  ;;  %v901_v16 = vld [vmem:[%s1420_s0 + $0x94] sm:$0xf]  ;;  %v782_v18 = vor.u32 %v902_v15, %v781_v14 }
  0x19   :  { %876 = vmatmul.msk.bf16.gmra.mxu2 %vm324_vm0, %v730_v21  ;;  %v905_v21 = vld [vmem:[%s1420_s0 + $0xb0] sm:$0xf0] }
  0x1a   :  { %355 = vmatpush.bf16.msra.mxu0 %v908_v19  ;;  %v786_v19 = vor.u32 %v901_v16, %v783_v17 }
  0x1b   :  { %404 = vmatpush.bf16.msra.mxu1 %v916_v20  ;;  %v793_v20 = vld [vmem:[%s1420_s0 + $0xa8] sm:$0xf] }
  0x1c   :  { %v794_v24 = vor.u32 %v905_v21, %v793_v20 }
  0x1e   :  { %356 = vmatpush.bf16.msra.mxu0 %v907_v22  ;;  %v904_v22 = vld [vmem:[%s1420_s0 + $0xac] sm:$0xf] }
  0x1f   :  { %405 = vmatpush.bf16.msra.mxu1 %v915_v23  ;;  %v795_v23 = vld [vmem:[%s1420_s0 + $0xb4] sm:$0xf0] }
  0x20   :  { %v798_v25 = vor.u32 %v904_v22, %v795_v23 }
  0x21   :  { %357 = vmatmul.bf16.vlgmr.msra.gmra.mxu0 %v710_v28  ;;  %v1176_v28 = vld [vmem:[%s1421_s2] ss:$0 sm:$0xff] }
  0x22   :  { %406 = vmatmul.bf16.vlgmr.msra.gmra.mxu1 %v714_v29 }
  0x29   :  { %877 = vmatmul.msk.bf16.gmra.mxu2 %vm324_vm0, %v742_v32 }
  0x31   :  { %362 = vmatmul.bf16.gmra.mxu0 %v722_v37 }
  0x32   :  { %411 = vmatmul.bf16.gmra.mxu1 %v726_v38 }
  0x39   :  { %878 = vmatmul.msk.bf16.gmra.mxu2 %vm324_vm0, %v754_v41 }
  0x41   :  { %367 = vmatmul.bf16.gmra.mxu0 %v734_v46 }
  0x42   :  { %416 = vmatmul.bf16.gmra.mxu1 %v738_v47 }
  0x49   :  { %879 = vmatmul.msk.bf16.gmra.mxu2 %vm324_vm0, %v766_v50 }
  0x51   :  { %372 = vmatmul.bf16.gmra.mxu0 %v746_v55 }
  0x52   :  { %421 = vmatmul.bf16.gmra.mxu1 %v750_v56 }
  0x59   :  { %880 = vmatmul.msk.bf16.gmra.mxu2 %vm324_vm0, %v778_v59 }
  0x61   :  { %377 = vmatmul.bf16.gmra.mxu0 %v758_v0 }
  0x62   :  { %426 = vmatmul.bf16.gmra.mxu1 %v762_v1 }
  0x69   :  { %881 = vmatmul.msk.bf16.gmra.mxu2 %vm324_vm0, %v790_v4 }
  0x71   :  { %382 = vmatmul.bf16.gmra.mxu0 %v770_v9 }
  0x72   :  { %431 = vmatmul.bf16.gmra.mxu1 %v774_v10 }
  0x79   :  { %882 = vmatmul.msk.bf16.gmra.mxu2 %vm324_vm0, %v802_v13 }
  0x81   :  { %387 = vmatmul.bf16.gmra.mxu0 %v782_v18 }
  0x82   :  { %436 = vmatmul.bf16.gmra.mxu1 %v786_v19 }
  0x8c   :  { %v456_v26 = vpop.f32.mrf.mxu2 }
  0x91   :  { %392 = vmatmul.bf16.gmra.mxu0 %v794_v24 }
  0x92   :  { %441 = vmatmul.bf16.gmra.mxu1 %v798_v25 }
  0x94   :  { %v458_v27 = vpop.f32.mrf.mxu2 }
  0x9c   :  { %v461_v32 = vpop.f32.mrf.mxu2 }
  0x9e   :  { %v358_v29 = vpop.f32.mrf.mxu0 }
  0x9f   :  { %v407_v30 = vpop.f32.mrf.mxu1  ;;  %v359_v31 = vadd.f32 %v1176_v28, %v358_v29 }
  0xa1   :  { %v408_v33 = vadd.f32 %v407_v30, %v359_v31 }
  0xa3   :  { %v1179_v34 = vadd.f32 %v456_v26, %v408_v33 }
  0xa4   :  { %v463_v38 = vpop.f32.mrf.mxu2 }
  0xa6   :  { %v360_v35 = vpop.f32.mrf.mxu0 }
  0xa7   :  { %v409_v36 = vpop.f32.mrf.mxu1  ;;  %v361_v37 = vadd.f32 %v1176_v28, %v360_v35 }
  0xa9   :  { %v410_v39 = vadd.f32 %v409_v36, %v361_v37 }
  0xab   :  { %v1182_v40 = vadd.f32 %v458_v27, %v410_v39 }
  0xac   :  { %v466_v44 = vpop.f32.mrf.mxu2 }
  0xae   :  { %v363_v41 = vpop.f32.mrf.mxu0 }
  0xaf   :  { %v412_v42 = vpop.f32.mrf.mxu1  ;;  %v364_v43 = vadd.f32 %v1176_v28, %v363_v41 }
  0xb1   :  { %v413_v45 = vadd.f32 %v412_v42, %v364_v43 }
  0xb3   :  { %v1185_v46 = vadd.f32 %v461_v32, %v413_v45 }
  0xb4   :  { %v468_v50 = vpop.f32.mrf.mxu2 }
  0xb6   :  { %v365_v47 = vpop.f32.mrf.mxu0 }
  0xb7   :  { %v414_v48 = vpop.f32.mrf.mxu1  ;;  %v366_v49 = vadd.f32 %v1176_v28, %v365_v47 }
  0xb9   :  { %v415_v51 = vadd.f32 %v414_v48, %v366_v49 }
  0xbb   :  { %v1188_v52 = vadd.f32 %v463_v38, %v415_v51 }
  0xbc   :  { %v471_v56 = vpop.f32.mrf.mxu2 }
  0xbe   :  { %v368_v53 = vpop.f32.mrf.mxu0 }
  0xbf   :  { %v417_v54 = vpop.f32.mrf.mxu1  ;;  %v369_v55 = vadd.f32 %v1176_v28, %v368_v53 }
  0xc1   :  { %v418_v57 = vadd.f32 %v417_v54, %v369_v55 }
  0xc3   :  { %v1191_v58 = vadd.f32 %v466_v44, %v418_v57 }
  0xc4   :  { %v473_v63 = vpop.f32.mrf.mxu2 }
  0xc6   :  { %v370_v59 = vpop.f32.mrf.mxu0 }
  0xc7   :  { %v419_v60 = vpop.f32.mrf.mxu1  ;;  %v371_v61 = vadd.f32 %v1176_v28, %v370_v59 }
  0xc9   :  { %v420_v62 = vadd.f32 %v419_v60, %v371_v61 }
  0xcb   :  { %v1194_v0 = vadd.f32 %v468_v50, %v420_v62 }
  0xcc   :  { %v476_v5 = vpop.f32.mrf.mxu2 }
  0xce   :  { %v373_v1 = vpop.f32.mrf.mxu0 }
  0xcf   :  { %v422_v2 = vpop.f32.mrf.mxu1  ;;  %v374_v3 = vadd.f32 %v1176_v28, %v373_v1 }
  0xd1   :  { %v423_v4 = vadd.f32 %v422_v2, %v374_v3 }
  0xd3   :  { %v1197_v6 = vadd.f32 %v471_v56, %v423_v4 }
  0xd4   :  { %v478_v12 = vpop.f32.mrf.mxu2 }
  0xd6   :  { %v375_v7 = vpop.f32.mrf.mxu0 }
  0xd7   :  { %v424_v8 = vpop.f32.mrf.mxu1  ;;  %v376_v9 = vadd.f32 %v1176_v28, %v375_v7 }
  0xd9   :  { %v425_v10 = vadd.f32 %v424_v8, %v376_v9 }
  0xdb   :  { %v1200_v11 = vadd.f32 %v473_v63, %v425_v10 }
  0xdc   :  { %v481_v20 = vpop.f32.mrf.mxu2 }
  0xde   :  { %v378_v13 = vpop.f32.mrf.mxu0 }
  0xdf   :  { %v427_v14 = vpop.f32.mrf.mxu1  ;;  %v379_v15 = vadd.f32 %v1176_v28, %v378_v13 }
  0xe1   :  { %v428_v16 = vadd.f32 %v427_v14, %v379_v15 }
  0xe3   :  { %v1203_v17 = vadd.f32 %v476_v5, %v428_v16 }
  0xe4   :  { %v483_v23 = vpop.f32.mrf.mxu2 }
  0xe6   :  { %v380_v18 = vpop.f32.mrf.mxu0 }
  0xe7   :  { %v429_v19 = vpop.f32.mrf.mxu1  ;;  %v381_v55 = vadd.f32 %v1176_v28, %v380_v18 }
  0xe9   :  { %v430_v61 = vadd.f32 %v429_v19, %v381_v55 }
  0xeb   :  { %v479_v1 = vadd.f32 %v478_v12, %v430_v61 }
  0xec   :  { %v486_v26 = vpop.f32.mrf.mxu2 }
  0xee   :  { %v383_v21 = vpop.f32.mrf.mxu0 }
  0xef   :  { %v432_v22 = vpop.f32.mrf.mxu1  ;;  %v384_v51 = vadd.f32 %v1176_v28, %v383_v21 }
  0xf1   :  { %v433_v59 = vadd.f32 %v432_v22, %v384_v51 }
  0xf3   :  { %v482_v63 = vadd.f32 %v481_v20, %v433_v59  ;;  %v1269_v59 = vld [vmem:[%s1423_s4] ss:$0 sm:$0xff] }
  0xf4   :  { %v488_v30 = vpop.f32.mrf.mxu2 }
  0xf6   :  { %v385_v24 = vpop.f32.mrf.mxu0 }
  0xf7   :  { %v434_v25 = vpop.f32.mrf.mxu1  ;;  %v386_v48 = vadd.f32 %v1176_v28, %v385_v24 }
  0xf9   :  { %v435_v56 = vadd.f32 %v434_v25, %v386_v48 }
  0xfb   :  { %v484_v62 = vadd.f32 %v483_v23, %v435_v56 }
  0xfc   :  { %v491_v36 = vpop.f32.mrf.mxu2 }
  0xfe   :  { %v388_v27 = vpop.f32.mrf.mxu0 }
  0xff   :  { %v437_v29 = vpop.f32.mrf.mxu1  ;;  %v389_v43 = vadd.f32 %v1176_v28, %v388_v27 }
 0x101   :  { %v438_v53 = vadd.f32 %v437_v29, %v389_v43 }
 0x103   :  { %v487_v60 = vadd.f32 %v486_v26, %v438_v53 }
 0x104   :  { %v493_v47 = vpop.f32.mrf.mxu2 }
 0x106   :  { %v390_v31 = vpop.f32.mrf.mxu0 }
 0x107   :  { %v439_v32 = vpop.f32.mrf.mxu1  ;;  %v391_v39 = vadd.f32 %v1176_v28, %v390_v31 }
 0x109   :  { %v440_v49 = vadd.f32 %v439_v32, %v391_v39 }
 0x10b   :  { %v489_v57 = vadd.f32 %v488_v30, %v440_v49  ;;  %v1261_v49 = vld [vmem:[%s1422_s3] ss:$0 sm:$0xff] }
 0x10e   :  { %v393_v33 = vpop.f32.mrf.mxu0 }
 0x10f   :  { %v442_v35 = vpop.f32.mrf.mxu1  ;;  %v394_v37 = vadd.f32 %v1176_v28, %v393_v33 }
 0x111   :  { %v443_v44 = vadd.f32 %v442_v35, %v394_v37 }
 0x113   :  { %v492_v54 = vadd.f32 %v491_v36, %v443_v44 }
 0x116   :  { %v395_v38 = vpop.f32.mrf.mxu0 }
 0x117   :  { %v396_v41 = vadd.f32 %v1176_v28, %v395_v38  ;;  %v444_v42 = vpop.f32.mrf.mxu1  ;;  %v931_v28 = vmov 1.0  }
 0x119   :  { %v445_v45 = vadd.f32 %v444_v42, %v396_v41 }
 0x11b   :  { %v494_v50 = vadd.f32 %v493_v47, %v445_v45 }
 0x11d   :  { %496 = vmatpush.msra.mxu3 %v494_v50 }
 0x11f   :  { %497 = vmatpush.msra.mxu3 %v492_v54 }
 0x121   :  { %498 = vmatpush.msra.mxu3 %v489_v57 }
 0x123   :  { %499 = vmatpush.msra.mxu3 %v487_v60 }
 0x125   :  { %500 = vmatpush.msra.mxu3 %v484_v62 }
 0x127   :  { %501 = vmatpush.msra.mxu3 %v482_v63 }
 0x129   :  { %502 = vmatpush.msra.mxu3 %v479_v1 }
 0x12b   :  { %503 = vmatpush.msra.mxu3 %v1203_v17 }
 0x12d   :  { %504 = vmatpush.msra.mxu3 %v1200_v11 }
 0x12f   :  { %505 = vmatpush.msra.mxu3 %v1197_v6 }
 0x131   :  { %506 = vmatpush.msra.mxu3 %v1194_v0 }
 0x133   :  { %507 = vmatpush.msra.mxu3 %v1191_v58 }
 0x135   :  { %508 = vmatpush.msra.mxu3 %v1188_v52 }
 0x137   :  { %509 = vmatpush.msra.mxu3 %v1185_v46 }
 0x139   :  { %510 = vmatpush.msra.mxu3 %v1182_v40 }
 0x13b   :  { %511 = vmatpush.msra.mxu3 %v1179_v34 }
 0x13c   :  { %512 = vmatmul.f32.vlgmr.msra.gmra.mxu3 %v931_v28 }
 0x1bf   :  { %v513_v2 = vpop.f32.mrf.mxu3 }
 0x1c0   :  { %v516_v3 = vmul.f32 0.0078125, %v513_v2 }
 0x1c2   :  { %v517_v4 = vperm.slane %v516_v3, 0 }
 0x1c4   :  { %v1221_v5 = vsub.f32 %v494_v50, %v517_v4  ;;  %v1223_v7 = vsub.f32 %v492_v54, %v517_v4  ;;  %v1227_v9 = vsub.f32 %v489_v57, %v517_v4  ;;  %v1231_v12 = vsub.f32 %v487_v60, %v517_v4 }
 0x1c5   :  { %v1235_v14 = vsub.f32 %v484_v62, %v517_v4  ;;  %v1239_v16 = vsub.f32 %v482_v63, %v517_v4  ;;  %v1243_v19 = vsub.f32 %v479_v1, %v517_v4  ;;  %v526_v21 = vsub.f32 %v1203_v17, %v517_v4 }
 0x1c6   :  { %v549_v8 = vmul.f32 %v1221_v5, %v1221_v5  ;;  %v548_v10 = vmul.f32 %v1223_v7, %v1223_v7  ;;  %v547_v13 = vmul.f32 %v1227_v9, %v1227_v9  ;;  %v546_v15 = vmul.f32 %v1231_v12, %v1231_v12 }
 0x1c7   :  { %v545_v18 = vmul.f32 %v1235_v14, %v1235_v14  ;;  %v544_v20 = vmul.f32 %v1239_v16, %v1239_v16  ;;  %v543_v22 = vmul.f32 %v1243_v19, %v1243_v19  ;;  %v525_v23 = vsub.f32 %v1200_v11, %v517_v4 }
 0x1c8   :  { %550 = vmatpush.msrb.mxu3 %v549_v8  ;;  %v542_v24 = vmul.f32 %v526_v21, %v526_v21  ;;  %v524_v25 = vsub.f32 %v1197_v6, %v517_v4  ;;  %v523_v27 = vsub.f32 %v1194_v0, %v517_v4  ;;  %v522_v30 = vsub.f32 %v1191_v58, %v517_v4 }
 0x1c9   :  { %v541_v26 = vmul.f32 %v525_v23, %v525_v23  ;;  %v521_v31 = vsub.f32 %v1188_v52, %v517_v4  ;;  %v520_v11 = vsub.f32 %v1185_v46, %v517_v4  ;;  %v519_v6 = vsub.f32 %v1182_v40, %v517_v4 }
 0x1ca   :  { %551 = vmatpush.msrb.mxu3 %v548_v10  ;;  %v540_v29 = vmul.f32 %v524_v25, %v524_v25  ;;  %v539_v17 = vmul.f32 %v523_v27, %v523_v27  ;;  %v538_v32 = vmul.f32 %v522_v30, %v522_v30  ;;  %v518_v0 = vsub.f32 %v1179_v34, %v517_v4 }
 0x1cb   :  { %v537_v33 = vmul.f32 %v521_v31, %v521_v31  ;;  %v536_v35 = vmul.f32 %v520_v11, %v520_v11  ;;  %v535_v36 = vmul.f32 %v519_v6, %v519_v6 }
 0x1cc   :  { %552 = vmatpush.msrb.mxu3 %v547_v13  ;;  %v534_v58 = vmul.f32 %v518_v0, %v518_v0 }
 0x1ce   :  { %553 = vmatpush.msrb.mxu3 %v546_v15 }
 0x1d0   :  { %554 = vmatpush.msrb.mxu3 %v545_v18 }
 0x1d2   :  { %555 = vmatpush.msrb.mxu3 %v544_v20  ;;  %v641_v20 = vld [vmem:[%s1424_s5 + $0x10] sm:$0xff] }
 0x1d4   :  { %556 = vmatpush.msrb.mxu3 %v543_v22 }
 0x1d6   :  { %557 = vmatpush.msrb.mxu3 %v542_v24  ;;  %v642_v24 = vld [vmem:[%s1424_s5 + $0x18] sm:$0xff] }
 0x1d8   :  { %558 = vmatpush.msrb.mxu3 %v541_v26 }
 0x1da   :  { %559 = vmatpush.msrb.mxu3 %v540_v29 }
 0x1dc   :  { %560 = vmatpush.msrb.mxu3 %v539_v17 }
 0x1de   :  { %561 = vmatpush.msrb.mxu3 %v538_v32 }
 0x1e0   :  { %562 = vmatpush.msrb.mxu3 %v537_v33 }
 0x1e2   :  { %563 = vmatpush.msrb.mxu3 %v536_v35 }
 0x1e4   :  { %564 = vmatpush.msrb.mxu3 %v535_v36 }
 0x1e6   :  { %565 = vmatpush.msrb.mxu3 %v534_v58 }
 0x1e7   :  { %566 = vmatmul.f32.vlgmr.msrb.gmra.mxu3 %v931_v28 }
 0x26a   :  { %v567_v37 = vpop.f32.mrf.mxu3 }
 0x26b   :  { %v570_v52 = vmul.f32 0.0078125, %v567_v37  ;;  %v646_v37 = vld [vmem:[%s1424_s5 + $0x38] sm:$0xff] }
 0x26d   :  { %v571_v38 = vadd.f32 1e-05, %v570_v52 }
 0x26f   :  { %929 = vrsqrt.f32 %v571_v38  ;;  %vm578_vm2 = vweird.f32 %v571_v38 }
 0x275   :  { %v930_v39 = vpop.eup %929 }
 0x276   :  { %v573_v46 = vmul.f32 %v930_v39, %v571_v38  ;;  %vm579_vm1 = vweird.f32 %v930_v39 }
 0x277   :  { %vm580_vm3 = vmor %vm578_vm2, %vm579_vm1 }
 0x278   :  { %v574_v41 = vmul.f32 %v930_v39, %v573_v46  ;;  %v647_v46 = vld [vmem:[%s1424_s5 + $0x40] sm:$0xff] }
 0x27a   :  { %v575_v42 = vmul.f32 0.5, %v574_v41 }
 0x27c   :  { %v576_v43 = vsub.f32 1.5, %v575_v42  ;;  %v648_v42 = vld [vmem:[%s1424_s5 + $0x48] sm:$0xff] }
 0x27e   :  { %v577_v40 = vmul.f32 %v930_v39, %v576_v43 }
 0x280   :  { %v581_v34 = vsel %vm580_vm3, %v930_v39, %v577_v40 }
 0x281   :  { %v582_v44 = vperm.slane %v581_v34, 0 }
 0x283   :  { %v583_v45 = vmul.f32 %v582_v44, %v518_v0  ;;  %v584_v47 = vmul.f32 %v582_v44, %v519_v6  ;;  %v585_v48 = vmul.f32 %v582_v44, %v520_v11  ;;  %v586_v50 = vmul.f32 %v582_v44, %v521_v31  ;;  %v645_v6 = vld [vmem:[%s1424_s5 + $0x30] sm:$0xff] }
 0x284   :  { %v587_v51 = vmul.f32 %v582_v44, %v522_v30  ;;  %v588_v53 = vmul.f32 %v582_v44, %v523_v27  ;;  %v589_v54 = vmul.f32 %v582_v44, %v524_v25  ;;  %v590_v60 = vmul.f32 %v582_v44, %v525_v23  ;;  %v644_v30 = vld [vmem:[%s1424_s5 + $0x28] sm:$0xff] }
 0x285   :  { %v603_v55 = vmul.f32 %v1261_v49, %v583_v45  ;;  %v604_v56 = vmul.f32 %v1261_v49, %v584_v47  ;;  %v605_v57 = vmul.f32 %v1261_v49, %v585_v48  ;;  %v606_v61 = vmul.f32 %v1261_v49, %v586_v50  ;;  %v649_v48 = vld [vmem:[%s1424_s5 + $0x50] sm:$0xff] }
 0x286   :  { %v591_v62 = vmul.f32 %v582_v44, %v526_v21  ;;  %v607_v63 = vmul.f32 %v1261_v49, %v587_v51  ;;  %v592_v1 = vmul.f32 %v582_v44, %v1243_v19  ;;  %v593_v28 = vmul.f32 %v582_v44, %v1239_v16  ;;  %v639_v16 = vld [vmem:[%s1424_s5] sm:$0xff]  ;;  %v640_v19 = vld [vmem:[%s1424_s5 + $0x8] sm:$0xff] }
 0x287   :  { %v608_v2 = vmul.f32 %v1261_v49, %v588_v53  ;;  %v609_v3 = vmul.f32 %v1261_v49, %v589_v54  ;;  %v623_v4 = vadd.f32 %v1269_v59, %v603_v55  ;;  %v624_v8 = vadd.f32 %v1269_v59, %v604_v56  ;;  %v650_v54 = vld [vmem:[%s1424_s5 + $0x58] sm:$0xff] }
 0x288   :  { %v625_v10 = vadd.f32 %v1269_v59, %v605_v57  ;;  %v594_v13 = vmul.f32 %v582_v44, %v1235_v14  ;;  %v610_v15 = vmul.f32 %v1261_v49, %v590_v60  ;;  %v626_v18 = vadd.f32 %v1269_v59, %v606_v61  ;;  %v651_v57 = vld [vmem:[%s1424_s5 + $0x60] sm:$0xff] }
 0x289   :  { %v595_v21 = vmul.f32 %v582_v44, %v1231_v12  ;;  %v596_v14 = vmul.f32 %v582_v44, %v1227_v9  ;;  %v611_v22 = vmul.f32 %v1261_v49, %v591_v62  ;;  %v627_v23 = vadd.f32 %v1269_v59, %v607_v63  ;;  %v643_v9 = vld [vmem:[%s1424_s5 + $0x20] sm:$0xff]  ;;  %v652_v63 = vld [vmem:[%s1424_s5 + $0x68] sm:$0xff] }
 0x28a   :  { %v597_v25 = vmul.f32 %v582_v44, %v1223_v7  ;;  %v612_v26 = vmul.f32 %v1261_v49, %v592_v1  ;;  %v613_v27 = vmul.f32 %v1261_v49, %v593_v28  ;;  %v628_v29 = vadd.f32 %v1269_v59, %v608_v2 }
 0x28b   :  { %v629_v12 = vadd.f32 %v1269_v59, %v609_v3  ;;  %v655_v17 = vadd.f32 %v639_v16, %v623_v4  ;;  %v656_v31 = vadd.f32 %v640_v19, %v624_v8  ;;  %v657_v32 = vadd.f32 %v641_v20, %v625_v10  ;;  %v653_v3 = vld [vmem:[%s1424_s5 + $0x70] sm:$0xff]  ;;  %v654_v10 = vld [vmem:[%s1424_s5 + $0x78] sm:$0xff] }
 0x28c   :  { %v598_v7 = vmul.f32 %v582_v44, %v1221_v5  ;;  %v614_v11 = vmul.f32 %v1261_v49, %v594_v13  ;;  %v630_v33 = vadd.f32 %v1269_v59, %v610_v15  ;;  %v658_v35 = vadd.f32 %v642_v24, %v626_v18 }
 0x28d   :  { %v615_v0 = vmul.f32 %v1261_v49, %v595_v21  ;;  %v616_v36 = vmul.f32 %v1261_v49, %v596_v14  ;;  %v631_v58 = vadd.f32 %v1269_v59, %v611_v22  ;;  %v659_v5 = vadd.f32 %v643_v9, %v627_v23 }
 0x28e   :  { %v617_v52 = vmul.f32 %v1261_v49, %v597_v25  ;;  %v632_v38 = vadd.f32 %v1269_v59, %v612_v26  ;;  %v633_v39 = vadd.f32 %v1269_v59, %v613_v27  ;;  %v660_v41 = vadd.f32 %v644_v30, %v628_v29 }
 0x28f   :  { %v661_v43 = vadd.f32 %v645_v6, %v629_v12  ;;  %v671_v40 = vmax.f32 %v655_v17, 0.0  ;;  %v672_v34 = vmax.f32 %v656_v31, 0.0  ;;  %v673_v44 = vmax.f32 %v657_v32, 0.0 }
 0x290   :  { %v618_v45 = vmul.f32 %v1261_v49, %v598_v7  ;;  %v634_v47 = vadd.f32 %v1269_v59, %v614_v11  ;;  %v662_v50 = vadd.f32 %v646_v37, %v630_v33  ;;  %v674_v51 = vmax.f32 %v658_v35, 0.0 }
 0x291   :  { %v635_v53 = vadd.f32 %v1269_v59, %v615_v0  ;;  %v663_v55 = vadd.f32 %v647_v46, %v631_v58  ;;  %v675_v56 = vmax.f32 %v659_v5, 0.0  ;;  %687 = vst.msk [vmem:[%s1425_s6] sm:$0xff] %vm324_vm0, %v671_v40  ;;  %v636_v49 = vadd.f32 %v1269_v59, %v616_v36 }
 0x292   :  { %v664_v60 = vadd.f32 %v648_v42, %v632_v38  ;;  %v676_v61 = vmax.f32 %v660_v41, 0.0  ;;  %688 = vst.msk [vmem:[%s1425_s6 + $0x8] sm:$0xff] %vm324_vm0, %v672_v34  ;;  %v637_v62 = vadd.f32 %v1269_v59, %v617_v52  ;;  %v665_v1 = vadd.f32 %v649_v48, %v633_v39 }
 0x293   :  { %v677_v28 = vmax.f32 %v661_v43, 0.0  ;;  %689 = vst.msk [vmem:[%s1425_s6 + $0x10] sm:$0xff] %vm324_vm0, %v673_v44  ;;  %v638_v2 = vadd.f32 %v1269_v59, %v618_v45  ;;  %v666_v4 = vadd.f32 %v650_v54, %v634_v47  ;;  %v678_v8 = vmax.f32 %v662_v50, 0.0 }
 0x294   :  { %690 = vst.msk [vmem:[%s1425_s6 + $0x18] sm:$0xff] %vm324_vm0, %v674_v51  ;;  %v667_v13 = vadd.f32 %v651_v57, %v635_v53  ;;  %v679_v15 = vmax.f32 %v663_v55, 0.0  ;;  %v668_v59 = vadd.f32 %v652_v63, %v636_v49  ;;  %v680_v18 = vmax.f32 %v664_v60, 0.0 }
 0x295   :  { %691 = vst.msk [vmem:[%s1425_s6 + $0x20] sm:$0xff] %vm324_vm0, %v675_v56  ;;  %v669_v16 = vadd.f32 %v653_v3, %v637_v62  ;;  %v681_v19 = vmax.f32 %v665_v1, 0.0  ;;  %v670_v20 = vadd.f32 %v654_v10, %v638_v2  ;;  %v682_v21 = vmax.f32 %v666_v4, 0.0 }
 0x296   :  { %692 = vst.msk [vmem:[%s1425_s6 + $0x28] sm:$0xff] %vm324_vm0, %v676_v61  ;;  %v683_v14 = vmax.f32 %v667_v13, 0.0  ;;  %v684_v22 = vmax.f32 %v668_v59, 0.0 }
 0x297   :  { %693 = vst.msk [vmem:[%s1425_s6 + $0x30] sm:$0xff] %vm324_vm0, %v677_v28  ;;  %v685_v23 = vmax.f32 %v669_v16, 0.0  ;;  %v686_v24 = vmax.f32 %v670_v20, 0.0 }
 0x298   :  { %694 = vst.msk [vmem:[%s1425_s6 + $0x38] sm:$0xff] %vm324_vm0, %v678_v8 }
 0x299   :  { %695 = vst.msk [vmem:[%s1425_s6 + $0x40] sm:$0xff] %vm324_vm0, %v679_v15 }
 0x29a   :  { %696 = vst.msk [vmem:[%s1425_s6 + $0x48] sm:$0xff] %vm324_vm0, %v680_v18 }
 0x29b   :  { %697 = vst.msk [vmem:[%s1425_s6 + $0x50] sm:$0xff] %vm324_vm0, %v681_v19 }
 0x29c   :  { %698 = vst.msk [vmem:[%s1425_s6 + $0x58] sm:$0xff] %vm324_vm0, %v682_v21 }
 0x29d   :  { %699 = vst.msk [vmem:[%s1425_s6 + $0x60] sm:$0xff] %vm324_vm0, %v683_v14 }
 0x29e   :  { %700 = vst.msk [vmem:[%s1425_s6 + $0x68] sm:$0xff] %vm324_vm0, %v684_v22 }
 0x29f   :  { %701 = vst.msk [vmem:[%s1425_s6 + $0x70] sm:$0xff] %vm324_vm0, %v685_v23 }
 0x2a0   :  { %702 = vst.msk [vmem:[%s1425_s6 + $0x78] sm:$0xff] %vm324_vm0, %v686_v24 }

// kernel: feat2net_forward.43
= control target key start
LH: loop header
LB: loop body
LE: loop exit
PB: predicated region body
PF: predicated region fallthrough
CT: control target
= control target key end

     0   :  { %vm207_vm0 = vcmask 261120   ;;  %v500_v61 = vmov 1.0   ;;  %vm361_vm4 = vcmask 523264   ;;  %s646_s1 = inlined_call_operand.vmem [shape: bf16[288,64], index: 1, kind: input, shape index: {}]   ;;  %s647_s0 = inlined_call_operand.vmem [shape: bf16[32,288], index: 0, kind: input, shape index: {}]   ;;  %s648_s2 = inlined_call_operand.vmem [shape: f32[1,64], index: 2, kind: input, shape index: {}]   ;;  %s649_s3 = inlined_call_operand.vmem [shape: f32[1,64], index: 3, kind: input, shape index: {}]   ;;  %s650_s4 = inlined_call_operand.vmem [shape: f32[1,64], index: 4, kind: input, shape index: {}]   ;;  %s651_s5 = inlined_call_operand.vmem [shape: f32[32,64], index: 5, kind: output, shape index: {}]  }
   0x1   :  { %v483_v0 = vld [vmem:[%s646_s1 + $0x38] sm:$0xff]  ;;  %v482_v2 = vld [vmem:[%s646_s1 + $0x30] sm:$0xff]  ;;  %v493_v4 = vld [vmem:[%s646_s1 + $0x88] sm:$0xff] }
   0x2   :  { %v491_v1 = vld [vmem:[%s646_s1 + $0x78] sm:$0xff]  ;;  %214 = vmatpush.bf16.msra.mxu0 %v483_v0  ;;  %v490_v3 = vld [vmem:[%s646_s1 + $0x70] sm:$0xff]  ;;  %258 = vmatpush.bf16.msra.mxu2 %v493_v4  ;;  %v492_v5 = vld [vmem:[%s646_s1 + $0x80] sm:$0xff] }
   0x3   :  { %233 = vmatpush.bf16.msra.mxu1 %v491_v1  ;;  %v380_v6 = vld [vmem:[%s647_s0 + $0x8] sm:$0xf]  ;;  %v472_v7 = vld [vmem:[%s647_s0 + $0x10] sm:$0xf0]  ;;  %v480_v11 = vld [vmem:[%s646_s1 + $0x20] sm:$0xff] }
   0x4   :  { %v481_v8 = vld [vmem:[%s646_s1 + $0x28] sm:$0xff]  ;;  %v381_v10 = vor.u32 %v472_v7, %v380_v6  ;;  %v488_v12 = vld [vmem:[%s646_s1 + $0x60] sm:$0xff]  ;;  %v479_v13 = vld [vmem:[%s646_s1 + $0x18] sm:$0xff] }
   0x5   :  { %v489_v9 = vld [vmem:[%s646_s1 + $0x68] sm:$0xff]  ;;  %v487_v14 = vld [vmem:[%s646_s1 + $0x58] sm:$0xff]  ;;  %v478_v15 = vld [vmem:[%s646_s1 + $0x10] sm:$0xff] }
   0x6   :  { %215 = vmatpush.bf16.msra.mxu0 %v482_v2  ;;  %259 = vmatpush.bf16.msra.mxu2 %v492_v5  ;;  %v486_v16 = vld [vmem:[%s646_s1 + $0x50] sm:$0xff]  ;;  %v392_v17 = vld [vmem:[%s647_s0 + $0x20] sm:$0xf]  ;;  %v475_v18 = vld [vmem:[%s647_s0 + $0x28] sm:$0xf0] }
   0x7   :  { %234 = vmatpush.bf16.msra.mxu1 %v490_v3  ;;  %v477_v19 = vld [vmem:[%s646_s1 + $0x8] sm:$0xff]  ;;  %v393_v21 = vor.u32 %v475_v18, %v392_v17  ;;  %v476_v22 = vld [vmem:[%s646_s1] sm:$0xff]  ;;  %v374_v27 = vld [vmem:[%s647_s0 + $0xc] sm:$0xf0] }
   0x8   :  { %v485_v20 = vld [vmem:[%s646_s1 + $0x48] sm:$0xff]  ;;  %v484_v23 = vld [vmem:[%s646_s1 + $0x40] sm:$0xff]  ;;  %v384_v30 = vld [vmem:[%s647_s0 + $0x18] sm:$0xf] }
   0x9   :  { %466 = vmatmul.msk.bf16.vlgmr.msra.gmra.mxu2 %vm207_vm0, %v381_v10  ;;  %v372_v24 = vld [vmem:[%s647_s0] sm:$0xf]  ;;  %v471_v25 = vld [vmem:[%s647_s0 + $0x8] sm:$0xf0]  ;;  %v470_v26 = vld [vmem:[%s647_s0 + $0x4] sm:$0xf] }
   0xa   :  { %216 = vmatpush.bf16.msra.mxu0 %v481_v8  ;;  %v373_v28 = vor.u32 %v471_v25, %v372_v24  ;;  %v377_v29 = vor.u32 %v470_v26, %v374_v27  ;;  %v474_v31 = vld [vmem:[%s647_s0 + $0x20] sm:$0xf0]  ;;  %v473_v32 = vld [vmem:[%s647_s0 + $0x1c] sm:$0xf]  ;;  %v386_v33 = vld [vmem:[%s647_s0 + $0x24] sm:$0xf0] }
   0xb   :  { %235 = vmatpush.bf16.msra.mxu1 %v489_v9  ;;  %v385_v34 = vor.u32 %v474_v31, %v384_v30  ;;  %v389_v35 = vor.u32 %v473_v32, %v386_v33  ;;  %v495_v45 = vld [vmem:[%s648_s2] ss:$0 sm:$0xff] }
   0xc   :  { %v497_v25 = vld [vmem:[%s650_s4] ss:$0 sm:$0xff] }
   0xe   :  { %217 = vmatpush.bf16.msra.mxu0 %v480_v11 }
   0xf   :  { %236 = vmatpush.bf16.msra.mxu1 %v488_v12 }
  0x12   :  { %218 = vmatpush.bf16.msra.mxu0 %v479_v13 }
  0x13   :  { %237 = vmatpush.bf16.msra.mxu1 %v487_v14 }
  0x16   :  { %219 = vmatpush.bf16.msra.mxu0 %v478_v15 }
  0x17   :  { %238 = vmatpush.bf16.msra.mxu1 %v486_v16 }
  0x19   :  { %467 = vmatmul.msk.bf16.gmra.mxu2 %vm207_vm0, %v393_v21 }
  0x1a   :  { %220 = vmatpush.bf16.msra.mxu0 %v477_v19 }
  0x1b   :  { %239 = vmatpush.bf16.msra.mxu1 %v485_v20  ;;  %v496_v20 = vld [vmem:[%s649_s3] ss:$0 sm:$0xff] }
  0x1e   :  { %221 = vmatpush.bf16.msra.mxu0 %v476_v22 }
  0x1f   :  { %240 = vmatpush.bf16.msra.mxu1 %v484_v23 }
  0x21   :  { %222 = vmatmul.bf16.vlgmr.msra.gmra.mxu0 %v373_v28 }
  0x22   :  { %241 = vmatmul.bf16.vlgmr.msra.gmra.mxu1 %v377_v29 }
  0x31   :  { %227 = vmatmul.bf16.gmra.mxu0 %v385_v34 }
  0x32   :  { %246 = vmatmul.bf16.gmra.mxu1 %v389_v35 }
  0x8c   :  { %v261_v36 = vpop.f32.mrf.mxu2 }
  0x94   :  { %v263_v39 = vpop.f32.mrf.mxu2 }
  0x9c   :  { %v266_v44 = vpop.f32.mrf.mxu2 }
  0x9e   :  { %v223_v37 = vpop.f32.mrf.mxu0 }
  0x9f   :  { %v242_v38 = vpop.f32.mrf.mxu1  ;;  %v224_v51 = vadd.f32 %v495_v45, %v223_v37 }
  0xa1   :  { %v243_v57 = vadd.f32 %v242_v38, %v224_v51 }
  0xa3   :  { %v262_v60 = vadd.f32 %v261_v36, %v243_v57 }
  0xa4   :  { %v268_v54 = vpop.f32.mrf.mxu2 }
  0xa6   :  { %v225_v40 = vpop.f32.mrf.mxu0 }
  0xa7   :  { %v244_v41 = vpop.f32.mrf.mxu1  ;;  %v226_v48 = vadd.f32 %v495_v45, %v225_v40 }
  0xa9   :  { %v245_v55 = vadd.f32 %v244_v41, %v226_v48 }
  0xab   :  { %v264_v59 = vadd.f32 %v263_v39, %v245_v55 }
  0xae   :  { %v228_v42 = vpop.f32.mrf.mxu0 }
  0xaf   :  { %v247_v43 = vpop.f32.mrf.mxu1  ;;  %v229_v46 = vadd.f32 %v495_v45, %v228_v42 }
  0xb1   :  { %v248_v52 = vadd.f32 %v247_v43, %v229_v46 }
  0xb3   :  { %v267_v58 = vadd.f32 %v266_v44, %v248_v52 }
  0xb6   :  { %v230_v47 = vpop.f32.mrf.mxu0 }
  0xb7   :  { %v231_v49 = vadd.f32 %v495_v45, %v230_v47  ;;  %v249_v50 = vpop.f32.mrf.mxu1 }
  0xb9   :  { %v250_v53 = vadd.f32 %v249_v50, %v231_v49 }
  0xbb   :  { %v269_v56 = vadd.f32 %v268_v54, %v250_v53 }
  0xbd   :  { %286 = vmatpush.msra.mxu3 %v269_v56 }
  0xbf   :  { %287 = vmatpush.msra.mxu3 %v267_v58 }
  0xc1   :  { %288 = vmatpush.msra.mxu3 %v264_v59 }
  0xc3   :  { %289 = vmatpush.msra.mxu3 %v262_v60 }
  0xc4   :  { %468 = vmatmul.msk.f32.vlgmr.msra.gmra.mxu3 %vm207_vm0, %v500_v61 }
 0x147   :  { %v291_v62 = vpop.f32.mrf.mxu3 }
 0x148   :  { %v294_v63 = vmul.f32 0.03125, %v291_v62 }
 0x14a   :  { %v295_v0 = vperm.slane %v294_v63, 0 }
 0x14c   :  { %v299_v1 = vsub.f32 %v269_v56, %v295_v0  ;;  %v298_v2 = vsub.f32 %v267_v58, %v295_v0  ;;  %v297_v4 = vsub.f32 %v264_v59, %v295_v0  ;;  %v296_v6 = vsub.f32 %v262_v60, %v295_v0 }
 0x14e   :  { %v303_v3 = vmul.f32 %v299_v1, %v299_v1  ;;  %v302_v5 = vmul.f32 %v298_v2, %v298_v2  ;;  %v301_v7 = vmul.f32 %v297_v4, %v297_v4  ;;  %v300_v8 = vmul.f32 %v296_v6, %v296_v6 }
 0x150   :  { %316 = vmatpush.msrb.mxu3 %v303_v3 }
 0x152   :  { %317 = vmatpush.msrb.mxu3 %v302_v5 }
 0x154   :  { %318 = vmatpush.msrb.mxu3 %v301_v7 }
 0x156   :  { %319 = vmatpush.msrb.mxu3 %v300_v8 }
 0x157   :  { %469 = vmatmul.msk.f32.vlgmr.msrb.gmra.mxu3 %vm207_vm0, %v500_v61 }
 0x1da   :  { %v321_v9 = vpop.f32.mrf.mxu3 }
 0x1db   :  { %v324_v10 = vmul.f32 0.03125, %v321_v9 }
 0x1dd   :  { %v325_v11 = vadd.f32 1e-05, %v324_v10 }
 0x1df   :  { %498 = vrsqrt.f32 %v325_v11  ;;  %vm332_vm2 = vweird.f32 %v325_v11 }
 0x1e5   :  { %v499_v12 = vpop.eup %498 }
 0x1e6   :  { %v327_v13 = vmul.f32 %v499_v12, %v325_v11  ;;  %vm333_vm1 = vweird.f32 %v499_v12 }
 0x1e7   :  { %vm334_vm3 = vmor %vm332_vm2, %vm333_vm1 }
 0x1e8   :  { %v328_v14 = vmul.f32 %v499_v12, %v327_v13 }
 0x1ea   :  { %v329_v15 = vmul.f32 0.5, %v328_v14 }
 0x1ec   :  { %v330_v16 = vsub.f32 1.5, %v329_v15 }
 0x1ee   :  { %v331_v17 = vmul.f32 %v499_v12, %v330_v16 }
 0x1f0   :  { %v335_v18 = vsel %vm334_vm3, %v499_v12, %v331_v17 }
 0x1f1   :  { %v336_v19 = vperm.slane %v335_v18, 0 }
 0x1f3   :  { %v337_v21 = vmul.f32 %v336_v19, %v296_v6  ;;  %v338_v22 = vmul.f32 %v336_v19, %v297_v4  ;;  %v339_v23 = vmul.f32 %v336_v19, %v298_v2  ;;  %v340_v24 = vmul.f32 %v336_v19, %v299_v1 }
 0x1f5   :  { %v345_v26 = vmul.f32 %v496_v20, %v337_v21  ;;  %v346_v27 = vmul.f32 %v496_v20, %v338_v22  ;;  %v347_v28 = vmul.f32 %v496_v20, %v339_v23  ;;  %v348_v29 = vmul.f32 %v496_v20, %v340_v24 }
 0x1f7   :  { %v353_v30 = vadd.f32 %v497_v25, %v345_v26  ;;  %v354_v31 = vadd.f32 %v497_v25, %v346_v27  ;;  %v355_v32 = vadd.f32 %v497_v25, %v347_v28  ;;  %v356_v33 = vadd.f32 %v497_v25, %v348_v29 }
 0x1f9   :  { %v357_v34 = vmax.f32 %v353_v30, 0.0  ;;  %v358_v35 = vmax.f32 %v354_v31, 0.0  ;;  %v359_v36 = vmax.f32 %v355_v32, 0.0  ;;  %v360_v37 = vmax.f32 %v356_v33, 0.0 }
 0x1fb   :  { %362 = vst.msk [vmem:[%s651_s5] sm:$0xff] %vm361_vm4, %v357_v34 }
 0x1fc   :  { %363 = vst.msk [vmem:[%s651_s5 + $0x8] sm:$0xff] %vm361_vm4, %v358_v35 }
 0x1fd   :  { %364 = vst.msk [vmem:[%s651_s5 + $0x10] sm:$0xff] %vm361_vm4, %v359_v36 }
 0x1fe   :  { %365 = vst.msk [vmem:[%s651_s5 + $0x18] sm:$0xff] %vm361_vm4, %v360_v37 }

// kernel: feat2net_forward.44
= control target key start
LH: loop header
LB: loop body
LE: loop exit
PB: predicated region body
PF: predicated region fallthrough
CT: control target
= control target key end

     0   :  { %vm55_vm0 = vcmask 261120   ;;  %v208_v13 = vmov 1.0   ;;  %vm167_vm4 = vcmask 523264   ;;  %s276_s1 = inlined_call_operand.vmem [shape: bf16[32,64], index: 1, kind: input, shape index: {}]   ;;  %s277_s2 = inlined_call_operand.vmem [shape: f32[1,64], index: 2, kind: input, shape index: {}]   ;;  %s278_s0 = inlined_call_operand.vmem [shape: bf16[32,32], index: 0, kind: input, shape index: {}]   ;;  %s279_s3 = inlined_call_operand.vmem [shape: f32[1,64], index: 3, kind: input, shape index: {}]   ;;  %s280_s4 = inlined_call_operand.vmem [shape: f32[1,64], index: 4, kind: input, shape index: {}]   ;;  %s281_s5 = inlined_call_operand.vmem [shape: f32[32,64], index: 5, kind: output, shape index: {}]  }
   0x1   :  { %v199_v0 = vld [vmem:[%s276_s1 + $0x8] sm:$0xff]  ;;  %v198_v1 = vld [vmem:[%s276_s1] sm:$0xff] }
   0x2   :  { %200 = vmatpush.bf16.msra.mxu3 %v199_v0  ;;  %68 = vmatpush.bf16.msra.mxu0 %v199_v0  ;;  %v197_v2 = vld [vmem:[%s278_s0 + $0x8] sm:$0xff]  ;;  %v196_v3 = vld [vmem:[%s278_s0] sm:$0xff] }
   0x3   :  { %v203_v6 = vld [vmem:[%s277_s2] ss:$0 sm:$0xff] }
   0x4   :  { %v204_v36 = vld [vmem:[%s279_s3] ss:$0 sm:$0xff] }
   0x5   :  { %v205_v41 = vld [vmem:[%s280_s4] ss:$0 sm:$0xff] }
   0x6   :  { %201 = vmatpush.bf16.msra.mxu3 %v198_v1  ;;  %69 = vmatpush.bf16.msra.mxu0 %v198_v1 }
   0x9   :  { %193 = vmatmul.msk.bf16.vlgmr.msra.gmra.mxu3 %vm55_vm0, %v197_v2  ;;  %192 = vmatmul.msk.bf16.vlgmr.msra.gmra.mxu0 %vm55_vm0, %v196_v3 }
  0x86   :  { %v71_v4 = vpop.f32.mrf.mxu0 }
  0x87   :  { %v72_v12 = vadd.f32 %v203_v6, %v71_v4 }
  0x8c   :  { %v76_v5 = vpop.f32.mrf.mxu3 }
  0x8d   :  { %v77_v10 = vadd.f32 %v203_v6, %v76_v5 }
  0x8e   :  { %v73_v9 = vpop.f32.mrf.mxu0 }
  0x8f   :  { %v74_v11 = vadd.f32 %v203_v6, %v73_v9 }
  0x94   :  { %v78_v7 = vpop.f32.mrf.mxu3 }
  0x95   :  { %v79_v8 = vadd.f32 %v203_v6, %v78_v7 }
  0x97   :  { %96 = vmatpush.msra.mxu1 %v79_v8 }
  0x99   :  { %97 = vmatpush.msra.mxu1 %v77_v10 }
  0x9b   :  { %98 = vmatpush.msra.mxu1 %v74_v11 }
  0x9d   :  { %99 = vmatpush.msra.mxu1 %v72_v12 }
  0x9e   :  { %194 = vmatmul.msk.f32.vlgmr.msra.gmra.mxu1 %vm55_vm0, %v208_v13 }
 0x11b   :  { %v101_v14 = vpop.f32.mrf.mxu1 }
 0x11c   :  { %v104_v15 = vmul.f32 0.03125, %v101_v14 }
 0x11e   :  { %v105_v16 = vperm.slane %v104_v15, 0 }
 0x120   :  { %v109_v17 = vsub.f32 %v79_v8, %v105_v16  ;;  %v108_v18 = vsub.f32 %v77_v10, %v105_v16  ;;  %v107_v20 = vsub.f32 %v74_v11, %v105_v16  ;;  %v106_v22 = vsub.f32 %v72_v12, %v105_v16 }
 0x122   :  { %v113_v19 = vmul.f32 %v109_v17, %v109_v17  ;;  %v112_v21 = vmul.f32 %v108_v18, %v108_v18  ;;  %v111_v23 = vmul.f32 %v107_v20, %v107_v20  ;;  %v110_v24 = vmul.f32 %v106_v22, %v106_v22 }
 0x124   :  { %126 = vmatpush.msra.mxu2 %v113_v19 }
 0x126   :  { %127 = vmatpush.msra.mxu2 %v112_v21 }
 0x128   :  { %128 = vmatpush.msra.mxu2 %v111_v23 }
 0x12a   :  { %129 = vmatpush.msra.mxu2 %v110_v24 }
 0x12b   :  { %195 = vmatmul.msk.f32.vlgmr.msra.gmra.mxu2 %vm55_vm0, %v208_v13 }
 0x1ae   :  { %v131_v25 = vpop.f32.mrf.mxu2 }
 0x1af   :  { %v134_v26 = vmul.f32 0.03125, %v131_v25 }
 0x1b1   :  { %v135_v27 = vadd.f32 1e-05, %v134_v26 }
 0x1b3   :  { %206 = vrsqrt.f32 %v135_v27  ;;  %vm142_vm2 = vweird.f32 %v135_v27 }
 0x1b9   :  { %v207_v28 = vpop.eup %206 }
 0x1ba   :  { %v137_v29 = vmul.f32 %v207_v28, %v135_v27  ;;  %vm143_vm1 = vweird.f32 %v207_v28 }
 0x1bb   :  { %vm144_vm3 = vmor %vm142_vm2, %vm143_vm1 }
 0x1bc   :  { %v138_v30 = vmul.f32 %v207_v28, %v137_v29 }
 0x1be   :  { %v139_v31 = vmul.f32 0.5, %v138_v30 }
 0x1c0   :  { %v140_v32 = vsub.f32 1.5, %v139_v31 }
 0x1c2   :  { %v141_v33 = vmul.f32 %v207_v28, %v140_v32 }
 0x1c4   :  { %v145_v34 = vsel %vm144_vm3, %v207_v28, %v141_v33 }
 0x1c5   :  { %v146_v35 = vperm.slane %v145_v34, 0 }
 0x1c7   :  { %v147_v37 = vmul.f32 %v146_v35, %v106_v22  ;;  %v148_v38 = vmul.f32 %v146_v35, %v107_v20  ;;  %v149_v39 = vmul.f32 %v146_v35, %v108_v18  ;;  %v150_v40 = vmul.f32 %v146_v35, %v109_v17 }
 0x1c9   :  { %v155_v42 = vmul.f32 %v204_v36, %v147_v37  ;;  %v156_v43 = vmul.f32 %v204_v36, %v148_v38  ;;  %v157_v44 = vmul.f32 %v204_v36, %v149_v39  ;;  %v158_v45 = vmul.f32 %v204_v36, %v150_v40 }
 0x1cb   :  { %v163_v46 = vadd.f32 %v205_v41, %v155_v42  ;;  %v164_v47 = vadd.f32 %v205_v41, %v156_v43  ;;  %v165_v48 = vadd.f32 %v205_v41, %v157_v44  ;;  %v166_v49 = vadd.f32 %v205_v41, %v158_v45 }
 0x1cd   :  { %168 = vst.msk [vmem:[%s281_s5] sm:$0xff] %vm167_vm4, %v163_v46 }
 0x1ce   :  { %169 = vst.msk [vmem:[%s281_s5 + $0x8] sm:$0xff] %vm167_vm4, %v164_v47 }
 0x1cf   :  { %170 = vst.msk [vmem:[%s281_s5 + $0x10] sm:$0xff] %vm167_vm4, %v165_v48 }
 0x1d0   :  { %171 = vst.msk [vmem:[%s281_s5 + $0x18] sm:$0xff] %vm167_vm4, %v166_v49 }

// kernel: feat2net_forward.46
= control target key start
LH: loop header
LB: loop body
LE: loop exit
PB: predicated region body
PF: predicated region fallthrough
CT: control target
= control target key end

     0   :  { %vm375_vm0 = vcmask 523264   ;;  %vm477_vm1 = vcmask 261120   ;;  %s1048_s1 = inlined_call_operand.vmem [shape: bf16[576,64], index: 1, kind: input, shape index: {}]   ;;  %s1049_s2 = inlined_call_operand.vmem [shape: f32[1,64], index: 2, kind: input, shape index: {}]   ;;  %s1050_s0 = inlined_call_operand.vmem [shape: bf16[32,576], index: 0, kind: input, shape index: {}]   ;;  %s1051_s3 = inlined_call_operand.vmem [shape: f32[1,64], index: 3, kind: input, shape index: {}]   ;;  %s1052_s4 = inlined_call_operand.vmem [shape: f32[1,64], index: 4, kind: input, shape index: {}]   ;;  %s1053_s5 = inlined_call_operand.vmem [shape: f32[32,64], index: 5, kind: output, shape index: {}]  }
   0x1   :  { %v781_v0 = vld [vmem:[%s1048_s1 + $0x38] sm:$0xff]  ;;  %v780_v4 = vld [vmem:[%s1048_s1 + $0x30] sm:$0xff]  ;;  %v779_v8 = vld [vmem:[%s1048_s1 + $0x28] sm:$0xff] }
   0x2   :  { %v797_v1 = vld [vmem:[%s1048_s1 + $0xb8] sm:$0xff]  ;;  %382 = vmatpush.bf16.msra.mxu0 %v781_v0  ;;  %v796_v5 = vld [vmem:[%s1048_s1 + $0xb0] sm:$0xff]  ;;  %v795_v9 = vld [vmem:[%s1048_s1 + $0xa8] sm:$0xff] }
   0x3   :  { %v805_v2 = vld [vmem:[%s1048_s1 + $0xf8] sm:$0xff]  ;;  %420 = vmatpush.bf16.msra.mxu2 %v797_v1  ;;  %v804_v6 = vld [vmem:[%s1048_s1 + $0xf0] sm:$0xff]  ;;  %v803_v10 = vld [vmem:[%s1048_s1 + $0xe8] sm:$0xff] }
   0x4   :  { %v789_v3 = vld [vmem:[%s1048_s1 + $0x78] sm:$0xff]  ;;  %439 = vmatpush.bf16.msra.mxu3 %v805_v2  ;;  %v788_v7 = vld [vmem:[%s1048_s1 + $0x70] sm:$0xff]  ;;  %v787_v11 = vld [vmem:[%s1048_s1 + $0x68] sm:$0xff] }
   0x5   :  { %401 = vmatpush.bf16.msra.mxu1 %v789_v3  ;;  %v778_v12 = vld [vmem:[%s1048_s1 + $0x20] sm:$0xff]  ;;  %v777_v16 = vld [vmem:[%s1048_s1 + $0x18] sm:$0xff]  ;;  %v776_v20 = vld [vmem:[%s1048_s1 + $0x10] sm:$0xff] }
   0x6   :  { %383 = vmatpush.bf16.msra.mxu0 %v780_v4  ;;  %v794_v13 = vld [vmem:[%s1048_s1 + $0xa0] sm:$0xff]  ;;  %v793_v17 = vld [vmem:[%s1048_s1 + $0x98] sm:$0xff]  ;;  %v792_v21 = vld [vmem:[%s1048_s1 + $0x90] sm:$0xff] }
   0x7   :  { %421 = vmatpush.bf16.msra.mxu2 %v796_v5  ;;  %v802_v14 = vld [vmem:[%s1048_s1 + $0xe0] sm:$0xff]  ;;  %v801_v18 = vld [vmem:[%s1048_s1 + $0xd8] sm:$0xff]  ;;  %v800_v22 = vld [vmem:[%s1048_s1 + $0xd0] sm:$0xff] }
   0x8   :  { %440 = vmatpush.bf16.msra.mxu3 %v804_v6  ;;  %v786_v15 = vld [vmem:[%s1048_s1 + $0x60] sm:$0xff]  ;;  %v785_v19 = vld [vmem:[%s1048_s1 + $0x58] sm:$0xff]  ;;  %v784_v23 = vld [vmem:[%s1048_s1 + $0x50] sm:$0xff] }
   0x9   :  { %402 = vmatpush.bf16.msra.mxu1 %v788_v7  ;;  %v775_v24 = vld [vmem:[%s1048_s1 + $0x8] sm:$0xff]  ;;  %v774_v28 = vld [vmem:[%s1048_s1] sm:$0xff]  ;;  %v766_v32 = vld [vmem:[%s1050_s0 + $0x10] sm:$0xf0] }
   0xa   :  { %384 = vmatpush.bf16.msra.mxu0 %v779_v8  ;;  %v791_v25 = vld [vmem:[%s1048_s1 + $0x88] sm:$0xff]  ;;  %v790_v29 = vld [vmem:[%s1048_s1 + $0x80] sm:$0xff]  ;;  %v767_v34 = vld [vmem:[%s1050_s0 + $0x18] sm:$0xf0] }
   0xb   :  { %422 = vmatpush.bf16.msra.mxu2 %v795_v9  ;;  %v799_v26 = vld [vmem:[%s1048_s1 + $0xc8] sm:$0xff]  ;;  %v798_v30 = vld [vmem:[%s1048_s1 + $0xc0] sm:$0xff]  ;;  %v580_v39 = vld [vmem:[%s1050_s0 + $0x14] sm:$0xf0] }
   0xc   :  { %441 = vmatpush.bf16.msra.mxu3 %v803_v10  ;;  %v783_v27 = vld [vmem:[%s1048_s1 + $0x48] sm:$0xff]  ;;  %v578_v31 = vld [vmem:[%s1050_s0] sm:$0xf]  ;;  %v764_v38 = vld [vmem:[%s1050_s0 + $0x4] sm:$0xf] }
   0xd   :  { %403 = vmatpush.bf16.msra.mxu1 %v787_v11  ;;  %v586_v33 = vld [vmem:[%s1050_s0 + $0x8] sm:$0xf]  ;;  %v765_v35 = vld [vmem:[%s1050_s0 + $0xc] sm:$0xf]  ;;  %v588_v36 = vld [vmem:[%s1050_s0 + $0x1c] sm:$0xf0]  ;;  %v579_v41 = vor.u32 %v766_v32, %v578_v31  ;;  %v583_v44 = vor.u32 %v764_v38, %v580_v39 }
   0xe   :  { %385 = vmatpush.bf16.msra.mxu0 %v778_v12  ;;  %v782_v37 = vld [vmem:[%s1048_s1 + $0x40] sm:$0xff]  ;;  %v809_v40 = vld [vmem:[%s1048_s1 + $0x118] sm:$0xff]  ;;  %v587_v42 = vor.u32 %v767_v34, %v586_v33  ;;  %v591_v43 = vor.u32 %v765_v35, %v588_v36  ;;  %v808_v45 = vld [vmem:[%s1048_s1 + $0x110] sm:$0xff] }
   0xf   :  { %423 = vmatpush.bf16.msra.mxu2 %v794_v13  ;;  %v807_v46 = vld [vmem:[%s1048_s1 + $0x108] sm:$0xff]  ;;  %v806_v47 = vld [vmem:[%s1048_s1 + $0x100] sm:$0xff]  ;;  %v771_v49 = vld [vmem:[%s1050_s0 + $0x38] sm:$0xf0] }
  0x10   :  { %442 = vmatpush.bf16.msra.mxu3 %v802_v14  ;;  %v598_v48 = vld [vmem:[%s1050_s0 + $0x28] sm:$0xf]  ;;  %v606_v50 = vld [vmem:[%s1050_s0 + $0x30] sm:$0xf]  ;;  %v772_v51 = vld [vmem:[%s1050_s0 + $0x40] sm:$0xf0] }
  0x11   :  { %404 = vmatpush.bf16.msra.mxu1 %v786_v15  ;;  %v770_v52 = vld [vmem:[%s1050_s0 + $0x34] sm:$0xf]  ;;  %v608_v53 = vld [vmem:[%s1050_s0 + $0x44] sm:$0xf0]  ;;  %v769_v54 = vld [vmem:[%s1050_s0 + $0x2c] sm:$0xf]  ;;  %v599_v56 = vor.u32 %v771_v49, %v598_v48  ;;  %v607_v57 = vor.u32 %v772_v51, %v606_v50 }
  0x12   :  { %386 = vmatpush.bf16.msra.mxu0 %v777_v16  ;;  %v600_v55 = vld [vmem:[%s1050_s0 + $0x3c] sm:$0xf0]  ;;  %v611_v58 = vor.u32 %v770_v52, %v608_v53  ;;  %v594_v60 = vld [vmem:[%s1050_s0 + $0x10] sm:$0xf]  ;;  %v768_v61 = vld [vmem:[%s1050_s0 + $0x20] sm:$0xf0] }
  0x13   :  { %424 = vmatpush.bf16.msra.mxu2 %v793_v17  ;;  %v603_v59 = vor.u32 %v769_v54, %v600_v55  ;;  %v614_v62 = vld [vmem:[%s1050_s0 + $0x38] sm:$0xf]  ;;  %v773_v63 = vld [vmem:[%s1050_s0 + $0x48] sm:$0xf0]  ;;  %v595_v0 = vor.u32 %v768_v61, %v594_v60  ;;  %v815_v16 = vld [vmem:[%s1049_s2] ss:$0 sm:$0xff] }
  0x14   :  { %443 = vmatpush.bf16.msra.mxu3 %v801_v18  ;;  %v615_v1 = vor.u32 %v773_v63, %v614_v62 }
  0x15   :  { %405 = vmatpush.bf16.msra.mxu1 %v785_v19 }
  0x16   :  { %387 = vmatpush.bf16.msra.mxu0 %v776_v20 }
  0x17   :  { %425 = vmatpush.bf16.msra.mxu2 %v792_v21 }
  0x18   :  { %444 = vmatpush.bf16.msra.mxu3 %v800_v22 }
  0x19   :  { %406 = vmatpush.bf16.msra.mxu1 %v784_v23 }
  0x1a   :  { %388 = vmatpush.bf16.msra.mxu0 %v775_v24 }
  0x1b   :  { %426 = vmatpush.bf16.msra.mxu2 %v791_v25 }
  0x1c   :  { %445 = vmatpush.bf16.msra.mxu3 %v799_v26 }
  0x1d   :  { %407 = vmatpush.bf16.msra.mxu1 %v783_v27 }
  0x1e   :  { %389 = vmatpush.bf16.msra.mxu0 %v774_v28 }
  0x1f   :  { %427 = vmatpush.bf16.msra.mxu2 %v790_v29 }
  0x20   :  { %446 = vmatpush.bf16.msra.mxu3 %v798_v30 }
  0x21   :  { %408 = vmatpush.bf16.msra.mxu1 %v782_v37  ;;  %390 = vmatmul.bf16.vlgmr.msra.gmra.mxu0 %v579_v41 }
  0x22   :  { %462 = vmatpush.bf16.msrb.mxu0 %v809_v40  ;;  %428 = vmatmul.bf16.vlgmr.msra.gmra.mxu2 %v587_v42 }
  0x23   :  { %447 = vmatmul.bf16.vlgmr.msra.gmra.mxu3 %v591_v43  ;;  %v820_v43 = vmov 1.0  }
  0x24   :  { %810 = vmatpush.bf16.msrb.mxu3 %v809_v40  ;;  %409 = vmatmul.bf16.vlgmr.msra.gmra.mxu1 %v583_v44 }
  0x26   :  { %463 = vmatpush.bf16.msrb.mxu0 %v808_v45 }
  0x28   :  { %811 = vmatpush.bf16.msrb.mxu3 %v808_v45 }
  0x2a   :  { %464 = vmatpush.bf16.msrb.mxu0 %v807_v46 }
  0x2c   :  { %812 = vmatpush.bf16.msrb.mxu3 %v807_v46 }
  0x2e   :  { %465 = vmatpush.bf16.msrb.mxu0 %v806_v47 }
  0x30   :  { %813 = vmatpush.bf16.msrb.mxu3 %v806_v47 }
  0x31   :  { %395 = vmatmul.bf16.gmra.mxu0 %v599_v56 }
  0x32   :  { %433 = vmatmul.bf16.gmra.mxu2 %v607_v57 }
  0x33   :  { %452 = vmatmul.bf16.gmra.mxu3 %v611_v58 }
  0x34   :  { %414 = vmatmul.bf16.gmra.mxu1 %v603_v59 }
  0x41   :  { %760 = vmatmul.msk.bf16.vlgmr.msrb.gmra.mxu0 %vm375_vm0, %v595_v0 }
  0x43   :  { %761 = vmatmul.msk.bf16.vlgmr.msrb.gmra.mxu3 %vm375_vm0, %v615_v1 }
  0x9e   :  { %v391_v2 = vpop.f32.mrf.mxu0 }
  0x9f   :  { %v392_v25 = vadd.f32 %v815_v16, %v391_v2  ;;  %v816_v2 = vld [vmem:[%s1051_s3] ss:$0 sm:$0xff] }
  0xa1   :  { %v410_v3 = vpop.f32.mrf.mxu1 }
  0xa2   :  { %v411_v29 = vadd.f32 %v410_v3, %v392_v25 }
  0xa5   :  { %v429_v5 = vpop.f32.mrf.mxu2 }
  0xa6   :  { %v448_v4 = vpop.f32.mrf.mxu3  ;;  %v393_v6 = vpop.f32.mrf.mxu0  ;;  %v430_v34 = vadd.f32 %v429_v5, %v411_v29 }
  0xa7   :  { %v394_v20 = vadd.f32 %v815_v16, %v393_v6 }
  0xa8   :  { %v449_v40 = vadd.f32 %v448_v4, %v430_v34 }
  0xa9   :  { %v412_v7 = vpop.f32.mrf.mxu1 }
  0xaa   :  { %v413_v27 = vadd.f32 %v412_v7, %v394_v20  ;;  %v817_v7 = vld [vmem:[%s1052_s4] ss:$0 sm:$0xff] }
  0xad   :  { %v431_v9 = vpop.f32.mrf.mxu2 }
  0xae   :  { %v450_v8 = vpop.f32.mrf.mxu3  ;;  %v396_v10 = vpop.f32.mrf.mxu0  ;;  %v432_v31 = vadd.f32 %v431_v9, %v413_v27 }
  0xaf   :  { %v397_v19 = vadd.f32 %v815_v16, %v396_v10 }
  0xb0   :  { %v451_v38 = vadd.f32 %v450_v8, %v432_v31 }
  0xb1   :  { %v415_v12 = vpop.f32.mrf.mxu1 }
  0xb2   :  { %v416_v26 = vadd.f32 %v415_v12, %v397_v19 }
  0xb5   :  { %v434_v13 = vpop.f32.mrf.mxu2 }
  0xb6   :  { %v453_v11 = vpop.f32.mrf.mxu3  ;;  %v398_v14 = vpop.f32.mrf.mxu0  ;;  %v435_v30 = vadd.f32 %v434_v13, %v416_v26 }
  0xb7   :  { %v399_v17 = vadd.f32 %v815_v16, %v398_v14 }
  0xb8   :  { %v454_v35 = vadd.f32 %v453_v11, %v435_v30 }
  0xb9   :  { %v417_v18 = vpop.f32.mrf.mxu1 }
  0xba   :  { %v418_v21 = vadd.f32 %v417_v18, %v399_v17 }
  0xbd   :  { %v436_v22 = vpop.f32.mrf.mxu2 }
  0xbe   :  { %v455_v15 = vpop.f32.mrf.mxu3  ;;  %v467_v23 = vpop.f32.mrf.mxu0  ;;  %v437_v28 = vadd.f32 %v436_v22, %v418_v21 }
  0xbf   :  { %v468_v42 = vadd.f32 %v467_v23, %v449_v40 }
  0xc0   :  { %v456_v32 = vadd.f32 %v455_v15, %v437_v28 }
  0xc6   :  { %v472_v24 = vpop.f32.mrf.mxu3  ;;  %v469_v37 = vpop.f32.mrf.mxu0 }
  0xc7   :  { %v473_v39 = vadd.f32 %v472_v24, %v454_v35  ;;  %v470_v41 = vadd.f32 %v469_v37, %v451_v38 }
  0xce   :  { %v474_v33 = vpop.f32.mrf.mxu3 }
  0xcf   :  { %v475_v36 = vadd.f32 %v474_v33, %v456_v32 }
  0xd1   :  { %493 = vmatpush.msrb.mxu1 %v475_v36 }
  0xd3   :  { %494 = vmatpush.msrb.mxu1 %v473_v39 }
  0xd5   :  { %495 = vmatpush.msrb.mxu1 %v470_v41 }
  0xd7   :  { %496 = vmatpush.msrb.mxu1 %v468_v42 }
  0xd8   :  { %762 = vmatmul.msk.f32.vlgmr.msrb.gmra.mxu1 %vm477_vm1, %v820_v43 }
 0x155   :  { %v498_v44 = vpop.f32.mrf.mxu1 }
 0x156   :  { %v501_v45 = vmul.f32 0.03125, %v498_v44 }
 0x158   :  { %v502_v46 = vperm.slane %v501_v45, 0 }
 0x15a   :  { %v506_v47 = vsub.f32 %v475_v36, %v502_v46  ;;  %v505_v48 = vsub.f32 %v473_v39, %v502_v46  ;;  %v504_v50 = vsub.f32 %v470_v41, %v502_v46  ;;  %v503_v52 = vsub.f32 %v468_v42, %v502_v46 }
 0x15c   :  { %v510_v49 = vmul.f32 %v506_v47, %v506_v47  ;;  %v509_v51 = vmul.f32 %v505_v48, %v505_v48  ;;  %v508_v53 = vmul.f32 %v504_v50, %v504_v50  ;;  %v507_v54 = vmul.f32 %v503_v52, %v503_v52 }
 0x15e   :  { %523 = vmatpush.msrb.mxu2 %v510_v49 }
 0x160   :  { %524 = vmatpush.msrb.mxu2 %v509_v51 }
 0x162   :  { %525 = vmatpush.msrb.mxu2 %v508_v53 }
 0x164   :  { %526 = vmatpush.msrb.mxu2 %v507_v54 }
 0x165   :  { %763 = vmatmul.msk.f32.vlgmr.msrb.gmra.mxu2 %vm477_vm1, %v820_v43 }
 0x1e8   :  { %v528_v55 = vpop.f32.mrf.mxu2 }
 0x1e9   :  { %v531_v56 = vmul.f32 0.03125, %v528_v55 }
 0x1eb   :  { %v532_v57 = vadd.f32 1e-05, %v531_v56 }
 0x1ed   :  { %818 = vrsqrt.f32 %v532_v57  ;;  %vm539_vm3 = vweird.f32 %v532_v57 }
 0x1f3   :  { %v819_v58 = vpop.eup %818 }
 0x1f4   :  { %v534_v59 = vmul.f32 %v819_v58, %v532_v57  ;;  %vm540_vm2 = vweird.f32 %v819_v58 }
 0x1f5   :  { %vm541_vm4 = vmor %vm539_vm3, %vm540_vm2 }
 0x1f6   :  { %v535_v60 = vmul.f32 %v819_v58, %v534_v59 }
 0x1f8   :  { %v536_v61 = vmul.f32 0.5, %v535_v60 }
 0x1fa   :  { %v537_v62 = vsub.f32 1.5, %v536_v61 }
 0x1fc   :  { %v538_v63 = vmul.f32 %v819_v58, %v537_v62 }
 0x1fe   :  { %v542_v0 = vsel %vm541_vm4, %v819_v58, %v538_v63 }
 0x1ff   :  { %v543_v1 = vperm.slane %v542_v0, 0 }
 0x201   :  { %v544_v3 = vmul.f32 %v543_v1, %v503_v52  ;;  %v545_v4 = vmul.f32 %v543_v1, %v504_v50  ;;  %v546_v5 = vmul.f32 %v543_v1, %v505_v48  ;;  %v547_v6 = vmul.f32 %v543_v1, %v506_v47 }
 0x203   :  { %v552_v8 = vmul.f32 %v816_v2, %v544_v3  ;;  %v553_v9 = vmul.f32 %v816_v2, %v545_v4  ;;  %v554_v10 = vmul.f32 %v816_v2, %v546_v5  ;;  %v555_v11 = vmul.f32 %v816_v2, %v547_v6 }
 0x205   :  { %v560_v12 = vadd.f32 %v817_v7, %v552_v8  ;;  %v561_v13 = vadd.f32 %v817_v7, %v553_v9  ;;  %v562_v14 = vadd.f32 %v817_v7, %v554_v10  ;;  %v563_v15 = vadd.f32 %v817_v7, %v555_v11 }
 0x207   :  { %v564_v16 = vmax.f32 %v560_v12, 0.0  ;;  %v565_v17 = vmax.f32 %v561_v13, 0.0  ;;  %v566_v18 = vmax.f32 %v562_v14, 0.0  ;;  %v567_v19 = vmax.f32 %v563_v15, 0.0 }
 0x209   :  { %568 = vst.msk [vmem:[%s1053_s5] sm:$0xff] %vm375_vm0, %v564_v16 }
 0x20a   :  { %569 = vst.msk [vmem:[%s1053_s5 + $0x8] sm:$0xff] %vm375_vm0, %v565_v17 }
 0x20b   :  { %570 = vst.msk [vmem:[%s1053_s5 + $0x10] sm:$0xff] %vm375_vm0, %v566_v18 }
 0x20c   :  { %571 = vst.msk [vmem:[%s1053_s5 + $0x18] sm:$0xff] %vm375_vm0, %v567_v19 }

// kernel: feat2net_forward.45
= control target key start
LH: loop header
LB: loop body
LE: loop exit
PB: predicated region body
PF: predicated region fallthrough
CT: control target
= control target key end

     0   :  { %vm378_vm0 = vcmask 523264   ;;  %vm480_vm1 = vcmask 261120   ;;  %s1076_s1 = inlined_call_operand.vmem [shape: bf16[576,64], index: 1, kind: input, shape index: {}]   ;;  %s1077_s2 = inlined_call_operand.vmem [shape: f32[1,64], index: 2, kind: input, shape index: {}]   ;;  %s1078_s0 = inlined_call_operand.vmem [shape: bf16[32,576], index: 0, kind: input, shape index: {}]   ;;  %s1079_s3 = inlined_call_operand.vmem [shape: f32[1,64], index: 3, kind: input, shape index: {}]   ;;  %s1080_s4 = inlined_call_operand.vmem [shape: f32[1,64], index: 4, kind: input, shape index: {}]   ;;  %s1081_s5 = inlined_call_operand.vmem [shape: f32[32,64], index: 5, kind: input, shape index: {}]   ;;  %s1082_s6 = inlined_call_operand.vmem [shape: f32[32,64], index: 6, kind: output, shape index: {}]  }
   0x1   :  { %v792_v0 = vld [vmem:[%s1076_s1 + $0x38] sm:$0xff]  ;;  %v791_v4 = vld [vmem:[%s1076_s1 + $0x30] sm:$0xff]  ;;  %v790_v8 = vld [vmem:[%s1076_s1 + $0x28] sm:$0xff] }
   0x2   :  { %v808_v1 = vld [vmem:[%s1076_s1 + $0xb8] sm:$0xff]  ;;  %385 = vmatpush.bf16.msra.mxu0 %v792_v0  ;;  %v807_v5 = vld [vmem:[%s1076_s1 + $0xb0] sm:$0xff]  ;;  %v806_v9 = vld [vmem:[%s1076_s1 + $0xa8] sm:$0xff] }
   0x3   :  { %v816_v2 = vld [vmem:[%s1076_s1 + $0xf8] sm:$0xff]  ;;  %423 = vmatpush.bf16.msra.mxu2 %v808_v1  ;;  %v815_v6 = vld [vmem:[%s1076_s1 + $0xf0] sm:$0xff]  ;;  %v814_v10 = vld [vmem:[%s1076_s1 + $0xe8] sm:$0xff] }
   0x4   :  { %v800_v3 = vld [vmem:[%s1076_s1 + $0x78] sm:$0xff]  ;;  %442 = vmatpush.bf16.msra.mxu3 %v816_v2  ;;  %v799_v7 = vld [vmem:[%s1076_s1 + $0x70] sm:$0xff]  ;;  %v798_v11 = vld [vmem:[%s1076_s1 + $0x68] sm:$0xff] }
   0x5   :  { %404 = vmatpush.bf16.msra.mxu1 %v800_v3  ;;  %v789_v12 = vld [vmem:[%s1076_s1 + $0x20] sm:$0xff]  ;;  %v788_v16 = vld [vmem:[%s1076_s1 + $0x18] sm:$0xff]  ;;  %v787_v20 = vld [vmem:[%s1076_s1 + $0x10] sm:$0xff] }
   0x6   :  { %386 = vmatpush.bf16.msra.mxu0 %v791_v4  ;;  %v805_v13 = vld [vmem:[%s1076_s1 + $0xa0] sm:$0xff]  ;;  %v804_v17 = vld [vmem:[%s1076_s1 + $0x98] sm:$0xff]  ;;  %v803_v21 = vld [vmem:[%s1076_s1 + $0x90] sm:$0xff] }
   0x7   :  { %424 = vmatpush.bf16.msra.mxu2 %v807_v5  ;;  %v813_v14 = vld [vmem:[%s1076_s1 + $0xe0] sm:$0xff]  ;;  %v812_v18 = vld [vmem:[%s1076_s1 + $0xd8] sm:$0xff]  ;;  %v811_v22 = vld [vmem:[%s1076_s1 + $0xd0] sm:$0xff] }
   0x8   :  { %443 = vmatpush.bf16.msra.mxu3 %v815_v6  ;;  %v797_v15 = vld [vmem:[%s1076_s1 + $0x60] sm:$0xff]  ;;  %v796_v19 = vld [vmem:[%s1076_s1 + $0x58] sm:$0xff]  ;;  %v795_v23 = vld [vmem:[%s1076_s1 + $0x50] sm:$0xff] }
   0x9   :  { %405 = vmatpush.bf16.msra.mxu1 %v799_v7  ;;  %v786_v24 = vld [vmem:[%s1076_s1 + $0x8] sm:$0xff]  ;;  %v785_v28 = vld [vmem:[%s1076_s1] sm:$0xff]  ;;  %v777_v32 = vld [vmem:[%s1078_s0 + $0x10] sm:$0xf0] }
   0xa   :  { %387 = vmatpush.bf16.msra.mxu0 %v790_v8  ;;  %v802_v25 = vld [vmem:[%s1076_s1 + $0x88] sm:$0xff]  ;;  %v801_v29 = vld [vmem:[%s1076_s1 + $0x80] sm:$0xff]  ;;  %v778_v34 = vld [vmem:[%s1078_s0 + $0x18] sm:$0xf0] }
   0xb   :  { %425 = vmatpush.bf16.msra.mxu2 %v806_v9  ;;  %v810_v26 = vld [vmem:[%s1076_s1 + $0xc8] sm:$0xff]  ;;  %v809_v30 = vld [vmem:[%s1076_s1 + $0xc0] sm:$0xff]  ;;  %v591_v39 = vld [vmem:[%s1078_s0 + $0x14] sm:$0xf0] }
   0xc   :  { %444 = vmatpush.bf16.msra.mxu3 %v814_v10  ;;  %v794_v27 = vld [vmem:[%s1076_s1 + $0x48] sm:$0xff]  ;;  %v589_v31 = vld [vmem:[%s1078_s0] sm:$0xf]  ;;  %v775_v38 = vld [vmem:[%s1078_s0 + $0x4] sm:$0xf] }
   0xd   :  { %406 = vmatpush.bf16.msra.mxu1 %v798_v11  ;;  %v597_v33 = vld [vmem:[%s1078_s0 + $0x8] sm:$0xf]  ;;  %v776_v35 = vld [vmem:[%s1078_s0 + $0xc] sm:$0xf]  ;;  %v599_v36 = vld [vmem:[%s1078_s0 + $0x1c] sm:$0xf0]  ;;  %v590_v41 = vor.u32 %v777_v32, %v589_v31  ;;  %v594_v44 = vor.u32 %v775_v38, %v591_v39 }
   0xe   :  { %388 = vmatpush.bf16.msra.mxu0 %v789_v12  ;;  %v793_v37 = vld [vmem:[%s1076_s1 + $0x40] sm:$0xff]  ;;  %v820_v40 = vld [vmem:[%s1076_s1 + $0x118] sm:$0xff]  ;;  %v598_v42 = vor.u32 %v778_v34, %v597_v33  ;;  %v602_v43 = vor.u32 %v776_v35, %v599_v36  ;;  %v819_v45 = vld [vmem:[%s1076_s1 + $0x110] sm:$0xff] }
   0xf   :  { %426 = vmatpush.bf16.msra.mxu2 %v805_v13  ;;  %v818_v46 = vld [vmem:[%s1076_s1 + $0x108] sm:$0xff]  ;;  %v817_v47 = vld [vmem:[%s1076_s1 + $0x100] sm:$0xff]  ;;  %v782_v49 = vld [vmem:[%s1078_s0 + $0x38] sm:$0xf0] }
  0x10   :  { %445 = vmatpush.bf16.msra.mxu3 %v813_v14  ;;  %v609_v48 = vld [vmem:[%s1078_s0 + $0x28] sm:$0xf]  ;;  %v617_v50 = vld [vmem:[%s1078_s0 + $0x30] sm:$0xf]  ;;  %v783_v51 = vld [vmem:[%s1078_s0 + $0x40] sm:$0xf0] }
  0x11   :  { %407 = vmatpush.bf16.msra.mxu1 %v797_v15  ;;  %v781_v52 = vld [vmem:[%s1078_s0 + $0x34] sm:$0xf]  ;;  %v619_v53 = vld [vmem:[%s1078_s0 + $0x44] sm:$0xf0]  ;;  %v780_v54 = vld [vmem:[%s1078_s0 + $0x2c] sm:$0xf]  ;;  %v610_v56 = vor.u32 %v782_v49, %v609_v48  ;;  %v618_v57 = vor.u32 %v783_v51, %v617_v50 }
  0x12   :  { %389 = vmatpush.bf16.msra.mxu0 %v788_v16  ;;  %v611_v55 = vld [vmem:[%s1078_s0 + $0x3c] sm:$0xf0]  ;;  %v622_v58 = vor.u32 %v781_v52, %v619_v53  ;;  %v605_v60 = vld [vmem:[%s1078_s0 + $0x10] sm:$0xf]  ;;  %v779_v61 = vld [vmem:[%s1078_s0 + $0x20] sm:$0xf0] }
  0x13   :  { %427 = vmatpush.bf16.msra.mxu2 %v804_v17  ;;  %v614_v59 = vor.u32 %v780_v54, %v611_v55  ;;  %v625_v62 = vld [vmem:[%s1078_s0 + $0x38] sm:$0xf]  ;;  %v784_v63 = vld [vmem:[%s1078_s0 + $0x48] sm:$0xf0]  ;;  %v606_v0 = vor.u32 %v779_v61, %v605_v60  ;;  %v826_v16 = vld [vmem:[%s1077_s2] ss:$0 sm:$0xff] }
  0x14   :  { %446 = vmatpush.bf16.msra.mxu3 %v812_v18  ;;  %v626_v1 = vor.u32 %v784_v63, %v625_v62 }
  0x15   :  { %408 = vmatpush.bf16.msra.mxu1 %v796_v19 }
  0x16   :  { %390 = vmatpush.bf16.msra.mxu0 %v787_v20 }
  0x17   :  { %428 = vmatpush.bf16.msra.mxu2 %v803_v21 }
  0x18   :  { %447 = vmatpush.bf16.msra.mxu3 %v811_v22 }
  0x19   :  { %409 = vmatpush.bf16.msra.mxu1 %v795_v23 }
  0x1a   :  { %391 = vmatpush.bf16.msra.mxu0 %v786_v24 }
  0x1b   :  { %429 = vmatpush.bf16.msra.mxu2 %v802_v25 }
  0x1c   :  { %448 = vmatpush.bf16.msra.mxu3 %v810_v26 }
  0x1d   :  { %410 = vmatpush.bf16.msra.mxu1 %v794_v27 }
  0x1e   :  { %392 = vmatpush.bf16.msra.mxu0 %v785_v28 }
  0x1f   :  { %430 = vmatpush.bf16.msra.mxu2 %v801_v29 }
  0x20   :  { %449 = vmatpush.bf16.msra.mxu3 %v809_v30 }
  0x21   :  { %411 = vmatpush.bf16.msra.mxu1 %v793_v37  ;;  %393 = vmatmul.bf16.vlgmr.msra.gmra.mxu0 %v590_v41 }
  0x22   :  { %465 = vmatpush.bf16.msrb.mxu0 %v820_v40  ;;  %431 = vmatmul.bf16.vlgmr.msra.gmra.mxu2 %v598_v42 }
  0x23   :  { %450 = vmatmul.bf16.vlgmr.msra.gmra.mxu3 %v602_v43  ;;  %v831_v43 = vmov 1.0  }
  0x24   :  { %821 = vmatpush.bf16.msrb.mxu3 %v820_v40  ;;  %412 = vmatmul.bf16.vlgmr.msra.gmra.mxu1 %v594_v44 }
  0x26   :  { %466 = vmatpush.bf16.msrb.mxu0 %v819_v45 }
  0x28   :  { %822 = vmatpush.bf16.msrb.mxu3 %v819_v45 }
  0x2a   :  { %467 = vmatpush.bf16.msrb.mxu0 %v818_v46 }
  0x2c   :  { %823 = vmatpush.bf16.msrb.mxu3 %v818_v46 }
  0x2e   :  { %468 = vmatpush.bf16.msrb.mxu0 %v817_v47 }
  0x30   :  { %824 = vmatpush.bf16.msrb.mxu3 %v817_v47 }
  0x31   :  { %398 = vmatmul.bf16.gmra.mxu0 %v610_v56 }
  0x32   :  { %436 = vmatmul.bf16.gmra.mxu2 %v618_v57 }
  0x33   :  { %455 = vmatmul.bf16.gmra.mxu3 %v622_v58 }
  0x34   :  { %417 = vmatmul.bf16.gmra.mxu1 %v614_v59 }
  0x41   :  { %771 = vmatmul.msk.bf16.vlgmr.msrb.gmra.mxu0 %vm378_vm0, %v606_v0 }
  0x43   :  { %772 = vmatmul.msk.bf16.vlgmr.msrb.gmra.mxu3 %vm378_vm0, %v626_v1 }
  0x9e   :  { %v394_v2 = vpop.f32.mrf.mxu0 }
  0x9f   :  { %v395_v25 = vadd.f32 %v826_v16, %v394_v2  ;;  %v827_v2 = vld [vmem:[%s1079_s3] ss:$0 sm:$0xff] }
  0xa1   :  { %v413_v3 = vpop.f32.mrf.mxu1 }
  0xa2   :  { %v414_v29 = vadd.f32 %v413_v3, %v395_v25 }
  0xa5   :  { %v432_v5 = vpop.f32.mrf.mxu2 }
  0xa6   :  { %v451_v4 = vpop.f32.mrf.mxu3  ;;  %v396_v6 = vpop.f32.mrf.mxu0  ;;  %v433_v34 = vadd.f32 %v432_v5, %v414_v29 }
  0xa7   :  { %v397_v20 = vadd.f32 %v826_v16, %v396_v6 }
  0xa8   :  { %v452_v40 = vadd.f32 %v451_v4, %v433_v34 }
  0xa9   :  { %v415_v7 = vpop.f32.mrf.mxu1 }
  0xaa   :  { %v416_v27 = vadd.f32 %v415_v7, %v397_v20  ;;  %v828_v7 = vld [vmem:[%s1080_s4] ss:$0 sm:$0xff] }
  0xad   :  { %v434_v9 = vpop.f32.mrf.mxu2 }
  0xae   :  { %v453_v8 = vpop.f32.mrf.mxu3  ;;  %v399_v10 = vpop.f32.mrf.mxu0  ;;  %v435_v31 = vadd.f32 %v434_v9, %v416_v27 }
  0xaf   :  { %v400_v19 = vadd.f32 %v826_v16, %v399_v10 }
  0xb0   :  { %v454_v38 = vadd.f32 %v453_v8, %v435_v31 }
  0xb1   :  { %v418_v12 = vpop.f32.mrf.mxu1 }
  0xb2   :  { %v419_v26 = vadd.f32 %v418_v12, %v400_v19  ;;  %v567_v12 = vld [vmem:[%s1081_s5] sm:$0xff] }
  0xb5   :  { %v437_v13 = vpop.f32.mrf.mxu2 }
  0xb6   :  { %v456_v11 = vpop.f32.mrf.mxu3  ;;  %v401_v14 = vpop.f32.mrf.mxu0  ;;  %v438_v30 = vadd.f32 %v437_v13, %v419_v26  ;;  %v568_v13 = vld [vmem:[%s1081_s5 + $0x8] sm:$0xff] }
  0xb7   :  { %v402_v17 = vadd.f32 %v826_v16, %v401_v14  ;;  %v569_v14 = vld [vmem:[%s1081_s5 + $0x10] sm:$0xff] }
  0xb8   :  { %v457_v35 = vadd.f32 %v456_v11, %v438_v30 }
  0xb9   :  { %v420_v18 = vpop.f32.mrf.mxu1 }
  0xba   :  { %v421_v21 = vadd.f32 %v420_v18, %v402_v17 }
  0xbd   :  { %v439_v22 = vpop.f32.mrf.mxu2 }
  0xbe   :  { %v458_v15 = vpop.f32.mrf.mxu3  ;;  %v470_v23 = vpop.f32.mrf.mxu0  ;;  %v440_v28 = vadd.f32 %v439_v22, %v421_v21 }
  0xbf   :  { %v471_v42 = vadd.f32 %v470_v23, %v452_v40 }
  0xc0   :  { %v459_v32 = vadd.f32 %v458_v15, %v440_v28  ;;  %v570_v15 = vld [vmem:[%s1081_s5 + $0x18] sm:$0xff] }
  0xc6   :  { %v475_v24 = vpop.f32.mrf.mxu3  ;;  %v472_v37 = vpop.f32.mrf.mxu0 }
  0xc7   :  { %v476_v39 = vadd.f32 %v475_v24, %v457_v35  ;;  %v473_v41 = vadd.f32 %v472_v37, %v454_v38 }
  0xce   :  { %v477_v33 = vpop.f32.mrf.mxu3 }
  0xcf   :  { %v478_v36 = vadd.f32 %v477_v33, %v459_v32 }
  0xd1   :  { %496 = vmatpush.msrb.mxu1 %v478_v36 }
  0xd3   :  { %497 = vmatpush.msrb.mxu1 %v476_v39 }
  0xd5   :  { %498 = vmatpush.msrb.mxu1 %v473_v41 }
  0xd7   :  { %499 = vmatpush.msrb.mxu1 %v471_v42 }
  0xd8   :  { %773 = vmatmul.msk.f32.vlgmr.msrb.gmra.mxu1 %vm480_vm1, %v831_v43 }
 0x155   :  { %v501_v44 = vpop.f32.mrf.mxu1 }
 0x156   :  { %v504_v45 = vmul.f32 0.03125, %v501_v44 }
 0x158   :  { %v505_v46 = vperm.slane %v504_v45, 0 }
 0x15a   :  { %v509_v47 = vsub.f32 %v478_v36, %v505_v46  ;;  %v508_v48 = vsub.f32 %v476_v39, %v505_v46  ;;  %v507_v50 = vsub.f32 %v473_v41, %v505_v46  ;;  %v506_v52 = vsub.f32 %v471_v42, %v505_v46 }
 0x15c   :  { %v513_v49 = vmul.f32 %v509_v47, %v509_v47  ;;  %v512_v51 = vmul.f32 %v508_v48, %v508_v48  ;;  %v511_v53 = vmul.f32 %v507_v50, %v507_v50  ;;  %v510_v54 = vmul.f32 %v506_v52, %v506_v52 }
 0x15e   :  { %526 = vmatpush.msrb.mxu2 %v513_v49 }
 0x160   :  { %527 = vmatpush.msrb.mxu2 %v512_v51 }
 0x162   :  { %528 = vmatpush.msrb.mxu2 %v511_v53 }
 0x164   :  { %529 = vmatpush.msrb.mxu2 %v510_v54 }
 0x165   :  { %774 = vmatmul.msk.f32.vlgmr.msrb.gmra.mxu2 %vm480_vm1, %v831_v43 }
 0x1e8   :  { %v531_v55 = vpop.f32.mrf.mxu2 }
 0x1e9   :  { %v534_v56 = vmul.f32 0.03125, %v531_v55 }
 0x1eb   :  { %v535_v57 = vadd.f32 1e-05, %v534_v56 }
 0x1ed   :  { %829 = vrsqrt.f32 %v535_v57  ;;  %vm542_vm3 = vweird.f32 %v535_v57 }
 0x1f3   :  { %v830_v58 = vpop.eup %829 }
 0x1f4   :  { %v537_v59 = vmul.f32 %v830_v58, %v535_v57  ;;  %vm543_vm2 = vweird.f32 %v830_v58 }
 0x1f5   :  { %vm544_vm4 = vmor %vm542_vm3, %vm543_vm2 }
 0x1f6   :  { %v538_v60 = vmul.f32 %v830_v58, %v537_v59 }
 0x1f8   :  { %v539_v61 = vmul.f32 0.5, %v538_v60 }
 0x1fa   :  { %v540_v62 = vsub.f32 1.5, %v539_v61 }
 0x1fc   :  { %v541_v63 = vmul.f32 %v830_v58, %v540_v62 }
 0x1fe   :  { %v545_v0 = vsel %vm544_vm4, %v830_v58, %v541_v63 }
 0x1ff   :  { %v546_v1 = vperm.slane %v545_v0, 0 }
 0x201   :  { %v547_v3 = vmul.f32 %v546_v1, %v506_v52  ;;  %v548_v4 = vmul.f32 %v546_v1, %v507_v50  ;;  %v549_v5 = vmul.f32 %v546_v1, %v508_v48  ;;  %v550_v6 = vmul.f32 %v546_v1, %v509_v47 }
 0x203   :  { %v555_v8 = vmul.f32 %v827_v2, %v547_v3  ;;  %v556_v9 = vmul.f32 %v827_v2, %v548_v4  ;;  %v557_v10 = vmul.f32 %v827_v2, %v549_v5  ;;  %v558_v11 = vmul.f32 %v827_v2, %v550_v6 }
 0x205   :  { %v563_v16 = vadd.f32 %v828_v7, %v555_v8  ;;  %v564_v17 = vadd.f32 %v828_v7, %v556_v9  ;;  %v565_v18 = vadd.f32 %v828_v7, %v557_v10  ;;  %v566_v19 = vadd.f32 %v828_v7, %v558_v11 }
 0x207   :  { %v571_v20 = vadd.f32 %v567_v12, %v563_v16  ;;  %v572_v21 = vadd.f32 %v568_v13, %v564_v17  ;;  %v573_v22 = vadd.f32 %v569_v14, %v565_v18  ;;  %v574_v23 = vadd.f32 %v570_v15, %v566_v19 }
 0x209   :  { %v575_v24 = vmax.f32 %v571_v20, 0.0  ;;  %v576_v25 = vmax.f32 %v572_v21, 0.0  ;;  %v577_v26 = vmax.f32 %v573_v22, 0.0  ;;  %v578_v27 = vmax.f32 %v574_v23, 0.0 }
 0x20b   :  { %579 = vst.msk [vmem:[%s1082_s6] sm:$0xff] %vm378_vm0, %v575_v24 }
 0x20c   :  { %580 = vst.msk [vmem:[%s1082_s6 + $0x8] sm:$0xff] %vm378_vm0, %v576_v25 }
 0x20d   :  { %581 = vst.msk [vmem:[%s1082_s6 + $0x10] sm:$0xff] %vm378_vm0, %v577_v26 }
 0x20e   :  { %582 = vst.msk [vmem:[%s1082_s6 + $0x18] sm:$0xff] %vm378_vm0, %v578_v27 }

// kernel: feat2net_forward.48
= control target key start
LH: loop header
LB: loop body
LE: loop exit
PB: predicated region body
PF: predicated region fallthrough
CT: control target
= control target key end

     0   :  { %vm333_vm0 = vcmask 523264   ;;  %vm402_vm1 = vcmask 64512   ;;  %s829_s1 = inlined_call_operand.vmem [shape: bf16[576,128], index: 1, kind: input, shape index: {}]   ;;  %s830_s2 = inlined_call_operand.vmem [shape: f32[1,128], index: 2, kind: input, shape index: {}]   ;;  %s831_s0 = inlined_call_operand.vmem [shape: bf16[8,576], index: 0, kind: input, shape index: {}]   ;;  %s832_s3 = inlined_call_operand.vmem [shape: f32[1,128], index: 3, kind: input, shape index: {}]   ;;  %s833_s4 = inlined_call_operand.vmem [shape: f32[1,128], index: 4, kind: input, shape index: {}]   ;;  %s834_s5 = inlined_call_operand.vmem [shape: f32[8,128], index: 5, kind: output, shape index: {}]  }
   0x1   :  { %v634_v0 = vld [vmem:[%s829_s1 + $0x38] sm:$0xff]  ;;  %v633_v4 = vld [vmem:[%s829_s1 + $0x30] sm:$0xff]  ;;  %v632_v8 = vld [vmem:[%s829_s1 + $0x28] sm:$0xff] }
   0x2   :  { %v650_v1 = vld [vmem:[%s829_s1 + $0xb8] sm:$0xff]  ;;  %337 = vmatpush.bf16.msra.mxu0 %v634_v0  ;;  %v649_v5 = vld [vmem:[%s829_s1 + $0xb0] sm:$0xff]  ;;  %v648_v9 = vld [vmem:[%s829_s1 + $0xa8] sm:$0xff]  ;;  %v669_v0 = vmov 1.0  }
   0x3   :  { %v658_v2 = vld [vmem:[%s829_s1 + $0xf8] sm:$0xff]  ;;  %363 = vmatpush.bf16.msra.mxu2 %v650_v1  ;;  %v657_v6 = vld [vmem:[%s829_s1 + $0xf0] sm:$0xff]  ;;  %v656_v10 = vld [vmem:[%s829_s1 + $0xe8] sm:$0xff] }
   0x4   :  { %v642_v3 = vld [vmem:[%s829_s1 + $0x78] sm:$0xff]  ;;  %376 = vmatpush.bf16.msra.mxu3 %v658_v2  ;;  %v641_v7 = vld [vmem:[%s829_s1 + $0x70] sm:$0xff]  ;;  %v640_v11 = vld [vmem:[%s829_s1 + $0x68] sm:$0xff] }
   0x5   :  { %350 = vmatpush.bf16.msra.mxu1 %v642_v3  ;;  %v631_v12 = vld [vmem:[%s829_s1 + $0x20] sm:$0xff]  ;;  %v630_v16 = vld [vmem:[%s829_s1 + $0x18] sm:$0xff]  ;;  %v629_v20 = vld [vmem:[%s829_s1 + $0x10] sm:$0xff] }
   0x6   :  { %338 = vmatpush.bf16.msra.mxu0 %v633_v4  ;;  %v647_v13 = vld [vmem:[%s829_s1 + $0xa0] sm:$0xff]  ;;  %v646_v17 = vld [vmem:[%s829_s1 + $0x98] sm:$0xff]  ;;  %v645_v21 = vld [vmem:[%s829_s1 + $0x90] sm:$0xff] }
   0x7   :  { %364 = vmatpush.bf16.msra.mxu2 %v649_v5  ;;  %v655_v14 = vld [vmem:[%s829_s1 + $0xe0] sm:$0xff]  ;;  %v654_v18 = vld [vmem:[%s829_s1 + $0xd8] sm:$0xff]  ;;  %v653_v22 = vld [vmem:[%s829_s1 + $0xd0] sm:$0xff] }
   0x8   :  { %377 = vmatpush.bf16.msra.mxu3 %v657_v6  ;;  %v639_v15 = vld [vmem:[%s829_s1 + $0x60] sm:$0xff]  ;;  %v638_v19 = vld [vmem:[%s829_s1 + $0x58] sm:$0xff]  ;;  %v637_v23 = vld [vmem:[%s829_s1 + $0x50] sm:$0xff] }
   0x9   :  { %351 = vmatpush.bf16.msra.mxu1 %v641_v7  ;;  %v628_v24 = vld [vmem:[%s829_s1 + $0x8] sm:$0xff]  ;;  %v21_v26 = vld [vmem:[%s831_s0] sm:$0xff]  ;;  %v662_v38 = vld [vmem:[%s829_s1 + $0x118] sm:$0xff] }
   0xa   :  { %339 = vmatpush.bf16.msra.mxu0 %v632_v8  ;;  %v644_v25 = vld [vmem:[%s829_s1 + $0x88] sm:$0xff]  ;;  %v103_v30 = vunpack.c.l.b16 %v21_v26  ;;  %v627_v32 = vld [vmem:[%s829_s1] sm:$0xff]  ;;  %v104_v35 = vunpack.c.h.b16 %v21_v26  ;;  %v661_v43 = vld [vmem:[%s829_s1 + $0x110] sm:$0xff] }
   0xb   :  { %365 = vmatpush.bf16.msra.mxu2 %v648_v9  ;;  %v22_v27 = vld [vmem:[%s831_s0 + $0x8] sm:$0xff]  ;;  %v643_v33 = vld [vmem:[%s829_s1 + $0x80] sm:$0xff]  ;;  %v23_v45 = vld [vmem:[%s831_s0 + $0x10] sm:$0xf] }
   0xc   :  { %378 = vmatpush.bf16.msra.mxu3 %v656_v10  ;;  %v652_v28 = vld [vmem:[%s829_s1 + $0xc8] sm:$0xff]  ;;  %v105_v31 = vunpack.c.l.b16 %v22_v27  ;;  %v106_v34 = vunpack.c.h.b16 %v22_v27  ;;  %v651_v36 = vld [vmem:[%s829_s1 + $0xc0] sm:$0xff]  ;;  %v108_v39 = vpack.c.b16 %v103_v30, %v103_v30  ;;  %v109_v42 = vpack.c.b16 %v104_v35, %v104_v35 }
   0xd   :  { %352 = vmatpush.bf16.msra.mxu1 %v640_v11  ;;  %v636_v29 = vld [vmem:[%s829_s1 + $0x48] sm:$0xff]  ;;  %v635_v37 = vld [vmem:[%s829_s1 + $0x40] sm:$0xff]  ;;  %v107_v47 = vunpack.c.l.b16 %v23_v45 }
   0xe   :  { %340 = vmatpush.bf16.msra.mxu0 %v631_v12  ;;  %v110_v40 = vpack.c.b16 %v105_v31, %v105_v31  ;;  %v111_v41 = vpack.c.b16 %v106_v34, %v106_v34  ;;  %v660_v44 = vld [vmem:[%s829_s1 + $0x108] sm:$0xff]  ;;  %v659_v46 = vld [vmem:[%s829_s1 + $0x100] sm:$0xff] }
   0xf   :  { %366 = vmatpush.bf16.msra.mxu2 %v647_v13  ;;  %v112_v48 = vpack.c.b16 %v107_v47, %v107_v47  ;;  %v664_v50 = vld [vmem:[%s830_s2] ss:$0 sm:$0xff] }
  0x10   :  { %379 = vmatpush.bf16.msra.mxu3 %v655_v14 }
  0x11   :  { %353 = vmatpush.bf16.msra.mxu1 %v639_v15 }
  0x12   :  { %341 = vmatpush.bf16.msra.mxu0 %v630_v16 }
  0x13   :  { %367 = vmatpush.bf16.msra.mxu2 %v646_v17 }
  0x14   :  { %380 = vmatpush.bf16.msra.mxu3 %v654_v18  ;;  %v665_v18 = vld [vmem:[%s832_s3] ss:$0 sm:$0xff] }
  0x15   :  { %354 = vmatpush.bf16.msra.mxu1 %v638_v19 }
  0x16   :  { %342 = vmatpush.bf16.msra.mxu0 %v629_v20  ;;  %v666_v20 = vld [vmem:[%s833_s4] ss:$0 sm:$0xff] }
  0x17   :  { %368 = vmatpush.bf16.msra.mxu2 %v645_v21 }
  0x18   :  { %381 = vmatpush.bf16.msra.mxu3 %v653_v22 }
  0x19   :  { %355 = vmatpush.bf16.msra.mxu1 %v637_v23 }
  0x1a   :  { %343 = vmatpush.bf16.msra.mxu0 %v628_v24 }
  0x1b   :  { %369 = vmatpush.bf16.msra.mxu2 %v644_v25 }
  0x1c   :  { %382 = vmatpush.bf16.msra.mxu3 %v652_v28 }
  0x1d   :  { %356 = vmatpush.bf16.msra.mxu1 %v636_v29 }
  0x1e   :  { %344 = vmatpush.bf16.msra.mxu0 %v627_v32 }
  0x1f   :  { %370 = vmatpush.bf16.msra.mxu2 %v643_v33 }
  0x20   :  { %383 = vmatpush.bf16.msra.mxu3 %v651_v36 }
  0x21   :  { %357 = vmatpush.bf16.msra.mxu1 %v635_v37  ;;  %345 = vmatmul.bf16.vlgmr.msra.gmra.mxu0 %v108_v39 }
  0x22   :  { %393 = vmatpush.bf16.msrb.mxu0 %v662_v38  ;;  %371 = vmatmul.bf16.vlgmr.msra.gmra.mxu2 %v110_v40 }
  0x23   :  { %384 = vmatmul.bf16.vlgmr.msra.gmra.mxu3 %v111_v41 }
  0x24   :  { %358 = vmatmul.bf16.vlgmr.msra.gmra.mxu1 %v109_v42 }
  0x26   :  { %394 = vmatpush.bf16.msrb.mxu0 %v661_v43 }
  0x2a   :  { %395 = vmatpush.bf16.msrb.mxu0 %v660_v44 }
  0x2e   :  { %396 = vmatpush.bf16.msrb.mxu0 %v659_v46 }
  0x31   :  { %624 = vmatmul.msk.bf16.vlgmr.msrb.gmra.mxu0 %vm333_vm0, %v112_v48 }
  0x9e   :  { %v346_v49 = vpop.f32.mrf.mxu0 }
  0x9f   :  { %v347_v52 = vadd.f32 %v664_v50, %v346_v49 }
  0xa1   :  { %v359_v51 = vpop.f32.mrf.mxu1 }
  0xa2   :  { %v360_v56 = vadd.f32 %v359_v51, %v347_v52 }
  0xa5   :  { %v372_v53 = vpop.f32.mrf.mxu2 }
  0xa6   :  { %v385_v54 = vpop.f32.mrf.mxu3  ;;  %v348_v55 = vpop.f32.mrf.mxu0  ;;  %v373_v58 = vadd.f32 %v372_v53, %v360_v56 }
  0xa8   :  { %v386_v60 = vadd.f32 %v385_v54, %v373_v58 }
  0xa9   :  { %v361_v57 = vpop.f32.mrf.mxu1 }
  0xad   :  { %v374_v59 = vpop.f32.mrf.mxu2 }
  0xae   :  { %v387_v61 = vpop.f32.mrf.mxu3  ;;  %v398_v62 = vpop.f32.mrf.mxu0 }
  0xaf   :  { %v399_v63 = vadd.f32 %v398_v62, %v386_v60 }
  0xb1   :  { %421 = vmatpush.msrb.mxu1 %v399_v63 }
  0xb2   :  { %625 = vmatmul.msk.f32.vlgmr.msrb.gmra.mxu1 %vm402_vm1, %v669_v0 }
  0xb6   :  { %v400_v1 = vpop.f32.mrf.mxu0 }
 0x12f   :  { %v423_v2 = vpop.f32.mrf.mxu1 }
 0x130   :  { %v426_v3 = vmul.f32 0.125, %v423_v2 }
 0x132   :  { %v427_v4 = vperm.slane %v426_v3, 0 }
 0x134   :  { %v428_v5 = vsub.f32 %v399_v63, %v427_v4 }
 0x136   :  { %v429_v6 = vmul.f32 %v428_v5, %v428_v5 }
 0x138   :  { %445 = vmatpush.msrb.mxu2 %v429_v6 }
 0x139   :  { %626 = vmatmul.msk.f32.vlgmr.msrb.gmra.mxu2 %vm402_vm1, %v669_v0 }
 0x1bc   :  { %v447_v7 = vpop.f32.mrf.mxu2 }
 0x1bd   :  { %v450_v8 = vmul.f32 0.125, %v447_v7 }
 0x1bf   :  { %v451_v9 = vadd.f32 1e-05, %v450_v8 }
 0x1c1   :  { %667 = vrsqrt.f32 %v451_v9  ;;  %vm458_vm3 = vweird.f32 %v451_v9 }
 0x1c7   :  { %v668_v10 = vpop.eup %667 }
 0x1c8   :  { %v453_v11 = vmul.f32 %v668_v10, %v451_v9  ;;  %vm459_vm2 = vweird.f32 %v668_v10 }
 0x1c9   :  { %vm460_vm4 = vmor %vm458_vm3, %vm459_vm2 }
 0x1ca   :  { %v454_v12 = vmul.f32 %v668_v10, %v453_v11 }
 0x1cc   :  { %v455_v13 = vmul.f32 0.5, %v454_v12 }
 0x1ce   :  { %v456_v14 = vsub.f32 1.5, %v455_v13 }
 0x1d0   :  { %v457_v15 = vmul.f32 %v668_v10, %v456_v14 }
 0x1d2   :  { %v461_v16 = vsel %vm460_vm4, %v668_v10, %v457_v15 }
 0x1d3   :  { %v462_v17 = vperm.slane %v461_v16, 0 }
 0x1d5   :  { %v463_v19 = vmul.f32 %v462_v17, %v428_v5 }
 0x1d7   :  { %v468_v21 = vmul.f32 %v665_v18, %v463_v19 }
 0x1d9   :  { %v473_v22 = vadd.f32 %v666_v20, %v468_v21 }
 0x1db   :  { %v474_v23 = vmax.f32 %v473_v22, 0.0 }
 0x1dd   :  { %475 = vst [vmem:[%s834_s5] sm:$0xff] %v474_v23 }

// kernel: feat2net_forward.49
= control target key start
LH: loop header
LB: loop body
LE: loop exit
PB: predicated region body
PF: predicated region fallthrough
CT: control target
= control target key end

     0   :  { %vm58_vm0 = vcmask 523264   ;;  %vm75_vm1 = vcmask 64512   ;;  %v181_v8 = vmov 1.0   ;;  %s239_s1 = inlined_call_operand.vmem [shape: bf16[64,128], index: 1, kind: input, shape index: {}]   ;;  %s240_s2 = inlined_call_operand.vmem [shape: f32[1,128], index: 2, kind: input, shape index: {}]   ;;  %s241_s0 = inlined_call_operand.vmem [shape: bf16[8,64], index: 0, kind: input, shape index: {}]   ;;  %s242_s3 = inlined_call_operand.vmem [shape: f32[1,128], index: 3, kind: input, shape index: {}]   ;;  %s243_s4 = inlined_call_operand.vmem [shape: f32[1,128], index: 4, kind: input, shape index: {}]   ;;  %s244_s5 = inlined_call_operand.vmem [shape: f32[8,128], index: 5, kind: output, shape index: {}]  }
   0x1   :  { %v174_v0 = vld [vmem:[%s239_s1 + $0x18] sm:$0xff]  ;;  %v173_v1 = vld [vmem:[%s239_s1 + $0x10] sm:$0xff]  ;;  %v172_v2 = vld [vmem:[%s239_s1 + $0x8] sm:$0xff] }
   0x2   :  { %66 = vmatpush.bf16.msra.mxu0 %v174_v0  ;;  %v171_v3 = vld [vmem:[%s239_s1] sm:$0xff] }
   0x3   :  { %v21_v4 = vld [vmem:[%s241_s0] sm:$0xf] }
   0x4   :  { %v176_v5 = vld [vmem:[%s240_s2] ss:$0 sm:$0xff] }
   0x5   :  { %v177_v26 = vld [vmem:[%s242_s3] ss:$0 sm:$0xff] }
   0x6   :  { %67 = vmatpush.bf16.msra.mxu0 %v173_v1  ;;  %v178_v28 = vld [vmem:[%s243_s4] ss:$0 sm:$0xff] }
   0xa   :  { %68 = vmatpush.bf16.msra.mxu0 %v172_v2 }
   0xe   :  { %69 = vmatpush.bf16.msra.mxu0 %v171_v3 }
  0x11   :  { %168 = vmatmul.msk.bf16.vlgmr.msra.gmra.mxu0 %vm58_vm0, %v21_v4 }
  0x8e   :  { %v71_v6 = vpop.f32.mrf.mxu0 }
  0x8f   :  { %v72_v7 = vadd.f32 %v176_v5, %v71_v6 }
  0x91   :  { %94 = vmatpush.msra.mxu1 %v72_v7 }
  0x92   :  { %169 = vmatmul.msk.f32.vlgmr.msra.gmra.mxu1 %vm75_vm1, %v181_v8 }
  0x96   :  { %v73_v9 = vpop.f32.mrf.mxu0 }
 0x10f   :  { %v96_v10 = vpop.f32.mrf.mxu1 }
 0x110   :  { %v99_v11 = vmul.f32 0.125, %v96_v10 }
 0x112   :  { %v100_v12 = vperm.slane %v99_v11, 0 }
 0x114   :  { %v101_v13 = vsub.f32 %v72_v7, %v100_v12 }
 0x116   :  { %v102_v14 = vmul.f32 %v101_v13, %v101_v13 }
 0x118   :  { %118 = vmatpush.msra.mxu2 %v102_v14 }
 0x119   :  { %170 = vmatmul.msk.f32.vlgmr.msra.gmra.mxu2 %vm75_vm1, %v181_v8 }
 0x19c   :  { %v120_v15 = vpop.f32.mrf.mxu2 }
 0x19d   :  { %v123_v16 = vmul.f32 0.125, %v120_v15 }
 0x19f   :  { %v124_v17 = vadd.f32 1e-05, %v123_v16 }
 0x1a1   :  { %179 = vrsqrt.f32 %v124_v17  ;;  %vm131_vm3 = vweird.f32 %v124_v17 }
 0x1a7   :  { %v180_v18 = vpop.eup %179 }
 0x1a8   :  { %v126_v19 = vmul.f32 %v180_v18, %v124_v17  ;;  %vm132_vm2 = vweird.f32 %v180_v18 }
 0x1a9   :  { %vm133_vm4 = vmor %vm131_vm3, %vm132_vm2 }
 0x1aa   :  { %v127_v20 = vmul.f32 %v180_v18, %v126_v19 }
 0x1ac   :  { %v128_v21 = vmul.f32 0.5, %v127_v20 }
 0x1ae   :  { %v129_v22 = vsub.f32 1.5, %v128_v21 }
 0x1b0   :  { %v130_v23 = vmul.f32 %v180_v18, %v129_v22 }
 0x1b2   :  { %v134_v24 = vsel %vm133_vm4, %v180_v18, %v130_v23 }
 0x1b3   :  { %v135_v25 = vperm.slane %v134_v24, 0 }
 0x1b5   :  { %v136_v27 = vmul.f32 %v135_v25, %v101_v13 }
 0x1b7   :  { %v141_v29 = vmul.f32 %v177_v26, %v136_v27 }
 0x1b9   :  { %v146_v30 = vadd.f32 %v178_v28, %v141_v29 }
 0x1bb   :  { %147 = vst [vmem:[%s244_s5] sm:$0xff] %v146_v30 }

// kernel: feat2net_forward.55
= control target key start
LH: loop header
LB: loop body
LE: loop exit
PB: predicated region body
PF: predicated region fallthrough
CT: control target
= control target key end

     0   :  { %s357_s1 = inlined_call_operand.vmem [shape: bf16[128,256], index: 1, kind: input, shape index: {}]   ;;  %s358_s0 = inlined_call_operand.vmem [shape: bf16[8,128], index: 0, kind: input, shape index: {}]   ;;  %s359_s2 = inlined_call_operand.vmem [shape: f32[1,256], index: 2, kind: input, shape index: {}]   ;;  %s360_s3 = inlined_call_operand.vmem [shape: f32[8,256], index: 3, kind: output, shape index: {}]  }
   0x1   :  { %v207_v0 = vld [vmem:[%s357_s1 + $0x70] sm:$0xf]  ;;  %v228_v1 = vld [vmem:[%s357_s1 + $0x74] sm:$0xf0]  ;;  %v227_v2 = vld [vmem:[%s357_s1 + $0x74] sm:$0xf] }
   0x2   :  { %v208_v3 = vor.u32 %v228_v1, %v207_v0  ;;  %v209_v4 = vld [vmem:[%s357_s1 + $0x78] sm:$0xf0]  ;;  %v199_v5 = vld [vmem:[%s357_s1 + $0x60] sm:$0xf]  ;;  %v226_v6 = vld [vmem:[%s357_s1 + $0x64] sm:$0xf0] }
   0x3   :  { %v212_v7 = vor.u32 %v227_v2, %v209_v4  ;;  %v225_v8 = vld [vmem:[%s357_s1 + $0x64] sm:$0xf]  ;;  %v201_v9 = vld [vmem:[%s357_s1 + $0x68] sm:$0xf0]  ;;  %v200_v10 = vor.u32 %v226_v6, %v199_v5  ;;  %v191_v12 = vld [vmem:[%s357_s1 + $0x50] sm:$0xf] }
   0x4   :  { %117 = vmatpush.bf16.msra.mxu0 %v208_v3  ;;  %v204_v11 = vor.u32 %v225_v8, %v201_v9  ;;  %v224_v13 = vld [vmem:[%s357_s1 + $0x54] sm:$0xf0]  ;;  %v223_v14 = vld [vmem:[%s357_s1 + $0x54] sm:$0xf]  ;;  %v193_v15 = vld [vmem:[%s357_s1 + $0x58] sm:$0xf0] }
   0x5   :  { %130 = vmatpush.bf16.msra.mxu1 %v212_v7  ;;  %v192_v16 = vor.u32 %v224_v13, %v191_v12  ;;  %v196_v17 = vor.u32 %v223_v14, %v193_v15  ;;  %v183_v18 = vld [vmem:[%s357_s1 + $0x40] sm:$0xf]  ;;  %v222_v19 = vld [vmem:[%s357_s1 + $0x44] sm:$0xf0]  ;;  %v221_v20 = vld [vmem:[%s357_s1 + $0x44] sm:$0xf] }
   0x6   :  { %v185_v21 = vld [vmem:[%s357_s1 + $0x48] sm:$0xf0]  ;;  %v184_v22 = vor.u32 %v222_v19, %v183_v18  ;;  %v175_v24 = vld [vmem:[%s357_s1 + $0x30] sm:$0xf]  ;;  %v220_v25 = vld [vmem:[%s357_s1 + $0x34] sm:$0xf0] }
   0x7   :  { %v188_v23 = vor.u32 %v221_v20, %v185_v21  ;;  %v219_v26 = vld [vmem:[%s357_s1 + $0x34] sm:$0xf]  ;;  %v177_v27 = vld [vmem:[%s357_s1 + $0x38] sm:$0xf0]  ;;  %v176_v28 = vor.u32 %v220_v25, %v175_v24  ;;  %v167_v30 = vld [vmem:[%s357_s1 + $0x20] sm:$0xf] }
   0x8   :  { %118 = vmatpush.bf16.msra.mxu0 %v200_v10  ;;  %v180_v29 = vor.u32 %v219_v26, %v177_v27  ;;  %v218_v31 = vld [vmem:[%s357_s1 + $0x24] sm:$0xf0]  ;;  %v217_v32 = vld [vmem:[%s357_s1 + $0x24] sm:$0xf]  ;;  %v169_v33 = vld [vmem:[%s357_s1 + $0x28] sm:$0xf0] }
   0x9   :  { %131 = vmatpush.bf16.msra.mxu1 %v204_v11  ;;  %v168_v34 = vor.u32 %v218_v31, %v167_v30  ;;  %v172_v35 = vor.u32 %v217_v32, %v169_v33  ;;  %v159_v36 = vld [vmem:[%s357_s1 + $0x10] sm:$0xf]  ;;  %v216_v37 = vld [vmem:[%s357_s1 + $0x14] sm:$0xf0]  ;;  %v215_v38 = vld [vmem:[%s357_s1 + $0x14] sm:$0xf] }
   0xa   :  { %v161_v39 = vld [vmem:[%s357_s1 + $0x18] sm:$0xf0]  ;;  %v160_v40 = vor.u32 %v216_v37, %v159_v36  ;;  %v151_v42 = vld [vmem:[%s357_s1] sm:$0xf]  ;;  %v214_v43 = vld [vmem:[%s357_s1 + $0x4] sm:$0xf0] }
   0xb   :  { %v164_v41 = vor.u32 %v215_v38, %v161_v39  ;;  %v213_v44 = vld [vmem:[%s357_s1 + $0x4] sm:$0xf]  ;;  %v153_v45 = vld [vmem:[%s357_s1 + $0x8] sm:$0xf0]  ;;  %v152_v46 = vor.u32 %v214_v43, %v151_v42  ;;  %v14_v48 = vld [vmem:[%s358_s0] sm:$0xf] }
   0xc   :  { %119 = vmatpush.bf16.msra.mxu0 %v192_v16  ;;  %v156_v47 = vor.u32 %v213_v44, %v153_v45  ;;  %v31_v49 = vld [vmem:[%s359_s2] sm:$0x3] }
   0xd   :  { %132 = vmatpush.bf16.msra.mxu1 %v196_v17  ;;  %v33_v50 = vperm.slane %v31_v49, 0  ;;  %v34_v51 = vperm.slane %v31_v49, 1 }
  0x10   :  { %120 = vmatpush.bf16.msra.mxu0 %v184_v22 }
  0x11   :  { %133 = vmatpush.bf16.msra.mxu1 %v188_v23 }
  0x14   :  { %121 = vmatpush.bf16.msra.mxu0 %v176_v28 }
  0x15   :  { %134 = vmatpush.bf16.msra.mxu1 %v180_v29 }
  0x18   :  { %122 = vmatpush.bf16.msra.mxu0 %v168_v34 }
  0x19   :  { %135 = vmatpush.bf16.msra.mxu1 %v172_v35 }
  0x1c   :  { %123 = vmatpush.bf16.msra.mxu0 %v160_v40 }
  0x1d   :  { %136 = vmatpush.bf16.msra.mxu1 %v164_v41 }
  0x20   :  { %124 = vmatpush.bf16.msra.mxu0 %v152_v46 }
  0x21   :  { %137 = vmatpush.bf16.msra.mxu1 %v156_v47 }
  0x23   :  { %125 = vmatmul.bf16.vlgmr.msra.gmra.mxu0 %v14_v48 }
  0x24   :  { %138 = vmatmul.bf16.vlgmr.msra.gmra.mxu1 %v14_v48 }
  0xa0   :  { %v126_v52 = vpop.f32.mrf.mxu0 }
  0xa1   :  { %v127_v53 = vadd.f32 %v126_v52, %v33_v50  ;;  %v139_v54 = vpop.f32.mrf.mxu1 }
  0xa2   :  { %v140_v55 = vadd.f32 %v139_v54, %v34_v51 }
  0xa3   :  { %143 = vst [vmem:[%s360_s3] sm:$0xff] %v127_v53 }
  0xa4   :  { %144 = vst [vmem:[%s360_s3 + $0x8] sm:$0xff] %v140_v55 }
  0xa8   :  { %v128_v56 = vpop.f32.mrf.mxu0 }
  0xa9   :  { %v141_v57 = vpop.f32.mrf.mxu1 }

// kernel: feat2net_forward.51
= control target key start
LH: loop header
LB: loop body
LE: loop exit
PB: predicated region body
PF: predicated region fallthrough
CT: control target
= control target key end

     0   :  { %vm754_vm0 = vcmask 64512   ;;  %s1474_s1 = inlined_call_operand.vmem [shape: bf16[1152,128], index: 1, kind: input, shape index: {}]   ;;  %s1475_s2 = inlined_call_operand.vmem [shape: f32[1,128], index: 2, kind: input, shape index: {}]   ;;  %s1476_s0 = inlined_call_operand.vmem [shape: bf16[8,1152], index: 0, kind: input, shape index: {}]   ;;  %s1477_s3 = inlined_call_operand.vmem [shape: f32[1,128], index: 3, kind: input, shape index: {}]   ;;  %s1478_s4 = inlined_call_operand.vmem [shape: f32[1,128], index: 4, kind: input, shape index: {}]   ;;  %s1479_s5 = inlined_call_operand.vmem [shape: f32[8,128], index: 5, kind: output, shape index: {}]  }
   0x1   :  { %v1129_v0 = vld [vmem:[%s1474_s1 + $0x38] sm:$0xff]  ;;  %v1128_v4 = vld [vmem:[%s1474_s1 + $0x30] sm:$0xff]  ;;  %v1127_v8 = vld [vmem:[%s1474_s1 + $0x28] sm:$0xff] }
   0x2   :  { %v1145_v1 = vld [vmem:[%s1474_s1 + $0xb8] sm:$0xff]  ;;  %637 = vmatpush.bf16.msra.mxu0 %v1129_v0  ;;  %v1144_v5 = vld [vmem:[%s1474_s1 + $0xb0] sm:$0xff]  ;;  %v1143_v9 = vld [vmem:[%s1474_s1 + $0xa8] sm:$0xff] }
   0x3   :  { %v1153_v2 = vld [vmem:[%s1474_s1 + $0xf8] sm:$0xff]  ;;  %663 = vmatpush.bf16.msra.mxu2 %v1145_v1  ;;  %v1152_v6 = vld [vmem:[%s1474_s1 + $0xf0] sm:$0xff]  ;;  %v1151_v10 = vld [vmem:[%s1474_s1 + $0xe8] sm:$0xff] }
   0x4   :  { %v1137_v3 = vld [vmem:[%s1474_s1 + $0x78] sm:$0xff]  ;;  %676 = vmatpush.bf16.msra.mxu3 %v1153_v2  ;;  %v1136_v7 = vld [vmem:[%s1474_s1 + $0x70] sm:$0xff]  ;;  %v1135_v11 = vld [vmem:[%s1474_s1 + $0x68] sm:$0xff] }
   0x5   :  { %650 = vmatpush.bf16.msra.mxu1 %v1137_v3  ;;  %v1126_v12 = vld [vmem:[%s1474_s1 + $0x20] sm:$0xff]  ;;  %v1125_v16 = vld [vmem:[%s1474_s1 + $0x18] sm:$0xff]  ;;  %v1124_v20 = vld [vmem:[%s1474_s1 + $0x10] sm:$0xff] }
   0x6   :  { %638 = vmatpush.bf16.msra.mxu0 %v1128_v4  ;;  %v1142_v13 = vld [vmem:[%s1474_s1 + $0xa0] sm:$0xff]  ;;  %v1141_v17 = vld [vmem:[%s1474_s1 + $0x98] sm:$0xff]  ;;  %v1140_v21 = vld [vmem:[%s1474_s1 + $0x90] sm:$0xff] }
   0x7   :  { %664 = vmatpush.bf16.msra.mxu2 %v1144_v5  ;;  %v1150_v14 = vld [vmem:[%s1474_s1 + $0xe0] sm:$0xff]  ;;  %v1149_v18 = vld [vmem:[%s1474_s1 + $0xd8] sm:$0xff]  ;;  %v1148_v22 = vld [vmem:[%s1474_s1 + $0xd0] sm:$0xff] }
   0x8   :  { %677 = vmatpush.bf16.msra.mxu3 %v1152_v6  ;;  %v1134_v15 = vld [vmem:[%s1474_s1 + $0x60] sm:$0xff]  ;;  %v1133_v19 = vld [vmem:[%s1474_s1 + $0x58] sm:$0xff]  ;;  %v1132_v23 = vld [vmem:[%s1474_s1 + $0x50] sm:$0xff] }
   0x9   :  { %651 = vmatpush.bf16.msra.mxu1 %v1136_v7  ;;  %v1123_v24 = vld [vmem:[%s1474_s1 + $0x8] sm:$0xff]  ;;  %v20_v29 = vld [vmem:[%s1476_s0] sm:$0xff]  ;;  %v1161_v34 = vld [vmem:[%s1474_s1 + $0x138] sm:$0xff] }
   0xa   :  { %639 = vmatpush.bf16.msra.mxu0 %v1127_v8  ;;  %v1139_v25 = vld [vmem:[%s1474_s1 + $0x88] sm:$0xff]  ;;  %v1122_v30 = vld [vmem:[%s1474_s1] sm:$0xff]  ;;  %v178_v33 = vunpack.c.l.b16 %v20_v29  ;;  %v1177_v35 = vld [vmem:[%s1474_s1 + $0x1b8] sm:$0xff]  ;;  %v179_v39 = vunpack.c.h.b16 %v20_v29 }
   0xb   :  { %665 = vmatpush.bf16.msra.mxu2 %v1143_v9  ;;  %v1147_v26 = vld [vmem:[%s1474_s1 + $0xc8] sm:$0xff]  ;;  %v1138_v31 = vld [vmem:[%s1474_s1 + $0x80] sm:$0xff]  ;;  %v1185_v40 = vld [vmem:[%s1474_s1 + $0x1f8] sm:$0xff] }
   0xc   :  { %678 = vmatpush.bf16.msra.mxu3 %v1151_v10  ;;  %v1131_v27 = vld [vmem:[%s1474_s1 + $0x48] sm:$0xff]  ;;  %v1146_v36 = vld [vmem:[%s1474_s1 + $0xc0] sm:$0xff]  ;;  %v1169_v41 = vld [vmem:[%s1474_s1 + $0x178] sm:$0xff]  ;;  %v187_v43 = vpack.c.b16 %v178_v33, %v178_v33  ;;  %v188_v47 = vpack.c.b16 %v179_v39, %v179_v39 }
   0xd   :  { %652 = vmatpush.bf16.msra.mxu1 %v1135_v11  ;;  %v21_v28 = vld [vmem:[%s1476_s0 + $0x8] sm:$0xff]  ;;  %v1130_v37 = vld [vmem:[%s1474_s1 + $0x40] sm:$0xff]  ;;  %v1160_v44 = vld [vmem:[%s1474_s1 + $0x130] sm:$0xff] }
   0xe   :  { %640 = vmatpush.bf16.msra.mxu0 %v1126_v12  ;;  %v180_v32 = vunpack.c.l.b16 %v21_v28  ;;  %v181_v38 = vunpack.c.h.b16 %v21_v28  ;;  %v1176_v45 = vld [vmem:[%s1474_s1 + $0x1b0] sm:$0xff]  ;;  %v1159_v50 = vld [vmem:[%s1474_s1 + $0x128] sm:$0xff]  ;;  %v1158_v54 = vld [vmem:[%s1474_s1 + $0x120] sm:$0xff] }
   0xf   :  { %666 = vmatpush.bf16.msra.mxu2 %v1142_v13  ;;  %v1184_v48 = vld [vmem:[%s1474_s1 + $0x1f0] sm:$0xff]  ;;  %v1175_v51 = vld [vmem:[%s1474_s1 + $0x1a8] sm:$0xff]  ;;  %v1174_v55 = vld [vmem:[%s1474_s1 + $0x1a0] sm:$0xff] }
  0x10   :  { %679 = vmatpush.bf16.msra.mxu3 %v1150_v14  ;;  %v189_v42 = vpack.c.b16 %v180_v32, %v180_v32  ;;  %v190_v46 = vpack.c.b16 %v181_v38, %v181_v38  ;;  %v1168_v49 = vld [vmem:[%s1474_s1 + $0x170] sm:$0xff]  ;;  %v1183_v52 = vld [vmem:[%s1474_s1 + $0x1e8] sm:$0xff]  ;;  %v1182_v56 = vld [vmem:[%s1474_s1 + $0x1e0] sm:$0xff] }
  0x11   :  { %653 = vmatpush.bf16.msra.mxu1 %v1134_v15  ;;  %v1167_v53 = vld [vmem:[%s1474_s1 + $0x168] sm:$0xff]  ;;  %v1166_v57 = vld [vmem:[%s1474_s1 + $0x160] sm:$0xff]  ;;  %v1157_v58 = vld [vmem:[%s1474_s1 + $0x118] sm:$0xff] }
  0x12   :  { %641 = vmatpush.bf16.msra.mxu0 %v1125_v16  ;;  %v1173_v59 = vld [vmem:[%s1474_s1 + $0x198] sm:$0xff]  ;;  %v1156_v62 = vld [vmem:[%s1474_s1 + $0x110] sm:$0xff]  ;;  %v1155_v2 = vld [vmem:[%s1474_s1 + $0x108] sm:$0xff] }
  0x13   :  { %667 = vmatpush.bf16.msra.mxu2 %v1141_v17  ;;  %v1181_v60 = vld [vmem:[%s1474_s1 + $0x1d8] sm:$0xff]  ;;  %v1172_v63 = vld [vmem:[%s1474_s1 + $0x190] sm:$0xff]  ;;  %v1171_v3 = vld [vmem:[%s1474_s1 + $0x188] sm:$0xff] }
  0x14   :  { %680 = vmatpush.bf16.msra.mxu3 %v1149_v18  ;;  %v1165_v61 = vld [vmem:[%s1474_s1 + $0x158] sm:$0xff]  ;;  %v1180_v0 = vld [vmem:[%s1474_s1 + $0x1d0] sm:$0xff]  ;;  %v1179_v6 = vld [vmem:[%s1474_s1 + $0x1c8] sm:$0xff] }
  0x15   :  { %654 = vmatpush.bf16.msra.mxu1 %v1133_v19  ;;  %v1164_v1 = vld [vmem:[%s1474_s1 + $0x150] sm:$0xff]  ;;  %v23_v4 = vld [vmem:[%s1476_s0 + $0x18] sm:$0xff]  ;;  %v1163_v7 = vld [vmem:[%s1474_s1 + $0x148] sm:$0xff] }
  0x16   :  { %642 = vmatpush.bf16.msra.mxu0 %v1124_v20  ;;  %v22_v5 = vld [vmem:[%s1476_s0 + $0x10] sm:$0xff]  ;;  %v184_v8 = vunpack.c.l.b16 %v23_v4  ;;  %v1154_v10 = vld [vmem:[%s1474_s1 + $0x100] sm:$0xff]  ;;  %v1193_v12 = vld [vmem:[%s1474_s1 + $0x238] sm:$0xff]  ;;  %v185_v13 = vunpack.c.h.b16 %v23_v4 }
  0x17   :  { %668 = vmatpush.bf16.msra.mxu2 %v1140_v21  ;;  %v182_v9 = vunpack.c.l.b16 %v22_v5  ;;  %v1170_v11 = vld [vmem:[%s1474_s1 + $0x180] sm:$0xff]  ;;  %v183_v16 = vunpack.c.h.b16 %v22_v5  ;;  %v1192_v19 = vld [vmem:[%s1474_s1 + $0x230] sm:$0xff] }
  0x18   :  { %681 = vmatpush.bf16.msra.mxu3 %v1148_v22  ;;  %v1178_v14 = vld [vmem:[%s1474_s1 + $0x1c0] sm:$0xff]  ;;  %v193_v17 = vpack.c.b16 %v184_v8, %v184_v8  ;;  %v194_v20 = vpack.c.b16 %v185_v13, %v185_v13  ;;  %v1191_v22 = vld [vmem:[%s1474_s1 + $0x228] sm:$0xff] }
  0x19   :  { %655 = vmatpush.bf16.msra.mxu1 %v1132_v23  ;;  %v1162_v15 = vld [vmem:[%s1474_s1 + $0x140] sm:$0xff]  ;;  %v191_v18 = vpack.c.b16 %v182_v9, %v182_v9  ;;  %v192_v21 = vpack.c.b16 %v183_v16, %v183_v16 }
  0x1a   :  { %643 = vmatpush.bf16.msra.mxu0 %v1123_v24  ;;  %v1190_v23 = vld [vmem:[%s1474_s1 + $0x220] sm:$0xff]  ;;  %v1189_v24 = vld [vmem:[%s1474_s1 + $0x218] sm:$0xff] }
  0x1b   :  { %669 = vmatpush.bf16.msra.mxu2 %v1139_v25  ;;  %v1188_v25 = vld [vmem:[%s1474_s1 + $0x210] sm:$0xff]  ;;  %v1186_v29 = vld [vmem:[%s1474_s1 + $0x200] sm:$0xff] }
  0x1c   :  { %682 = vmatpush.bf16.msra.mxu3 %v1147_v26  ;;  %v1187_v26 = vld [vmem:[%s1474_s1 + $0x208] sm:$0xff]  ;;  %v1195_v39 = vld [vmem:[%s1475_s2] ss:$0 sm:$0xff] }
  0x1d   :  { %656 = vmatpush.bf16.msra.mxu1 %v1131_v27  ;;  %v24_v27 = vld [vmem:[%s1476_s0 + $0x20] sm:$0xf] }
  0x1e   :  { %644 = vmatpush.bf16.msra.mxu0 %v1122_v30  ;;  %v186_v28 = vunpack.c.l.b16 %v24_v27 }
  0x1f   :  { %670 = vmatpush.bf16.msra.mxu2 %v1138_v31 }
  0x20   :  { %683 = vmatpush.bf16.msra.mxu3 %v1146_v36  ;;  %v195_v30 = vpack.c.b16 %v186_v28, %v186_v28 }
  0x21   :  { %657 = vmatpush.bf16.msra.mxu1 %v1130_v37  ;;  %645 = vmatmul.bf16.vlgmr.msra.gmra.mxu0 %v187_v43 }
  0x22   :  { %689 = vmatpush.bf16.msrb.mxu0 %v1161_v34  ;;  %671 = vmatmul.bf16.vlgmr.msra.gmra.mxu2 %v189_v42 }
  0x23   :  { %715 = vmatpush.bf16.msrb.mxu2 %v1177_v35  ;;  %684 = vmatmul.bf16.vlgmr.msra.gmra.mxu3 %v190_v46 }
  0x24   :  { %728 = vmatpush.bf16.msrb.mxu3 %v1185_v40  ;;  %658 = vmatmul.bf16.vlgmr.msra.gmra.mxu1 %v188_v47 }
  0x25   :  { %702 = vmatpush.bf16.msrb.mxu1 %v1169_v41 }
  0x26   :  { %690 = vmatpush.bf16.msrb.mxu0 %v1160_v44 }
  0x27   :  { %716 = vmatpush.bf16.msrb.mxu2 %v1176_v45 }
  0x28   :  { %729 = vmatpush.bf16.msrb.mxu3 %v1184_v48 }
  0x29   :  { %703 = vmatpush.bf16.msrb.mxu1 %v1168_v49 }
  0x2a   :  { %691 = vmatpush.bf16.msrb.mxu0 %v1159_v50 }
  0x2b   :  { %717 = vmatpush.bf16.msrb.mxu2 %v1175_v51 }
  0x2c   :  { %730 = vmatpush.bf16.msrb.mxu3 %v1183_v52 }
  0x2d   :  { %704 = vmatpush.bf16.msrb.mxu1 %v1167_v53 }
  0x2e   :  { %692 = vmatpush.bf16.msrb.mxu0 %v1158_v54 }
  0x2f   :  { %718 = vmatpush.bf16.msrb.mxu2 %v1174_v55 }
  0x30   :  { %731 = vmatpush.bf16.msrb.mxu3 %v1182_v56 }
  0x31   :  { %705 = vmatpush.bf16.msrb.mxu1 %v1166_v57 }
  0x32   :  { %693 = vmatpush.bf16.msrb.mxu0 %v1157_v58  ;;  %v1200_v58 = vmov 1.0  }
  0x33   :  { %719 = vmatpush.bf16.msrb.mxu2 %v1173_v59 }
  0x34   :  { %732 = vmatpush.bf16.msrb.mxu3 %v1181_v60 }
  0x35   :  { %706 = vmatpush.bf16.msrb.mxu1 %v1165_v61 }
  0x36   :  { %694 = vmatpush.bf16.msrb.mxu0 %v1156_v62 }
  0x37   :  { %720 = vmatpush.bf16.msrb.mxu2 %v1172_v63 }
  0x38   :  { %733 = vmatpush.bf16.msrb.mxu3 %v1180_v0 }
  0x39   :  { %707 = vmatpush.bf16.msrb.mxu1 %v1164_v1 }
  0x3a   :  { %695 = vmatpush.bf16.msrb.mxu0 %v1155_v2 }
  0x3b   :  { %721 = vmatpush.bf16.msrb.mxu2 %v1171_v3 }
  0x3c   :  { %734 = vmatpush.bf16.msrb.mxu3 %v1179_v6 }
  0x3d   :  { %708 = vmatpush.bf16.msrb.mxu1 %v1163_v7 }
  0x3e   :  { %696 = vmatpush.bf16.msrb.mxu0 %v1154_v10 }
  0x3f   :  { %722 = vmatpush.bf16.msrb.mxu2 %v1170_v11 }
  0x40   :  { %735 = vmatpush.bf16.msrb.mxu3 %v1178_v14  ;;  %v1197_v14 = vld [vmem:[%s1478_s4] ss:$0 sm:$0xff] }
  0x41   :  { %709 = vmatpush.bf16.msrb.mxu1 %v1162_v15  ;;  %697 = vmatmul.bf16.vlgmr.msrb.gmra.mxu0 %v191_v18 }
  0x42   :  { %741 = vmatpush.bf16.msra.mxu0 %v1193_v12  ;;  %723 = vmatmul.bf16.vlgmr.msrb.gmra.mxu2 %v193_v17  ;;  %v1196_v12 = vld [vmem:[%s1477_s3] ss:$0 sm:$0xff] }
  0x43   :  { %736 = vmatmul.bf16.vlgmr.msrb.gmra.mxu3 %v194_v20 }
  0x44   :  { %710 = vmatmul.bf16.vlgmr.msrb.gmra.mxu1 %v192_v21 }
  0x46   :  { %742 = vmatpush.bf16.msra.mxu0 %v1192_v19 }
  0x4a   :  { %743 = vmatpush.bf16.msra.mxu0 %v1191_v22 }
  0x4e   :  { %744 = vmatpush.bf16.msra.mxu0 %v1190_v23 }
  0x52   :  { %745 = vmatpush.bf16.msra.mxu0 %v1189_v24 }
  0x56   :  { %746 = vmatpush.bf16.msra.mxu0 %v1188_v25 }
  0x5a   :  { %747 = vmatpush.bf16.msra.mxu0 %v1187_v26 }
  0x5e   :  { %748 = vmatpush.bf16.msra.mxu0 %v1186_v29 }
  0x61   :  { %749 = vmatmul.bf16.vlgmr.msra.gmra.mxu0 %v195_v30 }
  0x9e   :  { %v646_v31 = vpop.f32.mrf.mxu0 }
  0x9f   :  { %v647_v40 = vadd.f32 %v1195_v39, %v646_v31 }
  0xa1   :  { %v659_v32 = vpop.f32.mrf.mxu1 }
  0xa2   :  { %v660_v43 = vadd.f32 %v659_v32, %v647_v40 }
  0xa5   :  { %v672_v33 = vpop.f32.mrf.mxu2 }
  0xa6   :  { %v685_v34 = vpop.f32.mrf.mxu3  ;;  %v648_v35 = vpop.f32.mrf.mxu0  ;;  %v673_v45 = vadd.f32 %v672_v33, %v660_v43 }
  0xa8   :  { %v686_v49 = vadd.f32 %v685_v34, %v673_v45 }
  0xa9   :  { %v661_v36 = vpop.f32.mrf.mxu1 }
  0xad   :  { %v674_v37 = vpop.f32.mrf.mxu2 }
  0xae   :  { %v687_v38 = vpop.f32.mrf.mxu3 }
  0xbe   :  { %v698_v41 = vpop.f32.mrf.mxu0 }
  0xbf   :  { %v699_v51 = vadd.f32 %v698_v41, %v686_v49 }
  0xc1   :  { %v711_v42 = vpop.f32.mrf.mxu1 }
  0xc2   :  { %v712_v53 = vadd.f32 %v711_v42, %v699_v51 }
  0xc5   :  { %v724_v44 = vpop.f32.mrf.mxu2 }
  0xc6   :  { %v737_v46 = vpop.f32.mrf.mxu3  ;;  %v700_v47 = vpop.f32.mrf.mxu0  ;;  %v725_v54 = vadd.f32 %v724_v44, %v712_v53 }
  0xc8   :  { %v738_v55 = vadd.f32 %v737_v46, %v725_v54 }
  0xc9   :  { %v713_v48 = vpop.f32.mrf.mxu1 }
  0xcd   :  { %v726_v50 = vpop.f32.mrf.mxu2 }
  0xce   :  { %v739_v52 = vpop.f32.mrf.mxu3 }
  0xde   :  { %v750_v56 = vpop.f32.mrf.mxu0 }
  0xdf   :  { %v751_v57 = vadd.f32 %v750_v56, %v738_v55 }
  0xe1   :  { %773 = vmatpush.msra.mxu1 %v751_v57 }
  0xe2   :  { %1120 = vmatmul.msk.f32.vlgmr.msra.gmra.mxu1 %vm754_vm0, %v1200_v58 }
  0xe6   :  { %v752_v59 = vpop.f32.mrf.mxu0 }
 0x15f   :  { %v775_v60 = vpop.f32.mrf.mxu1 }
 0x160   :  { %v778_v61 = vmul.f32 0.125, %v775_v60 }
 0x162   :  { %v779_v62 = vperm.slane %v778_v61, 0 }
 0x164   :  { %v780_v63 = vsub.f32 %v751_v57, %v779_v62 }
 0x166   :  { %v781_v0 = vmul.f32 %v780_v63, %v780_v63 }
 0x168   :  { %797 = vmatpush.msra.mxu2 %v781_v0 }
 0x169   :  { %1121 = vmatmul.msk.f32.vlgmr.msra.gmra.mxu2 %vm754_vm0, %v1200_v58 }
 0x1ec   :  { %v799_v1 = vpop.f32.mrf.mxu2 }
 0x1ed   :  { %v802_v2 = vmul.f32 0.125, %v799_v1 }
 0x1ef   :  { %v803_v3 = vadd.f32 1e-05, %v802_v2 }
 0x1f1   :  { %1198 = vrsqrt.f32 %v803_v3  ;;  %vm810_vm2 = vweird.f32 %v803_v3 }
 0x1f7   :  { %v1199_v4 = vpop.eup %1198 }
 0x1f8   :  { %v805_v5 = vmul.f32 %v1199_v4, %v803_v3  ;;  %vm811_vm1 = vweird.f32 %v1199_v4 }
 0x1f9   :  { %vm812_vm3 = vmor %vm810_vm2, %vm811_vm1 }
 0x1fa   :  { %v806_v6 = vmul.f32 %v1199_v4, %v805_v5 }
 0x1fc   :  { %v807_v7 = vmul.f32 0.5, %v806_v6 }
 0x1fe   :  { %v808_v8 = vsub.f32 1.5, %v807_v7 }
 0x200   :  { %v809_v9 = vmul.f32 %v1199_v4, %v808_v8 }
 0x202   :  { %v813_v10 = vsel %vm812_vm3, %v1199_v4, %v809_v9 }
 0x203   :  { %v814_v11 = vperm.slane %v813_v10, 0 }
 0x205   :  { %v815_v13 = vmul.f32 %v814_v11, %v780_v63 }
 0x207   :  { %v820_v15 = vmul.f32 %v1196_v12, %v815_v13 }
 0x209   :  { %v825_v16 = vadd.f32 %v1197_v14, %v820_v15 }
 0x20b   :  { %v826_v17 = vmax.f32 %v825_v16, 0.0 }
 0x20d   :  { %827 = vst [vmem:[%s1479_s5] sm:$0xff] %v826_v17 }

// kernel: feat2net_forward.56
= control target key start
LH: loop header
LB: loop body
LE: loop exit
PB: predicated region body
PF: predicated region fallthrough
CT: control target
= control target key end

     0   :  { %vm21_vm0 = vcmask 261120   ;;  %v136_v4 = vmov 1.0   ;;  %vm120_vm4 = vcmask 523264   ;;  %s206_s0 = inlined_call_operand.vmem [shape: f32[32,64], index: 0, kind: input, shape index: {}]   ;;  %s207_s1 = inlined_call_operand.vmem [shape: f32[1,64], index: 1, kind: input, shape index: {}]   ;;  %s208_s2 = inlined_call_operand.vmem [shape: f32[1,64], index: 2, kind: input, shape index: {}]   ;;  %s209_s3 = inlined_call_operand.vmem [shape: f32[32,64], index: 3, kind: input, shape index: {}]   ;;  %s210_s4 = inlined_call_operand.vmem [shape: f32[32,64], index: 4, kind: output, shape index: {}]  }
   0x1   :  { %v20_v0 = vld [vmem:[%s206_s0 + $0x18] sm:$0xff]  ;;  %v19_v1 = vld [vmem:[%s206_s0 + $0x10] sm:$0xff]  ;;  %v18_v2 = vld [vmem:[%s206_s0 + $0x8] sm:$0xff] }
   0x2   :  { %37 = vmatpush.msra.mxu0 %v20_v0  ;;  %v17_v3 = vld [vmem:[%s206_s0] sm:$0xff]  ;;  %v113_v42 = vld [vmem:[%s209_s3 + $0x8] sm:$0xff]  ;;  %v114_v43 = vld [vmem:[%s209_s3 + $0x10] sm:$0xff] }
   0x3   :  { %v132_v27 = vld [vmem:[%s207_s1] ss:$0 sm:$0xff]  ;;  %v115_v48 = vld [vmem:[%s209_s3 + $0x18] sm:$0xff] }
   0x4   :  { %38 = vmatpush.msra.mxu0 %v19_v1  ;;  %v133_v32 = vld [vmem:[%s208_s2] ss:$0 sm:$0xff] }
   0x5   :  { %v112_v41 = vld [vmem:[%s209_s3] sm:$0xff] }
   0x6   :  { %39 = vmatpush.msra.mxu0 %v18_v2 }
   0x8   :  { %40 = vmatpush.msra.mxu0 %v17_v3 }
   0x9   :  { %129 = vmatmul.msk.f32.vlgmr.msra.gmra.mxu0 %vm21_vm0, %v136_v4 }
  0x86   :  { %v42_v5 = vpop.f32.mrf.mxu0 }
  0x87   :  { %v45_v6 = vmul.f32 0.03125, %v42_v5 }
  0x89   :  { %v46_v7 = vperm.slane %v45_v6, 0 }
  0x8b   :  { %v50_v8 = vsub.f32 %v20_v0, %v46_v7  ;;  %v49_v9 = vsub.f32 %v19_v1, %v46_v7  ;;  %v48_v11 = vsub.f32 %v18_v2, %v46_v7  ;;  %v47_v13 = vsub.f32 %v17_v3, %v46_v7 }
  0x8d   :  { %v54_v10 = vmul.f32 %v50_v8, %v50_v8  ;;  %v53_v12 = vmul.f32 %v49_v9, %v49_v9  ;;  %v52_v14 = vmul.f32 %v48_v11, %v48_v11  ;;  %v51_v15 = vmul.f32 %v47_v13, %v47_v13 }
  0x8f   :  { %67 = vmatpush.msra.mxu1 %v54_v10 }
  0x91   :  { %68 = vmatpush.msra.mxu1 %v53_v12 }
  0x93   :  { %69 = vmatpush.msra.mxu1 %v52_v14 }
  0x95   :  { %70 = vmatpush.msra.mxu1 %v51_v15 }
  0x96   :  { %130 = vmatmul.msk.f32.vlgmr.msra.gmra.mxu1 %vm21_vm0, %v136_v4 }
 0x113   :  { %v72_v16 = vpop.f32.mrf.mxu1 }
 0x114   :  { %v75_v17 = vmul.f32 0.03125, %v72_v16 }
 0x116   :  { %v76_v18 = vadd.f32 1e-05, %v75_v17 }
 0x118   :  { %134 = vrsqrt.f32 %v76_v18  ;;  %vm83_vm2 = vweird.f32 %v76_v18 }
 0x11e   :  { %v135_v19 = vpop.eup %134 }
 0x11f   :  { %v78_v20 = vmul.f32 %v135_v19, %v76_v18  ;;  %vm84_vm1 = vweird.f32 %v135_v19 }
 0x120   :  { %vm85_vm3 = vmor %vm83_vm2, %vm84_vm1 }
 0x121   :  { %v79_v21 = vmul.f32 %v135_v19, %v78_v20 }
 0x123   :  { %v80_v22 = vmul.f32 0.5, %v79_v21 }
 0x125   :  { %v81_v23 = vsub.f32 1.5, %v80_v22 }
 0x127   :  { %v82_v24 = vmul.f32 %v135_v19, %v81_v23 }
 0x129   :  { %v86_v25 = vsel %vm85_vm3, %v135_v19, %v82_v24 }
 0x12a   :  { %v87_v26 = vperm.slane %v86_v25, 0 }
 0x12c   :  { %v88_v28 = vmul.f32 %v87_v26, %v47_v13  ;;  %v89_v29 = vmul.f32 %v87_v26, %v48_v11  ;;  %v90_v30 = vmul.f32 %v87_v26, %v49_v9  ;;  %v91_v31 = vmul.f32 %v87_v26, %v50_v8 }
 0x12e   :  { %v96_v33 = vmul.f32 %v132_v27, %v88_v28  ;;  %v97_v34 = vmul.f32 %v132_v27, %v89_v29  ;;  %v98_v35 = vmul.f32 %v132_v27, %v90_v30  ;;  %v99_v36 = vmul.f32 %v132_v27, %v91_v31 }
 0x130   :  { %v104_v37 = vadd.f32 %v133_v32, %v96_v33  ;;  %v105_v38 = vadd.f32 %v133_v32, %v97_v34  ;;  %v106_v39 = vadd.f32 %v133_v32, %v98_v35  ;;  %v107_v40 = vadd.f32 %v133_v32, %v99_v36 }
 0x132   :  { %v108_v44 = vmax.f32 %v104_v37, 0.0  ;;  %v109_v45 = vmax.f32 %v105_v38, 0.0  ;;  %v110_v46 = vmax.f32 %v106_v39, 0.0  ;;  %v111_v47 = vmax.f32 %v107_v40, 0.0 }
 0x134   :  { %v116_v49 = vadd.f32 %v112_v41, %v108_v44  ;;  %v117_v50 = vadd.f32 %v113_v42, %v109_v45  ;;  %v118_v51 = vadd.f32 %v114_v43, %v110_v46  ;;  %v119_v52 = vadd.f32 %v115_v48, %v111_v47 }
 0x136   :  { %121 = vst.msk [vmem:[%s210_s4] sm:$0xff] %vm120_vm4, %v116_v49 }
 0x137   :  { %122 = vst.msk [vmem:[%s210_s4 + $0x8] sm:$0xff] %vm120_vm4, %v117_v50 }
 0x138   :  { %123 = vst.msk [vmem:[%s210_s4 + $0x10] sm:$0xff] %vm120_vm4, %v118_v51 }
 0x139   :  { %124 = vst.msk [vmem:[%s210_s4 + $0x18] sm:$0xff] %vm120_vm4, %v119_v52 }

// kernel: feat2net_forward.59
= control target key start
LH: loop header
LB: loop body
LE: loop exit
PB: predicated region body
PF: predicated region fallthrough
CT: control target
= control target key end

     0   :  { %vm65_vm0 = vcmask 523264   ;;  %s189_s1 = inlined_call_operand.vmem [shape: bf16[64,128], index: 1, kind: input, shape index: {}]   ;;  %s190_s2 = inlined_call_operand.vmem [shape: f32[1,128], index: 2, kind: input, shape index: {}]   ;;  %s191_s0 = inlined_call_operand.vmem [shape: bf16[32,64], index: 0, kind: input, shape index: {}]   ;;  %s192_s3 = inlined_call_operand.vmem [shape: f32[32,128], index: 3, kind: output, shape index: {}]  }
   0x1   :  { %v130_v0 = vld [vmem:[%s189_s1 + $0x18] sm:$0xff]  ;;  %v129_v1 = vld [vmem:[%s189_s1 + $0x10] sm:$0xff]  ;;  %v128_v2 = vld [vmem:[%s189_s1 + $0x8] sm:$0xff] }
   0x2   :  { %76 = vmatpush.bf16.msra.mxu0 %v130_v0  ;;  %131 = vmatpush.bf16.msra.mxu1 %v130_v0  ;;  %v127_v3 = vld [vmem:[%s189_s1] sm:$0xff]  ;;  %v126_v5 = vld [vmem:[%s191_s0 + $0x8] sm:$0xff] }
   0x3   :  { %v125_v4 = vld [vmem:[%s191_s0] sm:$0xff] }
   0x4   :  { %v135_v6 = vld [vmem:[%s190_s2] ss:$0 sm:$0xff] }
   0x6   :  { %77 = vmatpush.bf16.msra.mxu0 %v129_v1  ;;  %132 = vmatpush.bf16.msra.mxu1 %v129_v1 }
   0xa   :  { %78 = vmatpush.bf16.msra.mxu0 %v128_v2  ;;  %133 = vmatpush.bf16.msra.mxu1 %v128_v2 }
   0xe   :  { %79 = vmatpush.bf16.msra.mxu0 %v127_v3  ;;  %134 = vmatpush.bf16.msra.mxu1 %v127_v3 }
  0x11   :  { %123 = vmatmul.msk.bf16.vlgmr.msra.gmra.mxu0 %vm65_vm0, %v125_v4  ;;  %124 = vmatmul.msk.bf16.vlgmr.msra.gmra.mxu1 %vm65_vm0, %v126_v5 }
  0x8e   :  { %v81_v7 = vpop.f32.mrf.mxu0  ;;  %v86_v8 = vpop.f32.mrf.mxu1 }
  0x8f   :  { %v82_v9 = vadd.f32 %v135_v6, %v81_v7  ;;  %v87_v10 = vadd.f32 %v135_v6, %v86_v8 }
  0x91   :  { %91 = vst [vmem:[%s192_s3] sm:$0xff] %v82_v9 }
  0x92   :  { %93 = vst [vmem:[%s192_s3 + $0x10] sm:$0xff] %v87_v10 }
  0x96   :  { %v83_v11 = vpop.f32.mrf.mxu0  ;;  %v88_v12 = vpop.f32.mrf.mxu1 }
  0x97   :  { %v84_v13 = vadd.f32 %v135_v6, %v83_v11  ;;  %v89_v14 = vadd.f32 %v135_v6, %v88_v12 }
  0x99   :  { %92 = vst [vmem:[%s192_s3 + $0x8] sm:$0xff] %v84_v13 }
  0x9a   :  { %94 = vst [vmem:[%s192_s3 + $0x18] sm:$0xff] %v89_v14 }

// kernel: feat2net_forward.50
= control target key start
LH: loop header
LB: loop body
LE: loop exit
PB: predicated region body
PF: predicated region fallthrough
CT: control target
= control target key end

     0   :  { %vm757_vm0 = vcmask 64512   ;;  %s1487_s1 = inlined_call_operand.vmem [shape: bf16[1152,128], index: 1, kind: input, shape index: {}]   ;;  %s1488_s2 = inlined_call_operand.vmem [shape: f32[1,128], index: 2, kind: input, shape index: {}]   ;;  %s1489_s0 = inlined_call_operand.vmem [shape: bf16[8,1152], index: 0, kind: input, shape index: {}]   ;;  %s1490_s3 = inlined_call_operand.vmem [shape: f32[1,128], index: 3, kind: input, shape index: {}]   ;;  %s1491_s4 = inlined_call_operand.vmem [shape: f32[1,128], index: 4, kind: input, shape index: {}]   ;;  %s1492_s5 = inlined_call_operand.vmem [shape: f32[8,128], index: 5, kind: input, shape index: {}]   ;;  %s1493_s6 = inlined_call_operand.vmem [shape: f32[8,128], index: 6, kind: output, shape index: {}]  }
   0x1   :  { %v1134_v0 = vld [vmem:[%s1487_s1 + $0x38] sm:$0xff]  ;;  %v1133_v4 = vld [vmem:[%s1487_s1 + $0x30] sm:$0xff]  ;;  %v1132_v8 = vld [vmem:[%s1487_s1 + $0x28] sm:$0xff] }
   0x2   :  { %v1150_v1 = vld [vmem:[%s1487_s1 + $0xb8] sm:$0xff]  ;;  %640 = vmatpush.bf16.msra.mxu0 %v1134_v0  ;;  %v1149_v5 = vld [vmem:[%s1487_s1 + $0xb0] sm:$0xff]  ;;  %v1148_v9 = vld [vmem:[%s1487_s1 + $0xa8] sm:$0xff] }
   0x3   :  { %v1158_v2 = vld [vmem:[%s1487_s1 + $0xf8] sm:$0xff]  ;;  %666 = vmatpush.bf16.msra.mxu2 %v1150_v1  ;;  %v1157_v6 = vld [vmem:[%s1487_s1 + $0xf0] sm:$0xff]  ;;  %v1156_v10 = vld [vmem:[%s1487_s1 + $0xe8] sm:$0xff] }
   0x4   :  { %v1142_v3 = vld [vmem:[%s1487_s1 + $0x78] sm:$0xff]  ;;  %679 = vmatpush.bf16.msra.mxu3 %v1158_v2  ;;  %v1141_v7 = vld [vmem:[%s1487_s1 + $0x70] sm:$0xff]  ;;  %v1140_v11 = vld [vmem:[%s1487_s1 + $0x68] sm:$0xff] }
   0x5   :  { %653 = vmatpush.bf16.msra.mxu1 %v1142_v3  ;;  %v1131_v12 = vld [vmem:[%s1487_s1 + $0x20] sm:$0xff]  ;;  %v1130_v16 = vld [vmem:[%s1487_s1 + $0x18] sm:$0xff]  ;;  %v1129_v20 = vld [vmem:[%s1487_s1 + $0x10] sm:$0xff] }
   0x6   :  { %641 = vmatpush.bf16.msra.mxu0 %v1133_v4  ;;  %v1147_v13 = vld [vmem:[%s1487_s1 + $0xa0] sm:$0xff]  ;;  %v1146_v17 = vld [vmem:[%s1487_s1 + $0x98] sm:$0xff]  ;;  %v1145_v21 = vld [vmem:[%s1487_s1 + $0x90] sm:$0xff] }
   0x7   :  { %667 = vmatpush.bf16.msra.mxu2 %v1149_v5  ;;  %v1155_v14 = vld [vmem:[%s1487_s1 + $0xe0] sm:$0xff]  ;;  %v1154_v18 = vld [vmem:[%s1487_s1 + $0xd8] sm:$0xff]  ;;  %v1153_v22 = vld [vmem:[%s1487_s1 + $0xd0] sm:$0xff] }
   0x8   :  { %680 = vmatpush.bf16.msra.mxu3 %v1157_v6  ;;  %v1139_v15 = vld [vmem:[%s1487_s1 + $0x60] sm:$0xff]  ;;  %v1138_v19 = vld [vmem:[%s1487_s1 + $0x58] sm:$0xff]  ;;  %v1137_v23 = vld [vmem:[%s1487_s1 + $0x50] sm:$0xff] }
   0x9   :  { %654 = vmatpush.bf16.msra.mxu1 %v1141_v7  ;;  %v1128_v24 = vld [vmem:[%s1487_s1 + $0x8] sm:$0xff]  ;;  %v23_v29 = vld [vmem:[%s1489_s0] sm:$0xff]  ;;  %v1166_v34 = vld [vmem:[%s1487_s1 + $0x138] sm:$0xff] }
   0xa   :  { %642 = vmatpush.bf16.msra.mxu0 %v1132_v8  ;;  %v1144_v25 = vld [vmem:[%s1487_s1 + $0x88] sm:$0xff]  ;;  %v1127_v30 = vld [vmem:[%s1487_s1] sm:$0xff]  ;;  %v181_v33 = vunpack.c.l.b16 %v23_v29  ;;  %v1182_v35 = vld [vmem:[%s1487_s1 + $0x1b8] sm:$0xff]  ;;  %v182_v39 = vunpack.c.h.b16 %v23_v29 }
   0xb   :  { %668 = vmatpush.bf16.msra.mxu2 %v1148_v9  ;;  %v1152_v26 = vld [vmem:[%s1487_s1 + $0xc8] sm:$0xff]  ;;  %v1143_v31 = vld [vmem:[%s1487_s1 + $0x80] sm:$0xff]  ;;  %v1190_v40 = vld [vmem:[%s1487_s1 + $0x1f8] sm:$0xff] }
   0xc   :  { %681 = vmatpush.bf16.msra.mxu3 %v1156_v10  ;;  %v1136_v27 = vld [vmem:[%s1487_s1 + $0x48] sm:$0xff]  ;;  %v1151_v36 = vld [vmem:[%s1487_s1 + $0xc0] sm:$0xff]  ;;  %v1174_v41 = vld [vmem:[%s1487_s1 + $0x178] sm:$0xff]  ;;  %v190_v43 = vpack.c.b16 %v181_v33, %v181_v33  ;;  %v191_v47 = vpack.c.b16 %v182_v39, %v182_v39 }
   0xd   :  { %655 = vmatpush.bf16.msra.mxu1 %v1140_v11  ;;  %v24_v28 = vld [vmem:[%s1489_s0 + $0x8] sm:$0xff]  ;;  %v1135_v37 = vld [vmem:[%s1487_s1 + $0x40] sm:$0xff]  ;;  %v1165_v44 = vld [vmem:[%s1487_s1 + $0x130] sm:$0xff] }
   0xe   :  { %643 = vmatpush.bf16.msra.mxu0 %v1131_v12  ;;  %v183_v32 = vunpack.c.l.b16 %v24_v28  ;;  %v184_v38 = vunpack.c.h.b16 %v24_v28  ;;  %v1181_v45 = vld [vmem:[%s1487_s1 + $0x1b0] sm:$0xff]  ;;  %v1164_v50 = vld [vmem:[%s1487_s1 + $0x128] sm:$0xff]  ;;  %v1163_v54 = vld [vmem:[%s1487_s1 + $0x120] sm:$0xff] }
   0xf   :  { %669 = vmatpush.bf16.msra.mxu2 %v1147_v13  ;;  %v1189_v48 = vld [vmem:[%s1487_s1 + $0x1f0] sm:$0xff]  ;;  %v1180_v51 = vld [vmem:[%s1487_s1 + $0x1a8] sm:$0xff]  ;;  %v1179_v55 = vld [vmem:[%s1487_s1 + $0x1a0] sm:$0xff] }
  0x10   :  { %682 = vmatpush.bf16.msra.mxu3 %v1155_v14  ;;  %v192_v42 = vpack.c.b16 %v183_v32, %v183_v32  ;;  %v193_v46 = vpack.c.b16 %v184_v38, %v184_v38  ;;  %v1173_v49 = vld [vmem:[%s1487_s1 + $0x170] sm:$0xff]  ;;  %v1188_v52 = vld [vmem:[%s1487_s1 + $0x1e8] sm:$0xff]  ;;  %v1187_v56 = vld [vmem:[%s1487_s1 + $0x1e0] sm:$0xff] }
  0x11   :  { %656 = vmatpush.bf16.msra.mxu1 %v1139_v15  ;;  %v1172_v53 = vld [vmem:[%s1487_s1 + $0x168] sm:$0xff]  ;;  %v1171_v57 = vld [vmem:[%s1487_s1 + $0x160] sm:$0xff]  ;;  %v1162_v58 = vld [vmem:[%s1487_s1 + $0x118] sm:$0xff] }
  0x12   :  { %644 = vmatpush.bf16.msra.mxu0 %v1130_v16  ;;  %v1178_v59 = vld [vmem:[%s1487_s1 + $0x198] sm:$0xff]  ;;  %v1161_v62 = vld [vmem:[%s1487_s1 + $0x110] sm:$0xff]  ;;  %v1160_v2 = vld [vmem:[%s1487_s1 + $0x108] sm:$0xff] }
  0x13   :  { %670 = vmatpush.bf16.msra.mxu2 %v1146_v17  ;;  %v1186_v60 = vld [vmem:[%s1487_s1 + $0x1d8] sm:$0xff]  ;;  %v1177_v63 = vld [vmem:[%s1487_s1 + $0x190] sm:$0xff]  ;;  %v1176_v3 = vld [vmem:[%s1487_s1 + $0x188] sm:$0xff] }
  0x14   :  { %683 = vmatpush.bf16.msra.mxu3 %v1154_v18  ;;  %v1170_v61 = vld [vmem:[%s1487_s1 + $0x158] sm:$0xff]  ;;  %v1185_v0 = vld [vmem:[%s1487_s1 + $0x1d0] sm:$0xff]  ;;  %v1184_v6 = vld [vmem:[%s1487_s1 + $0x1c8] sm:$0xff] }
  0x15   :  { %657 = vmatpush.bf16.msra.mxu1 %v1138_v19  ;;  %v1169_v1 = vld [vmem:[%s1487_s1 + $0x150] sm:$0xff]  ;;  %v26_v4 = vld [vmem:[%s1489_s0 + $0x18] sm:$0xff]  ;;  %v1168_v7 = vld [vmem:[%s1487_s1 + $0x148] sm:$0xff] }
  0x16   :  { %645 = vmatpush.bf16.msra.mxu0 %v1129_v20  ;;  %v25_v5 = vld [vmem:[%s1489_s0 + $0x10] sm:$0xff]  ;;  %v187_v8 = vunpack.c.l.b16 %v26_v4  ;;  %v1159_v10 = vld [vmem:[%s1487_s1 + $0x100] sm:$0xff]  ;;  %v1198_v12 = vld [vmem:[%s1487_s1 + $0x238] sm:$0xff]  ;;  %v188_v13 = vunpack.c.h.b16 %v26_v4 }
  0x17   :  { %671 = vmatpush.bf16.msra.mxu2 %v1145_v21  ;;  %v185_v9 = vunpack.c.l.b16 %v25_v5  ;;  %v1175_v11 = vld [vmem:[%s1487_s1 + $0x180] sm:$0xff]  ;;  %v186_v16 = vunpack.c.h.b16 %v25_v5  ;;  %v1197_v19 = vld [vmem:[%s1487_s1 + $0x230] sm:$0xff] }
  0x18   :  { %684 = vmatpush.bf16.msra.mxu3 %v1153_v22  ;;  %v1183_v14 = vld [vmem:[%s1487_s1 + $0x1c0] sm:$0xff]  ;;  %v196_v17 = vpack.c.b16 %v187_v8, %v187_v8  ;;  %v197_v20 = vpack.c.b16 %v188_v13, %v188_v13  ;;  %v1196_v22 = vld [vmem:[%s1487_s1 + $0x228] sm:$0xff] }
  0x19   :  { %658 = vmatpush.bf16.msra.mxu1 %v1137_v23  ;;  %v1167_v15 = vld [vmem:[%s1487_s1 + $0x140] sm:$0xff]  ;;  %v194_v18 = vpack.c.b16 %v185_v9, %v185_v9  ;;  %v195_v21 = vpack.c.b16 %v186_v16, %v186_v16 }
  0x1a   :  { %646 = vmatpush.bf16.msra.mxu0 %v1128_v24  ;;  %v1195_v23 = vld [vmem:[%s1487_s1 + $0x220] sm:$0xff]  ;;  %v1194_v24 = vld [vmem:[%s1487_s1 + $0x218] sm:$0xff] }
  0x1b   :  { %672 = vmatpush.bf16.msra.mxu2 %v1144_v25  ;;  %v1193_v25 = vld [vmem:[%s1487_s1 + $0x210] sm:$0xff]  ;;  %v1191_v29 = vld [vmem:[%s1487_s1 + $0x200] sm:$0xff] }
  0x1c   :  { %685 = vmatpush.bf16.msra.mxu3 %v1152_v26  ;;  %v1192_v26 = vld [vmem:[%s1487_s1 + $0x208] sm:$0xff]  ;;  %v1200_v39 = vld [vmem:[%s1488_s2] ss:$0 sm:$0xff] }
  0x1d   :  { %659 = vmatpush.bf16.msra.mxu1 %v1136_v27  ;;  %v27_v27 = vld [vmem:[%s1489_s0 + $0x20] sm:$0xf] }
  0x1e   :  { %647 = vmatpush.bf16.msra.mxu0 %v1127_v30  ;;  %v189_v28 = vunpack.c.l.b16 %v27_v27  ;;  %v829_v16 = vld [vmem:[%s1492_s5] sm:$0xff] }
  0x1f   :  { %673 = vmatpush.bf16.msra.mxu2 %v1143_v31 }
  0x20   :  { %686 = vmatpush.bf16.msra.mxu3 %v1151_v36  ;;  %v198_v30 = vpack.c.b16 %v189_v28, %v189_v28 }
  0x21   :  { %660 = vmatpush.bf16.msra.mxu1 %v1135_v37  ;;  %648 = vmatmul.bf16.vlgmr.msra.gmra.mxu0 %v190_v43 }
  0x22   :  { %692 = vmatpush.bf16.msrb.mxu0 %v1166_v34  ;;  %674 = vmatmul.bf16.vlgmr.msra.gmra.mxu2 %v192_v42 }
  0x23   :  { %718 = vmatpush.bf16.msrb.mxu2 %v1182_v35  ;;  %687 = vmatmul.bf16.vlgmr.msra.gmra.mxu3 %v193_v46 }
  0x24   :  { %731 = vmatpush.bf16.msrb.mxu3 %v1190_v40  ;;  %661 = vmatmul.bf16.vlgmr.msra.gmra.mxu1 %v191_v47 }
  0x25   :  { %705 = vmatpush.bf16.msrb.mxu1 %v1174_v41 }
  0x26   :  { %693 = vmatpush.bf16.msrb.mxu0 %v1165_v44 }
  0x27   :  { %719 = vmatpush.bf16.msrb.mxu2 %v1181_v45 }
  0x28   :  { %732 = vmatpush.bf16.msrb.mxu3 %v1189_v48 }
  0x29   :  { %706 = vmatpush.bf16.msrb.mxu1 %v1173_v49 }
  0x2a   :  { %694 = vmatpush.bf16.msrb.mxu0 %v1164_v50 }
  0x2b   :  { %720 = vmatpush.bf16.msrb.mxu2 %v1180_v51 }
  0x2c   :  { %733 = vmatpush.bf16.msrb.mxu3 %v1188_v52 }
  0x2d   :  { %707 = vmatpush.bf16.msrb.mxu1 %v1172_v53 }
  0x2e   :  { %695 = vmatpush.bf16.msrb.mxu0 %v1163_v54 }
  0x2f   :  { %721 = vmatpush.bf16.msrb.mxu2 %v1179_v55 }
  0x30   :  { %734 = vmatpush.bf16.msrb.mxu3 %v1187_v56 }
  0x31   :  { %708 = vmatpush.bf16.msrb.mxu1 %v1171_v57 }
  0x32   :  { %696 = vmatpush.bf16.msrb.mxu0 %v1162_v58  ;;  %v1205_v58 = vmov 1.0  }
  0x33   :  { %722 = vmatpush.bf16.msrb.mxu2 %v1178_v59 }
  0x34   :  { %735 = vmatpush.bf16.msrb.mxu3 %v1186_v60 }
  0x35   :  { %709 = vmatpush.bf16.msrb.mxu1 %v1170_v61 }
  0x36   :  { %697 = vmatpush.bf16.msrb.mxu0 %v1161_v62 }
  0x37   :  { %723 = vmatpush.bf16.msrb.mxu2 %v1177_v63 }
  0x38   :  { %736 = vmatpush.bf16.msrb.mxu3 %v1185_v0 }
  0x39   :  { %710 = vmatpush.bf16.msrb.mxu1 %v1169_v1 }
  0x3a   :  { %698 = vmatpush.bf16.msrb.mxu0 %v1160_v2 }
  0x3b   :  { %724 = vmatpush.bf16.msrb.mxu2 %v1176_v3 }
  0x3c   :  { %737 = vmatpush.bf16.msrb.mxu3 %v1184_v6 }
  0x3d   :  { %711 = vmatpush.bf16.msrb.mxu1 %v1168_v7 }
  0x3e   :  { %699 = vmatpush.bf16.msrb.mxu0 %v1159_v10 }
  0x3f   :  { %725 = vmatpush.bf16.msrb.mxu2 %v1175_v11 }
  0x40   :  { %738 = vmatpush.bf16.msrb.mxu3 %v1183_v14  ;;  %v1202_v14 = vld [vmem:[%s1491_s4] ss:$0 sm:$0xff] }
  0x41   :  { %712 = vmatpush.bf16.msrb.mxu1 %v1167_v15  ;;  %700 = vmatmul.bf16.vlgmr.msrb.gmra.mxu0 %v194_v18 }
  0x42   :  { %744 = vmatpush.bf16.msra.mxu0 %v1198_v12  ;;  %726 = vmatmul.bf16.vlgmr.msrb.gmra.mxu2 %v196_v17  ;;  %v1201_v12 = vld [vmem:[%s1490_s3] ss:$0 sm:$0xff] }
  0x43   :  { %739 = vmatmul.bf16.vlgmr.msrb.gmra.mxu3 %v197_v20 }
  0x44   :  { %713 = vmatmul.bf16.vlgmr.msrb.gmra.mxu1 %v195_v21 }
  0x46   :  { %745 = vmatpush.bf16.msra.mxu0 %v1197_v19 }
  0x4a   :  { %746 = vmatpush.bf16.msra.mxu0 %v1196_v22 }
  0x4e   :  { %747 = vmatpush.bf16.msra.mxu0 %v1195_v23 }
  0x52   :  { %748 = vmatpush.bf16.msra.mxu0 %v1194_v24 }
  0x56   :  { %749 = vmatpush.bf16.msra.mxu0 %v1193_v25 }
  0x5a   :  { %750 = vmatpush.bf16.msra.mxu0 %v1192_v26 }
  0x5e   :  { %751 = vmatpush.bf16.msra.mxu0 %v1191_v29 }
  0x61   :  { %752 = vmatmul.bf16.vlgmr.msra.gmra.mxu0 %v198_v30 }
  0x9e   :  { %v649_v31 = vpop.f32.mrf.mxu0 }
  0x9f   :  { %v650_v40 = vadd.f32 %v1200_v39, %v649_v31 }
  0xa1   :  { %v662_v32 = vpop.f32.mrf.mxu1 }
  0xa2   :  { %v663_v43 = vadd.f32 %v662_v32, %v650_v40 }
  0xa5   :  { %v675_v33 = vpop.f32.mrf.mxu2 }
  0xa6   :  { %v688_v34 = vpop.f32.mrf.mxu3  ;;  %v651_v35 = vpop.f32.mrf.mxu0  ;;  %v676_v45 = vadd.f32 %v675_v33, %v663_v43 }
  0xa8   :  { %v689_v49 = vadd.f32 %v688_v34, %v676_v45 }
  0xa9   :  { %v664_v36 = vpop.f32.mrf.mxu1 }
  0xad   :  { %v677_v37 = vpop.f32.mrf.mxu2 }
  0xae   :  { %v690_v38 = vpop.f32.mrf.mxu3 }
  0xbe   :  { %v701_v41 = vpop.f32.mrf.mxu0 }
  0xbf   :  { %v702_v51 = vadd.f32 %v701_v41, %v689_v49 }
  0xc1   :  { %v714_v42 = vpop.f32.mrf.mxu1 }
  0xc2   :  { %v715_v53 = vadd.f32 %v714_v42, %v702_v51 }
  0xc5   :  { %v727_v44 = vpop.f32.mrf.mxu2 }
  0xc6   :  { %v740_v46 = vpop.f32.mrf.mxu3  ;;  %v703_v47 = vpop.f32.mrf.mxu0  ;;  %v728_v54 = vadd.f32 %v727_v44, %v715_v53 }
  0xc8   :  { %v741_v55 = vadd.f32 %v740_v46, %v728_v54 }
  0xc9   :  { %v716_v48 = vpop.f32.mrf.mxu1 }
  0xcd   :  { %v729_v50 = vpop.f32.mrf.mxu2 }
  0xce   :  { %v742_v52 = vpop.f32.mrf.mxu3 }
  0xde   :  { %v753_v56 = vpop.f32.mrf.mxu0 }
  0xdf   :  { %v754_v57 = vadd.f32 %v753_v56, %v741_v55 }
  0xe1   :  { %776 = vmatpush.msra.mxu1 %v754_v57 }
  0xe2   :  { %1125 = vmatmul.msk.f32.vlgmr.msra.gmra.mxu1 %vm757_vm0, %v1205_v58 }
  0xe6   :  { %v755_v59 = vpop.f32.mrf.mxu0 }
 0x15f   :  { %v778_v60 = vpop.f32.mrf.mxu1 }
 0x160   :  { %v781_v61 = vmul.f32 0.125, %v778_v60 }
 0x162   :  { %v782_v62 = vperm.slane %v781_v61, 0 }
 0x164   :  { %v783_v63 = vsub.f32 %v754_v57, %v782_v62 }
 0x166   :  { %v784_v0 = vmul.f32 %v783_v63, %v783_v63 }
 0x168   :  { %800 = vmatpush.msra.mxu2 %v784_v0 }
 0x169   :  { %1126 = vmatmul.msk.f32.vlgmr.msra.gmra.mxu2 %vm757_vm0, %v1205_v58 }
 0x1ec   :  { %v802_v1 = vpop.f32.mrf.mxu2 }
 0x1ed   :  { %v805_v2 = vmul.f32 0.125, %v802_v1 }
 0x1ef   :  { %v806_v3 = vadd.f32 1e-05, %v805_v2 }
 0x1f1   :  { %1203 = vrsqrt.f32 %v806_v3  ;;  %vm813_vm2 = vweird.f32 %v806_v3 }
 0x1f7   :  { %v1204_v4 = vpop.eup %1203 }
 0x1f8   :  { %v808_v5 = vmul.f32 %v1204_v4, %v806_v3  ;;  %vm814_vm1 = vweird.f32 %v1204_v4 }
 0x1f9   :  { %vm815_vm3 = vmor %vm813_vm2, %vm814_vm1 }
 0x1fa   :  { %v809_v6 = vmul.f32 %v1204_v4, %v808_v5 }
 0x1fc   :  { %v810_v7 = vmul.f32 0.5, %v809_v6 }
 0x1fe   :  { %v811_v8 = vsub.f32 1.5, %v810_v7 }
 0x200   :  { %v812_v9 = vmul.f32 %v1204_v4, %v811_v8 }
 0x202   :  { %v816_v10 = vsel %vm815_vm3, %v1204_v4, %v812_v9 }
 0x203   :  { %v817_v11 = vperm.slane %v816_v10, 0 }
 0x205   :  { %v818_v13 = vmul.f32 %v817_v11, %v783_v63 }
 0x207   :  { %v823_v15 = vmul.f32 %v1201_v12, %v818_v13 }
 0x209   :  { %v828_v17 = vadd.f32 %v1202_v14, %v823_v15 }
 0x20b   :  { %v830_v18 = vadd.f32 %v829_v16, %v828_v17 }
 0x20d   :  { %v831_v19 = vmax.f32 %v830_v18, 0.0 }
 0x20f   :  { %832 = vst [vmem:[%s1493_s6] sm:$0xff] %v831_v19 }

// kernel: feat2net_forward.60
= control target key start
LH: loop header
LB: loop body
LE: loop exit
PB: predicated region body
PF: predicated region fallthrough
CT: control target
= control target key end

     0   :  { %v250_v16 = vmov 1.0   ;;  %vm224_vm3 = vcmask 261120   ;;  %s495_s0 = inlined_call_operand.vmem [shape: f32[128,32], index: 0, kind: input, shape index: {}]   ;;  %s496_s1 = inlined_call_operand.vmem [shape: f32[1,32], index: 1, kind: input, shape index: {}]   ;;  %s497_s2 = inlined_call_operand.vmem [shape: f32[1,32], index: 2, kind: input, shape index: {}]   ;;  %s498_s3 = inlined_call_operand.vmem [shape: f32[128,32], index: 3, kind: input, shape index: {}]   ;;  %s499_s4 = inlined_call_operand.vmem [shape: f32[128,32], index: 4, kind: output, shape index: {}]  }
   0x1   :  { %v32_v0 = vld [vmem:[%s495_s0 + $0x78] sm:$0xff]  ;;  %v31_v1 = vld [vmem:[%s495_s0 + $0x70] sm:$0xff]  ;;  %v30_v2 = vld [vmem:[%s495_s0 + $0x68] sm:$0xff] }
   0x2   :  { %33 = vmatpush.msra.mxu0 %v32_v0  ;;  %v29_v3 = vld [vmem:[%s495_s0 + $0x60] sm:$0xff]  ;;  %v28_v4 = vld [vmem:[%s495_s0 + $0x58] sm:$0xff]  ;;  %v27_v5 = vld [vmem:[%s495_s0 + $0x50] sm:$0xff] }
   0x3   :  { %v26_v6 = vld [vmem:[%s495_s0 + $0x48] sm:$0xff]  ;;  %v25_v7 = vld [vmem:[%s495_s0 + $0x40] sm:$0xff]  ;;  %v24_v8 = vld [vmem:[%s495_s0 + $0x38] sm:$0xff] }
   0x4   :  { %34 = vmatpush.msra.mxu0 %v31_v1  ;;  %v23_v9 = vld [vmem:[%s495_s0 + $0x30] sm:$0xff]  ;;  %v22_v10 = vld [vmem:[%s495_s0 + $0x28] sm:$0xff]  ;;  %v21_v11 = vld [vmem:[%s495_s0 + $0x20] sm:$0xff] }
   0x5   :  { %v20_v12 = vld [vmem:[%s495_s0 + $0x18] sm:$0xff]  ;;  %v19_v13 = vld [vmem:[%s495_s0 + $0x10] sm:$0xff]  ;;  %v18_v14 = vld [vmem:[%s495_s0 + $0x8] sm:$0xff] }
   0x6   :  { %35 = vmatpush.msra.mxu0 %v30_v2  ;;  %v17_v15 = vld [vmem:[%s495_s0] sm:$0xff] }
   0x8   :  { %36 = vmatpush.msra.mxu0 %v29_v3 }
   0xa   :  { %37 = vmatpush.msra.mxu0 %v28_v4 }
   0xc   :  { %38 = vmatpush.msra.mxu0 %v27_v5 }
   0xe   :  { %39 = vmatpush.msra.mxu0 %v26_v6 }
  0x10   :  { %40 = vmatpush.msra.mxu0 %v25_v7 }
  0x12   :  { %41 = vmatpush.msra.mxu0 %v24_v8 }
  0x14   :  { %42 = vmatpush.msra.mxu0 %v23_v9 }
  0x16   :  { %43 = vmatpush.msra.mxu0 %v22_v10 }
  0x18   :  { %44 = vmatpush.msra.mxu0 %v21_v11 }
  0x1a   :  { %45 = vmatpush.msra.mxu0 %v20_v12 }
  0x1c   :  { %46 = vmatpush.msra.mxu0 %v19_v13 }
  0x1e   :  { %47 = vmatpush.msra.mxu0 %v18_v14 }
  0x20   :  { %48 = vmatpush.msra.mxu0 %v17_v15 }
  0x21   :  { %49 = vmatmul.f32.vlgmr.msra.gmra.mxu0 %v250_v16 }
  0x9e   :  { %v50_v17 = vpop.f32.mrf.mxu0 }
  0x9f   :  { %v53_v18 = vmul.f32 0.0078125, %v50_v17 }
  0xa1   :  { %v54_v19 = vperm.slane %v53_v18, 0 }
  0xa3   :  { %v324_v20 = vsub.f32 %v32_v0, %v54_v19  ;;  %v326_v21 = vsub.f32 %v31_v1, %v54_v19  ;;  %v330_v23 = vsub.f32 %v30_v2, %v54_v19  ;;  %v334_v25 = vsub.f32 %v29_v3, %v54_v19  ;;  %v246_v2 = vld [vmem:[%s496_s1] ss:$0 sm:$0xff] }
  0xa4   :  { %v338_v27 = vsub.f32 %v28_v4, %v54_v19  ;;  %v342_v29 = vsub.f32 %v27_v5, %v54_v19  ;;  %v346_v31 = vsub.f32 %v26_v6, %v54_v19  ;;  %v63_v33 = vsub.f32 %v25_v7, %v54_v19 }
  0xa5   :  { %v86_v22 = vmul.f32 %v324_v20, %v324_v20  ;;  %v85_v24 = vmul.f32 %v326_v21, %v326_v21  ;;  %v84_v26 = vmul.f32 %v330_v23, %v330_v23  ;;  %v83_v28 = vmul.f32 %v334_v25, %v334_v25 }
  0xa6   :  { %v82_v30 = vmul.f32 %v338_v27, %v338_v27  ;;  %v81_v32 = vmul.f32 %v342_v29, %v342_v29  ;;  %v80_v34 = vmul.f32 %v346_v31, %v346_v31  ;;  %v62_v35 = vsub.f32 %v24_v8, %v54_v19 }
  0xa7   :  { %87 = vmatpush.msra.mxu1 %v86_v22  ;;  %v79_v36 = vmul.f32 %v63_v33, %v63_v33  ;;  %v61_v37 = vsub.f32 %v23_v9, %v54_v19  ;;  %v60_v39 = vsub.f32 %v22_v10, %v54_v19  ;;  %v59_v41 = vsub.f32 %v21_v11, %v54_v19  ;;  %v358_v10 = vld [vmem:[%s497_s2] ss:$0 sm:$0xff] }
  0xa8   :  { %v78_v38 = vmul.f32 %v62_v35, %v62_v35  ;;  %v58_v43 = vsub.f32 %v20_v12, %v54_v19  ;;  %v57_v45 = vsub.f32 %v19_v13, %v54_v19  ;;  %v56_v47 = vsub.f32 %v18_v14, %v54_v19 }
  0xa9   :  { %88 = vmatpush.msra.mxu1 %v85_v24  ;;  %v77_v40 = vmul.f32 %v61_v37, %v61_v37  ;;  %v76_v42 = vmul.f32 %v60_v39, %v60_v39  ;;  %v75_v44 = vmul.f32 %v59_v41, %v59_v41  ;;  %v55_v49 = vsub.f32 %v17_v15, %v54_v19 }
  0xaa   :  { %v74_v46 = vmul.f32 %v58_v43, %v58_v43  ;;  %v73_v48 = vmul.f32 %v57_v45, %v57_v45  ;;  %v72_v50 = vmul.f32 %v56_v47, %v56_v47 }
  0xab   :  { %89 = vmatpush.msra.mxu1 %v84_v26  ;;  %v71_v51 = vmul.f32 %v55_v49, %v55_v49 }
  0xad   :  { %90 = vmatpush.msra.mxu1 %v83_v28 }
  0xaf   :  { %91 = vmatpush.msra.mxu1 %v82_v30 }
  0xb1   :  { %92 = vmatpush.msra.mxu1 %v81_v32 }
  0xb3   :  { %93 = vmatpush.msra.mxu1 %v80_v34 }
  0xb5   :  { %94 = vmatpush.msra.mxu1 %v79_v36 }
  0xb7   :  { %95 = vmatpush.msra.mxu1 %v78_v38 }
  0xb9   :  { %96 = vmatpush.msra.mxu1 %v77_v40 }
  0xbb   :  { %97 = vmatpush.msra.mxu1 %v76_v42 }
  0xbd   :  { %98 = vmatpush.msra.mxu1 %v75_v44  ;;  %v194_v44 = vld [vmem:[%s498_s3 + $0x10] sm:$0xff] }
  0xbf   :  { %99 = vmatpush.msra.mxu1 %v74_v46 }
  0xc1   :  { %100 = vmatpush.msra.mxu1 %v73_v48  ;;  %v195_v48 = vld [vmem:[%s498_s3 + $0x18] sm:$0xff] }
  0xc3   :  { %101 = vmatpush.msra.mxu1 %v72_v50 }
  0xc5   :  { %102 = vmatpush.msra.mxu1 %v71_v51 }
  0xc6   :  { %103 = vmatmul.f32.vlgmr.msra.gmra.mxu1 %v250_v16 }
 0x143   :  { %v104_v52 = vpop.f32.mrf.mxu1 }
 0x144   :  { %v107_v53 = vmul.f32 0.0078125, %v104_v52 }
 0x146   :  { %v108_v54 = vadd.f32 1e-05, %v107_v53  ;;  %v196_v53 = vld [vmem:[%s498_s3 + $0x20] sm:$0xff] }
 0x148   :  { %248 = vrsqrt.f32 %v108_v54  ;;  %vm115_vm1 = vweird.f32 %v108_v54 }
 0x14e   :  { %v249_v55 = vpop.eup %248 }
 0x14f   :  { %v110_v56 = vmul.f32 %v249_v55, %v108_v54  ;;  %vm116_vm0 = vweird.f32 %v249_v55 }
 0x150   :  { %vm117_vm2 = vmor %vm115_vm1, %vm116_vm0 }
 0x151   :  { %v111_v57 = vmul.f32 %v249_v55, %v110_v56 }
 0x153   :  { %v112_v58 = vmul.f32 0.5, %v111_v57 }
 0x155   :  { %v113_v59 = vsub.f32 1.5, %v112_v58 }
 0x157   :  { %v114_v60 = vmul.f32 %v249_v55, %v113_v59 }
 0x159   :  { %v118_v61 = vsel %vm117_vm2, %v249_v55, %v114_v60  ;;  %v197_v55 = vld [vmem:[%s498_s3 + $0x28] sm:$0xff] }
 0x15a   :  { %v119_v62 = vperm.slane %v118_v61, 0 }
 0x15c   :  { %v120_v63 = vmul.f32 %v119_v62, %v55_v49  ;;  %v121_v0 = vmul.f32 %v119_v62, %v56_v47  ;;  %v122_v1 = vmul.f32 %v119_v62, %v57_v45  ;;  %v123_v3 = vmul.f32 %v119_v62, %v58_v43  ;;  %v192_v43 = vld [vmem:[%s498_s3] sm:$0xff] }
 0x15d   :  { %v124_v4 = vmul.f32 %v119_v62, %v59_v41  ;;  %v125_v5 = vmul.f32 %v119_v62, %v60_v39  ;;  %v126_v6 = vmul.f32 %v119_v62, %v61_v37  ;;  %v127_v11 = vmul.f32 %v119_v62, %v62_v35 }
 0x15e   :  { %v140_v7 = vmul.f32 %v246_v2, %v120_v63  ;;  %v141_v8 = vmul.f32 %v246_v2, %v121_v0  ;;  %v142_v9 = vmul.f32 %v246_v2, %v122_v1  ;;  %v143_v12 = vmul.f32 %v246_v2, %v123_v3  ;;  %v199_v3 = vld [vmem:[%s498_s3 + $0x38] sm:$0xff] }
 0x15f   :  { %v128_v13 = vmul.f32 %v119_v62, %v63_v33  ;;  %v144_v14 = vmul.f32 %v246_v2, %v124_v4  ;;  %v129_v15 = vmul.f32 %v119_v62, %v346_v31  ;;  %v130_v16 = vmul.f32 %v119_v62, %v342_v29 }
 0x160   :  { %v145_v17 = vmul.f32 %v246_v2, %v125_v5  ;;  %v146_v18 = vmul.f32 %v246_v2, %v126_v6  ;;  %v160_v19 = vadd.f32 %v358_v10, %v140_v7  ;;  %v161_v22 = vadd.f32 %v358_v10, %v141_v8  ;;  %v200_v6 = vld [vmem:[%s498_s3 + $0x40] sm:$0xff] }
 0x161   :  { %v162_v24 = vadd.f32 %v358_v10, %v142_v9  ;;  %v131_v26 = vmul.f32 %v119_v62, %v338_v27  ;;  %v147_v28 = vmul.f32 %v246_v2, %v127_v11  ;;  %v163_v30 = vadd.f32 %v358_v10, %v143_v12  ;;  %v201_v11 = vld [vmem:[%s498_s3 + $0x48] sm:$0xff] }
 0x162   :  { %v132_v32 = vmul.f32 %v119_v62, %v334_v25  ;;  %v133_v31 = vmul.f32 %v119_v62, %v330_v23  ;;  %v148_v33 = vmul.f32 %v246_v2, %v128_v13  ;;  %v164_v29 = vadd.f32 %v358_v10, %v144_v14 }
 0x163   :  { %v134_v34 = vmul.f32 %v119_v62, %v326_v21  ;;  %v149_v35 = vmul.f32 %v246_v2, %v129_v15  ;;  %v150_v36 = vmul.f32 %v246_v2, %v130_v16  ;;  %v165_v37 = vadd.f32 %v358_v10, %v145_v17  ;;  %v193_v21 = vld [vmem:[%s498_s3 + $0x8] sm:$0xff]  ;;  %v202_v15 = vld [vmem:[%s498_s3 + $0x50] sm:$0xff] }
 0x164   :  { %v166_v38 = vadd.f32 %v358_v10, %v146_v18  ;;  %v176_v27 = vmax.f32 %v160_v19, 0.0  ;;  %v177_v39 = vmax.f32 %v161_v22, 0.0  ;;  %v178_v40 = vmax.f32 %v162_v24, 0.0  ;;  %v203_v18 = vld [vmem:[%s498_s3 + $0x58] sm:$0xff]  ;;  %v204_v22 = vld [vmem:[%s498_s3 + $0x60] sm:$0xff] }
 0x165   :  { %v135_v41 = vmul.f32 %v119_v62, %v324_v20  ;;  %v151_v42 = vmul.f32 %v246_v2, %v131_v26  ;;  %v167_v25 = vadd.f32 %v358_v10, %v147_v28  ;;  %v179_v23 = vmax.f32 %v163_v30, 0.0  ;;  %v198_v62 = vld [vmem:[%s498_s3 + $0x30] sm:$0xff]  ;;  %v205_v28 = vld [vmem:[%s498_s3 + $0x68] sm:$0xff] }
 0x166   :  { %v152_v45 = vmul.f32 %v246_v2, %v132_v32  ;;  %v153_v46 = vmul.f32 %v246_v2, %v133_v31  ;;  %v168_v20 = vadd.f32 %v358_v10, %v148_v33  ;;  %v180_v47 = vmax.f32 %v164_v29, 0.0  ;;  %v206_v31 = vld [vmem:[%s498_s3 + $0x70] sm:$0xff]  ;;  %v207_v29 = vld [vmem:[%s498_s3 + $0x78] sm:$0xff] }
 0x167   :  { %v154_v49 = vmul.f32 %v246_v2, %v134_v34  ;;  %v169_v50 = vadd.f32 %v358_v10, %v149_v35  ;;  %v170_v51 = vadd.f32 %v358_v10, %v150_v36  ;;  %v181_v52 = vmax.f32 %v165_v37, 0.0 }
 0x168   :  { %v182_v54 = vmax.f32 %v166_v38, 0.0  ;;  %v208_v56 = vadd.f32 %v192_v43, %v176_v27  ;;  %v209_v57 = vadd.f32 %v193_v21, %v177_v39  ;;  %v210_v58 = vadd.f32 %v194_v44, %v178_v40 }
 0x169   :  { %v155_v59 = vmul.f32 %v246_v2, %v135_v41  ;;  %v171_v60 = vadd.f32 %v358_v10, %v151_v42  ;;  %v183_v61 = vmax.f32 %v167_v25, 0.0  ;;  %v211_v63 = vadd.f32 %v195_v48, %v179_v23 }
 0x16a   :  { %v172_v0 = vadd.f32 %v358_v10, %v152_v45  ;;  %v184_v1 = vmax.f32 %v168_v20, 0.0  ;;  %v212_v4 = vadd.f32 %v196_v53, %v180_v47  ;;  %225 = vst.msk [vmem:[%s499_s4] sm:$0xff] %vm224_vm3, %v208_v56  ;;  %v173_v2 = vadd.f32 %v358_v10, %v153_v46 }
 0x16b   :  { %v185_v5 = vmax.f32 %v169_v50, 0.0  ;;  %v213_v7 = vadd.f32 %v197_v55, %v181_v52  ;;  %226 = vst.msk [vmem:[%s499_s4 + $0x8] sm:$0xff] %vm224_vm3, %v209_v57  ;;  %v174_v8 = vadd.f32 %v358_v10, %v154_v49  ;;  %v186_v9 = vmax.f32 %v170_v51, 0.0 }
 0x16c   :  { %v214_v12 = vadd.f32 %v198_v62, %v182_v54  ;;  %227 = vst.msk [vmem:[%s499_s4 + $0x10] sm:$0xff] %vm224_vm3, %v210_v58  ;;  %v175_v13 = vadd.f32 %v358_v10, %v155_v59  ;;  %v187_v14 = vmax.f32 %v171_v60, 0.0  ;;  %v215_v16 = vadd.f32 %v199_v3, %v183_v61 }
 0x16d   :  { %228 = vst.msk [vmem:[%s499_s4 + $0x18] sm:$0xff] %vm224_vm3, %v211_v63  ;;  %v188_v17 = vmax.f32 %v172_v0, 0.0  ;;  %v216_v19 = vadd.f32 %v200_v6, %v184_v1  ;;  %v189_v10 = vmax.f32 %v173_v2, 0.0  ;;  %v217_v24 = vadd.f32 %v201_v11, %v185_v5 }
 0x16e   :  { %229 = vst.msk [vmem:[%s499_s4 + $0x20] sm:$0xff] %vm224_vm3, %v212_v4  ;;  %v190_v26 = vmax.f32 %v174_v8, 0.0  ;;  %v218_v30 = vadd.f32 %v202_v15, %v186_v9  ;;  %v191_v32 = vmax.f32 %v175_v13, 0.0  ;;  %v219_v33 = vadd.f32 %v203_v18, %v187_v14 }
 0x16f   :  { %230 = vst.msk [vmem:[%s499_s4 + $0x28] sm:$0xff] %vm224_vm3, %v213_v7  ;;  %v220_v34 = vadd.f32 %v204_v22, %v188_v17  ;;  %v221_v35 = vadd.f32 %v205_v28, %v189_v10 }
 0x170   :  { %231 = vst.msk [vmem:[%s499_s4 + $0x30] sm:$0xff] %vm224_vm3, %v214_v12  ;;  %v222_v36 = vadd.f32 %v206_v31, %v190_v26  ;;  %v223_v37 = vadd.f32 %v207_v29, %v191_v32 }
 0x171   :  { %232 = vst.msk [vmem:[%s499_s4 + $0x38] sm:$0xff] %vm224_vm3, %v215_v16 }
 0x172   :  { %233 = vst.msk [vmem:[%s499_s4 + $0x40] sm:$0xff] %vm224_vm3, %v216_v19 }
 0x173   :  { %234 = vst.msk [vmem:[%s499_s4 + $0x48] sm:$0xff] %vm224_vm3, %v217_v24 }
 0x174   :  { %235 = vst.msk [vmem:[%s499_s4 + $0x50] sm:$0xff] %vm224_vm3, %v218_v30 }
 0x175   :  { %236 = vst.msk [vmem:[%s499_s4 + $0x58] sm:$0xff] %vm224_vm3, %v219_v33 }
 0x176   :  { %237 = vst.msk [vmem:[%s499_s4 + $0x60] sm:$0xff] %vm224_vm3, %v220_v34 }
 0x177   :  { %238 = vst.msk [vmem:[%s499_s4 + $0x68] sm:$0xff] %vm224_vm3, %v221_v35 }
 0x178   :  { %239 = vst.msk [vmem:[%s499_s4 + $0x70] sm:$0xff] %vm224_vm3, %v222_v36 }
 0x179   :  { %240 = vst.msk [vmem:[%s499_s4 + $0x78] sm:$0xff] %vm224_vm3, %v223_v37 }

// kernel: feat2net_forward.65
= control target key start
LH: loop header
LB: loop body
LE: loop exit
PB: predicated region body
PF: predicated region fallthrough
CT: control target
= control target key end

     0   :  { %s377_s0 = inlined_call_operand.vmem [shape: bf16[128,32], index: 0, kind: input, shape index: {}]   ;;  %s378_s1 = inlined_call_operand.vmem [shape: bf16[32,32], index: 1, kind: input, shape index: {}]   ;;  %s379_s2 = inlined_call_operand.vmem [shape: f32[1,32], index: 2, kind: input, shape index: {}]   ;;  %s380_s3 = inlined_call_operand.hbm [shape: f32[128,32], index: 3, kind: output, shape index: {}]  }
   0x1   :  { %v257_v0 = vld [vmem:[%s378_s1 + $0x8] sm:$0xff]  ;;  %v256_v1 = vld [vmem:[%s378_s1] sm:$0xff] }
   0x2   :  { %123 = vmatpush.bf16.msra.mxu0 %v257_v0  ;;  %258 = vmatpush.bf16.msra.mxu1 %v257_v0 }
   0x3   :  { %259 = vmatpush.bf16.msra.mxu2 %v257_v0  ;;  %260 = vmatpush.bf16.msra.mxu3 %v257_v0 }
   0x4   :  { %8 = vsyncpa [#allocation3], 0  ;;  %v248_v2 = vld [vmem:[%s377_s0] sm:$0xff]  ;;  %v250_v3 = vld [vmem:[%s377_s0 + $0x10] sm:$0xff]  ;;  %vm92_vm0 = vcmask 261120   ;;  %s188_s8 = sshll.u32 %s380_s3, 4  ;;  %s189_s8 = int_to_ptr.hbm [resolvable:$true] %s188_s8 }
   0x5   :  { %v252_v4 = vld [vmem:[%s377_s0 + $0x20] sm:$0xff]  ;;  %v254_v5 = vld [vmem:[%s377_s0 + $0x30] sm:$0xff]  ;;  %v249_v6 = vld [vmem:[%s377_s0 + $0x8] sm:$0xff]  ;;  %s295_s9 = smov 128   ;;  %s296_s10 = smov 8  }
   0x6   :  { %124 = vmatpush.bf16.msra.mxu0 %v256_v1  ;;  %261 = vmatpush.bf16.msra.mxu1 %v256_v1  ;;  %v251_v7 = vld [vmem:[%s377_s0 + $0x18] sm:$0xff]  ;;  %v253_v8 = vld [vmem:[%s377_s0 + $0x28] sm:$0xff]  ;;  %v267_v10 = vld [vmem:[%s379_s2] ss:$0 sm:$0xff] }
   0x7   :  { %262 = vmatpush.bf16.msra.mxu2 %v256_v1  ;;  %263 = vmatpush.bf16.msra.mxu3 %v256_v1  ;;  %v255_v9 = vld [vmem:[%s377_s0 + $0x38] sm:$0xff]  ;;  %s294_s0 = smov [#allocation2]  }
   0x8   :  { %s186_s2 = sshll.u32 %s294_s0, 4  ;;  %s187_s2 = int_to_ptr.vmem [resolvable:$true] %s186_s2 }
   0x9   :  { %240 = vmatmul.msk.bf16.vlgmr.msra.gmra.mxu0 %vm92_vm0, %v248_v2  ;;  %242 = vmatmul.msk.bf16.vlgmr.msra.gmra.mxu1 %vm92_vm0, %v250_v3 }
   0xa   :  { %244 = vmatmul.msk.bf16.vlgmr.msra.gmra.mxu2 %vm92_vm0, %v252_v4  ;;  %246 = vmatmul.msk.bf16.vlgmr.msra.gmra.mxu3 %vm92_vm0, %v254_v5 }
  0x19   :  { %241 = vmatmul.msk.bf16.gmra.mxu0 %vm92_vm0, %v249_v6  ;;  %243 = vmatmul.msk.bf16.gmra.mxu1 %vm92_vm0, %v251_v7 }
  0x1a   :  { %245 = vmatmul.msk.bf16.gmra.mxu2 %vm92_vm0, %v253_v8  ;;  %247 = vmatmul.msk.bf16.gmra.mxu3 %vm92_vm0, %v255_v9 }
  0x86   :  { %v126_v11 = vpop.f32.mrf.mxu0  ;;  %v136_v12 = vpop.f32.mrf.mxu1 }
  0x87   :  { %v127_v13 = vadd.f32 %v267_v10, %v126_v11  ;;  %v137_v14 = vadd.f32 %v267_v10, %v136_v12 }
  0x89   :  { %166 = vst.msk [vmem:[#allocation2] sm:$0xff] %vm92_vm0, %v127_v13 }
  0x8a   :  { %170 = vst.msk [vmem:[#allocation2 + $0x20] sm:$0xff] %vm92_vm0, %v137_v14 }
  0x8d   :  { %v146_v15 = vpop.f32.mrf.mxu2  ;;  %v156_v16 = vpop.f32.mrf.mxu3 }
  0x8e   :  { %v147_v17 = vadd.f32 %v267_v10, %v146_v15  ;;  %v157_v18 = vadd.f32 %v267_v10, %v156_v16  ;;  %v128_v19 = vpop.f32.mrf.mxu0  ;;  %v138_v20 = vpop.f32.mrf.mxu1 }
  0x8f   :  { %v129_v21 = vadd.f32 %v267_v10, %v128_v19  ;;  %v139_v22 = vadd.f32 %v267_v10, %v138_v20 }
  0x90   :  { %174 = vst.msk [vmem:[#allocation2 + $0x40] sm:$0xff] %vm92_vm0, %v147_v17 }
  0x91   :  { %178 = vst.msk [vmem:[#allocation2 + $0x60] sm:$0xff] %vm92_vm0, %v157_v18 }
  0x92   :  { %167 = vst.msk [vmem:[#allocation2 + $0x8] sm:$0xff] %vm92_vm0, %v129_v21 }
  0x93   :  { %171 = vst.msk [vmem:[#allocation2 + $0x28] sm:$0xff] %vm92_vm0, %v139_v22 }
  0x95   :  { %v148_v23 = vpop.f32.mrf.mxu2  ;;  %v158_v24 = vpop.f32.mrf.mxu3 }
  0x96   :  { %v149_v25 = vadd.f32 %v267_v10, %v148_v23  ;;  %v159_v26 = vadd.f32 %v267_v10, %v158_v24  ;;  %v131_v27 = vpop.f32.mrf.mxu0  ;;  %v141_v28 = vpop.f32.mrf.mxu1 }
  0x97   :  { %v132_v29 = vadd.f32 %v267_v10, %v131_v27  ;;  %v142_v30 = vadd.f32 %v267_v10, %v141_v28 }
  0x98   :  { %175 = vst.msk [vmem:[#allocation2 + $0x48] sm:$0xff] %vm92_vm0, %v149_v25 }
  0x99   :  { %179 = vst.msk [vmem:[#allocation2 + $0x68] sm:$0xff] %vm92_vm0, %v159_v26 }
  0x9a   :  { %168 = vst.msk [vmem:[#allocation2 + $0x10] sm:$0xff] %vm92_vm0, %v132_v29 }
  0x9b   :  { %172 = vst.msk [vmem:[#allocation2 + $0x30] sm:$0xff] %vm92_vm0, %v142_v30 }
  0x9d   :  { %v151_v31 = vpop.f32.mrf.mxu2  ;;  %v161_v32 = vpop.f32.mrf.mxu3 }
  0x9e   :  { %v152_v33 = vadd.f32 %v267_v10, %v151_v31  ;;  %v162_v34 = vadd.f32 %v267_v10, %v161_v32  ;;  %v133_v35 = vpop.f32.mrf.mxu0  ;;  %v143_v36 = vpop.f32.mrf.mxu1 }
  0x9f   :  { %v134_v37 = vadd.f32 %v267_v10, %v133_v35  ;;  %v144_v38 = vadd.f32 %v267_v10, %v143_v36 }
  0xa0   :  { %176 = vst.msk [vmem:[#allocation2 + $0x50] sm:$0xff] %vm92_vm0, %v152_v33 }
  0xa1   :  { %180 = vst.msk [vmem:[#allocation2 + $0x70] sm:$0xff] %vm92_vm0, %v162_v34 }
  0xa2   :  { %169 = vst.msk [vmem:[#allocation2 + $0x18] sm:$0xff] %vm92_vm0, %v134_v37 }
  0xa3   :  { %173 = vst.msk [vmem:[#allocation2 + $0x38] sm:$0xff] %vm92_vm0, %v144_v38 }
  0xa5   :  { %v153_v39 = vpop.f32.mrf.mxu2  ;;  %v163_v40 = vpop.f32.mrf.mxu3 }
  0xa6   :  { %v154_v41 = vadd.f32 %v267_v10, %v153_v39  ;;  %v164_v42 = vadd.f32 %v267_v10, %v163_v40 }
  0xa8   :  { %177 = vst.msk [vmem:[#allocation2 + $0x58] sm:$0xff] %vm92_vm0, %v154_v41 }
  0xa9   :  { %181 = vst.msk [vmem:[#allocation2 + $0x78] sm:$0xff] %vm92_vm0, %v164_v42 }
  0xaa   :  { %194 = dma.vmem_to_hbm [thread:$0]  %s187_s2, 2048, %s189_s8, [#allocation3], %s295_s9, %s295_s9, %s296_s10  }
  0xab   :  { %292 = dma.done.wait [#allocation3], 2048  }
  0xac   :  { %293 = vsyncadd [#allocation3], 4294965248 }
  0xad   :  { %199 = vsyncpa [#allocation3], 1 }

// kernel: feat2net_forward.63
= control target key start
LH: loop header
LB: loop body
LE: loop exit
PB: predicated region body
PF: predicated region fallthrough
CT: control target
= control target key end

     0   :  { %vm97_vm0 = vcmask 261120   ;;  %v420_v43 = vmov 1.0   ;;  %s597_s1 = inlined_call_operand.vmem [shape: bf16[32,32], index: 1, kind: input, shape index: {}]   ;;  %s598_s2 = inlined_call_operand.vmem [shape: f32[1,32], index: 2, kind: input, shape index: {}]   ;;  %s599_s0 = inlined_call_operand.vmem [shape: bf16[128,32], index: 0, kind: input, shape index: {}]   ;;  %s600_s3 = inlined_call_operand.vmem [shape: f32[1,32], index: 3, kind: input, shape index: {}]   ;;  %s601_s4 = inlined_call_operand.vmem [shape: f32[1,32], index: 4, kind: input, shape index: {}]   ;;  %s602_s5 = inlined_call_operand.vmem [shape: f32[128,32], index: 5, kind: output, shape index: {}]  }
   0x1   :  { %v407_v0 = vld [vmem:[%s597_s1 + $0x8] sm:$0xff]  ;;  %v406_v1 = vld [vmem:[%s597_s1] sm:$0xff]  ;;  %v401_v3 = vld [vmem:[%s599_s0 + $0x18] sm:$0xff] }
   0x2   :  { %410 = vmatpush.bf16.msra.mxu3 %v407_v0  ;;  %409 = vmatpush.bf16.msra.mxu2 %v407_v0  ;;  %v403_v2 = vld [vmem:[%s599_s0 + $0x28] sm:$0xff]  ;;  %v398_v5 = vld [vmem:[%s599_s0] sm:$0xff]  ;;  %v404_v6 = vld [vmem:[%s599_s0 + $0x30] sm:$0xff] }
   0x3   :  { %408 = vmatpush.bf16.msra.mxu1 %v407_v0  ;;  %128 = vmatpush.bf16.msra.mxu0 %v407_v0  ;;  %v399_v4 = vld [vmem:[%s599_s0 + $0x8] sm:$0xff]  ;;  %v402_v7 = vld [vmem:[%s599_s0 + $0x20] sm:$0xff]  ;;  %v400_v8 = vld [vmem:[%s599_s0 + $0x10] sm:$0xff] }
   0x4   :  { %v405_v9 = vld [vmem:[%s599_s0 + $0x38] sm:$0xff]  ;;  %v415_v19 = vld [vmem:[%s598_s2] ss:$0 sm:$0xff] }
   0x6   :  { %413 = vmatpush.bf16.msra.mxu3 %v406_v1  ;;  %412 = vmatpush.bf16.msra.mxu2 %v406_v1 }
   0x7   :  { %411 = vmatpush.bf16.msra.mxu1 %v406_v1  ;;  %129 = vmatpush.bf16.msra.mxu0 %v406_v1 }
   0x9   :  { %395 = vmatmul.msk.bf16.vlgmr.msra.gmra.mxu3 %vm97_vm0, %v403_v2  ;;  %393 = vmatmul.msk.bf16.vlgmr.msra.gmra.mxu2 %vm97_vm0, %v401_v3 }
   0xa   :  { %391 = vmatmul.msk.bf16.vlgmr.msra.gmra.mxu1 %vm97_vm0, %v399_v4  ;;  %390 = vmatmul.msk.bf16.vlgmr.msra.gmra.mxu0 %vm97_vm0, %v398_v5 }
  0x19   :  { %396 = vmatmul.msk.bf16.gmra.mxu3 %vm97_vm0, %v404_v6  ;;  %394 = vmatmul.msk.bf16.gmra.mxu2 %vm97_vm0, %v402_v7 }
  0x1a   :  { %392 = vmatmul.msk.bf16.gmra.mxu1 %vm97_vm0, %v400_v8 }
  0x29   :  { %397 = vmatmul.msk.bf16.gmra.mxu3 %vm97_vm0, %v405_v9 }
  0x87   :  { %v136_v15 = vpop.f32.mrf.mxu1  ;;  %v131_v32 = vpop.f32.mrf.mxu0 }
  0x88   :  { %v137_v40 = vadd.f32 %v415_v19, %v136_v15  ;;  %v132_v42 = vadd.f32 %v415_v19, %v131_v32 }
  0x8c   :  { %v156_v10 = vpop.f32.mrf.mxu3  ;;  %v146_v13 = vpop.f32.mrf.mxu2 }
  0x8d   :  { %v157_v29 = vadd.f32 %v415_v19, %v156_v10  ;;  %v147_v35 = vadd.f32 %v415_v19, %v146_v13 }
  0x8f   :  { %v138_v18 = vpop.f32.mrf.mxu1  ;;  %v133_v39 = vpop.f32.mrf.mxu0 }
  0x90   :  { %v139_v38 = vadd.f32 %v415_v19, %v138_v18  ;;  %v134_v41 = vadd.f32 %v415_v19, %v133_v39 }
  0x94   :  { %v158_v11 = vpop.f32.mrf.mxu3  ;;  %v148_v16 = vpop.f32.mrf.mxu2 }
  0x95   :  { %v159_v27 = vadd.f32 %v415_v19, %v158_v11  ;;  %v149_v33 = vadd.f32 %v415_v19, %v148_v16 }
  0x97   :  { %v141_v26 = vpop.f32.mrf.mxu1 }
  0x98   :  { %v142_v37 = vadd.f32 %v415_v19, %v141_v26 }
  0x9c   :  { %v161_v12 = vpop.f32.mrf.mxu3  ;;  %v151_v20 = vpop.f32.mrf.mxu2 }
  0x9d   :  { %v162_v25 = vadd.f32 %v415_v19, %v161_v12  ;;  %v152_v31 = vadd.f32 %v415_v19, %v151_v20 }
  0x9f   :  { %v143_v34 = vpop.f32.mrf.mxu1 }
  0xa0   :  { %v144_v36 = vadd.f32 %v415_v19, %v143_v34 }
  0xa4   :  { %v163_v14 = vpop.f32.mrf.mxu3  ;;  %v153_v28 = vpop.f32.mrf.mxu2 }
  0xa5   :  { %v164_v24 = vadd.f32 %v415_v19, %v163_v14  ;;  %v154_v30 = vadd.f32 %v415_v19, %v153_v28 }
  0xac   :  { %v166_v17 = vpop.f32.mrf.mxu3 }
  0xad   :  { %v167_v23 = vadd.f32 %v415_v19, %v166_v17 }
  0xb4   :  { %v168_v21 = vpop.f32.mrf.mxu3 }
  0xb5   :  { %v169_v22 = vadd.f32 %v415_v19, %v168_v21 }
  0xb7   :  { %171 = vmatpush.msrb.mxu1 %v169_v22 }
  0xb9   :  { %172 = vmatpush.msrb.mxu1 %v167_v23 }
  0xbb   :  { %173 = vmatpush.msrb.mxu1 %v164_v24 }
  0xbd   :  { %174 = vmatpush.msrb.mxu1 %v162_v25 }
  0xbf   :  { %175 = vmatpush.msrb.mxu1 %v159_v27 }
  0xc1   :  { %176 = vmatpush.msrb.mxu1 %v157_v29 }
  0xc3   :  { %177 = vmatpush.msrb.mxu1 %v154_v30 }
  0xc5   :  { %178 = vmatpush.msrb.mxu1 %v152_v31 }
  0xc7   :  { %179 = vmatpush.msrb.mxu1 %v149_v33 }
  0xc9   :  { %180 = vmatpush.msrb.mxu1 %v147_v35 }
  0xcb   :  { %181 = vmatpush.msrb.mxu1 %v144_v36 }
  0xcd   :  { %182 = vmatpush.msrb.mxu1 %v142_v37 }
  0xcf   :  { %183 = vmatpush.msrb.mxu1 %v139_v38 }
  0xd1   :  { %184 = vmatpush.msrb.mxu1 %v137_v40 }
  0xd3   :  { %185 = vmatpush.msrb.mxu1 %v134_v41 }
  0xd5   :  { %186 = vmatpush.msrb.mxu1 %v132_v42 }
  0xd6   :  { %187 = vmatmul.f32.vlgmr.msrb.gmra.mxu1 %v420_v43 }
 0x153   :  { %v188_v44 = vpop.f32.mrf.mxu1 }
 0x154   :  { %v191_v45 = vmul.f32 0.0078125, %v188_v44 }
 0x156   :  { %v192_v46 = vperm.slane %v191_v45, 0 }
 0x158   :  { %v492_v47 = vsub.f32 %v169_v22, %v192_v46  ;;  %v494_v48 = vsub.f32 %v167_v23, %v192_v46  ;;  %v498_v50 = vsub.f32 %v164_v24, %v192_v46  ;;  %v502_v52 = vsub.f32 %v162_v25, %v192_v46 }
 0x159   :  { %v506_v54 = vsub.f32 %v159_v27, %v192_v46  ;;  %v510_v56 = vsub.f32 %v157_v29, %v192_v46  ;;  %v514_v58 = vsub.f32 %v154_v30, %v192_v46  ;;  %v201_v60 = vsub.f32 %v152_v31, %v192_v46  ;;  %v416_v29 = vld [vmem:[%s600_s3] ss:$0 sm:$0xff] }
 0x15a   :  { %v224_v49 = vmul.f32 %v492_v47, %v492_v47  ;;  %v223_v51 = vmul.f32 %v494_v48, %v494_v48  ;;  %v222_v53 = vmul.f32 %v498_v50, %v498_v50  ;;  %v221_v55 = vmul.f32 %v502_v52, %v502_v52 }
 0x15b   :  { %v220_v57 = vmul.f32 %v506_v54, %v506_v54  ;;  %v219_v59 = vmul.f32 %v510_v56, %v510_v56  ;;  %v218_v61 = vmul.f32 %v514_v58, %v514_v58  ;;  %v200_v62 = vsub.f32 %v149_v33, %v192_v46 }
 0x15c   :  { %225 = vmatpush.msrb.mxu2 %v224_v49  ;;  %v217_v63 = vmul.f32 %v201_v60, %v201_v60  ;;  %v199_v0 = vsub.f32 %v147_v35, %v192_v46  ;;  %v198_v2 = vsub.f32 %v144_v36, %v192_v46  ;;  %v197_v4 = vsub.f32 %v142_v37, %v192_v46  ;;  %v417_v37 = vld [vmem:[%s601_s4] ss:$0 sm:$0xff] }
 0x15d   :  { %v216_v1 = vmul.f32 %v200_v62, %v200_v62  ;;  %v196_v6 = vsub.f32 %v139_v38, %v192_v46  ;;  %v195_v8 = vsub.f32 %v137_v40, %v192_v46  ;;  %v194_v10 = vsub.f32 %v134_v41, %v192_v46 }
 0x15e   :  { %226 = vmatpush.msrb.mxu2 %v223_v51  ;;  %v215_v3 = vmul.f32 %v199_v0, %v199_v0  ;;  %v214_v5 = vmul.f32 %v198_v2, %v198_v2  ;;  %v213_v7 = vmul.f32 %v197_v4, %v197_v4  ;;  %v193_v12 = vsub.f32 %v132_v42, %v192_v46 }
 0x15f   :  { %v212_v9 = vmul.f32 %v196_v6, %v196_v6  ;;  %v211_v11 = vmul.f32 %v195_v8, %v195_v8  ;;  %v210_v13 = vmul.f32 %v194_v10, %v194_v10 }
 0x160   :  { %227 = vmatpush.msrb.mxu2 %v222_v53  ;;  %v209_v14 = vmul.f32 %v193_v12, %v193_v12 }
 0x162   :  { %228 = vmatpush.msrb.mxu2 %v221_v55 }
 0x164   :  { %229 = vmatpush.msrb.mxu2 %v220_v57 }
 0x166   :  { %230 = vmatpush.msrb.mxu2 %v219_v59 }
 0x168   :  { %231 = vmatpush.msrb.mxu2 %v218_v61 }
 0x16a   :  { %232 = vmatpush.msrb.mxu2 %v217_v63 }
 0x16c   :  { %233 = vmatpush.msrb.mxu2 %v216_v1 }
 0x16e   :  { %234 = vmatpush.msrb.mxu2 %v215_v3 }
 0x170   :  { %235 = vmatpush.msrb.mxu2 %v214_v5 }
 0x172   :  { %236 = vmatpush.msrb.mxu2 %v213_v7 }
 0x174   :  { %237 = vmatpush.msrb.mxu2 %v212_v9 }
 0x176   :  { %238 = vmatpush.msrb.mxu2 %v211_v11 }
 0x178   :  { %239 = vmatpush.msrb.mxu2 %v210_v13 }
 0x17a   :  { %240 = vmatpush.msrb.mxu2 %v209_v14 }
 0x17b   :  { %241 = vmatmul.f32.vlgmr.msrb.gmra.mxu2 %v420_v43 }
 0x1fe   :  { %v242_v15 = vpop.f32.mrf.mxu2 }
 0x1ff   :  { %v245_v16 = vmul.f32 0.0078125, %v242_v15 }
 0x201   :  { %v246_v17 = vadd.f32 1e-05, %v245_v16 }
 0x203   :  { %418 = vrsqrt.f32 %v246_v17  ;;  %vm253_vm2 = vweird.f32 %v246_v17 }
 0x209   :  { %v419_v18 = vpop.eup %418 }
 0x20a   :  { %v248_v19 = vmul.f32 %v419_v18, %v246_v17  ;;  %vm254_vm1 = vweird.f32 %v419_v18 }
 0x20b   :  { %vm255_vm3 = vmor %vm253_vm2, %vm254_vm1 }
 0x20c   :  { %v249_v20 = vmul.f32 %v419_v18, %v248_v19 }
 0x20e   :  { %v250_v21 = vmul.f32 0.5, %v249_v20 }
 0x210   :  { %v251_v22 = vsub.f32 1.5, %v250_v21 }
 0x212   :  { %v252_v23 = vmul.f32 %v419_v18, %v251_v22 }
 0x214   :  { %v256_v24 = vsel %vm255_vm3, %v419_v18, %v252_v23 }
 0x215   :  { %v257_v25 = vperm.slane %v256_v24, 0 }
 0x217   :  { %v258_v26 = vmul.f32 %v257_v25, %v193_v12  ;;  %v259_v27 = vmul.f32 %v257_v25, %v194_v10  ;;  %v260_v28 = vmul.f32 %v257_v25, %v195_v8  ;;  %v261_v30 = vmul.f32 %v257_v25, %v196_v6 }
 0x218   :  { %v262_v31 = vmul.f32 %v257_v25, %v197_v4  ;;  %v263_v32 = vmul.f32 %v257_v25, %v198_v2  ;;  %v264_v33 = vmul.f32 %v257_v25, %v199_v0  ;;  %v265_v38 = vmul.f32 %v257_v25, %v200_v62 }
 0x219   :  { %v278_v34 = vmul.f32 %v416_v29, %v258_v26  ;;  %v279_v35 = vmul.f32 %v416_v29, %v259_v27  ;;  %v280_v36 = vmul.f32 %v416_v29, %v260_v28  ;;  %v281_v39 = vmul.f32 %v416_v29, %v261_v30 }
 0x21a   :  { %v266_v40 = vmul.f32 %v257_v25, %v201_v60  ;;  %v282_v41 = vmul.f32 %v416_v29, %v262_v31  ;;  %v267_v42 = vmul.f32 %v257_v25, %v514_v58  ;;  %v268_v43 = vmul.f32 %v257_v25, %v510_v56 }
 0x21b   :  { %v283_v44 = vmul.f32 %v416_v29, %v263_v32  ;;  %v284_v45 = vmul.f32 %v416_v29, %v264_v33  ;;  %v298_v46 = vadd.f32 %v417_v37, %v278_v34  ;;  %v299_v49 = vadd.f32 %v417_v37, %v279_v35 }
 0x21c   :  { %v300_v51 = vadd.f32 %v417_v37, %v280_v36  ;;  %v269_v53 = vmul.f32 %v257_v25, %v506_v54  ;;  %v285_v55 = vmul.f32 %v416_v29, %v265_v38  ;;  %v301_v57 = vadd.f32 %v417_v37, %v281_v39 }
 0x21d   :  { %v270_v59 = vmul.f32 %v257_v25, %v502_v52  ;;  %v271_v61 = vmul.f32 %v257_v25, %v498_v50  ;;  %v286_v62 = vmul.f32 %v416_v29, %v266_v40  ;;  %v302_v60 = vadd.f32 %v417_v37, %v282_v41 }
 0x21e   :  { %v272_v63 = vmul.f32 %v257_v25, %v494_v48  ;;  %v287_v58 = vmul.f32 %v416_v29, %v267_v42  ;;  %v288_v0 = vmul.f32 %v416_v29, %v268_v43  ;;  %v303_v56 = vadd.f32 %v417_v37, %v283_v44 }
 0x21f   :  { %v304_v1 = vadd.f32 %v417_v37, %v284_v45  ;;  %v314_v2 = vmax.f32 %v298_v46, 0.0  ;;  %v315_v3 = vmax.f32 %v299_v49, 0.0  ;;  %v316_v4 = vmax.f32 %v300_v51, 0.0 }
 0x220   :  { %v273_v5 = vmul.f32 %v257_v25, %v492_v47  ;;  %v289_v54 = vmul.f32 %v416_v29, %v269_v53  ;;  %v305_v6 = vadd.f32 %v417_v37, %v285_v55  ;;  %v317_v7 = vmax.f32 %v301_v57, 0.0 }
 0x221   :  { %v290_v8 = vmul.f32 %v416_v29, %v270_v59  ;;  %v306_v52 = vadd.f32 %v417_v37, %v286_v62  ;;  %v318_v9 = vmax.f32 %v302_v60, 0.0  ;;  %330 = vst.msk [vmem:[%s602_s5] sm:$0xff] %vm97_vm0, %v314_v2  ;;  %v291_v48 = vmul.f32 %v416_v29, %v271_v61 }
 0x222   :  { %v307_v50 = vadd.f32 %v417_v37, %v287_v58  ;;  %v319_v10 = vmax.f32 %v303_v56, 0.0  ;;  %331 = vst.msk [vmem:[%s602_s5 + $0x8] sm:$0xff] %vm97_vm0, %v315_v3  ;;  %v292_v47 = vmul.f32 %v416_v29, %v272_v63  ;;  %v308_v11 = vadd.f32 %v417_v37, %v288_v0 }
 0x223   :  { %v320_v12 = vmax.f32 %v304_v1, 0.0  ;;  %332 = vst.msk [vmem:[%s602_s5 + $0x10] sm:$0xff] %vm97_vm0, %v316_v4  ;;  %v293_v13 = vmul.f32 %v416_v29, %v273_v5  ;;  %v309_v14 = vadd.f32 %v417_v37, %v289_v54  ;;  %v321_v15 = vmax.f32 %v305_v6, 0.0 }
 0x224   :  { %333 = vst.msk [vmem:[%s602_s5 + $0x18] sm:$0xff] %vm97_vm0, %v317_v7  ;;  %v310_v16 = vadd.f32 %v417_v37, %v290_v8  ;;  %v322_v17 = vmax.f32 %v306_v52, 0.0  ;;  %v311_v18 = vadd.f32 %v417_v37, %v291_v48  ;;  %v323_v19 = vmax.f32 %v307_v50, 0.0 }
 0x225   :  { %334 = vst.msk [vmem:[%s602_s5 + $0x20] sm:$0xff] %vm97_vm0, %v318_v9  ;;  %v312_v20 = vadd.f32 %v417_v37, %v292_v47  ;;  %v324_v21 = vmax.f32 %v308_v11, 0.0  ;;  %v313_v22 = vadd.f32 %v417_v37, %v293_v13  ;;  %v325_v23 = vmax.f32 %v309_v14, 0.0 }
 0x226   :  { %335 = vst.msk [vmem:[%s602_s5 + $0x28] sm:$0xff] %vm97_vm0, %v319_v10  ;;  %v326_v24 = vmax.f32 %v310_v16, 0.0  ;;  %v327_v25 = vmax.f32 %v311_v18, 0.0 }
 0x227   :  { %336 = vst.msk [vmem:[%s602_s5 + $0x30] sm:$0xff] %vm97_vm0, %v320_v12  ;;  %v328_v26 = vmax.f32 %v312_v20, 0.0  ;;  %v329_v27 = vmax.f32 %v313_v22, 0.0 }
 0x228   :  { %337 = vst.msk [vmem:[%s602_s5 + $0x38] sm:$0xff] %vm97_vm0, %v321_v15 }
 0x229   :  { %338 = vst.msk [vmem:[%s602_s5 + $0x40] sm:$0xff] %vm97_vm0, %v322_v17 }
 0x22a   :  { %339 = vst.msk [vmem:[%s602_s5 + $0x48] sm:$0xff] %vm97_vm0, %v323_v19 }
 0x22b   :  { %340 = vst.msk [vmem:[%s602_s5 + $0x50] sm:$0xff] %vm97_vm0, %v324_v21 }
 0x22c   :  { %341 = vst.msk [vmem:[%s602_s5 + $0x58] sm:$0xff] %vm97_vm0, %v325_v23 }
 0x22d   :  { %342 = vst.msk [vmem:[%s602_s5 + $0x60] sm:$0xff] %vm97_vm0, %v326_v24 }
 0x22e   :  { %343 = vst.msk [vmem:[%s602_s5 + $0x68] sm:$0xff] %vm97_vm0, %v327_v25 }
 0x22f   :  { %344 = vst.msk [vmem:[%s602_s5 + $0x70] sm:$0xff] %vm97_vm0, %v328_v26 }
 0x230   :  { %345 = vst.msk [vmem:[%s602_s5 + $0x78] sm:$0xff] %vm97_vm0, %v329_v27 }

</bundles_post_ra>
